<compile_context>
chip_gen: v5e
topology: v5e:2x2
jax: 0.10.0
libtpu: 0.0.40
codegen_flags: <defaults>
</compile_context>

<pallas_src>
import math

import numpy as np

import jax
import jax.numpy as jnp
from jax.experimental import pallas as pl
from jax.experimental.pallas import tpu as pltpu


# ----------------------------------------------------------------------------
# Helpers
# ----------------------------------------------------------------------------
def _full_spec(shape):
    """Whole-array block (trivial grid=(1,))."""
    nd = len(shape)
    return pl.BlockSpec(tuple(shape), lambda i: (0,) * nd)


_BN_EPS = 1e-5
_BN_SCALE = 1.0 / math.sqrt(1.0 + _BN_EPS)   # gamma=1, beta=0, mean=0, var=1 (eval)


def _kaiming_conv(key, cout, cin, k):
    fan_out = cout * k  # PyTorch fan_out for Conv1d
    std = math.sqrt(2.0 / fan_out)
    return std * jax.random.normal(key, (cout, cin, k), dtype=jnp.float32)


def _conv_bn_folded(key, cout, cin, k):
    """Conv1d weight in kernel-ready tap-major layout (k*cin, cout) bf16 with the
    eval-mode BN scale folded in, plus the (zero) BN bias."""
    w = _kaiming_conv(key, cout, cin, k)                       # (cout, cin, k)
    wk = jnp.transpose(w, (2, 1, 0)).reshape(k * cin, cout)    # row = tap*cin + cin_idx
    wk = (wk * _BN_SCALE).astype(jnp.bfloat16)
    b = jnp.zeros((1, cout), jnp.float32)
    return wk, b


def init_ram1d_params(key, layers=(1, 1, 1, 1), num_classes=10, in_channels=3):
    keys = iter(jax.random.split(key, 256))
    params = {"stem": {}}
    params["stem"]["w"], params["stem"]["b"] = _conv_bn_folded(next(keys), 64,
                                                               in_channels, 7)
    inplanes = 64
    stage_planes = (64, 128, 256, 512)
    stage_strides = (1, 2, 2, 2)
    for si in range(4):
        planes = stage_planes[si]
        blocks = []
        for bi in range(layers[si]):
            stride = stage_strides[si] if bi == 0 else 1
            blk = {}
            blk["w1"], blk["b1"] = _conv_bn_folded(next(keys), planes, inplanes, 3)
            blk["w2"], blk["b2"] = _conv_bn_folded(next(keys), planes, planes, 3)
            if stride != 1 or inplanes != planes:    # BasicBlock.expansion == 1
                blk["wd"], blk["bd"] = _conv_bn_folded(next(keys), planes, inplanes, 1)
            inplanes = planes
            blocks.append(blk)
        params[f"layer{si + 1}"] = blocks

    # nn.Linear(512, num_classes): uniform(-1/sqrt(512), 1/sqrt(512)); FC kept f32.
    bound = 1.0 / math.sqrt(512)
    params["fc_w"] = jnp.transpose(
        jax.random.uniform(next(keys), (num_classes, 512),
                           minval=-bound, maxval=bound, dtype=jnp.float32), (1, 0))
    params["fc_b"] = jax.random.uniform(next(keys), (1, num_classes),
                                        minval=-bound, maxval=bound, dtype=jnp.float32)
    return params


# ----------------------------------------------------------------------------
# The single fused kernel
# ----------------------------------------------------------------------------
def _make_fused_kernel(plan, B, Lc):
    f32 = jnp.float32

    def kernel(*refs):
        o_ref = refs[-1]
        v = lambda i: refs[i][...]

        # ---- stem: conv7/s2 (pre-im2col'ed input, K=7*Cin) + BN + ReLU -------------
        h = jnp.maximum(
            jnp.dot(v(plan["i_x"]), v(plan["i_ws"]), preferred_element_type=f32)
            + v(plan["i_bs"]), 0.0)                                     # (B*Lc, 64)

        # ---- maxpool(3, s2, p1): re-pad via selection dot, 3-tap max, subsample ----
        hp = jnp.dot(v(plan["i_Sstem"]), h, preferred_element_type=f32)  # (B*(Lc+2), 64)
        R = B * (Lc + 2)
        m = jnp.maximum(jnp.maximum(hp[0:R - 2, :], hp[1:R - 1, :]), hp[2:R, :])
        hpad = jnp.dot(v(plan["i_Spool"]), m,
                       preferred_element_type=f32).astype(jnp.bfloat16)

        # ---- BasicBlocks (whole net stays in VMEM as values) -----------------------
        for e in plan["blocks"]:
            Rin = hpad.shape[0]
            Min = Rin - 2
            # conv1: tap-stack along K -> one dot (batch folded into M)
            ts1 = jnp.concatenate(
                [hpad[0:Min], hpad[1:1 + Min], hpad[2:2 + Min]], axis=-1)
            h1 = jnp.maximum(
                jnp.dot(ts1, v(e["w1"]), preferred_element_type=f32) + v(e["b1"]), 0.0)
            # stride-1: re-pad; stride-2: subsample + re-pad (one selection dot)
            h1p = jnp.dot(v(e["s_mid"]), h1,
                          preferred_element_type=f32).astype(jnp.bfloat16)

            Rout = h1p.shape[0]
            Mout = Rout - 2
            # conv2
            ts2 = jnp.concatenate(
                [h1p[0:Mout], h1p[1:1 + Mout], h1p[2:2 + Mout]], axis=-1)
            y2 = jnp.dot(ts2, v(e["w2"]), preferred_element_type=f32) + v(e["b2"])

            # residual path
            if e["wd"] is not None:
                idf = (jnp.dot(hpad[1:1 + Min], v(e["wd"]),
                               preferred_element_type=f32) + v(e["bd"]))
                if e["stride"] == 2:
                    idf = jnp.dot(v(e["s_mid"]), idf,
                                  preferred_element_type=f32)[1:1 + Mout]
                idn = idf
            else:
                idn = hpad[1:1 + Min].astype(f32)
            z = jnp.maximum(y2 + idn, 0.0)

            # emit next per-batch zero-padded slab (pads stay exactly zero)
            hpad = jnp.dot(v(e["s_out"]), z,
                           preferred_element_type=f32).astype(jnp.bfloat16)

        # ---- head: global average pool (one dot) + FC (one dot) --------------------
        pooled = jnp.dot(v(plan["i_A"]), hpad, preferred_element_type=f32)  # (B, 512)
        o_ref[...] = (jnp.dot(pooled, v(plan["i_fcw"]), preferred_element_type=f32)
                      + v(plan["i_fcb"]))

    return kernel


# ----------------------------------------------------------------------------
# Forward pass (one pallas_call)
# ----------------------------------------------------------------------------
def ram1d_forward(params, x_ncl):
    """x_ncl: (B, Cin, L) PyTorch layout -> logits (B, num_classes)."""
    x = jnp.transpose(x_ncl, (0, 2, 1)).astype(jnp.float32)     # (B, L, Cin)
    B, L0, Cin = x.shape
    assert L0 % 32 == 0, "this implementation assumes L divisible by 32"

    Lc = L0 // 2            # stem conv output length
    Lp = Lc // 2            # after maxpool

    # Stem im2col on the RAW input (tiny, done once in XLA): (B*Lc, 7*Cin) bf16.
    xp = jnp.pad(x, ((0, 0), (3, 3), (0, 0)))
    cols = [xp[:, k:k + 2 * Lc:2, :] for k in range(7)]
    x_stem = jnp.concatenate(cols, axis=-1).reshape(B * Lc, 7 * Cin).astype(jnp.bfloat16)

    args = []

    def add(a):
        args.append(a)
        return len(args) - 1

    def sel(nr, nc, pairs, val=1.0, dtype=jnp.float32):
        m = np.zeros((nr, nc), np.float32)
        for r, c in pairs:
            m[r, c] = val
        return jnp.asarray(m, dtype=dtype)

    def repad_mat(L):
        seg = L + 2
        return sel(B * seg, B * seg - 2,
                   [(b * seg + 1 + j, b * seg + j)
                    for b in range(B) for j in range(L)])

    def s2_mat(Lin):
        Lout = Lin // 2
        si, so = Lin + 2, Lout + 2
        return sel(B * so, B * si - 2,
                   [(b * so + 1 + j, b * si + 2 * j)
                    for b in range(B) for j in range(Lout)])

    plan = {}
    plan["i_x"] = add(x_stem)
    plan["i_ws"] = add(params["stem"]["w"])
    plan["i_bs"] = add(params["stem"]["b"])
    # maxpool pre-pad and stride-2 subsample selection matrices
    plan["i_Sstem"] = add(sel(B * (Lc + 2), B * Lc,
                              [(b * (Lc + 2) + 1 + j, b * Lc + j)
                               for b in range(B) for j in range(Lc)]))
    plan["i_Spool"] = add(sel(B * (Lp + 2), B * (Lc + 2) - 2,
                              [(b * (Lp + 2) + 1 + j, b * (Lc + 2) + 2 * j)
                               for b in range(B) for j in range(Lp)]))

    repad_cache = {}

    def repad_idx(L):
        if L not in repad_cache:
            repad_cache[L] = add(repad_mat(L))
        return repad_cache[L]

    blocks = []
    L = Lp
    for si in range(4):
        for bi, blk in enumerate(params[f"layer{si + 1}"]):
            stride = 2 if (si > 0 and bi == 0) else 1
            e = {"stride": stride}
            e["w1"] = add(blk["w1"]); e["b1"] = add(blk["b1"])
            e["w2"] = add(blk["w2"]); e["b2"] = add(blk["b2"])
            if "wd" in blk:
                e["wd"] = add(blk["wd"]); e["bd"] = add(blk["bd"])
            else:
                e["wd"] = None
            if stride == 2:
                assert L % 2 == 0
                e["s_mid"] = add(s2_mat(L))
                L = L // 2
            else:
                e["s_mid"] = repad_idx(L)
            e["s_out"] = repad_idx(L)
            blocks.append(e)
        # TODO(synk): AttentionModule_stage{1,2,3} after layers 1-3 were not provided
        # in the reference source -> identity.
    plan["blocks"] = blocks

    segf = L + 2
    plan["i_A"] = add(sel(B, B * segf,
                          [(b, b * segf + 1 + j) for b in range(B) for j in range(L)],
                          val=1.0 / float(L), dtype=jnp.bfloat16))
    plan["i_fcw"] = add(params["fc_w"])
    plan["i_fcb"] = add(params["fc_b"])

    ncls = params["fc_w"].shape[-1]
    kernel = _make_fused_kernel(plan, B, Lc)

    return pl.pallas_call(
        kernel,
        out_shape=jax.ShapeDtypeStruct((B, ncls), jnp.float32),
        grid=(1,),
        in_specs=[_full_spec(a.shape) for a in args],
        out_specs=_full_spec((B, ncls)),
        compiler_params=pltpu.CompilerParams(dimension_semantics=("arbitrary",)),
    )(*args)


# ----------------------------------------------------------------------------
if __name__ == "__main__":
    key = jax.random.PRNGKey(0)
    pkey, xkey = jax.random.split(key)

    B, CIN, L, NUM_CLASSES = 2, 3, 64, 10
    params = init_ram1d_params(pkey, layers=(1, 1, 1, 1),
                               num_classes=NUM_CLASSES, in_channels=CIN)
    x = jax.random.normal(xkey, (B, CIN, L), dtype=jnp.float32)

    fwd = jax.jit(ram1d_forward)
    logits = jax.block_until_ready(fwd(params, x))

    assert logits.shape == (B, NUM_CLASSES), logits.shape
    assert bool(jnp.all(jnp.isfinite(logits)))
    print("KERNEL_OK")
</pallas_src>

<mosaic_0001>
module attributes {stable_mosaic.version = 11 : i64} {
  func.func @kernel(%arg0: i32, %arg1: memref<64x21xbf16, #tpu.memory_space<vmem>>, %arg2: memref<21x64xbf16, #tpu.memory_space<vmem>>, %arg3: memref<1x64xf32, #tpu.memory_space<vmem>>, %arg4: memref<68x64xf32, #tpu.memory_space<vmem>>, %arg5: memref<36x66xf32, #tpu.memory_space<vmem>>, %arg6: memref<192x64xbf16, #tpu.memory_space<vmem>>, %arg7: memref<1x64xf32, #tpu.memory_space<vmem>>, %arg8: memref<192x64xbf16, #tpu.memory_space<vmem>>, %arg9: memref<1x64xf32, #tpu.memory_space<vmem>>, %arg10: memref<36x34xf32, #tpu.memory_space<vmem>>, %arg11: memref<192x128xbf16, #tpu.memory_space<vmem>>, %arg12: memref<1x128xf32, #tpu.memory_space<vmem>>, %arg13: memref<384x128xbf16, #tpu.memory_space<vmem>>, %arg14: memref<1x128xf32, #tpu.memory_space<vmem>>, %arg15: memref<64x128xbf16, #tpu.memory_space<vmem>>, %arg16: memref<1x128xf32, #tpu.memory_space<vmem>>, %arg17: memref<20x34xf32, #tpu.memory_space<vmem>>, %arg18: memref<20x18xf32, #tpu.memory_space<vmem>>, %arg19: memref<384x256xbf16, #tpu.memory_space<vmem>>, %arg20: memref<1x256xf32, #tpu.memory_space<vmem>>, %arg21: memref<768x256xbf16, #tpu.memory_space<vmem>>, %arg22: memref<1x256xf32, #tpu.memory_space<vmem>>, %arg23: memref<128x256xbf16, #tpu.memory_space<vmem>>, %arg24: memref<1x256xf32, #tpu.memory_space<vmem>>, %arg25: memref<12x18xf32, #tpu.memory_space<vmem>>, %arg26: memref<12x10xf32, #tpu.memory_space<vmem>>, %arg27: memref<768x512xbf16, #tpu.memory_space<vmem>>, %arg28: memref<1x512xf32, #tpu.memory_space<vmem>>, %arg29: memref<1536x512xbf16, #tpu.memory_space<vmem>>, %arg30: memref<1x512xf32, #tpu.memory_space<vmem>>, %arg31: memref<256x512xbf16, #tpu.memory_space<vmem>>, %arg32: memref<1x512xf32, #tpu.memory_space<vmem>>, %arg33: memref<8x10xf32, #tpu.memory_space<vmem>>, %arg34: memref<8x6xf32, #tpu.memory_space<vmem>>, %arg35: memref<2x8xbf16, #tpu.memory_space<vmem>>, %arg36: memref<512x10xf32, #tpu.memory_space<vmem>>, %arg37: memref<1x10xf32, #tpu.memory_space<vmem>>, %arg38: memref<2x10xf32, #tpu.memory_space<vmem>>) attributes {dimension_semantics = [#tpu.dimension_semantics<arbitrary>], iteration_bounds = array<i64: 1>, scalar_prefetch = 0 : i64, scratch_operands = 0 : i64, tpu.core_type = #tpu.core_type<tc>, window_params = [{pipeline_mode = #tpu.pipeline_mode<synchronous>, transform_indices = @transform_0, window_bounds = array<i64: 64, 21>}, {pipeline_mode = #tpu.pipeline_mode<synchronous>, transform_indices = @transform_1, window_bounds = array<i64: 21, 64>}, {pipeline_mode = #tpu.pipeline_mode<synchronous>, transform_indices = @transform_2, window_bounds = array<i64: 1, 64>}, {pipeline_mode = #tpu.pipeline_mode<synchronous>, transform_indices = @transform_3, window_bounds = array<i64: 68, 64>}, {pipeline_mode = #tpu.pipeline_mode<synchronous>, transform_indices = @transform_4, window_bounds = array<i64: 36, 66>}, {pipeline_mode = #tpu.pipeline_mode<synchronous>, transform_indices = @transform_5, window_bounds = array<i64: 192, 64>}, {pipeline_mode = #tpu.pipeline_mode<synchronous>, transform_indices = @transform_6, window_bounds = array<i64: 1, 64>}, {pipeline_mode = #tpu.pipeline_mode<synchronous>, transform_indices = @transform_7, window_bounds = array<i64: 192, 64>}, {pipeline_mode = #tpu.pipeline_mode<synchronous>, transform_indices = @transform_8, window_bounds = array<i64: 1, 64>}, {pipeline_mode = #tpu.pipeline_mode<synchronous>, transform_indices = @transform_9, window_bounds = array<i64: 36, 34>}, {pipeline_mode = #tpu.pipeline_mode<synchronous>, transform_indices = @transform_10, window_bounds = array<i64: 192, 128>}, {pipeline_mode = #tpu.pipeline_mode<synchronous>, transform_indices = @transform_11, window_bounds = array<i64: 1, 128>}, {pipeline_mode = #tpu.pipeline_mode<synchronous>, transform_indices = @transform_12, window_bounds = array<i64: 384, 128>}, {pipeline_mode = #tpu.pipeline_mode<synchronous>, transform_indices = @transform_13, window_bounds = array<i64: 1, 128>}, {pipeline_mode = #tpu.pipeline_mode<synchronous>, transform_indices = @transform_14, window_bounds = array<i64: 64, 128>}, {pipeline_mode = #tpu.pipeline_mode<synchronous>, transform_indices = @transform_15, window_bounds = array<i64: 1, 128>}, {pipeline_mode = #tpu.pipeline_mode<synchronous>, transform_indices = @transform_16, window_bounds = array<i64: 20, 34>}, {pipeline_mode = #tpu.pipeline_mode<synchronous>, transform_indices = @transform_17, window_bounds = array<i64: 20, 18>}, {pipeline_mode = #tpu.pipeline_mode<synchronous>, transform_indices = @transform_18, window_bounds = array<i64: 384, 256>}, {pipeline_mode = #tpu.pipeline_mode<synchronous>, transform_indices = @transform_19, window_bounds = array<i64: 1, 256>}, {pipeline_mode = #tpu.pipeline_mode<synchronous>, transform_indices = @transform_20, window_bounds = array<i64: 768, 256>}, {pipeline_mode = #tpu.pipeline_mode<synchronous>, transform_indices = @transform_21, window_bounds = array<i64: 1, 256>}, {pipeline_mode = #tpu.pipeline_mode<synchronous>, transform_indices = @transform_22, window_bounds = array<i64: 128, 256>}, {pipeline_mode = #tpu.pipeline_mode<synchronous>, transform_indices = @transform_23, window_bounds = array<i64: 1, 256>}, {pipeline_mode = #tpu.pipeline_mode<synchronous>, transform_indices = @transform_24, window_bounds = array<i64: 12, 18>}, {pipeline_mode = #tpu.pipeline_mode<synchronous>, transform_indices = @transform_25, window_bounds = array<i64: 12, 10>}, {pipeline_mode = #tpu.pipeline_mode<synchronous>, transform_indices = @transform_26, window_bounds = array<i64: 768, 512>}, {pipeline_mode = #tpu.pipeline_mode<synchronous>, transform_indices = @transform_27, window_bounds = array<i64: 1, 512>}, {pipeline_mode = #tpu.pipeline_mode<synchronous>, transform_indices = @transform_28, window_bounds = array<i64: 1536, 512>}, {pipeline_mode = #tpu.pipeline_mode<synchronous>, transform_indices = @transform_29, window_bounds = array<i64: 1, 512>}, {pipeline_mode = #tpu.pipeline_mode<synchronous>, transform_indices = @transform_30, window_bounds = array<i64: 256, 512>}, {pipeline_mode = #tpu.pipeline_mode<synchronous>, transform_indices = @transform_31, window_bounds = array<i64: 1, 512>}, {pipeline_mode = #tpu.pipeline_mode<synchronous>, transform_indices = @transform_32, window_bounds = array<i64: 8, 10>}, {pipeline_mode = #tpu.pipeline_mode<synchronous>, transform_indices = @transform_33, window_bounds = array<i64: 8, 6>}, {pipeline_mode = #tpu.pipeline_mode<synchronous>, transform_indices = @transform_34, window_bounds = array<i64: 2, 8>}, {pipeline_mode = #tpu.pipeline_mode<synchronous>, transform_indices = @transform_35, window_bounds = array<i64: 512, 10>}, {pipeline_mode = #tpu.pipeline_mode<synchronous>, transform_indices = @transform_36, window_bounds = array<i64: 1, 10>}, {pipeline_mode = #tpu.pipeline_mode<synchronous>, transform_indices = @transform_37, window_bounds = array<i64: 2, 10>}]} {
    %c0 = arith.constant 0 : index
    %c0_0 = arith.constant 0 : index
    %0 = vector.load %arg1[%c0, %c0_0] : memref<64x21xbf16, #tpu.memory_space<vmem>>, vector<64x21xbf16>
    %c0_1 = arith.constant 0 : index
    %c0_2 = arith.constant 0 : index
    %1 = vector.load %arg2[%c0_1, %c0_2] : memref<21x64xbf16, #tpu.memory_space<vmem>>, vector<21x64xbf16>
    %cst = arith.constant dense<0.000000e+00> : vector<64x64xf32>
    %2 = tpu.matmul %0, %1, %cst {dimension_numbers = #tpu.dot_dimension_numbers<[1], [0], [0], [1], [0, 0, 1, 1], [], []>} : vector<64x21xbf16>, vector<21x64xbf16>, vector<64x64xf32> -> vector<64x64xf32>
    %c0_3 = arith.constant 0 : index
    %c0_4 = arith.constant 0 : index
    %3 = vector.load %arg3[%c0_3, %c0_4] : memref<1x64xf32, #tpu.memory_space<vmem>>, vector<1x64xf32>
    %4 = vector.broadcast %3 : vector<1x64xf32> to vector<64x64xf32>
    %5 = arith.addf %2, %4 : vector<64x64xf32>
    %cst_5 = arith.constant 0.000000e+00 : f32
    %6 = vector.broadcast %cst_5 : f32 to vector<64x64xf32>
    %7 = arith.maximumf %5, %6 : vector<64x64xf32>
    %c0_6 = arith.constant 0 : index
    %c0_7 = arith.constant 0 : index
    %8 = vector.load %arg4[%c0_6, %c0_7] : memref<68x64xf32, #tpu.memory_space<vmem>>, vector<68x64xf32>
    %cst_8 = arith.constant dense<0.000000e+00> : vector<68x64xf32>
    %9 = tpu.matmul %8, %7, %cst_8 {dimension_numbers = #tpu.dot_dimension_numbers<[1], [0], [0], [1], [0, 0, 1, 1], [], []>} : vector<68x64xf32>, vector<64x64xf32>, vector<68x64xf32> -> vector<68x64xf32>
    %10 = vector.extract_strided_slice %9 {offsets = [0, 0], sizes = [66, 64], strides = [1, 1]} : vector<68x64xf32> to vector<66x64xf32>
    %11 = vector.extract_strided_slice %9 {offsets = [1, 0], sizes = [66, 64], strides = [1, 1]} : vector<68x64xf32> to vector<66x64xf32>
    %12 = arith.maximumf %10, %11 : vector<66x64xf32>
    %13 = vector.extract_strided_slice %9 {offsets = [2, 0], sizes = [66, 64], strides = [1, 1]} : vector<68x64xf32> to vector<66x64xf32>
    %14 = arith.maximumf %12, %13 : vector<66x64xf32>
    %c0_9 = arith.constant 0 : index
    %c0_10 = arith.constant 0 : index
    %15 = vector.load %arg5[%c0_9, %c0_10] : memref<36x66xf32, #tpu.memory_space<vmem>>, vector<36x66xf32>
    %cst_11 = arith.constant dense<0.000000e+00> : vector<36x64xf32>
    %16 = tpu.matmul %15, %14, %cst_11 {dimension_numbers = #tpu.dot_dimension_numbers<[1], [0], [0], [1], [0, 0, 1, 1], [], []>} : vector<36x66xf32>, vector<66x64xf32>, vector<36x64xf32> -> vector<36x64xf32>
    %17 = arith.truncf %16 : vector<36x64xf32> to vector<36x64xbf16>
    %18 = vector.extract_strided_slice %17 {offsets = [0, 0], sizes = [34, 64], strides = [1, 1]} : vector<36x64xbf16> to vector<34x64xbf16>
    %19 = vector.extract_strided_slice %17 {offsets = [1, 0], sizes = [34, 64], strides = [1, 1]} : vector<36x64xbf16> to vector<34x64xbf16>
    %20 = vector.extract_strided_slice %17 {offsets = [2, 0], sizes = [34, 64], strides = [1, 1]} : vector<36x64xbf16> to vector<34x64xbf16>
    %21 = tpu.concatenate %18, %19, %20 in 1 : vector<34x64xbf16>, vector<34x64xbf16>, vector<34x64xbf16> -> vector<34x192xbf16>
    %c0_12 = arith.constant 0 : index
    %c0_13 = arith.constant 0 : index
    %22 = vector.load %arg6[%c0_12, %c0_13] : memref<192x64xbf16, #tpu.memory_space<vmem>>, vector<192x64xbf16>
    %cst_14 = arith.constant dense<0.000000e+00> : vector<34x64xf32>
    %23 = tpu.matmul %21, %22, %cst_14 {dimension_numbers = #tpu.dot_dimension_numbers<[1], [0], [0], [1], [0, 0, 1, 1], [], []>} : vector<34x192xbf16>, vector<192x64xbf16>, vector<34x64xf32> -> vector<34x64xf32>
    %c0_15 = arith.constant 0 : index
    %c0_16 = arith.constant 0 : index
    %24 = vector.load %arg7[%c0_15, %c0_16] : memref<1x64xf32, #tpu.memory_space<vmem>>, vector<1x64xf32>
    %25 = vector.broadcast %24 : vector<1x64xf32> to vector<34x64xf32>
    %26 = arith.addf %23, %25 : vector<34x64xf32>
    %cst_17 = arith.constant 0.000000e+00 : f32
    %27 = vector.broadcast %cst_17 : f32 to vector<34x64xf32>
    %28 = arith.maximumf %26, %27 : vector<34x64xf32>
    %c0_18 = arith.constant 0 : index
    %c0_19 = arith.constant 0 : index
    %29 = vector.load %arg10[%c0_18, %c0_19] : memref<36x34xf32, #tpu.memory_space<vmem>>, vector<36x34xf32>
    %cst_20 = arith.constant dense<0.000000e+00> : vector<36x64xf32>
    %30 = tpu.matmul %29, %28, %cst_20 {dimension_numbers = #tpu.dot_dimension_numbers<[1], [0], [0], [1], [0, 0, 1, 1], [], []>} : vector<36x34xf32>, vector<34x64xf32>, vector<36x64xf32> -> vector<36x64xf32>
    %31 = arith.truncf %30 : vector<36x64xf32> to vector<36x64xbf16>
    %32 = vector.extract_strided_slice %31 {offsets = [0, 0], sizes = [34, 64], strides = [1, 1]} : vector<36x64xbf16> to vector<34x64xbf16>
    %33 = vector.extract_strided_slice %31 {offsets = [1, 0], sizes = [34, 64], strides = [1, 1]} : vector<36x64xbf16> to vector<34x64xbf16>
    %34 = vector.extract_strided_slice %31 {offsets = [2, 0], sizes = [34, 64], strides = [1, 1]} : vector<36x64xbf16> to vector<34x64xbf16>
    %35 = tpu.concatenate %32, %33, %34 in 1 : vector<34x64xbf16>, vector<34x64xbf16>, vector<34x64xbf16> -> vector<34x192xbf16>
    %c0_21 = arith.constant 0 : index
    %c0_22 = arith.constant 0 : index
    %36 = vector.load %arg8[%c0_21, %c0_22] : memref<192x64xbf16, #tpu.memory_space<vmem>>, vector<192x64xbf16>
    %cst_23 = arith.constant dense<0.000000e+00> : vector<34x64xf32>
    %37 = tpu.matmul %35, %36, %cst_23 {dimension_numbers = #tpu.dot_dimension_numbers<[1], [0], [0], [1], [0, 0, 1, 1], [], []>} : vector<34x192xbf16>, vector<192x64xbf16>, vector<34x64xf32> -> vector<34x64xf32>
    %c0_24 = arith.constant 0 : index
    %c0_25 = arith.constant 0 : index
    %38 = vector.load %arg9[%c0_24, %c0_25] : memref<1x64xf32, #tpu.memory_space<vmem>>, vector<1x64xf32>
    %39 = vector.broadcast %38 : vector<1x64xf32> to vector<34x64xf32>
    %40 = arith.addf %37, %39 : vector<34x64xf32>
    %41 = vector.extract_strided_slice %17 {offsets = [1, 0], sizes = [34, 64], strides = [1, 1]} : vector<36x64xbf16> to vector<34x64xbf16>
    %42 = arith.extf %41 : vector<34x64xbf16> to vector<34x64xf32>
    %43 = arith.addf %40, %42 : vector<34x64xf32>
    %cst_26 = arith.constant 0.000000e+00 : f32
    %44 = vector.broadcast %cst_26 : f32 to vector<34x64xf32>
    %45 = arith.maximumf %43, %44 : vector<34x64xf32>
    %c0_27 = arith.constant 0 : index
    %c0_28 = arith.constant 0 : index
    %46 = vector.load %arg10[%c0_27, %c0_28] : memref<36x34xf32, #tpu.memory_space<vmem>>, vector<36x34xf32>
    %cst_29 = arith.constant dense<0.000000e+00> : vector<36x64xf32>
    %47 = tpu.matmul %46, %45, %cst_29 {dimension_numbers = #tpu.dot_dimension_numbers<[1], [0], [0], [1], [0, 0, 1, 1], [], []>} : vector<36x34xf32>, vector<34x64xf32>, vector<36x64xf32> -> vector<36x64xf32>
    %48 = arith.truncf %47 : vector<36x64xf32> to vector<36x64xbf16>
    %49 = vector.extract_strided_slice %48 {offsets = [0, 0], sizes = [34, 64], strides = [1, 1]} : vector<36x64xbf16> to vector<34x64xbf16>
    %50 = vector.extract_strided_slice %48 {offsets = [1, 0], sizes = [34, 64], strides = [1, 1]} : vector<36x64xbf16> to vector<34x64xbf16>
    %51 = vector.extract_strided_slice %48 {offsets = [2, 0], sizes = [34, 64], strides = [1, 1]} : vector<36x64xbf16> to vector<34x64xbf16>
    %52 = tpu.concatenate %49, %50, %51 in 1 : vector<34x64xbf16>, vector<34x64xbf16>, vector<34x64xbf16> -> vector<34x192xbf16>
    %c0_30 = arith.constant 0 : index
    %c0_31 = arith.constant 0 : index
    %53 = vector.load %arg11[%c0_30, %c0_31] : memref<192x128xbf16, #tpu.memory_space<vmem>>, vector<192x128xbf16>
    %cst_32 = arith.constant dense<0.000000e+00> : vector<34x128xf32>
    %54 = tpu.matmul %52, %53, %cst_32 {dimension_numbers = #tpu.dot_dimension_numbers<[1], [0], [0], [1], [0, 0, 1, 1], [], []>} : vector<34x192xbf16>, vector<192x128xbf16>, vector<34x128xf32> -> vector<34x128xf32>
    %c0_33 = arith.constant 0 : index
    %c0_34 = arith.constant 0 : index
    %55 = vector.load %arg12[%c0_33, %c0_34] : memref<1x128xf32, #tpu.memory_space<vmem>>, vector<1x128xf32>
    %56 = vector.broadcast %55 : vector<1x128xf32> to vector<34x128xf32>
    %57 = arith.addf %54, %56 : vector<34x128xf32>
    %cst_35 = arith.constant 0.000000e+00 : f32
    %58 = vector.broadcast %cst_35 : f32 to vector<34x128xf32>
    %59 = arith.maximumf %57, %58 : vector<34x128xf32>
    %c0_36 = arith.constant 0 : index
    %c0_37 = arith.constant 0 : index
    %60 = vector.load %arg17[%c0_36, %c0_37] : memref<20x34xf32, #tpu.memory_space<vmem>>, vector<20x34xf32>
    %cst_38 = arith.constant dense<0.000000e+00> : vector<20x128xf32>
    %61 = tpu.matmul %60, %59, %cst_38 {dimension_numbers = #tpu.dot_dimension_numbers<[1], [0], [0], [1], [0, 0, 1, 1], [], []>} : vector<20x34xf32>, vector<34x128xf32>, vector<20x128xf32> -> vector<20x128xf32>
    %62 = arith.truncf %61 : vector<20x128xf32> to vector<20x128xbf16>
    %63 = vector.extract_strided_slice %62 {offsets = [0, 0], sizes = [18, 128], strides = [1, 1]} : vector<20x128xbf16> to vector<18x128xbf16>
    %64 = vector.extract_strided_slice %62 {offsets = [1, 0], sizes = [18, 128], strides = [1, 1]} : vector<20x128xbf16> to vector<18x128xbf16>
    %65 = vector.extract_strided_slice %62 {offsets = [2, 0], sizes = [18, 128], strides = [1, 1]} : vector<20x128xbf16> to vector<18x128xbf16>
    %66 = tpu.concatenate %63, %64, %65 in 1 : vector<18x128xbf16>, vector<18x128xbf16>, vector<18x128xbf16> -> vector<18x384xbf16>
    %c0_39 = arith.constant 0 : index
    %c0_40 = arith.constant 0 : index
    %67 = vector.load %arg13[%c0_39, %c0_40] : memref<384x128xbf16, #tpu.memory_space<vmem>>, vector<384x128xbf16>
    %cst_41 = arith.constant dense<0.000000e+00> : vector<18x128xf32>
    %68 = tpu.matmul %66, %67, %cst_41 {dimension_numbers = #tpu.dot_dimension_numbers<[1], [0], [0], [1], [0, 0, 1, 1], [], []>} : vector<18x384xbf16>, vector<384x128xbf16>, vector<18x128xf32> -> vector<18x128xf32>
    %c0_42 = arith.constant 0 : index
    %c0_43 = arith.constant 0 : index
    %69 = vector.load %arg14[%c0_42, %c0_43] : memref<1x128xf32, #tpu.memory_space<vmem>>, vector<1x128xf32>
    %70 = vector.broadcast %69 : vector<1x128xf32> to vector<18x128xf32>
    %71 = arith.addf %68, %70 : vector<18x128xf32>
    %72 = vector.extract_strided_slice %48 {offsets = [1, 0], sizes = [34, 64], strides = [1, 1]} : vector<36x64xbf16> to vector<34x64xbf16>
    %c0_44 = arith.constant 0 : index
    %c0_45 = arith.constant 0 : index
    %73 = vector.load %arg15[%c0_44, %c0_45] : memref<64x128xbf16, #tpu.memory_space<vmem>>, vector<64x128xbf16>
    %cst_46 = arith.constant dense<0.000000e+00> : vector<34x128xf32>
    %74 = tpu.matmul %72, %73, %cst_46 {dimension_numbers = #tpu.dot_dimension_numbers<[1], [0], [0], [1], [0, 0, 1, 1], [], []>} : vector<34x64xbf16>, vector<64x128xbf16>, vector<34x128xf32> -> vector<34x128xf32>
    %c0_47 = arith.constant 0 : index
    %c0_48 = arith.constant 0 : index
    %75 = vector.load %arg16[%c0_47, %c0_48] : memref<1x128xf32, #tpu.memory_space<vmem>>, vector<1x128xf32>
    %76 = vector.broadcast %75 : vector<1x128xf32> to vector<34x128xf32>
    %77 = arith.addf %74, %76 : vector<34x128xf32>
    %c0_49 = arith.constant 0 : index
    %c0_50 = arith.constant 0 : index
    %78 = vector.load %arg17[%c0_49, %c0_50] : memref<20x34xf32, #tpu.memory_space<vmem>>, vector<20x34xf32>
    %cst_51 = arith.constant dense<0.000000e+00> : vector<20x128xf32>
    %79 = tpu.matmul %78, %77, %cst_51 {dimension_numbers = #tpu.dot_dimension_numbers<[1], [0], [0], [1], [0, 0, 1, 1], [], []>} : vector<20x34xf32>, vector<34x128xf32>, vector<20x128xf32> -> vector<20x128xf32>
    %80 = vector.extract_strided_slice %79 {offsets = [1, 0], sizes = [18, 128], strides = [1, 1]} : vector<20x128xf32> to vector<18x128xf32>
    %81 = arith.addf %71, %80 : vector<18x128xf32>
    %cst_52 = arith.constant 0.000000e+00 : f32
    %82 = vector.broadcast %cst_52 : f32 to vector<18x128xf32>
    %83 = arith.maximumf %81, %82 : vector<18x128xf32>
    %c0_53 = arith.constant 0 : index
    %c0_54 = arith.constant 0 : index
    %84 = vector.load %arg18[%c0_53, %c0_54] : memref<20x18xf32, #tpu.memory_space<vmem>>, vector<20x18xf32>
    %cst_55 = arith.constant dense<0.000000e+00> : vector<20x128xf32>
    %85 = tpu.matmul %84, %83, %cst_55 {dimension_numbers = #tpu.dot_dimension_numbers<[1], [0], [0], [1], [0, 0, 1, 1], [], []>} : vector<20x18xf32>, vector<18x128xf32>, vector<20x128xf32> -> vector<20x128xf32>
    %86 = arith.truncf %85 : vector<20x128xf32> to vector<20x128xbf16>
    %87 = vector.extract_strided_slice %86 {offsets = [0, 0], sizes = [18, 128], strides = [1, 1]} : vector<20x128xbf16> to vector<18x128xbf16>
    %88 = vector.extract_strided_slice %86 {offsets = [1, 0], sizes = [18, 128], strides = [1, 1]} : vector<20x128xbf16> to vector<18x128xbf16>
    %89 = vector.extract_strided_slice %86 {offsets = [2, 0], sizes = [18, 128], strides = [1, 1]} : vector<20x128xbf16> to vector<18x128xbf16>
    %90 = tpu.concatenate %87, %88, %89 in 1 : vector<18x128xbf16>, vector<18x128xbf16>, vector<18x128xbf16> -> vector<18x384xbf16>
    %c0_56 = arith.constant 0 : index
    %c0_57 = arith.constant 0 : index
    %91 = vector.load %arg19[%c0_56, %c0_57] : memref<384x256xbf16, #tpu.memory_space<vmem>>, vector<384x256xbf16>
    %cst_58 = arith.constant dense<0.000000e+00> : vector<18x256xf32>
    %92 = tpu.matmul %90, %91, %cst_58 {dimension_numbers = #tpu.dot_dimension_numbers<[1], [0], [0], [1], [0, 0, 1, 1], [], []>} : vector<18x384xbf16>, vector<384x256xbf16>, vector<18x256xf32> -> vector<18x256xf32>
    %c0_59 = arith.constant 0 : index
    %c0_60 = arith.constant 0 : index
    %93 = vector.load %arg20[%c0_59, %c0_60] : memref<1x256xf32, #tpu.memory_space<vmem>>, vector<1x256xf32>
    %94 = vector.broadcast %93 : vector<1x256xf32> to vector<18x256xf32>
    %95 = arith.addf %92, %94 : vector<18x256xf32>
    %cst_61 = arith.constant 0.000000e+00 : f32
    %96 = vector.broadcast %cst_61 : f32 to vector<18x256xf32>
    %97 = arith.maximumf %95, %96 : vector<18x256xf32>
    %c0_62 = arith.constant 0 : index
    %c0_63 = arith.constant 0 : index
    %98 = vector.load %arg25[%c0_62, %c0_63] : memref<12x18xf32, #tpu.memory_space<vmem>>, vector<12x18xf32>
    %cst_64 = arith.constant dense<0.000000e+00> : vector<12x256xf32>
    %99 = tpu.matmul %98, %97, %cst_64 {dimension_numbers = #tpu.dot_dimension_numbers<[1], [0], [0], [1], [0, 0, 1, 1], [], []>} : vector<12x18xf32>, vector<18x256xf32>, vector<12x256xf32> -> vector<12x256xf32>
    %100 = arith.truncf %99 : vector<12x256xf32> to vector<12x256xbf16>
    %101 = vector.extract_strided_slice %100 {offsets = [0, 0], sizes = [10, 256], strides = [1, 1]} : vector<12x256xbf16> to vector<10x256xbf16>
    %102 = vector.extract_strided_slice %100 {offsets = [1, 0], sizes = [10, 256], strides = [1, 1]} : vector<12x256xbf16> to vector<10x256xbf16>
    %103 = vector.extract_strided_slice %100 {offsets = [2, 0], sizes = [10, 256], strides = [1, 1]} : vector<12x256xbf16> to vector<10x256xbf16>
    %104 = tpu.concatenate %101, %102, %103 in 1 : vector<10x256xbf16>, vector<10x256xbf16>, vector<10x256xbf16> -> vector<10x768xbf16>
    %c0_65 = arith.constant 0 : index
    %c0_66 = arith.constant 0 : index
    %105 = vector.load %arg21[%c0_65, %c0_66] : memref<768x256xbf16, #tpu.memory_space<vmem>>, vector<768x256xbf16>
    %cst_67 = arith.constant dense<0.000000e+00> : vector<10x256xf32>
    %106 = tpu.matmul %104, %105, %cst_67 {dimension_numbers = #tpu.dot_dimension_numbers<[1], [0], [0], [1], [0, 0, 1, 1], [], []>} : vector<10x768xbf16>, vector<768x256xbf16>, vector<10x256xf32> -> vector<10x256xf32>
    %c0_68 = arith.constant 0 : index
    %c0_69 = arith.constant 0 : index
    %107 = vector.load %arg22[%c0_68, %c0_69] : memref<1x256xf32, #tpu.memory_space<vmem>>, vector<1x256xf32>
    %108 = vector.broadcast %107 : vector<1x256xf32> to vector<10x256xf32>
    %109 = arith.addf %106, %108 : vector<10x256xf32>
    %110 = vector.extract_strided_slice %86 {offsets = [1, 0], sizes = [18, 128], strides = [1, 1]} : vector<20x128xbf16> to vector<18x128xbf16>
    %c0_70 = arith.constant 0 : index
    %c0_71 = arith.constant 0 : index
    %111 = vector.load %arg23[%c0_70, %c0_71] : memref<128x256xbf16, #tpu.memory_space<vmem>>, vector<128x256xbf16>
    %cst_72 = arith.constant dense<0.000000e+00> : vector<18x256xf32>
    %112 = tpu.matmul %110, %111, %cst_72 {dimension_numbers = #tpu.dot_dimension_numbers<[1], [0], [0], [1], [0, 0, 1, 1], [], []>} : vector<18x128xbf16>, vector<128x256xbf16>, vector<18x256xf32> -> vector<18x256xf32>
    %c0_73 = arith.constant 0 : index
    %c0_74 = arith.constant 0 : index
    %113 = vector.load %arg24[%c0_73, %c0_74] : memref<1x256xf32, #tpu.memory_space<vmem>>, vector<1x256xf32>
    %114 = vector.broadcast %113 : vector<1x256xf32> to vector<18x256xf32>
    %115 = arith.addf %112, %114 : vector<18x256xf32>
    %c0_75 = arith.constant 0 : index
    %c0_76 = arith.constant 0 : index
    %116 = vector.load %arg25[%c0_75, %c0_76] : memref<12x18xf32, #tpu.memory_space<vmem>>, vector<12x18xf32>
    %cst_77 = arith.constant dense<0.000000e+00> : vector<12x256xf32>
    %117 = tpu.matmul %116, %115, %cst_77 {dimension_numbers = #tpu.dot_dimension_numbers<[1], [0], [0], [1], [0, 0, 1, 1], [], []>} : vector<12x18xf32>, vector<18x256xf32>, vector<12x256xf32> -> vector<12x256xf32>
    %118 = vector.extract_strided_slice %117 {offsets = [1, 0], sizes = [10, 256], strides = [1, 1]} : vector<12x256xf32> to vector<10x256xf32>
    %119 = arith.addf %109, %118 : vector<10x256xf32>
    %cst_78 = arith.constant 0.000000e+00 : f32
    %120 = vector.broadcast %cst_78 : f32 to vector<10x256xf32>
    %121 = arith.maximumf %119, %120 : vector<10x256xf32>
    %c0_79 = arith.constant 0 : index
    %c0_80 = arith.constant 0 : index
    %122 = vector.load %arg26[%c0_79, %c0_80] : memref<12x10xf32, #tpu.memory_space<vmem>>, vector<12x10xf32>
    %cst_81 = arith.constant dense<0.000000e+00> : vector<12x256xf32>
    %123 = tpu.matmul %122, %121, %cst_81 {dimension_numbers = #tpu.dot_dimension_numbers<[1], [0], [0], [1], [0, 0, 1, 1], [], []>} : vector<12x10xf32>, vector<10x256xf32>, vector<12x256xf32> -> vector<12x256xf32>
    %124 = arith.truncf %123 : vector<12x256xf32> to vector<12x256xbf16>
    %125 = vector.extract_strided_slice %124 {offsets = [0, 0], sizes = [10, 256], strides = [1, 1]} : vector<12x256xbf16> to vector<10x256xbf16>
    %126 = vector.extract_strided_slice %124 {offsets = [1, 0], sizes = [10, 256], strides = [1, 1]} : vector<12x256xbf16> to vector<10x256xbf16>
    %127 = vector.extract_strided_slice %124 {offsets = [2, 0], sizes = [10, 256], strides = [1, 1]} : vector<12x256xbf16> to vector<10x256xbf16>
    %128 = tpu.concatenate %125, %126, %127 in 1 : vector<10x256xbf16>, vector<10x256xbf16>, vector<10x256xbf16> -> vector<10x768xbf16>
    %c0_82 = arith.constant 0 : index
    %c0_83 = arith.constant 0 : index
    %129 = vector.load %arg27[%c0_82, %c0_83] : memref<768x512xbf16, #tpu.memory_space<vmem>>, vector<768x512xbf16>
    %cst_84 = arith.constant dense<0.000000e+00> : vector<10x512xf32>
    %130 = tpu.matmul %128, %129, %cst_84 {dimension_numbers = #tpu.dot_dimension_numbers<[1], [0], [0], [1], [0, 0, 1, 1], [], []>} : vector<10x768xbf16>, vector<768x512xbf16>, vector<10x512xf32> -> vector<10x512xf32>
    %c0_85 = arith.constant 0 : index
    %c0_86 = arith.constant 0 : index
    %131 = vector.load %arg28[%c0_85, %c0_86] : memref<1x512xf32, #tpu.memory_space<vmem>>, vector<1x512xf32>
    %132 = vector.broadcast %131 : vector<1x512xf32> to vector<10x512xf32>
    %133 = arith.addf %130, %132 : vector<10x512xf32>
    %cst_87 = arith.constant 0.000000e+00 : f32
    %134 = vector.broadcast %cst_87 : f32 to vector<10x512xf32>
    %135 = arith.maximumf %133, %134 : vector<10x512xf32>
    %c0_88 = arith.constant 0 : index
    %c0_89 = arith.constant 0 : index
    %136 = vector.load %arg33[%c0_88, %c0_89] : memref<8x10xf32, #tpu.memory_space<vmem>>, vector<8x10xf32>
    %cst_90 = arith.constant dense<0.000000e+00> : vector<8x512xf32>
    %137 = tpu.matmul %136, %135, %cst_90 {dimension_numbers = #tpu.dot_dimension_numbers<[1], [0], [0], [1], [0, 0, 1, 1], [], []>} : vector<8x10xf32>, vector<10x512xf32>, vector<8x512xf32> -> vector<8x512xf32>
    %138 = arith.truncf %137 : vector<8x512xf32> to vector<8x512xbf16>
    %139 = vector.extract_strided_slice %138 {offsets = [0, 0], sizes = [6, 512], strides = [1, 1]} : vector<8x512xbf16> to vector<6x512xbf16>
    %140 = vector.extract_strided_slice %138 {offsets = [1, 0], sizes = [6, 512], strides = [1, 1]} : vector<8x512xbf16> to vector<6x512xbf16>
    %141 = vector.extract_strided_slice %138 {offsets = [2, 0], sizes = [6, 512], strides = [1, 1]} : vector<8x512xbf16> to vector<6x512xbf16>
    %142 = tpu.concatenate %139, %140, %141 in 1 : vector<6x512xbf16>, vector<6x512xbf16>, vector<6x512xbf16> -> vector<6x1536xbf16>
    %c0_91 = arith.constant 0 : index
    %c0_92 = arith.constant 0 : index
    %143 = vector.load %arg29[%c0_91, %c0_92] : memref<1536x512xbf16, #tpu.memory_space<vmem>>, vector<1536x512xbf16>
    %cst_93 = arith.constant dense<0.000000e+00> : vector<6x512xf32>
    %144 = tpu.matmul %142, %143, %cst_93 {dimension_numbers = #tpu.dot_dimension_numbers<[1], [0], [0], [1], [0, 0, 1, 1], [], []>} : vector<6x1536xbf16>, vector<1536x512xbf16>, vector<6x512xf32> -> vector<6x512xf32>
    %c0_94 = arith.constant 0 : index
    %c0_95 = arith.constant 0 : index
    %145 = vector.load %arg30[%c0_94, %c0_95] : memref<1x512xf32, #tpu.memory_space<vmem>>, vector<1x512xf32>
    %146 = vector.broadcast %145 : vector<1x512xf32> to vector<6x512xf32>
    %147 = arith.addf %144, %146 : vector<6x512xf32>
    %148 = vector.extract_strided_slice %124 {offsets = [1, 0], sizes = [10, 256], strides = [1, 1]} : vector<12x256xbf16> to vector<10x256xbf16>
    %c0_96 = arith.constant 0 : index
    %c0_97 = arith.constant 0 : index
    %149 = vector.load %arg31[%c0_96, %c0_97] : memref<256x512xbf16, #tpu.memory_space<vmem>>, vector<256x512xbf16>
    %cst_98 = arith.constant dense<0.000000e+00> : vector<10x512xf32>
    %150 = tpu.matmul %148, %149, %cst_98 {dimension_numbers = #tpu.dot_dimension_numbers<[1], [0], [0], [1], [0, 0, 1, 1], [], []>} : vector<10x256xbf16>, vector<256x512xbf16>, vector<10x512xf32> -> vector<10x512xf32>
    %c0_99 = arith.constant 0 : index
    %c0_100 = arith.constant 0 : index
    %151 = vector.load %arg32[%c0_99, %c0_100] : memref<1x512xf32, #tpu.memory_space<vmem>>, vector<1x512xf32>
    %152 = vector.broadcast %151 : vector<1x512xf32> to vector<10x512xf32>
    %153 = arith.addf %150, %152 : vector<10x512xf32>
    %c0_101 = arith.constant 0 : index
    %c0_102 = arith.constant 0 : index
    %154 = vector.load %arg33[%c0_101, %c0_102] : memref<8x10xf32, #tpu.memory_space<vmem>>, vector<8x10xf32>
    %cst_103 = arith.constant dense<0.000000e+00> : vector<8x512xf32>
    %155 = tpu.matmul %154, %153, %cst_103 {dimension_numbers = #tpu.dot_dimension_numbers<[1], [0], [0], [1], [0, 0, 1, 1], [], []>} : vector<8x10xf32>, vector<10x512xf32>, vector<8x512xf32> -> vector<8x512xf32>
    %156 = vector.extract_strided_slice %155 {offsets = [1, 0], sizes = [6, 512], strides = [1, 1]} : vector<8x512xf32> to vector<6x512xf32>
    %157 = arith.addf %147, %156 : vector<6x512xf32>
    %cst_104 = arith.constant 0.000000e+00 : f32
    %158 = vector.broadcast %cst_104 : f32 to vector<6x512xf32>
    %159 = arith.maximumf %157, %158 : vector<6x512xf32>
    %c0_105 = arith.constant 0 : index
    %c0_106 = arith.constant 0 : index
    %160 = vector.load %arg34[%c0_105, %c0_106] : memref<8x6xf32, #tpu.memory_space<vmem>>, vector<8x6xf32>
    %cst_107 = arith.constant dense<0.000000e+00> : vector<8x512xf32>
    %161 = tpu.matmul %160, %159, %cst_107 {dimension_numbers = #tpu.dot_dimension_numbers<[1], [0], [0], [1], [0, 0, 1, 1], [], []>} : vector<8x6xf32>, vector<6x512xf32>, vector<8x512xf32> -> vector<8x512xf32>
    %162 = arith.truncf %161 : vector<8x512xf32> to vector<8x512xbf16>
    %c0_108 = arith.constant 0 : index
    %c0_109 = arith.constant 0 : index
    %163 = vector.load %arg35[%c0_108, %c0_109] : memref<2x8xbf16, #tpu.memory_space<vmem>>, vector<2x8xbf16>
    %cst_110 = arith.constant dense<0.000000e+00> : vector<2x512xf32>
    %164 = tpu.matmul %163, %162, %cst_110 {dimension_numbers = #tpu.dot_dimension_numbers<[1], [0], [0], [1], [0, 0, 1, 1], [], []>} : vector<2x8xbf16>, vector<8x512xbf16>, vector<2x512xf32> -> vector<2x512xf32>
    %c0_111 = arith.constant 0 : index
    %c0_112 = arith.constant 0 : index
    %165 = vector.load %arg36[%c0_111, %c0_112] : memref<512x10xf32, #tpu.memory_space<vmem>>, vector<512x10xf32>
    %cst_113 = arith.constant dense<0.000000e+00> : vector<2x10xf32>
    %166 = tpu.matmul %164, %165, %cst_113 {dimension_numbers = #tpu.dot_dimension_numbers<[1], [0], [0], [1], [0, 0, 1, 1], [], []>} : vector<2x512xf32>, vector<512x10xf32>, vector<2x10xf32> -> vector<2x10xf32>
    %c0_114 = arith.constant 0 : index
    %c0_115 = arith.constant 0 : index
    %167 = vector.load %arg37[%c0_114, %c0_115] : memref<1x10xf32, #tpu.memory_space<vmem>>, vector<1x10xf32>
    %168 = vector.broadcast %167 : vector<1x10xf32> to vector<2x10xf32>
    %169 = arith.addf %166, %168 : vector<2x10xf32>
    %c0_116 = arith.constant 0 : index
    %c0_117 = arith.constant 0 : index
    %170 = vector.load %arg38[%c0_116, %c0_117] : memref<2x10xf32, #tpu.memory_space<vmem>>, vector<2x10xf32>
    tpu.vector_store %arg38[%c0_116, %c0_117], %169 {strides = array<i32>} : memref<2x10xf32, #tpu.memory_space<vmem>>, vector<2x10xf32>,
    return
  }
  func.func @transform_0(%arg0: i32) -> (i32, i32) {
    %c0_i32 = arith.constant 0 : i32
    %c0_i32_0 = arith.constant 0 : i32
    %c0_i32_1 = arith.constant 0 : i32
    return %c0_i32, %c0_i32_0 : i32, i32
  }
  func.func @transform_1(%arg0: i32) -> (i32, i32) {
    %c0_i32 = arith.constant 0 : i32
    %c0_i32_0 = arith.constant 0 : i32
    %c0_i32_1 = arith.constant 0 : i32
    return %c0_i32, %c0_i32_0 : i32, i32
  }
  func.func @transform_2(%arg0: i32) -> (i32, i32) {
    %c0_i32 = arith.constant 0 : i32
    %c0_i32_0 = arith.constant 0 : i32
    %c0_i32_1 = arith.constant 0 : i32
    return %c0_i32, %c0_i32_0 : i32, i32
  }
  func.func @transform_3(%arg0: i32) -> (i32, i32) {
    %c0_i32 = arith.constant 0 : i32
    %c0_i32_0 = arith.constant 0 : i32
    %c0_i32_1 = arith.constant 0 : i32
    return %c0_i32, %c0_i32_0 : i32, i32
  }
  func.func @transform_4(%arg0: i32) -> (i32, i32) {
    %c0_i32 = arith.constant 0 : i32
    %c0_i32_0 = arith.constant 0 : i32
    %c0_i32_1 = arith.constant 0 : i32
    return %c0_i32, %c0_i32_0 : i32, i32
  }
  func.func @transform_5(%arg0: i32) -> (i32, i32) {
    %c0_i32 = arith.constant 0 : i32
    %c0_i32_0 = arith.constant 0 : i32
    %c0_i32_1 = arith.constant 0 : i32
    return %c0_i32, %c0_i32_0 : i32, i32
  }
  func.func @transform_6(%arg0: i32) -> (i32, i32) {
    %c0_i32 = arith.constant 0 : i32
    %c0_i32_0 = arith.constant 0 : i32
    %c0_i32_1 = arith.constant 0 : i32
    return %c0_i32, %c0_i32_0 : i32, i32
  }
  func.func @transform_7(%arg0: i32) -> (i32, i32) {
    %c0_i32 = arith.constant 0 : i32
    %c0_i32_0 = arith.constant 0 : i32
    %c0_i32_1 = arith.constant 0 : i32
    return %c0_i32, %c0_i32_0 : i32, i32
  }
  func.func @transform_8(%arg0: i32) -> (i32, i32) {
    %c0_i32 = arith.constant 0 : i32
    %c0_i32_0 = arith.constant 0 : i32
    %c0_i32_1 = arith.constant 0 : i32
    return %c0_i32, %c0_i32_0 : i32, i32
  }
  func.func @transform_9(%arg0: i32) -> (i32, i32) {
    %c0_i32 = arith.constant 0 : i32
    %c0_i32_0 = arith.constant 0 : i32
    %c0_i32_1 = arith.constant 0 : i32
    return %c0_i32, %c0_i32_0 : i32, i32
  }
  func.func @transform_10(%arg0: i32) -> (i32, i32) {
    %c0_i32 = arith.constant 0 : i32
    %c0_i32_0 = arith.constant 0 : i32
    %c0_i32_1 = arith.constant 0 : i32
    return %c0_i32, %c0_i32_0 : i32, i32
  }
  func.func @transform_11(%arg0: i32) -> (i32, i32) {
    %c0_i32 = arith.constant 0 : i32
    %c0_i32_0 = arith.constant 0 : i32
    %c0_i32_1 = arith.constant 0 : i32
    return %c0_i32, %c0_i32_0 : i32, i32
  }
  func.func @transform_12(%arg0: i32) -> (i32, i32) {
    %c0_i32 = arith.constant 0 : i32
    %c0_i32_0 = arith.constant 0 : i32
    %c0_i32_1 = arith.constant 0 : i32
    return %c0_i32, %c0_i32_0 : i32, i32
  }
  func.func @transform_13(%arg0: i32) -> (i32, i32) {
    %c0_i32 = arith.constant 0 : i32
    %c0_i32_0 = arith.constant 0 : i32
    %c0_i32_1 = arith.constant 0 : i32
    return %c0_i32, %c0_i32_0 : i32, i32
  }
  func.func @transform_14(%arg0: i32) -> (i32, i32) {
    %c0_i32 = arith.constant 0 : i32
    %c0_i32_0 = arith.constant 0 : i32
    %c0_i32_1 = arith.constant 0 : i32
    return %c0_i32, %c0_i32_0 : i32, i32
  }
  func.func @transform_15(%arg0: i32) -> (i32, i32) {
    %c0_i32 = arith.constant 0 : i32
    %c0_i32_0 = arith.constant 0 : i32
    %c0_i32_1 = arith.constant 0 : i32
    return %c0_i32, %c0_i32_0 : i32, i32
  }
  func.func @transform_16(%arg0: i32) -> (i32, i32) {
    %c0_i32 = arith.constant 0 : i32
    %c0_i32_0 = arith.constant 0 : i32
    %c0_i32_1 = arith.constant 0 : i32
    return %c0_i32, %c0_i32_0 : i32, i32
  }
  func.func @transform_17(%arg0: i32) -> (i32, i32) {
    %c0_i32 = arith.constant 0 : i32
    %c0_i32_0 = arith.constant 0 : i32
    %c0_i32_1 = arith.constant 0 : i32
    return %c0_i32, %c0_i32_0 : i32, i32
  }
  func.func @transform_18(%arg0: i32) -> (i32, i32) {
    %c0_i32 = arith.constant 0 : i32
    %c0_i32_0 = arith.constant 0 : i32
    %c0_i32_1 = arith.constant 0 : i32
    return %c0_i32, %c0_i32_0 : i32, i32
  }
  func.func @transform_19(%arg0: i32) -> (i32, i32) {
    %c0_i32 = arith.constant 0 : i32
    %c0_i32_0 = arith.constant 0 : i32
    %c0_i32_1 = arith.constant 0 : i32
    return %c0_i32, %c0_i32_0 : i32, i32
  }
  func.func @transform_20(%arg0: i32) -> (i32, i32) {
    %c0_i32 = arith.constant 0 : i32
    %c0_i32_0 = arith.constant 0 : i32
    %c0_i32_1 = arith.constant 0 : i32
    return %c0_i32, %c0_i32_0 : i32, i32
  }
  func.func @transform_21(%arg0: i32) -> (i32, i32) {
    %c0_i32 = arith.constant 0 : i32
    %c0_i32_0 = arith.constant 0 : i32
    %c0_i32_1 = arith.constant 0 : i32
    return %c0_i32, %c0_i32_0 : i32, i32
  }
  func.func @transform_22(%arg0: i32) -> (i32, i32) {
    %c0_i32 = arith.constant 0 : i32
    %c0_i32_0 = arith.constant 0 : i32
    %c0_i32_1 = arith.constant 0 : i32
    return %c0_i32, %c0_i32_0 : i32, i32
  }
  func.func @transform_23(%arg0: i32) -> (i32, i32) {
    %c0_i32 = arith.constant 0 : i32
    %c0_i32_0 = arith.constant 0 : i32
    %c0_i32_1 = arith.constant 0 : i32
    return %c0_i32, %c0_i32_0 : i32, i32
  }
  func.func @transform_24(%arg0: i32) -> (i32, i32) {
    %c0_i32 = arith.constant 0 : i32
    %c0_i32_0 = arith.constant 0 : i32
    %c0_i32_1 = arith.constant 0 : i32
    return %c0_i32, %c0_i32_0 : i32, i32
  }
  func.func @transform_25(%arg0: i32) -> (i32, i32) {
    %c0_i32 = arith.constant 0 : i32
    %c0_i32_0 = arith.constant 0 : i32
    %c0_i32_1 = arith.constant 0 : i32
    return %c0_i32, %c0_i32_0 : i32, i32
  }
  func.func @transform_26(%arg0: i32) -> (i32, i32) {
    %c0_i32 = arith.constant 0 : i32
    %c0_i32_0 = arith.constant 0 : i32
    %c0_i32_1 = arith.constant 0 : i32
    return %c0_i32, %c0_i32_0 : i32, i32
  }
  func.func @transform_27(%arg0: i32) -> (i32, i32) {
    %c0_i32 = arith.constant 0 : i32
    %c0_i32_0 = arith.constant 0 : i32
    %c0_i32_1 = arith.constant 0 : i32
    return %c0_i32, %c0_i32_0 : i32, i32
  }
  func.func @transform_28(%arg0: i32) -> (i32, i32) {
    %c0_i32 = arith.constant 0 : i32
    %c0_i32_0 = arith.constant 0 : i32
    %c0_i32_1 = arith.constant 0 : i32
    return %c0_i32, %c0_i32_0 : i32, i32
  }
  func.func @transform_29(%arg0: i32) -> (i32, i32) {
    %c0_i32 = arith.constant 0 : i32
    %c0_i32_0 = arith.constant 0 : i32
    %c0_i32_1 = arith.constant 0 : i32
    return %c0_i32, %c0_i32_0 : i32, i32
  }
  func.func @transform_30(%arg0: i32) -> (i32, i32) {
    %c0_i32 = arith.constant 0 : i32
    %c0_i32_0 = arith.constant 0 : i32
    %c0_i32_1 = arith.constant 0 : i32
    return %c0_i32, %c0_i32_0 : i32, i32
  }
  func.func @transform_31(%arg0: i32) -> (i32, i32) {
    %c0_i32 = arith.constant 0 : i32
    %c0_i32_0 = arith.constant 0 : i32
    %c0_i32_1 = arith.constant 0 : i32
    return %c0_i32, %c0_i32_0 : i32, i32
  }
  func.func @transform_32(%arg0: i32) -> (i32, i32) {
    %c0_i32 = arith.constant 0 : i32
    %c0_i32_0 = arith.constant 0 : i32
    %c0_i32_1 = arith.constant 0 : i32
    return %c0_i32, %c0_i32_0 : i32, i32
  }
  func.func @transform_33(%arg0: i32) -> (i32, i32) {
    %c0_i32 = arith.constant 0 : i32
    %c0_i32_0 = arith.constant 0 : i32
    %c0_i32_1 = arith.constant 0 : i32
    return %c0_i32, %c0_i32_0 : i32, i32
  }
  func.func @transform_34(%arg0: i32) -> (i32, i32) {
    %c0_i32 = arith.constant 0 : i32
    %c0_i32_0 = arith.constant 0 : i32
    %c0_i32_1 = arith.constant 0 : i32
    return %c0_i32, %c0_i32_0 : i32, i32
  }
  func.func @transform_35(%arg0: i32) -> (i32, i32) {
    %c0_i32 = arith.constant 0 : i32
    %c0_i32_0 = arith.constant 0 : i32
    %c0_i32_1 = arith.constant 0 : i32
    return %c0_i32, %c0_i32_0 : i32, i32
  }
  func.func @transform_36(%arg0: i32) -> (i32, i32) {
    %c0_i32 = arith.constant 0 : i32
    %c0_i32_0 = arith.constant 0 : i32
    %c0_i32_1 = arith.constant 0 : i32
    return %c0_i32, %c0_i32_0 : i32, i32
  }
  func.func @transform_37(%arg0: i32) -> (i32, i32) {
    %c0_i32 = arith.constant 0 : i32
    %c0_i32_0 = arith.constant 0 : i32
    %c0_i32_1 = arith.constant 0 : i32
    return %c0_i32, %c0_i32_0 : i32, i32
  }
}

</mosaic_0001>

<bundles_post_ra>
// kernel: ram1d_forward.1
= control target key start
LH: loop header
LB: loop body
LE: loop exit
PB: predicated region body
PF: predicated region fallthrough
CT: control target
= control target key end

     0   :  { %s14804_s6 = smov 1   ;;  %s14805_s10 = smov 2   ;;  %s15958_s0 = inlined_call_operand.smem [shape: u32[38], index: -1, kind: input, shape index: {}] }
   0x1   :  { %s14890_s5 = sld [smem:[%s15958_s0]]   ;;  %s14806_s14 = smov 3  }
   0x2   :  { %s14895_s9 = sld [smem:[%s15958_s0 + %s14804_s6]]   ;;  %s14807_s18 = smov 4  }
   0x3   :  { %s14900_s13 = sld [smem:[%s15958_s0 + %s14805_s10]]   ;;  %s14808_s22 = smov 5  }
   0x4   :  { %s14905_s17 = sld [smem:[%s15958_s0 + %s14806_s14]]   ;;  %s14809_s26 = smov 6  }
   0x5   :  { %s14910_s21 = sld [smem:[%s15958_s0 + %s14807_s18]]   ;;  %s14810_s30 = smov 7  }
   0x6   :  { %s14915_s25 = sld [smem:[%s15958_s0 + %s14808_s22]]   ;;  %s14811_s4 = smov 8  }
   0x7   :  { %15979 = sst [smem:[#allocation72_spill]] %s14890_s5  ;;  %s14812_s10 = smov 9  }
   0x8   :  { %15980 = sst [smem:[#allocation73_spill]] %s14895_s9  ;;  %s14813_s15 = smov 10  }
   0x9   :  { %s14920_s29 = sld [smem:[%s15958_s0 + %s14809_s26]]   ;;  %s14814_s20 = smov 11  }
   0xa   :  { %15981 = sst [smem:[#allocation74_spill]] %s14905_s17  ;;  %s14815_s26 = smov 12  }
   0xb   :  { %s14925_s3 = sld [smem:[%s15958_s0 + %s14810_s30]]   ;;  %s14816_s1 = smov 13  }
   0xc   :  { %15982 = sst [smem:[#allocation75_spill]] %s14915_s25  ;;  %s14817_s7 = smov 14  }
   0xd   :  { %s14930_s8 = sld [smem:[%s15958_s0 + %s14811_s4]]   ;;  %s14819_s22 = smov 16  }
   0xe   :  { %s14935_s14 = sld [smem:[%s15958_s0 + %s14812_s10]]   ;;  %s14820_s28 = smov 17  }
   0xf   :  { %15983 = sst [smem:[#allocation76_spill]] %s14920_s29 }
  0x10   :  { %s14940_s19 = sld [smem:[%s15958_s0 + %s14813_s15]]   ;;  %s14818_s15 = smov 15  }
  0x11   :  { %15984 = sst [smem:[#allocation77_spill]] %s14925_s3 }
  0x12   :  { %s14945_s24 = sld [smem:[%s15958_s0 + %s14814_s20]]  }
  0x13   :  { %s14950_s30 = sld [smem:[%s15958_s0 + %s14815_s26]]  }
  0x14   :  { %15985 = sst [smem:[#allocation78_spill]] %s14935_s14 }
  0x15   :  { %s14955_s6 = sld [smem:[%s15958_s0 + %s14816_s1]]  }
  0x16   :  { %s14960_s12 = sld [smem:[%s15958_s0 + %s14817_s7]]   ;;  %s14821_s7 = smov 18  }
  0x17   :  { %s14965_s20 = sld [smem:[%s15958_s0 + %s14818_s15]]   ;;  %s14822_s15 = smov 19  }
  0x18   :  { %15986 = sst [smem:[#allocation79_spill]] %s14945_s24 }
  0x19   :  { %s14970_s27 = sld [smem:[%s15958_s0 + %s14819_s22]]   ;;  %s14823_s22 = smov 20  }
  0x1a   :  { %s14975_s4 = sld [smem:[%s15958_s0 + %s14820_s28]]   ;;  %s14824_s28 = smov 21  }
  0x1b   :  { %15987 = sst [smem:[#allocation80_spill]] %s14955_s6 }
  0x1c   :  { %s14980_s3 = sld [smem:[%s15958_s0 + %s14821_s7]]   ;;  %s14825_s7 = smov 22  }
  0x1d   :  { %15988 = sst [smem:[#allocation81_spill]] %s14965_s20 }
  0x1e   :  { %s14985_s25 = sld [smem:[%s15958_s0 + %s14822_s15]]   ;;  %s14826_s15 = smov 23  }
  0x1f   :  { %s14990_s5 = sld [smem:[%s15958_s0 + %s14823_s22]]   ;;  %s14827_s22 = smov 24  }
  0x20   :  { %15989 = sst [smem:[#allocation82_spill]] %s14975_s4 }
  0x21   :  { %s14995_s4 = sld [smem:[%s15958_s0 + %s14824_s28]]   ;;  %s14828_s28 = smov 25  }
  0x22   :  { %s15000_s20 = sld [smem:[%s15958_s0 + %s14825_s7]]   ;;  %s14829_s7 = smov 26  }
  0x23   :  { %s15010_s6 = sld [smem:[%s15958_s0 + %s14827_s22]]   ;;  %s14831_s22 = smov 28  }
  0x24   :  { %15990 = sst [smem:[#allocation83_spill]] %s14985_s25 }
  0x25   :  { %s15005_s25 = sld [smem:[%s15958_s0 + %s14826_s15]]   ;;  %s14830_s15 = smov 27  }
  0x26   :  { %s15020_s24 = sld [smem:[%s15958_s0 + %s14829_s7]]   ;;  %s14833_s7 = smov 30  }
  0x27   :  { %15991 = sst [smem:[#allocation84_spill]] %s14995_s4 }
  0x28   :  { %s15015_s4 = sld [smem:[%s15958_s0 + %s14828_s28]]   ;;  %s14832_s28 = smov 29  }
  0x29   :  { %s15030_s14 = sld [smem:[%s15958_s0 + %s14831_s22]]   ;;  %s14835_s22 = smov 32  }
  0x2a   :  { %s15040_s29 = sld [smem:[%s15958_s0 + %s14833_s7]]   ;;  %s14837_s7 = smov 34  }
  0x2b   :  { %15992 = sst [smem:[#allocation85_spill]] %s15005_s25 }
  0x2c   :  { %s15025_s25 = sld [smem:[%s15958_s0 + %s14830_s15]]   ;;  %s14834_s15 = smov 31  }
  0x2d   :  { %s15050_s17 = sld [smem:[%s15958_s0 + %s14835_s22]]   ;;  %s14839_s22 = smov 36  }
  0x2e   :  { %15993 = sst [smem:[#allocation86_spill]] %s15015_s4 }
  0x2f   :  { %s15035_s4 = sld [smem:[%s15958_s0 + %s14832_s28]]   ;;  %s14836_s28 = smov 33  }
  0x30   :  { %s15060_s9 = sld [smem:[%s15958_s0 + %s14837_s7]]  }
  0x32   :  { %15994 = sst [smem:[#allocation87_spill]] %s15025_s25 }
  0x33   :  { %s15045_s25 = sld [smem:[%s15958_s0 + %s14834_s15]]   ;;  %s14838_s15 = smov 35  }
  0x34   :  { %15997 = sst [smem:[#allocation90_spill]] %s15050_s17 }
  0x35   :  { %15995 = sst [smem:[#allocation88_spill]] %s15035_s4 }
  0x36   :  { %s15055_s4 = sld [smem:[%s15958_s0 + %s14836_s28]]   ;;  %s14840_s28 = smov 37  }
  0x37   :  { %s15070_s17 = sld [smem:[%s15958_s0 + %s14839_s22]]  }
  0x39   :  { %15996 = sst [smem:[#allocation89_spill]] %s15045_s25 }
  0x3a   :  { %s15065_s25 = sld [smem:[%s15958_s0 + %s14838_s15]]  }
  0x3c   :  { %15998 = sst [smem:[#allocation91_spill]] %s15055_s4 }
  0x3d   :  { %s15075_s4 = sld [smem:[%s15958_s0 + %s14840_s28]]  }
  0x3e   :  { %80 = vsyncpa [#allocation3], 0 }
  0x3f   :  { %81 = vsyncpa [#allocation6], 0 }
  0x40   :  { %82 = vsyncpa [#allocation9], 0 }
  0x41   :  { %83 = vsyncpa [#allocation12], 0 }
  0x42   :  { %84 = vsyncpa [#allocation15], 0 }
  0x43   :  { %85 = vsyncpa [#allocation18], 0 }
  0x44   :  { %86 = vsyncpa [#allocation21], 0 }
  0x45   :  { %87 = vsyncpa [#allocation24], 0 }
  0x46   :  { %88 = vsyncpa [#allocation27], 0 }
  0x47   :  { %89 = vsyncpa [#allocation30], 0 }
  0x48   :  { %90 = vsyncpa [#allocation33], 0 }
  0x49   :  { %91 = vsyncpa [#allocation36], 0 }
  0x4a   :  { %92 = vsyncpa [#allocation39], 0 }
  0x4b   :  { %93 = vsyncpa [#allocation42], 0 }
  0x4c   :  { %94 = vsyncpa [#allocation45], 0 }
  0x4d   :  { %95 = vsyncpa [#allocation48], 0 }
  0x4e   :  { %96 = vsyncpa [#allocation51], 0  ;;  %s118_s0 = sshll.u32 %s14900_s13, 4  ;;  %s119_s0 = int_to_ptr.hbm [resolvable:$true] %s118_s0 }
  0x4f   :  { %97 = vsyncpa [#allocation4], 0  ;;  %s14841_s7 = smov [#allocation5]   ;;  %s13952_s11 = sshra.s32 %s119_s0, 4  ;;  %s13953_s11 = int_to_ptr.hbm [resolvable:$true] %s13952_s11 }
  0x50   :  { %s120_s10 = sshll.u32 %s14841_s7, 4  ;;  %s13954_s15 = scalar_lea.hbm %s13953_s11, 1  ;;  %s121_s10 = int_to_ptr.vmem [resolvable:$true] %s120_s10 }
  0x51   :  { %p13955_p0 = scmp.ne.s32.totalorder %s13953_s11, %s13954_s15  ;;  %s13956_s16 = scalar_lea.hbm %s14900_s13, 1 }
  0x52   :  { %p13957_p1 = scmp.lt.s32.totalorder %s13953_s11, %s14900_s13  ;;  %p13958_p2 = scmp.lt.s32.totalorder %s13956_s16, %s13954_s15 }
  0x54   :  { %p13959_p3 = por %p13958_p2, %p13957_p1 }
  0x56   :  { %p13960_p4 = pnand %p13959_p3, %p13955_p0 }
  0x58   :  { %13963 = shalt.err (!%p13960_p4)
}
  0x59   :  { %123 = dma.hbm_to_vmem [thread:$0]  %s119_s0, 16, %s121_s10, [#allocation6]  }
  0x5a   :  { %s141_s18 = sshll.u32 %s14910_s21, 4  ;;  %s14842_s22 = smov [#allocation8]   ;;  %s142_s18 = int_to_ptr.hbm [resolvable:$true] %s141_s18 }
  0x5b   :  { %s143_s23 = sshll.u32 %s14842_s22, 4  ;;  %s170_s26 = sshll.u32 %s14930_s8, 4  ;;  %s144_s23 = int_to_ptr.vmem [resolvable:$true] %s143_s23  ;;  %s171_s26 = int_to_ptr.hbm [resolvable:$true] %s170_s26 }
  0x5c   :  { %s13976_s28 = sshra.s32 %s142_s18, 4  ;;  %s13980_s13 = scalar_lea.hbm %s14910_s21, 40  ;;  %s13977_s28 = int_to_ptr.hbm [resolvable:$true] %s13976_s28 }
  0x5d   :  { %s13978_s1 = scalar_lea.hbm %s13977_s28, 40  ;;  %p13981_p6 = scmp.lt.s32.totalorder %s13977_s28, %s14910_s21 }
  0x5e   :  { %p13979_p5 = scmp.ne.s32.totalorder %s13977_s28, %s13978_s1  ;;  %p13982_p7 = scmp.lt.s32.totalorder %s13980_s13, %s13978_s1 }
  0x60   :  { %p13983_p8 = por %p13982_p7, %p13981_p6 }
  0x62   :  { %p13984_p9 = pnand %p13983_p8, %p13979_p5 }
  0x64   :  { %13987 = shalt.err (!%p13984_p9)
}
  0x65   :  { %s14843_s2 = smov 128   ;;  %s14844_s0 = smov 8  }
  0x66   :  { %149 = dma.hbm_to_vmem [thread:$0]  %s142_s18, 640, %s144_s23, [#allocation9], %s14843_s2, %s14843_s2, %s14844_s0  }
  0x67   :  { %s14845_s7 = smov [#allocation11]   ;;  %s193_s11 = sshll.u32 %s14940_s19, 4  ;;  %s194_s11 = int_to_ptr.hbm [resolvable:$true] %s193_s11 }
  0x68   :  { %s172_s10 = sshll.u32 %s14845_s7, 4  ;;  %s14000_s15 = sshra.s32 %s171_s26, 4  ;;  %s173_s10 = int_to_ptr.vmem [resolvable:$true] %s172_s10  ;;  %s14001_s15 = int_to_ptr.hbm [resolvable:$true] %s14000_s15 }
  0x69   :  { %s14002_s21 = scalar_lea.hbm %s14001_s15, 1  ;;  %s14004_s16 = scalar_lea.hbm %s14930_s8, 1 }
  0x6a   :  { %p14003_p10 = scmp.ne.s32.totalorder %s14001_s15, %s14002_s21  ;;  %p14005_p11 = scmp.lt.s32.totalorder %s14001_s15, %s14930_s8 }
  0x6b   :  { %p14006_p12 = scmp.lt.s32.totalorder %s14004_s16, %s14002_s21 }
  0x6d   :  { %p14007_p13 = por %p14006_p12, %p14005_p11 }
  0x6f   :  { %p14008_p0 = pnand %p14007_p13, %p14003_p10 }
  0x71   :  { %14011 = shalt.err (!%p14008_p0)
}
  0x72   :  { %175 = dma.hbm_to_vmem [thread:$0]  %s171_s26, 16, %s173_s10, [#allocation12]  }
  0x73   :  { %s14846_s18 = smov [#allocation14]   ;;  %s217_s23 = sshll.u32 %s14950_s30, 4  ;;  %s15091_s23 = int_to_ptr.hbm [resolvable:$true] %s217_s23 }
  0x74   :  { %s195_s22 = sshll.u32 %s14846_s18, 4  ;;  %s14024_s28 = sshra.s32 %s194_s11, 4  ;;  %s196_s22 = int_to_ptr.vmem [resolvable:$true] %s195_s22  ;;  %s14025_s28 = int_to_ptr.hbm [resolvable:$true] %s14024_s28 }
  0x75   :  { %s14026_s1 = scalar_lea.hbm %s14025_s28, 96  ;;  %s14028_s8 = scalar_lea.hbm %s14940_s19, 96 }
  0x76   :  { %p14027_p1 = scmp.ne.s32.totalorder %s14025_s28, %s14026_s1  ;;  %p14029_p2 = scmp.lt.s32.totalorder %s14025_s28, %s14940_s19 }
  0x77   :  { %p14030_p3 = scmp.lt.s32.totalorder %s14028_s8, %s14026_s1 }
  0x79   :  { %p14031_p4 = por %p14030_p3, %p14029_p2 }
  0x7b   :  { %p14032_p5 = pnand %p14031_p4, %p14027_p1 }
  0x7d   :  { %14035 = shalt.err (!%p14032_p5)
}
  0x7e   :  { %s14847_s26 = smov 64   ;;  %s14848_s13 = smov 4  }
  0x7f   :  { %201 = dma.hbm_to_vmem [thread:$0]  %s194_s11, 1536, %s196_s22, [#allocation15], %s14847_s26, %s14847_s26, %s14848_s13  }
  0x80   :  { %s241_s7 = sshll.u32 %s14960_s12, 4  ;;  %s14849_s10 = smov [#allocation17]   ;;  %s15099_s7 = int_to_ptr.hbm [resolvable:$true] %s241_s7 }
  0x81   :  { %s219_s15 = sshll.u32 %s14849_s10, 4  ;;  %s14048_s19 = sshra.s32 %s15091_s23, 4  ;;  %s220_s15 = int_to_ptr.vmem [resolvable:$true] %s219_s15  ;;  %s14049_s19 = int_to_ptr.hbm [resolvable:$true] %s14048_s19 }
  0x82   :  { %s14050_s21 = scalar_lea.hbm %s14049_s19, 192  ;;  %s14052_s16 = scalar_lea.hbm %s14950_s30, 192 }
  0x83   :  { %p14051_p6 = scmp.ne.s32.totalorder %s14049_s19, %s14050_s21  ;;  %p14053_p7 = scmp.lt.s32.totalorder %s14049_s19, %s14950_s30 }
  0x84   :  { %p14054_p8 = scmp.lt.s32.totalorder %s14052_s16, %s14050_s21 }
  0x86   :  { %p14055_p9 = por %p14054_p8, %p14053_p7 }
  0x88   :  { %p14056_p10 = pnand %p14055_p9, %p14051_p6 }
  0x8a   :  { %14059 = shalt.err (!%p14056_p10)
}
  0x8b   :  { %225 = dma.hbm_to_vmem [thread:$0]  %s15091_s23, 3072, %s220_s15, [#allocation18], %s14847_s26, %s14847_s26, %s14848_s13  }
  0x8c   :  { %s14850_s11 = smov [#allocation20]   ;;  %s265_s22 = sshll.u32 %s14970_s27, 4  ;;  %s15109_s22 = int_to_ptr.hbm [resolvable:$true] %s265_s22 }
  0x8d   :  { %s243_s18 = sshll.u32 %s14850_s11, 4  ;;  %s14072_s30 = sshra.s32 %s15099_s7, 4  ;;  %s244_s18 = int_to_ptr.vmem [resolvable:$true] %s243_s18  ;;  %s14073_s30 = int_to_ptr.hbm [resolvable:$true] %s14072_s30 }
  0x8e   :  { %s14074_s28 = scalar_lea.hbm %s14073_s30, 32  ;;  %s14076_s1 = scalar_lea.hbm %s14960_s12, 32 }
  0x8f   :  { %p14075_p11 = scmp.ne.s32.totalorder %s14073_s30, %s14074_s28  ;;  %p14077_p12 = scmp.lt.s32.totalorder %s14073_s30, %s14960_s12 }
  0x90   :  { %p14078_p13 = scmp.lt.s32.totalorder %s14076_s1, %s14074_s28 }
  0x92   :  { %p14079_p0 = por %p14078_p13, %p14077_p12 }
  0x94   :  { %p14080_p1 = pnand %p14079_p0, %p14075_p11 }
  0x96   :  { %14083 = shalt.err (!%p14080_p1)
}
  0x97   :  { %249 = dma.hbm_to_vmem [thread:$0]  %s15099_s7, 512, %s244_s18, [#allocation21], %s14847_s26, %s14847_s26, %s14848_s13  }
  0x98   :  { %s291_s23 = sshll.u32 %s14980_s3, 4  ;;  %s14851_s8 = smov [#allocation23]   ;;  %s15119_s23 = int_to_ptr.hbm [resolvable:$true] %s291_s23 }
  0x99   :  { %s267_s10 = sshll.u32 %s14851_s8, 4  ;;  %s14096_s12 = sshra.s32 %s15109_s22, 4  ;;  %s268_s10 = int_to_ptr.vmem [resolvable:$true] %s267_s10  ;;  %s14097_s12 = int_to_ptr.hbm [resolvable:$true] %s14096_s12 }
  0x9a   :  { %s14098_s15 = scalar_lea.hbm %s14097_s12, 24  ;;  %s14100_s19 = scalar_lea.hbm %s14970_s27, 24 }
  0x9b   :  { %p14099_p2 = scmp.ne.s32.totalorder %s14097_s12, %s14098_s15  ;;  %p14101_p3 = scmp.lt.s32.totalorder %s14097_s12, %s14970_s27 }
  0x9c   :  { %p14102_p4 = scmp.lt.s32.totalorder %s14100_s19, %s14098_s15 }
  0x9e   :  { %p14103_p5 = por %p14102_p4, %p14101_p3 }
  0xa0   :  { %p14104_p6 = pnand %p14103_p5, %p14099_p2 }
  0xa2   :  { %14107 = shalt.err (!%p14104_p6)
}
  0xa3   :  { %273 = dma.hbm_to_vmem [thread:$0]  %s15109_s22, 384, %s268_s10, [#allocation24], %s14843_s2, %s14843_s2, %s14844_s0  }
  0xa4   :  { %s14852_s7 = smov [#allocation26]   ;;  %s315_s16 = sshll.u32 %s14990_s5, 4  ;;  %s15129_s16 = int_to_ptr.hbm [resolvable:$true] %s315_s16 }
  0xa5   :  { %s293_s21 = sshll.u32 %s14852_s7, 4  ;;  %s14120_s27 = sshra.s32 %s15119_s23, 4  ;;  %s294_s21 = int_to_ptr.vmem [resolvable:$true] %s293_s21  ;;  %s14121_s27 = int_to_ptr.hbm [resolvable:$true] %s14120_s27 }
  0xa6   :  { %s14122_s11 = scalar_lea.hbm %s14121_s27, 384  ;;  %s14124_s18 = scalar_lea.hbm %s14980_s3, 384 }
  0xa7   :  { %p14123_p7 = scmp.ne.s32.totalorder %s14121_s27, %s14122_s11  ;;  %p14125_p8 = scmp.lt.s32.totalorder %s14121_s27, %s14980_s3 }
  0xa8   :  { %p14126_p9 = scmp.lt.s32.totalorder %s14124_s18, %s14122_s11 }
  0xaa   :  { %p14127_p10 = por %p14126_p9, %p14125_p8 }
  0xac   :  { %p14128_p11 = pnand %p14127_p10, %p14123_p7 }
  0xae   :  { %14131 = shalt.err (!%p14128_p11)
}
  0xaf   :  { %299 = dma.hbm_to_vmem [thread:$0]  %s15119_s23, 6144, %s294_s21, [#allocation27], %s14843_s2, %s14843_s2, %s14844_s0  }
  0xb0   :  { %s339_s22 = sshll.u32 %s15000_s20, 4  ;;  %s14853_s30 = smov [#allocation29]   ;;  %s15139_s22 = int_to_ptr.hbm [resolvable:$true] %s339_s22 }
  0xb1   :  { %s317_s28 = sshll.u32 %s14853_s30, 4  ;;  %s14144_s3 = sshra.s32 %s15129_s16, 4  ;;  %s318_s28 = int_to_ptr.vmem [resolvable:$true] %s317_s28  ;;  %s14145_s3 = int_to_ptr.hbm [resolvable:$true] %s14144_s3 }
  0xb2   :  { %s14146_s1 = scalar_lea.hbm %s14145_s3, 768  ;;  %s14148_s8 = scalar_lea.hbm %s14990_s5, 768 }
  0xb3   :  { %p14147_p12 = scmp.ne.s32.totalorder %s14145_s3, %s14146_s1  ;;  %p14149_p13 = scmp.lt.s32.totalorder %s14145_s3, %s14990_s5 }
  0xb4   :  { %p14150_p0 = scmp.lt.s32.totalorder %s14148_s8, %s14146_s1 }
  0xb6   :  { %p14151_p1 = por %p14150_p0, %p14149_p13 }
  0xb8   :  { %p14152_p2 = pnand %p14151_p1, %p14147_p12 }
  0xba   :  { %14155 = shalt.err (!%p14152_p2)
}
  0xbb   :  { %323 = dma.hbm_to_vmem [thread:$0]  %s15129_s16, 12288, %s318_s28, [#allocation30], %s14843_s2, %s14843_s2, %s14844_s0  }
  0xbc   :  { %s14854_s23 = smov [#allocation32]   ;;  %s363_s12 = sshll.u32 %s15010_s6, 4  ;;  %s15149_s12 = int_to_ptr.hbm [resolvable:$true] %s363_s12 }
  0xbd   :  { %s341_s10 = sshll.u32 %s14854_s23, 4  ;;  %s14168_s5 = sshra.s32 %s15139_s22, 4  ;;  %s342_s10 = int_to_ptr.vmem [resolvable:$true] %s341_s10  ;;  %s14169_s5 = int_to_ptr.hbm [resolvable:$true] %s14168_s5 }
  0xbe   :  { %s14170_s15 = scalar_lea.hbm %s14169_s5, 128  ;;  %s14172_s19 = scalar_lea.hbm %s15000_s20, 128 }
  0xbf   :  { %p14171_p3 = scmp.ne.s32.totalorder %s14169_s5, %s14170_s15  ;;  %p14173_p4 = scmp.lt.s32.totalorder %s14169_s5, %s15000_s20 }
  0xc0   :  { %p14174_p5 = scmp.lt.s32.totalorder %s14172_s19, %s14170_s15 }
  0xc2   :  { %p14175_p6 = por %p14174_p5, %p14173_p4 }
  0xc4   :  { %p14176_p7 = pnand %p14175_p6, %p14171_p3 }
  0xc6   :  { %14179 = shalt.err (!%p14176_p7)
}
  0xc7   :  { %347 = dma.hbm_to_vmem [thread:$0]  %s15139_s22, 2048, %s342_s10, [#allocation33], %s14843_s2, %s14843_s2, %s14844_s0  }
  0xc8   :  { %s389_s7 = sshll.u32 %s15020_s24, 4  ;;  %s14855_s21 = smov [#allocation35]   ;;  %s15159_s7 = int_to_ptr.hbm [resolvable:$true] %s389_s7 }
  0xc9   :  { %s365_s16 = sshll.u32 %s14855_s21, 4  ;;  %s14192_s20 = sshra.s32 %s15149_s12, 4  ;;  %s366_s16 = int_to_ptr.vmem [resolvable:$true] %s365_s16  ;;  %s14193_s20 = int_to_ptr.hbm [resolvable:$true] %s14192_s20 }
  0xca   :  { %s14194_s27 = scalar_lea.hbm %s14193_s20, 16  ;;  %s14196_s11 = scalar_lea.hbm %s15010_s6, 16 }
  0xcb   :  { %p14195_p8 = scmp.ne.s32.totalorder %s14193_s20, %s14194_s27  ;;  %p14197_p9 = scmp.lt.s32.totalorder %s14193_s20, %s15010_s6 }
  0xcc   :  { %p14198_p10 = scmp.lt.s32.totalorder %s14196_s11, %s14194_s27 }
  0xce   :  { %p14199_p11 = por %p14198_p10, %p14197_p9 }
  0xd0   :  { %p14200_p12 = pnand %p14199_p11, %p14195_p8 }
  0xd2   :  { %14203 = shalt.err (!%p14200_p12)
}
  0xd3   :  { %371 = dma.hbm_to_vmem [thread:$0]  %s15149_s12, 256, %s366_s16, [#allocation36], %s14843_s2, %s14843_s2, %s14844_s0  }
  0xd4   :  { %s14856_s18 = smov [#allocation38]   ;;  %s14216_s30 = sshra.s32 %s15159_s7, 4  ;;  %s14217_s30 = int_to_ptr.hbm [resolvable:$true] %s14216_s30 }
  0xd5   :  { %s391_s22 = sshll.u32 %s14856_s18, 4  ;;  %s14218_s28 = scalar_lea.hbm %s14217_s30, 1536  ;;  %s392_s22 = int_to_ptr.vmem [resolvable:$true] %s391_s22 }
  0xd6   :  { %p14219_p13 = scmp.ne.s32.totalorder %s14217_s30, %s14218_s28  ;;  %s14220_s6 = scalar_lea.hbm %s15020_s24, 1536 }
  0xd7   :  { %p14221_p0 = scmp.lt.s32.totalorder %s14217_s30, %s15020_s24  ;;  %p14222_p1 = scmp.lt.s32.totalorder %s14220_s6, %s14218_s28 }
  0xd9   :  { %p14223_p2 = por %p14222_p1, %p14221_p0 }
  0xdb   :  { %p14224_p3 = pnand %p14223_p2, %p14219_p13 }
  0xdd   :  { %14227 = shalt.err (!%p14224_p3)
}
  0xde   :  { %s14857_s3 = smov 256   ;;  %s14858_s1 = smov 16  }
  0xdf   :  { %397 = dma.hbm_to_vmem [thread:$0]  %s15159_s7, 24576, %s392_s22, [#allocation39], %s14857_s3, %s14857_s3, %s14858_s1  }
  0xe0   :  { %s413_s8 = sshll.u32 %s15030_s14, 4  ;;  %s14859_s23 = smov [#allocation41]   ;;  %s414_s8 = int_to_ptr.hbm [resolvable:$true] %s413_s8 }
  0xe1   :  { %s415_s10 = sshll.u32 %s14859_s23, 4  ;;  %s437_s24 = sshll.u32 %s15040_s29, 4  ;;  %s416_s10 = int_to_ptr.vmem [resolvable:$true] %s415_s10  ;;  %s438_s24 = int_to_ptr.hbm [resolvable:$true] %s437_s24 }
  0xe2   :  { %s14240_s12 = sshra.s32 %s414_s8, 4  ;;  %s14244_s15 = scalar_lea.hbm %s15030_s14, 3072  ;;  %s14241_s12 = int_to_ptr.hbm [resolvable:$true] %s14240_s12 }
  0xe3   :  { %s14242_s5 = scalar_lea.hbm %s14241_s12, 3072  ;;  %p14245_p5 = scmp.lt.s32.totalorder %s14241_s12, %s15030_s14 }
  0xe4   :  { %p14243_p4 = scmp.ne.s32.totalorder %s14241_s12, %s14242_s5  ;;  %p14246_p6 = scmp.lt.s32.totalorder %s14244_s15, %s14242_s5 }
  0xe6   :  { %p14247_p7 = por %p14246_p6, %p14245_p5 }
  0xe8   :  { %p14248_p8 = pnand %p14247_p7, %p14243_p4 }
  0xea   :  { %14251 = shalt.err (!%p14248_p8)
}
  0xeb   :  { %s15999_s19 = sld [smem:[#allocation90_spill]]  ;;  %s14860_s7 = smov [#allocation44]  }
  0xec   :  { %421 = dma.hbm_to_vmem [thread:$0]  %s414_s8, 49152, %s416_s10, [#allocation42], %s14857_s3, %s14857_s3, %s14858_s1  }
  0xed   :  { %s439_s21 = sshll.u32 %s14860_s7, 4  ;;  %s14264_s20 = sshra.s32 %s438_s24, 4  ;;  %s440_s21 = int_to_ptr.vmem [resolvable:$true] %s439_s21  ;;  %s14265_s20 = int_to_ptr.hbm [resolvable:$true] %s14264_s20 }
  0xee   :  { %s14266_s14 = scalar_lea.hbm %s14265_s20, 512  ;;  %s14268_s27 = scalar_lea.hbm %s15040_s29, 512 }
  0xef   :  { %p14267_p9 = scmp.ne.s32.totalorder %s14265_s20, %s14266_s14  ;;  %p14269_p10 = scmp.lt.s32.totalorder %s14265_s20, %s15040_s29 }
  0xf0   :  { %p14270_p11 = scmp.lt.s32.totalorder %s14268_s27, %s14266_s14 }
  0xf1   :  { %s462_s16 = sshll.u32 %s15999_s19, 4  ;;  %s463_s16 = int_to_ptr.hbm [resolvable:$true] %s462_s16 }
  0xf2   :  { %p14271_p12 = por %p14270_p11, %p14269_p10 }
  0xf4   :  { %p14272_p13 = pnand %p14271_p12, %p14267_p9 }
  0xf6   :  { %14275 = shalt.err (!%p14272_p13)
}
  0xf7   :  { %445 = dma.hbm_to_vmem [thread:$0]  %s438_s24, 8192, %s440_s21, [#allocation45], %s14857_s3, %s14857_s3, %s14858_s1  }
  0xf8   :  { %s484_s11 = sshll.u32 %s15060_s9, 4  ;;  %s14861_s18 = smov [#allocation47]   ;;  %s485_s11 = int_to_ptr.hbm [resolvable:$true] %s484_s11 }
  0xf9   :  { %s464_s22 = sshll.u32 %s14861_s18, 4  ;;  %s14288_s30 = sshra.s32 %s463_s16, 4  ;;  %s465_s22 = int_to_ptr.vmem [resolvable:$true] %s464_s22  ;;  %s14289_s30 = int_to_ptr.hbm [resolvable:$true] %s14288_s30 }
  0xfa   :  { %s14290_s28 = scalar_lea.hbm %s14289_s30, 8  ;;  %s14292_s29 = scalar_lea.hbm %s15999_s19, 8 }
  0xfb   :  { %p14291_p0 = scmp.ne.s32.totalorder %s14289_s30, %s14290_s28  ;;  %p14293_p1 = scmp.lt.s32.totalorder %s14289_s30, %s15999_s19 }
  0xfc   :  { %p14294_p2 = scmp.lt.s32.totalorder %s14292_s29, %s14290_s28 }
  0xfe   :  { %p14295_p3 = por %p14294_p2, %p14293_p1 }
 0x100   :  { %p14296_p4 = pnand %p14295_p3, %p14291_p0 }
 0x102   :  { %14299 = shalt.err (!%p14296_p4)
}
 0x103   :  { %467 = dma.hbm_to_vmem [thread:$0]  %s463_s16, 128, %s465_s22, [#allocation48]  }
 0x104   :  { %s16000_s6 = sld [smem:[#allocation73_spill]]  ;;  %s14862_s3 = smov [#allocation50]  }
 0x105   :  { %s486_s1 = sshll.u32 %s14862_s3, 4  ;;  %s14312_s23 = sshra.s32 %s485_s11, 4  ;;  %s487_s1 = int_to_ptr.vmem [resolvable:$true] %s486_s1  ;;  %s14313_s23 = int_to_ptr.hbm [resolvable:$true] %s14312_s23 }
 0x106   :  { %s14314_s10 = scalar_lea.hbm %s14313_s23, 1  ;;  %s14316_s24 = scalar_lea.hbm %s15060_s9, 1 }
 0x107   :  { %p14315_p5 = scmp.ne.s32.totalorder %s14313_s23, %s14314_s10  ;;  %p14317_p6 = scmp.lt.s32.totalorder %s14313_s23, %s15060_s9 }
 0x108   :  { %p14318_p7 = scmp.lt.s32.totalorder %s14316_s24, %s14314_s10 }
 0x10a   :  { %s104_s8 = sshll.u32 %s16000_s6, 4  ;;  %p14319_p8 = por %p14318_p7, %p14317_p6  ;;  %s15192_s8 = int_to_ptr.hbm [resolvable:$true] %s104_s8 }
 0x10c   :  { %p14320_p9 = pnand %p14319_p8, %p14315_p5 }
 0x10e   :  { %14323 = shalt.err (!%p14320_p9)
}
 0x10f   :  { %489 = dma.hbm_to_vmem [thread:$0]  %s485_s11, 16, %s487_s1, [#allocation51]  }
 0x110   :  { %s16001_s12 = sld [smem:[#allocation74_spill]]  ;;  %s14863_s15 = smov [#allocation2]  }
 0x111   :  { %s106_s19 = sshll.u32 %s14863_s15, 4  ;;  %s14336_s7 = sshra.s32 %s15192_s8, 4  ;;  %s107_s19 = int_to_ptr.vmem [resolvable:$true] %s106_s19  ;;  %s14337_s7 = int_to_ptr.hbm [resolvable:$true] %s14336_s7 }
 0x112   :  { %s14338_s21 = scalar_lea.hbm %s14337_s7, 12  ;;  %s14340_s9 = scalar_lea.hbm %s16000_s6, 12 }
 0x113   :  { %p14339_p10 = scmp.ne.s32.totalorder %s14337_s7, %s14338_s21  ;;  %p14341_p11 = scmp.lt.s32.totalorder %s14337_s7, %s16000_s6 }
 0x114   :  { %p14342_p12 = scmp.lt.s32.totalorder %s14340_s9, %s14338_s21 }
 0x116   :  { %s128_s5 = sshll.u32 %s16001_s12, 4  ;;  %p14343_p13 = por %p14342_p12, %p14341_p11  ;;  %s15197_s5 = int_to_ptr.hbm [resolvable:$true] %s128_s5 }
 0x118   :  { %p14344_p0 = pnand %p14343_p13, %p14339_p10 }
 0x11a   :  { %14347 = shalt.err (!%p14344_p0)
}
 0x11b   :  { %s16002_s16 = sld [smem:[#allocation76_spill]]  ;;  %s14864_s20 = smov [#allocation7]  }
 0x11c   :  { %112 = dma.hbm_to_vmem [thread:$0]  %s15192_s8, 192, %s107_s19, [#allocation3], %s14847_s26, %s14847_s26, %s14848_s13  }
 0x11d   :  { %s130_s14 = sshll.u32 %s14864_s20, 4  ;;  %s14360_s11 = sshra.s32 %s15197_s5, 4  ;;  %s131_s14 = int_to_ptr.vmem [resolvable:$true] %s130_s14  ;;  %s14361_s11 = int_to_ptr.hbm [resolvable:$true] %s14360_s11 }
 0x11e   :  { %s14362_s18 = scalar_lea.hbm %s14361_s11, 72  ;;  %s14364_s22 = scalar_lea.hbm %s16001_s12, 72 }
 0x11f   :  { %p14363_p1 = scmp.ne.s32.totalorder %s14361_s11, %s14362_s18  ;;  %p14365_p2 = scmp.lt.s32.totalorder %s14361_s11, %s16001_s12 }
 0x120   :  { %p14366_p3 = scmp.lt.s32.totalorder %s14364_s22, %s14362_s18 }
 0x121   :  { %s157_s27 = sshll.u32 %s16002_s16, 4  ;;  %s158_s27 = int_to_ptr.hbm [resolvable:$true] %s157_s27 }
 0x122   :  { %p14367_p4 = por %p14366_p3, %p14365_p2 }
 0x124   :  { %p14368_p5 = pnand %p14367_p4, %p14363_p1 }
 0x126   :  { %14371 = shalt.err (!%p14368_p5)
}
 0x127   :  { %s16003_s13 = sld [smem:[#allocation78_spill]]  ;;  %s14865_s28 = smov [#allocation10]  }
 0x128   :  { %136 = dma.hbm_to_vmem [thread:$0]  %s15197_s5, 1152, %s131_s14, [#allocation6], %s14843_s2, %s14843_s2, %s14844_s0  }
 0x129   :  { %s159_s29 = sshll.u32 %s14865_s28, 4  ;;  %s14384_s6 = sshra.s32 %s158_s27, 4  ;;  %s160_s29 = int_to_ptr.vmem [resolvable:$true] %s159_s29  ;;  %s14385_s6 = int_to_ptr.hbm [resolvable:$true] %s14384_s6 }
 0x12a   :  { %s14386_s3 = scalar_lea.hbm %s14385_s6, 1  ;;  %s14388_s1 = scalar_lea.hbm %s16002_s16, 1 }
 0x12b   :  { %p14387_p6 = scmp.ne.s32.totalorder %s14385_s6, %s14386_s3  ;;  %p14389_p7 = scmp.lt.s32.totalorder %s14385_s6, %s16002_s16 }
 0x12c   :  { %p14390_p8 = scmp.lt.s32.totalorder %s14388_s1, %s14386_s3 }
 0x12d   :  { %s180_s30 = sshll.u32 %s16003_s13, 4  ;;  %s15215_s30 = int_to_ptr.hbm [resolvable:$true] %s180_s30 }
 0x12e   :  { %p14391_p9 = por %p14390_p8, %p14389_p7 }
 0x130   :  { %p14392_p10 = pnand %p14391_p9, %p14387_p6 }
 0x132   :  { %14395 = shalt.err (!%p14392_p10)
}
 0x133   :  { %162 = dma.hbm_to_vmem [thread:$0]  %s158_s27, 16, %s160_s29, [#allocation9]  }
 0x134   :  { %s16004_s8 = sld [smem:[#allocation79_spill]]  ;;  %s14866_s23 = smov [#allocation13]  }
 0x135   :  { %s182_s10 = sshll.u32 %s14866_s23, 4  ;;  %s14408_s12 = sshra.s32 %s15215_s30, 4  ;;  %s183_s10 = int_to_ptr.vmem [resolvable:$true] %s182_s10  ;;  %s14409_s12 = int_to_ptr.hbm [resolvable:$true] %s14408_s12 }
 0x136   :  { %s14410_s5 = scalar_lea.hbm %s14409_s12, 40  ;;  %s14412_s15 = scalar_lea.hbm %s16003_s13, 40 }
 0x137   :  { %p14411_p11 = scmp.ne.s32.totalorder %s14409_s12, %s14410_s5  ;;  %p14413_p12 = scmp.lt.s32.totalorder %s14409_s12, %s16003_s13 }
 0x138   :  { %p14414_p13 = scmp.lt.s32.totalorder %s14412_s15, %s14410_s5 }
 0x13a   :  { %s207_s24 = sshll.u32 %s16004_s8, 4  ;;  %p14415_p0 = por %p14414_p13, %p14413_p12  ;;  %s208_s24 = int_to_ptr.hbm [resolvable:$true] %s207_s24 }
 0x13c   :  { %p14416_p1 = pnand %p14415_p0, %p14411_p11 }
 0x13e   :  { %14419 = shalt.err (!%p14416_p1)
}
 0x13f   :  { %s16005_s19 = sld [smem:[#allocation80_spill]]  ;;  %s14867_s21 = smov [#allocation16]  }
 0x140   :  { %188 = dma.hbm_to_vmem [thread:$0]  %s15215_s30, 640, %s183_s10, [#allocation12], %s14843_s2, %s14843_s2, %s14844_s0  }
 0x141   :  { %s209_s9 = sshll.u32 %s14867_s21, 4  ;;  %s14432_s16 = sshra.s32 %s208_s24, 4  ;;  %s210_s9 = int_to_ptr.vmem [resolvable:$true] %s209_s9  ;;  %s14433_s16 = int_to_ptr.hbm [resolvable:$true] %s14432_s16 }
 0x142   :  { %s14434_s20 = scalar_lea.hbm %s14433_s16, 1  ;;  %s14436_s14 = scalar_lea.hbm %s16004_s8, 1 }
 0x143   :  { %p14435_p2 = scmp.ne.s32.totalorder %s14433_s16, %s14434_s20  ;;  %p14437_p3 = scmp.lt.s32.totalorder %s14433_s16, %s16004_s8 }
 0x144   :  { %p14438_p4 = scmp.lt.s32.totalorder %s14436_s14, %s14434_s20 }
 0x145   :  { %s231_s7 = sshll.u32 %s16005_s19, 4  ;;  %s232_s7 = int_to_ptr.hbm [resolvable:$true] %s231_s7 }
 0x146   :  { %p14439_p5 = por %p14438_p4, %p14437_p3 }
 0x148   :  { %p14440_p6 = pnand %p14439_p5, %p14435_p2 }
 0x14a   :  { %14443 = shalt.err (!%p14440_p6)
}
 0x14b   :  { %212 = dma.hbm_to_vmem [thread:$0]  %s208_s24, 16, %s210_s9, [#allocation15]  }
 0x14c   :  { %s16006_s27 = sld [smem:[#allocation81_spill]]  ;;  %s14868_s11 = smov [#allocation19]  }
 0x14d   :  { %s233_s18 = sshll.u32 %s14868_s11, 4  ;;  %s14456_s13 = sshra.s32 %s232_s7, 4  ;;  %s234_s18 = int_to_ptr.vmem [resolvable:$true] %s233_s18  ;;  %s14457_s13 = int_to_ptr.hbm [resolvable:$true] %s14456_s13 }
 0x14e   :  { %s14458_s30 = scalar_lea.hbm %s14457_s13, 1  ;;  %s14460_s28 = scalar_lea.hbm %s16005_s19, 1 }
 0x14f   :  { %p14459_p7 = scmp.ne.s32.totalorder %s14457_s13, %s14458_s30  ;;  %p14461_p8 = scmp.lt.s32.totalorder %s14457_s13, %s16005_s19 }
 0x150   :  { %p14462_p9 = scmp.lt.s32.totalorder %s14460_s28, %s14458_s30 }
 0x152   :  { %s255_s22 = sshll.u32 %s16006_s27, 4  ;;  %p14463_p10 = por %p14462_p9, %p14461_p8  ;;  %s256_s22 = int_to_ptr.hbm [resolvable:$true] %s255_s22 }
 0x154   :  { %p14464_p11 = pnand %p14463_p10, %p14459_p7 }
 0x156   :  { %14467 = shalt.err (!%p14464_p11)
}
 0x157   :  { %236 = dma.hbm_to_vmem [thread:$0]  %s232_s7, 16, %s234_s18, [#allocation18]  }
 0x158   :  { %s16007_s29 = sld [smem:[#allocation82_spill]]  ;;  %s14869_s3 = smov [#allocation22]  }
 0x159   :  { %s257_s1 = sshll.u32 %s14869_s3, 4  ;;  %s14480_s8 = sshra.s32 %s256_s22, 4  ;;  %s258_s1 = int_to_ptr.vmem [resolvable:$true] %s257_s1  ;;  %s14481_s8 = int_to_ptr.hbm [resolvable:$true] %s14480_s8 }
 0x15a   :  { %s14482_s23 = scalar_lea.hbm %s14481_s8, 1  ;;  %s14484_s10 = scalar_lea.hbm %s16006_s27, 1 }
 0x15b   :  { %p14483_p12 = scmp.ne.s32.totalorder %s14481_s8, %s14482_s23  ;;  %p14485_p13 = scmp.lt.s32.totalorder %s14481_s8, %s16006_s27 }
 0x15c   :  { %p14486_p0 = scmp.lt.s32.totalorder %s14484_s10, %s14482_s23 }
 0x15e   :  { %s278_s6 = sshll.u32 %s16007_s29, 4  ;;  %p14487_p1 = por %p14486_p0, %p14485_p13  ;;  %s15234_s6 = int_to_ptr.hbm [resolvable:$true] %s278_s6 }
 0x160   :  { %p14488_p2 = pnand %p14487_p1, %p14483_p12 }
 0x162   :  { %14491 = shalt.err (!%p14488_p2)
}
 0x163   :  { %260 = dma.hbm_to_vmem [thread:$0]  %s256_s22, 16, %s258_s1, [#allocation21]  }
 0x164   :  { %s16008_s24 = sld [smem:[#allocation83_spill]]  ;;  %s14870_s12 = smov [#allocation25]  }
 0x165   :  { %s280_s5 = sshll.u32 %s14870_s12, 4  ;;  %s14504_s19 = sshra.s32 %s15234_s6, 4  ;;  %s281_s5 = int_to_ptr.vmem [resolvable:$true] %s280_s5  ;;  %s14505_s19 = int_to_ptr.hbm [resolvable:$true] %s14504_s19 }
 0x166   :  { %s14506_s7 = scalar_lea.hbm %s14505_s19, 24  ;;  %s14508_s21 = scalar_lea.hbm %s16007_s29, 24 }
 0x167   :  { %p14507_p3 = scmp.ne.s32.totalorder %s14505_s19, %s14506_s7  ;;  %p14509_p4 = scmp.lt.s32.totalorder %s14505_s19, %s16007_s29 }
 0x168   :  { %p14510_p5 = scmp.lt.s32.totalorder %s14508_s21, %s14506_s7 }
 0x16a   :  { %s305_s15 = sshll.u32 %s16008_s24, 4  ;;  %p14511_p6 = por %p14510_p5, %p14509_p4  ;;  %s306_s15 = int_to_ptr.hbm [resolvable:$true] %s305_s15 }
 0x16c   :  { %p14512_p7 = pnand %p14511_p6, %p14507_p3 }
 0x16e   :  { %14515 = shalt.err (!%p14512_p7)
}
 0x16f   :  { %s16009_s9 = sld [smem:[#allocation84_spill]]  ;;  %s14871_s20 = smov [#allocation28]  }
 0x170   :  { %286 = dma.hbm_to_vmem [thread:$0]  %s15234_s6, 384, %s281_s5, [#allocation24], %s14843_s2, %s14843_s2, %s14844_s0  }
 0x171   :  { %s307_s14 = sshll.u32 %s14871_s20, 4  ;;  %s14528_s27 = sshra.s32 %s306_s15, 4  ;;  %s308_s14 = int_to_ptr.vmem [resolvable:$true] %s307_s14  ;;  %s14529_s27 = int_to_ptr.hbm [resolvable:$true] %s14528_s27 }
 0x172   :  { %s14530_s11 = scalar_lea.hbm %s14529_s27, 2  ;;  %s14532_s18 = scalar_lea.hbm %s16008_s24, 2 }
 0x173   :  { %p14531_p8 = scmp.ne.s32.totalorder %s14529_s27, %s14530_s11  ;;  %p14533_p9 = scmp.lt.s32.totalorder %s14529_s27, %s16008_s24 }
 0x174   :  { %p14534_p10 = scmp.lt.s32.totalorder %s14532_s18, %s14530_s11 }
 0x175   :  { %s329_s16 = sshll.u32 %s16009_s9, 4  ;;  %s330_s16 = int_to_ptr.hbm [resolvable:$true] %s329_s16 }
 0x176   :  { %p14535_p11 = por %p14534_p10, %p14533_p9 }
 0x178   :  { %p14536_p12 = pnand %p14535_p11, %p14531_p8 }
 0x17a   :  { %14539 = shalt.err (!%p14536_p12)
}
 0x17b   :  { %310 = dma.hbm_to_vmem [thread:$0]  %s306_s15, 32, %s308_s14, [#allocation27]  }
 0x17c   :  { %s16010_s22 = sld [smem:[#allocation85_spill]]  ;;  %s14872_s13 = smov [#allocation31]  }
 0x17d   :  { %s331_s30 = sshll.u32 %s14872_s13, 4  ;;  %s14552_s29 = sshra.s32 %s330_s16, 4  ;;  %s332_s30 = int_to_ptr.vmem [resolvable:$true] %s331_s30  ;;  %s14553_s29 = int_to_ptr.hbm [resolvable:$true] %s14552_s29 }
 0x17e   :  { %s14554_s6 = scalar_lea.hbm %s14553_s29, 2  ;;  %s14556_s3 = scalar_lea.hbm %s16009_s9, 2 }
 0x17f   :  { %p14555_p13 = scmp.ne.s32.totalorder %s14553_s29, %s14554_s6  ;;  %p14557_p0 = scmp.lt.s32.totalorder %s14553_s29, %s16009_s9 }
 0x180   :  { %p14558_p1 = scmp.lt.s32.totalorder %s14556_s3, %s14554_s6 }
 0x182   :  { %s353_s28 = sshll.u32 %s16010_s22, 4  ;;  %p14559_p2 = por %p14558_p1, %p14557_p0  ;;  %s354_s28 = int_to_ptr.hbm [resolvable:$true] %s353_s28 }
 0x184   :  { %p14560_p3 = pnand %p14559_p2, %p14555_p13 }
 0x186   :  { %14563 = shalt.err (!%p14560_p3)
}
 0x187   :  { %334 = dma.hbm_to_vmem [thread:$0]  %s330_s16, 32, %s332_s30, [#allocation30]  }
 0x188   :  { %s16011_s1 = sld [smem:[#allocation86_spill]]  ;;  %s14873_s23 = smov [#allocation34]  }
 0x189   :  { %s355_s10 = sshll.u32 %s14873_s23, 4  ;;  %s14576_s24 = sshra.s32 %s354_s28, 4  ;;  %s356_s10 = int_to_ptr.vmem [resolvable:$true] %s355_s10  ;;  %s14577_s24 = int_to_ptr.hbm [resolvable:$true] %s14576_s24 }
 0x18a   :  { %s14578_s12 = scalar_lea.hbm %s14577_s24, 2  ;;  %s14580_s5 = scalar_lea.hbm %s16010_s22, 2 }
 0x18b   :  { %p14579_p4 = scmp.ne.s32.totalorder %s14577_s24, %s14578_s12  ;;  %p14581_p5 = scmp.lt.s32.totalorder %s14577_s24, %s16010_s22 }
 0x18c   :  { %p14582_p6 = scmp.lt.s32.totalorder %s14580_s5, %s14578_s12 }
 0x18e   :  { %s376_s8 = sshll.u32 %s16011_s1, 4  ;;  %p14583_p7 = por %p14582_p6, %p14581_p5  ;;  %s15253_s8 = int_to_ptr.hbm [resolvable:$true] %s376_s8 }
 0x190   :  { %p14584_p8 = pnand %p14583_p7, %p14579_p4 }
 0x192   :  { %14587 = shalt.err (!%p14584_p8)
}
 0x193   :  { %358 = dma.hbm_to_vmem [thread:$0]  %s354_s28, 32, %s356_s10, [#allocation33]  }
 0x194   :  { %s16012_s15 = sld [smem:[#allocation87_spill]]  ;;  %s14874_s19 = smov [#allocation37]  }
 0x195   :  { %s378_s7 = sshll.u32 %s14874_s19, 4  ;;  %s14600_s9 = sshra.s32 %s15253_s8, 4  ;;  %s379_s7 = int_to_ptr.vmem [resolvable:$true] %s378_s7  ;;  %s14601_s9 = int_to_ptr.hbm [resolvable:$true] %s14600_s9 }
 0x196   :  { %s14602_s16 = scalar_lea.hbm %s14601_s9, 16  ;;  %s14604_s20 = scalar_lea.hbm %s16011_s1, 16 }
 0x197   :  { %p14603_p9 = scmp.ne.s32.totalorder %s14601_s9, %s14602_s16  ;;  %p14605_p10 = scmp.lt.s32.totalorder %s14601_s9, %s16011_s1 }
 0x198   :  { %p14606_p11 = scmp.lt.s32.totalorder %s14604_s20, %s14602_s16 }
 0x19a   :  { %s403_s21 = sshll.u32 %s16012_s15, 4  ;;  %p14607_p12 = por %p14606_p11, %p14605_p10  ;;  %s404_s21 = int_to_ptr.hbm [resolvable:$true] %s403_s21 }
 0x19c   :  { %p14608_p13 = pnand %p14607_p12, %p14603_p9 }
 0x19e   :  { %14611 = shalt.err (!%p14608_p13)
}
 0x19f   :  { %s16013_s14 = sld [smem:[#allocation88_spill]]  ;;  %s14875_s11 = smov [#allocation40]  }
 0x1a0   :  { %384 = dma.hbm_to_vmem [thread:$0]  %s15253_s8, 256, %s379_s7, [#allocation36], %s14843_s2, %s14843_s2, %s14844_s0  }
 0x1a1   :  { %s405_s18 = sshll.u32 %s14875_s11, 4  ;;  %s14624_s22 = sshra.s32 %s404_s21, 4  ;;  %s406_s18 = int_to_ptr.vmem [resolvable:$true] %s405_s18  ;;  %s14625_s22 = int_to_ptr.hbm [resolvable:$true] %s14624_s22 }
 0x1a2   :  { %s14626_s13 = scalar_lea.hbm %s14625_s22, 4  ;;  %s14628_s30 = scalar_lea.hbm %s16012_s15, 4 }
 0x1a3   :  { %p14627_p0 = scmp.ne.s32.totalorder %s14625_s22, %s14626_s13  ;;  %p14629_p1 = scmp.lt.s32.totalorder %s14625_s22, %s16012_s15 }
 0x1a4   :  { %p14630_p2 = scmp.lt.s32.totalorder %s14628_s30, %s14626_s13 }
 0x1a5   :  { %s427_s27 = sshll.u32 %s16013_s14, 4  ;;  %s428_s27 = int_to_ptr.hbm [resolvable:$true] %s427_s27 }
 0x1a6   :  { %p14631_p3 = por %p14630_p2, %p14629_p1 }
 0x1a8   :  { %p14632_p4 = pnand %p14631_p3, %p14627_p0 }
 0x1aa   :  { %14635 = shalt.err (!%p14632_p4)
}
 0x1ab   :  { %408 = dma.hbm_to_vmem [thread:$0]  %s404_s21, 64, %s406_s18, [#allocation39]  }
 0x1ac   :  { %s16014_s28 = sld [smem:[#allocation89_spill]]  ;;  %s14876_s2 = smov [#allocation43]  }
 0x1ad   :  { %s429_s0 = sshll.u32 %s14876_s2, 4  ;;  %s14648_s6 = sshra.s32 %s428_s27, 4  ;;  %s430_s0 = int_to_ptr.vmem [resolvable:$true] %s429_s0  ;;  %s14649_s6 = int_to_ptr.hbm [resolvable:$true] %s14648_s6 }
 0x1ae   :  { %s14650_s3 = scalar_lea.hbm %s14649_s6, 4  ;;  %s14652_s1 = scalar_lea.hbm %s16013_s14, 4 }
 0x1af   :  { %p14651_p5 = scmp.ne.s32.totalorder %s14649_s6, %s14650_s3  ;;  %p14653_p6 = scmp.lt.s32.totalorder %s14649_s6, %s16013_s14 }
 0x1b0   :  { %p14654_p7 = scmp.lt.s32.totalorder %s14652_s1, %s14650_s3 }
 0x1b2   :  { %s451_s29 = sshll.u32 %s16014_s28, 4  ;;  %p14655_p8 = por %p14654_p7, %p14653_p6  ;;  %s452_s29 = int_to_ptr.hbm [resolvable:$true] %s451_s29 }
 0x1b4   :  { %p14656_p9 = pnand %p14655_p8, %p14651_p5 }
 0x1b6   :  { %14659 = shalt.err (!%p14656_p9)
}
 0x1b7   :  { %432 = dma.hbm_to_vmem [thread:$0]  %s428_s27, 64, %s430_s0, [#allocation42]  }
 0x1b8   :  { %s16015_s8 = sld [smem:[#allocation91_spill]]  ;;  %s14877_s10 = smov [#allocation46]  }
 0x1b9   :  { %s453_s24 = sshll.u32 %s14877_s10, 4  ;;  %s14672_s12 = sshra.s32 %s452_s29, 4  ;;  %s454_s24 = int_to_ptr.vmem [resolvable:$true] %s453_s24  ;;  %s14673_s12 = int_to_ptr.hbm [resolvable:$true] %s14672_s12 }
 0x1ba   :  { %s14674_s5 = scalar_lea.hbm %s14673_s12, 4  ;;  %s14676_s15 = scalar_lea.hbm %s16014_s28, 4 }
 0x1bb   :  { %p14675_p10 = scmp.ne.s32.totalorder %s14673_s12, %s14674_s5  ;;  %p14677_p11 = scmp.lt.s32.totalorder %s14673_s12, %s16014_s28 }
 0x1bc   :  { %p14678_p12 = scmp.lt.s32.totalorder %s14676_s15, %s14674_s5 }
 0x1be   :  { %s473_s23 = sshll.u32 %s16015_s8, 4  ;;  %p14679_p13 = por %p14678_p12, %p14677_p11  ;;  %s474_s23 = int_to_ptr.hbm [resolvable:$true] %s473_s23 }
 0x1c0   :  { %p14680_p0 = pnand %p14679_p13, %p14675_p10 }
 0x1c2   :  { %14683 = shalt.err (!%p14680_p0)
}
 0x1c3   :  { %456 = dma.hbm_to_vmem [thread:$0]  %s452_s29, 64, %s454_s24, [#allocation45]  }
 0x1c4   :  { %s14878_s19 = smov [#allocation49]   ;;  %s497_s21 = sshll.u32 %s15070_s17, 4  ;;  %s498_s21 = int_to_ptr.hbm [resolvable:$true] %s497_s21 }
 0x1c5   :  { %s475_s7 = sshll.u32 %s14878_s19, 4  ;;  %s14696_s9 = sshra.s32 %s474_s23, 4  ;;  %s476_s7 = int_to_ptr.vmem [resolvable:$true] %s475_s7  ;;  %s14697_s9 = int_to_ptr.hbm [resolvable:$true] %s14696_s9 }
 0x1c6   :  { %s14698_s16 = scalar_lea.hbm %s14697_s9, 8  ;;  %s14700_s20 = scalar_lea.hbm %s16015_s8, 8 }
 0x1c7   :  { %p14699_p1 = scmp.ne.s32.totalorder %s14697_s9, %s14698_s16  ;;  %p14701_p2 = scmp.lt.s32.totalorder %s14697_s9, %s16015_s8 }
 0x1c8   :  { %p14702_p3 = scmp.lt.s32.totalorder %s14700_s20, %s14698_s16 }
 0x1ca   :  { %p14703_p4 = por %p14702_p3, %p14701_p2 }
 0x1cc   :  { %p14704_p5 = pnand %p14703_p4, %p14699_p1 }
 0x1ce   :  { %14707 = shalt.err (!%p14704_p5)
}
 0x1cf   :  { %478 = dma.hbm_to_vmem [thread:$0]  %s474_s23, 128, %s476_s7, [#allocation48]  }
 0x1d0   :  { %s14879_s14 = smov [#allocation52]   ;;  %s14720_s11 = sshra.s32 %s498_s21, 4  ;;  %s14721_s11 = int_to_ptr.hbm [resolvable:$true] %s14720_s11 }
 0x1d1   :  { %s499_s27 = sshll.u32 %s14879_s14, 4  ;;  %s14722_s18 = scalar_lea.hbm %s14721_s11, 1  ;;  %s500_s27 = int_to_ptr.vmem [resolvable:$true] %s499_s27 }
 0x1d2   :  { %p14723_p6 = scmp.ne.s32.totalorder %s14721_s11, %s14722_s18  ;;  %s14724_s22 = scalar_lea.hbm %s15070_s17, 1 }
 0x1d3   :  { %p14725_p7 = scmp.lt.s32.totalorder %s14721_s11, %s15070_s17  ;;  %p14726_p8 = scmp.lt.s32.totalorder %s14724_s22, %s14722_s18 }
 0x1d5   :  { %p14727_p9 = por %p14726_p8, %p14725_p7 }
 0x1d7   :  { %p14728_p10 = pnand %p14727_p9, %p14723_p6 }
 0x1d9   :  { %14731 = shalt.err (!%p14728_p10)
}
 0x1da   :  { %502 = dma.hbm_to_vmem [thread:$0]  %s498_s21, 16, %s500_s27, [#allocation51]  }
 0x1db   :  { %14768 = dma.done.wait [#allocation3], 192  }
 0x1dc   :  { %14769 = vsyncadd [#allocation3], 4294967104 }
 0x1dd   :  { %14770 = dma.done.wait [#allocation6], 1168  }
 0x1de   :  { %14771 = vsyncadd [#allocation6], 4294966128 }
 0x1df   :  { %14772 = dma.done.wait [#allocation9], 656  }
 0x1e0   :  { %14773 = vsyncadd [#allocation9], 4294966640 }
 0x1e1   :  { %14774 = dma.done.wait [#allocation12], 656  }
 0x1e2   :  { %14775 = vsyncadd [#allocation12], 4294966640 }
 0x1e3   :  { %14776 = dma.done.wait [#allocation15], 1552  }
 0x1e4   :  { %14777 = vsyncadd [#allocation15], 4294965744 }
 0x1e5   :  { %14778 = dma.done.wait [#allocation18], 3088  }
 0x1e6   :  { %14779 = vsyncadd [#allocation18], 4294964208 }
 0x1e7   :  { %14780 = dma.done.wait [#allocation21], 528  }
 0x1e8   :  { %14781 = vsyncadd [#allocation21], 4294966768 }
 0x1e9   :  { %14782 = dma.done.wait [#allocation24], 768  }
 0x1ea   :  { %14783 = vsyncadd [#allocation24], 4294966528 }
 0x1eb   :  { %14784 = dma.done.wait [#allocation27], 6176  }
 0x1ec   :  { %14785 = vsyncadd [#allocation27], 4294961120 }
 0x1ed   :  { %14786 = dma.done.wait [#allocation30], 12320  }
 0x1ee   :  { %14787 = vsyncadd [#allocation30], 4294954976 }
 0x1ef   :  { %14788 = dma.done.wait [#allocation33], 2080  }
 0x1f0   :  { %14789 = vsyncadd [#allocation33], 4294965216 }
 0x1f1   :  { %14790 = dma.done.wait [#allocation36], 512  }
 0x1f2   :  { %14791 = vsyncadd [#allocation36], 4294966784 }
 0x1f3   :  { %14792 = dma.done.wait [#allocation39], 24640  }
 0x1f4   :  { %14793 = vsyncadd [#allocation39], 4294942656 }
 0x1f5   :  { %14794 = dma.done.wait [#allocation42], 49216  }
 0x1f6   :  { %14795 = vsyncadd [#allocation42], 4294918080 }
 0x1f7   :  { %14796 = dma.done.wait [#allocation45], 8256  }
 0x1f8   :  { %14797 = vsyncadd [#allocation45], 4294959040 }
 0x1f9   :  { %14798 = dma.done.wait [#allocation48], 256  }
 0x1fa   :  { %14799 = vsyncadd [#allocation48], 4294967040 }
 0x1fb   :  { %14800 = dma.done.wait [#allocation51], 32  }
 0x1fc   :  { %14801 = vsyncadd [#allocation51], 4294967264  ;;  %s16016_s17 = sld [smem:[#allocation72_spill]]  ;;  %vm693_vm0 = vcmask 1041408   ;;  %vm694_vm1 = vcmask 1042432   ;;  %v14880_v0 = vmov 65535  }
 0x1fd   :  { %v695_v1 = vsel %vm693_vm0, 4294967295, %v14880_v0  ;;  %v646_v2 = vld [vmem:[#allocation2 + $0x8] sm:$0x7]  ;;  %v12998_v7 = vld [vmem:[#allocation2] sm:$0xff]  ;;  %vm680_vm2 = vcmask 171008   ;;  %v737_v37 = vld [vmem:[#allocation7] sm:$0xff] }
 0x1fe   :  { %v676_v3 = vunpack.c.l.b16 %v646_v2  ;;  %v696_v4 = vsel %vm694_vm1, %v695_v1, 0  ;;  %v13941_v19 = vld [vmem:[#allocation5] ss:$0 sm:$0xff]  ;;  %vm746_vm3 = vcmask 523264   ;;  %v738_v38 = vld [vmem:[#allocation7 + $0x8] sm:$0xff]  ;;  %v739_v39 = vld [vmem:[#allocation7 + $0x10] sm:$0xff] }
 0x1ff   :  { %v740_v40 = vld [vmem:[#allocation7 + $0x18] sm:$0xff]  ;;  %v741_v41 = vld [vmem:[#allocation7 + $0x20] sm:$0xff]  ;;  %v742_v42 = vld [vmem:[#allocation7 + $0x28] sm:$0xff]  ;;  %vm827_vm4 = vcmask 1046528   ;;  %vm863_vm5 = vcmask 1045504   ;;  %s16017_s13 = sld [smem:[#allocation75_spill]] }
 0x200   :  { %v678_v5 = vpack.c.b16 %v676_v3, %v676_v3  ;;  %v743_v43 = vld [vmem:[#allocation7 + $0x30] sm:$0xff]  ;;  %v744_v44 = vld [vmem:[#allocation7 + $0x38] sm:$0xff]  ;;  %v745_v45 = vld [vmem:[#allocation7 + $0x40] sm:$0xf]  ;;  %vm904_vm6 = vcmask 539648   ;;  %s16018_s30 = sld [smem:[#allocation77_spill]] }
 0x201   :  { %vm973_vm7 = vsmask.f32 7424  ;;  %vm1183_vm8 = vcmask 277504   ;;  %vm2183_vm9 = vcmask 146432   ;;  %vm3721_vm10 = vcmask 80896   ;;  %s14760_s29 = scalar_lea.hbm %s15075_s4, 2 }
 0x202   :  { %v698_v6 = vand.u32 %v696_v4, %v678_v5  ;;  %v12994_v8 = vld [vmem:[%s16016_s17] sm:$0xff]  ;;  %v12995_v9 = vld [vmem:[%s16016_s17 + $0x8] sm:$0xff]  ;;  %v12996_v10 = vld [vmem:[%s16016_s17 + $0x10] sm:$0xff]  ;;  %vm9027_vm11 = vcmask 48128   ;;  %vm9132_vm12 = vcmask 1043456   ;;  %vm9128_vm13 = vcmask 64512  }
 0x203   :  { %v12997_v11 = vld [vmem:[%s16016_s17 + $0x18] sm:$0xff]  ;;  %vm9345_vm14 = vcmask 74752  }
 0x204   :  { %706 = vmatpush.bf16.msra.mxu0 %v698_v6 }
 0x208   :  { %707 = vmatpush.bf16.msra.mxu0 %v12998_v7 }
 0x20b   :  { %9437 = vmatmul.msk.bf16.vlgmr.msra.gmra.mxu0 %vm680_vm2, %v12994_v8 }
 0x21b   :  { %9438 = vmatmul.msk.bf16.gmra.mxu0 %vm680_vm2, %v12995_v9 }
 0x22b   :  { %9439 = vmatmul.msk.bf16.gmra.mxu0 %vm680_vm2, %v12996_v10 }
 0x23b   :  { %9440 = vmatmul.msk.bf16.gmra.mxu0 %vm680_vm2, %v12997_v11 }
 0x288   :  { %v709_v12 = vpop.f32.mrf.mxu0 }
 0x289   :  { %v710_v33 = vadd.f32 %v13941_v19, %v709_v12 }
 0x28b   :  { %v729_v36 = vmax.f32 %v710_v33, 0.0 }
 0x290   :  { %v711_v13 = vpop.f32.mrf.mxu0 }
 0x291   :  { %v712_v31 = vadd.f32 %v13941_v19, %v711_v13 }
 0x293   :  { %v730_v35 = vmax.f32 %v712_v31, 0.0 }
 0x298   :  { %v714_v14 = vpop.f32.mrf.mxu0 }
 0x299   :  { %v715_v29 = vadd.f32 %v13941_v19, %v714_v14 }
 0x29b   :  { %v731_v34 = vmax.f32 %v715_v29, 0.0 }
 0x2a0   :  { %v716_v15 = vpop.f32.mrf.mxu0 }
 0x2a1   :  { %v717_v27 = vadd.f32 %v13941_v19, %v716_v15 }
 0x2a3   :  { %v732_v32 = vmax.f32 %v717_v27, 0.0 }
 0x2a8   :  { %v719_v16 = vpop.f32.mrf.mxu0 }
 0x2a9   :  { %v720_v25 = vadd.f32 %v13941_v19, %v719_v16 }
 0x2ab   :  { %v733_v30 = vmax.f32 %v720_v25, 0.0 }
 0x2b0   :  { %v721_v17 = vpop.f32.mrf.mxu0 }
 0x2b1   :  { %v722_v23 = vadd.f32 %v13941_v19, %v721_v17 }
 0x2b3   :  { %v734_v28 = vmax.f32 %v722_v23, 0.0 }
 0x2b8   :  { %v724_v18 = vpop.f32.mrf.mxu0 }
 0x2b9   :  { %v725_v21 = vadd.f32 %v13941_v19, %v724_v18 }
 0x2bb   :  { %v735_v26 = vmax.f32 %v725_v21, 0.0 }
 0x2c0   :  { %v726_v20 = vpop.f32.mrf.mxu0 }
 0x2c1   :  { %v727_v22 = vadd.f32 %v13941_v19, %v726_v20 }
 0x2c3   :  { %v736_v24 = vmax.f32 %v727_v22, 0.0 }
 0x2c5   :  { %782 = vmatpush.msra.mxu1 %v736_v24 }
 0x2c7   :  { %783 = vmatpush.msra.mxu1 %v735_v26 }
 0x2c9   :  { %784 = vmatpush.msra.mxu1 %v734_v28 }
 0x2cb   :  { %785 = vmatpush.msra.mxu1 %v733_v30 }
 0x2cd   :  { %786 = vmatpush.msra.mxu1 %v732_v32 }
 0x2cf   :  { %787 = vmatpush.msra.mxu1 %v731_v34 }
 0x2d1   :  { %788 = vmatpush.msra.mxu1 %v730_v35 }
 0x2d3   :  { %789 = vmatpush.msra.mxu1 %v729_v36 }
 0x2d4   :  { %9441 = vmatmul.msk.f32.vlgmr.msra.gmra.mxu1 %vm746_vm3, %v737_v37 }
 0x2dc   :  { %9442 = vmatmul.msk.f32.gmra.mxu1 %vm746_vm3, %v738_v38 }
 0x2e4   :  { %9443 = vmatmul.msk.f32.gmra.mxu1 %vm746_vm3, %v739_v39 }
 0x2ec   :  { %9444 = vmatmul.msk.f32.gmra.mxu1 %vm746_vm3, %v740_v40 }
 0x2f4   :  { %9445 = vmatmul.msk.f32.gmra.mxu1 %vm746_vm3, %v741_v41 }
 0x2fc   :  { %9446 = vmatmul.msk.f32.gmra.mxu1 %vm746_vm3, %v742_v42 }
 0x304   :  { %9447 = vmatmul.msk.f32.gmra.mxu1 %vm746_vm3, %v743_v43  ;;  %v899_v43 = vld [vmem:[#allocation8] sm:$0xff] }
 0x30c   :  { %9448 = vmatmul.msk.f32.gmra.mxu1 %vm746_vm3, %v744_v44  ;;  %v900_v44 = vld [vmem:[#allocation8 + $0x8] sm:$0xff] }
 0x314   :  { %9449 = vmatmul.msk.f32.gmra.mxu1 %vm746_vm3, %v745_v45  ;;  %v901_v45 = vld [vmem:[#allocation8 + $0x10] sm:$0xff] }
 0x351   :  { %v15293_v46 = vpop.f32.mrf.mxu1 }
 0x352   :  { %v828_v23 = vrot.slane %v15293_v46, 1  ;;  %v864_v38 = vrot.slane %v15293_v46, 2 }
 0x359   :  { %v15295_v47 = vpop.f32.mrf.mxu1 }
 0x35a   :  { %v829_v17 = vrot.slane %v15295_v47, 1  ;;  %v865_v34 = vrot.slane %v15295_v47, 2 }
 0x35c   :  { %v830_v31 = vsel %vm827_vm4, %v828_v23, %v829_v17  ;;  %v866_v41 = vsel %vm863_vm5, %v864_v38, %v865_v34 }
 0x35d   :  { %v854_v37 = vmax.f32 %v15293_v46, %v830_v31  ;;  %v902_v46 = vld [vmem:[#allocation8 + $0x18] sm:$0xff] }
 0x35f   :  { %v890_v42 = vmax.f32 %v854_v37, %v866_v41 }
 0x361   :  { %v15297_v48 = vpop.f32.mrf.mxu1 }
 0x362   :  { %v831_v11 = vrot.slane %v15297_v48, 1  ;;  %v867_v29 = vrot.slane %v15297_v48, 2 }
 0x364   :  { %v832_v26 = vsel %vm827_vm4, %v829_v17, %v831_v11  ;;  %v868_v39 = vsel %vm863_vm5, %v865_v34, %v867_v29 }
 0x365   :  { %v855_v33 = vmax.f32 %v15295_v47, %v832_v26  ;;  %v903_v47 = vld [vmem:[#allocation8 + $0x20] sm:$0xf] }
 0x367   :  { %v891_v40 = vmax.f32 %v855_v33, %v868_v39 }
 0x369   :  { %v800_v49 = vpop.f32.mrf.mxu1 }
 0x36a   :  { %v833_v6 = vrot.slane %v800_v49, 1  ;;  %v869_v24 = vrot.slane %v800_v49, 2 }
 0x36c   :  { %v834_v20 = vsel %vm827_vm4, %v831_v11, %v833_v6  ;;  %v870_v35 = vsel %vm863_vm5, %v867_v29, %v869_v24 }
 0x36d   :  { %v856_v28 = vmax.f32 %v15297_v48, %v834_v20  ;;  %v13010_v48 = vld [vmem:[%s16017_s13 + $0x58] sm:$0xff] }
 0x36f   :  { %v892_v36 = vmax.f32 %v856_v28, %v870_v35  ;;  %v13005_v28 = vld [vmem:[%s16017_s13 + $0x30] sm:$0xff]  ;;  %v13004_v35 = vld [vmem:[%s16017_s13 + $0x28] sm:$0xff] }
 0x371   :  { %v803_v50 = vpop.f32.mrf.mxu1 }
 0x372   :  { %v835_v0 = vrot.slane %v803_v50, 1  ;;  %v871_v18 = vrot.slane %v803_v50, 2 }
 0x374   :  { %v836_v14 = vsel %vm827_vm4, %v833_v6, %v835_v0  ;;  %v872_v30 = vsel %vm863_vm5, %v869_v24, %v871_v18  ;;  %v13006_v24 = vld [vmem:[%s16017_s13 + $0x38] sm:$0xff] }
 0x375   :  { %v857_v22 = vmax.f32 %v800_v49, %v836_v14  ;;  %v13009_v49 = vld [vmem:[%s16017_s13 + $0x50] sm:$0xff]  ;;  %1127 = vmatpush.bf16.msra.mxu3 %v13006_v24  ;;  %v15382_v24 = vld [vmem:[#allocation13 + $0x20] sm:$0xf] }
 0x377   :  { %v893_v32 = vmax.f32 %v857_v22, %v872_v30 }
 0x379   :  { %v806_v51 = vpop.f32.mrf.mxu1  ;;  %1128 = vmatpush.bf16.msra.mxu3 %v13005_v28  ;;  %v13019_v28 = vld [vmem:[%s16018_s30 + $0x40] sm:$0xff] }
 0x37a   :  { %v837_v59 = vrot.slane %v806_v51, 1  ;;  %v873_v12 = vrot.slane %v806_v51, 2 }
 0x37c   :  { %v838_v9 = vsel %vm827_vm4, %v835_v0, %v837_v59  ;;  %v874_v25 = vsel %vm863_vm5, %v871_v18, %v873_v12 }
 0x37d   :  { %v858_v16 = vmax.f32 %v803_v50, %v838_v9  ;;  %v13008_v50 = vld [vmem:[%s16017_s13 + $0x48] sm:$0xff]  ;;  %1129 = vmatpush.bf16.msra.mxu3 %v13004_v35 }
 0x37f   :  { %v894_v27 = vmax.f32 %v858_v16, %v874_v25 }
 0x381   :  { %v809_v52 = vpop.f32.mrf.mxu1 }
 0x382   :  { %v839_v55 = vrot.slane %v809_v52, 1  ;;  %v875_v7 = vrot.slane %v809_v52, 2 }
 0x384   :  { %v840_v2 = vsel %vm827_vm4, %v837_v59, %v839_v55  ;;  %v876_v19 = vsel %vm863_vm5, %v873_v12, %v875_v7 }
 0x385   :  { %v859_v10 = vmax.f32 %v806_v51, %v840_v2  ;;  %v13007_v51 = vld [vmem:[%s16017_s13 + $0x40] sm:$0xff] }
 0x387   :  { %v895_v21 = vmax.f32 %v859_v10, %v876_v19 }
 0x389   :  { %v812_v53 = vpop.f32.mrf.mxu1 }
 0x38a   :  { %v841_v54 = vrot.slane %v812_v53, 1  ;;  %v877_v61 = vrot.slane %v812_v53, 2 }
 0x38c   :  { %v842_v60 = vsel %vm827_vm4, %v839_v55, %v841_v54  ;;  %v878_v13 = vsel %vm863_vm5, %v875_v7, %v877_v61 }
 0x38d   :  { %v860_v5 = vmax.f32 %v809_v52, %v842_v60 }
 0x38f   :  { %v896_v15 = vmax.f32 %v860_v5, %v878_v13 }
 0x391   :  { %v815_v56 = vpop.f32.mrf.mxu1 }
 0x392   :  { %v843_v57 = vrot.slane %v815_v56, 1  ;;  %v879_v58 = vrot.slane %v815_v56, 2 }
 0x394   :  { %v862_v62 = vmax.f32 %v815_v56, %v843_v57  ;;  %v844_v63 = vsel %vm827_vm4, %v841_v54, %v843_v57  ;;  %v880_v4 = vsel %vm863_vm5, %v877_v61, %v879_v58 }
 0x395   :  { %v861_v1 = vmax.f32 %v812_v53, %v844_v63 }
 0x396   :  { %v898_v3 = vmax.f32 %v862_v62, %v879_v58 }
 0x397   :  { %v897_v8 = vmax.f32 %v861_v1, %v880_v4 }
 0x398   :  { %9450 = vmatpush.msk.msra.mxu2 %vm693_vm0, %v898_v3 }
 0x39a   :  { %931 = vmatpush.msra.mxu2 %v897_v8 }
 0x39c   :  { %932 = vmatpush.msra.mxu2 %v896_v15 }
 0x39e   :  { %933 = vmatpush.msra.mxu2 %v895_v21 }
 0x3a0   :  { %934 = vmatpush.msra.mxu2 %v894_v27 }
 0x3a2   :  { %935 = vmatpush.msra.mxu2 %v893_v32 }
 0x3a4   :  { %936 = vmatpush.msra.mxu2 %v892_v36 }
 0x3a6   :  { %937 = vmatpush.msra.mxu2 %v891_v40  ;;  %v13003_v40 = vld [vmem:[%s16017_s13 + $0x20] sm:$0xff] }
 0x3a7   :  { %1130 = vmatpush.bf16.msra.mxu3 %v13003_v40 }
 0x3a8   :  { %938 = vmatpush.msra.mxu2 %v890_v42  ;;  %v13002_v42 = vld [vmem:[%s16017_s13 + $0x18] sm:$0xff] }
 0x3a9   :  { %9451 = vmatmul.msk.f32.vlgmr.msra.gmra.mxu2 %vm904_vm6, %v899_v43 }
 0x3aa   :  { %1154 = vmatpush.bf16.msrb.mxu2 %v13010_v48 }
 0x3ab   :  { %1131 = vmatpush.bf16.msra.mxu3 %v13002_v42 }
 0x3ae   :  { %1155 = vmatpush.bf16.msrb.mxu2 %v13009_v49 }
 0x3b1   :  { %9452 = vmatmul.msk.f32.gmra.mxu2 %vm904_vm6, %v900_v44  ;;  %v13001_v44 = vld [vmem:[%s16017_s13 + $0x10] sm:$0xff] }
 0x3b2   :  { %1156 = vmatpush.bf16.msrb.mxu2 %v13008_v50  ;;  %1132 = vmatpush.bf16.msra.mxu3 %v13001_v44 }
 0x3b6   :  { %1157 = vmatpush.bf16.msrb.mxu2 %v13007_v51 }
 0x3b9   :  { %9453 = vmatmul.msk.f32.gmra.mxu2 %vm904_vm6, %v901_v45  ;;  %v13000_v45 = vld [vmem:[%s16017_s13 + $0x8] sm:$0xff] }
 0x3ba   :  { %1133 = vmatpush.bf16.msra.mxu3 %v13000_v45 }
 0x3c1   :  { %9454 = vmatmul.msk.f32.gmra.mxu2 %vm904_vm6, %v902_v46  ;;  %v12999_v46 = vld [vmem:[%s16017_s13] sm:$0xff] }
 0x3c2   :  { %1134 = vmatpush.bf16.msra.mxu3 %v12999_v46 }
 0x3c9   :  { %9455 = vmatmul.msk.f32.gmra.mxu2 %vm904_vm6, %v903_v47 }
 0x42c   :  { %v940_v52 = vpop.f32.mrf.mxu2 }
 0x42d   :  { %v955_v53 = vpack.c.bf16 %v940_v52, %v940_v52 }
 0x42f   :  { %v1450_v55 = vunpack.c.l.bf16 %v955_v53  ;;  %v965_v0 = vunpack.c.l.b16 %v955_v53 }
 0x431   :  { %v1460_v58 = vrot.slane %v1450_v55, 1 }
 0x434   :  { %v943_v54 = vpop.f32.mrf.mxu2 }
 0x435   :  { %v956_v56 = vpack.c.bf16 %v943_v54, %v943_v54 }
 0x437   :  { %v1451_v57 = vunpack.c.l.bf16 %v956_v56  ;;  %v966_v62 = vunpack.c.l.b16 %v956_v56 }
 0x439   :  { %v1461_v59 = vrot.slane %v1451_v57, 1  ;;  %v970_v2 = vpack.c.b16 %v966_v62, %v965_v0  ;;  %v13942_v0 = vld [vmem:[#allocation10] ss:$0 sm:$0xff] }
 0x43b   :  { %v15330_v60 = vsel %vm827_vm4, %v1460_v58, %v1461_v59  ;;  %v977_v7 = vshll.u32 %v970_v2, 16  ;;  %v1004_v14 = vrot.slane %v970_v2, 1  ;;  %v975_v16 = vshrl.u32 %v970_v2, 16 }
 0x43c   :  { %v946_v61 = vpop.f32.mrf.mxu2 }
 0x43d   :  { %v957_v63 = vpack.c.bf16 %v946_v61, %v946_v61  ;;  %v979_v13 = vrot.slane %v977_v7, 1 }
 0x43f   :  { %v1452_v1 = vunpack.c.l.bf16 %v957_v63  ;;  %v967_v8 = vunpack.c.l.b16 %v957_v63  ;;  %v980_v22 = vor.u32 %v979_v13, %v975_v16 }
 0x441   :  { %v1463_v3 = vrot.slane %v1452_v1, 1 }
 0x443   :  { %v15333_v4 = vsel %vm827_vm4, %v1461_v59, %v1463_v3 }
 0x444   :  { %v949_v5 = vpop.f32.mrf.mxu2 }
 0x445   :  { %v958_v6 = vpack.c.bf16 %v949_v5, %v949_v5 }
 0x447   :  { %v968_v9 = vunpack.c.l.b16 %v958_v6  ;;  %v1453_v10 = vunpack.c.l.bf16 %v958_v6 }
 0x449   :  { %v971_v11 = vpack.c.b16 %v968_v9, %v967_v8  ;;  %v1465_v12 = vrot.slane %v1453_v10, 1 }
 0x44b   :  { %v1005_v15 = vrot.slane %v971_v11, 1  ;;  %v982_v17 = vshll.u32 %v971_v11, 16  ;;  %v15336_v18 = vsel %vm827_vm4, %v1463_v3, %v1465_v12  ;;  %v986_v31 = vshrl.u32 %v971_v11, 16 }
 0x44c   :  { %v952_v19 = vpop.f32.mrf.mxu2 }
 0x44d   :  { %v959_v20 = vpack.c.bf16 %v952_v19, %v952_v19  ;;  %v1006_v21 = vsel %vm827_vm4, %v1004_v14, %v1005_v15  ;;  %v984_v23 = vrot.slane %v982_v17, 1 }
 0x44e   :  { %9504 = vmatmul.msk.bf16.vlgmr.msrb.gmra.mxu2 %vm746_vm3, %v1006_v21  ;;  %v15370_v21 = vld [vmem:[#allocation13 + $0x8] sm:$0xff] }
 0x44f   :  { %v969_v25 = vunpack.c.l.b16 %v959_v20  ;;  %v1454_v26 = vunpack.c.l.bf16 %v959_v20  ;;  %v985_v27 = vsel %vm973_vm7, %v980_v22, %v984_v23  ;;  %v988_v36 = vor.u32 %v986_v31, %v984_v23  ;;  %v15366_v20 = vld [vmem:[#allocation13] sm:$0xff]  ;;  %v15374_v22 = vld [vmem:[#allocation13 + $0x10] sm:$0xff]  ;;  %v15378_v23 = vld [vmem:[#allocation13 + $0x18] sm:$0xff] }
 0x450   :  { %997 = vrot.lane.b32.xlu0 %v985_v27, %s14847_s26  ;;  %v13020_v27 = vld [vmem:[%s16018_s30 + $0x48] sm:$0xff] }
 0x451   :  { %v972_v29 = vpack.c.b16 %v969_v25, %v969_v25  ;;  %v15344_v30 = vrot.slane %v1454_v26, 1  ;;  %v13022_v25 = vld [vmem:[%s16018_s30 + $0x58] sm:$0xff]  ;;  %v13021_v26 = vld [vmem:[%s16018_s30 + $0x50] sm:$0xff] }
 0x452   :  { %1431 = vmatpush.bf16.msrb.mxu1 %v13022_v25 }
 0x453   :  { %v990_v32 = vshll.u32 %v972_v29, 16  ;;  %v994_v33 = vshrl.u32 %v972_v29, 16  ;;  %v15348_v34 = vsel %vm827_vm4, %v1465_v12, %v15344_v30  ;;  %v1007_v41 = vrot.slane %v972_v29, 1 }
 0x455   :  { %v992_v37 = vrot.slane %v990_v32, 1  ;;  %v1008_v43 = vsel %vm827_vm4, %v1005_v15, %v1007_v41 }
 0x456   :  { %1432 = vmatpush.bf16.msrb.mxu1 %v13021_v26 }
 0x457   :  { %v993_v38 = vsel %vm973_vm7, %v988_v36, %v992_v37  ;;  %v996_v39 = vor.u32 %v994_v33, %v992_v37 }
 0x458   :  { %999 = vrot.lane.b32.xlu0 %v993_v38, %s14847_s26 }
 0x459   :  { %1001 = vrot.lane.b32.xlu1 %v996_v39, %s14847_s26 }
 0x45a   :  { %1433 = vmatpush.bf16.msrb.mxu1 %v13020_v27 }
 0x45e   :  { %9505 = vmatmul.msk.bf16.gmra.mxu2 %vm746_vm3, %v1008_v43  ;;  %1434 = vmatpush.bf16.msrb.mxu1 %v13019_v28 }
 0x46e   :  { %9506 = vmatmul.msk.bf16.gmra.mxu2 %vm746_vm3, %v1007_v41 }
 0x4c2   :  { %v998_v47 = vpop.permute.xlu0 %997 }
 0x4c3   :  { %v1010_v48 = vsel %vm746_vm3, %v970_v2, %v998_v47 }
 0x4c4   :  { %1135 = vmatmul.bf16.vlgmr.msra.gmra.mxu3 %v1010_v48 }
 0x4ca   :  { %v1000_v49 = vpop.permute.xlu0 %999 }
 0x4cb   :  { %v1013_v51 = vsel %vm746_vm3, %v971_v11, %v1000_v49  ;;  %v1002_v53 = vpop.permute.xlu1 %1001 }
 0x4cc   :  { %v1016_v55 = vsel %vm746_vm3, %v972_v29, %v1002_v53 }
 0x4d1   :  { %v1159_v50 = vpop.f32.mrf.mxu2 }
 0x4d4   :  { %1140 = vmatmul.bf16.gmra.mxu3 %v1013_v51 }
 0x4d9   :  { %v1161_v52 = vpop.f32.mrf.mxu2 }
 0x4e1   :  { %v1164_v54 = vpop.f32.mrf.mxu2 }
 0x4e4   :  { %1145 = vmatmul.bf16.gmra.mxu3 %v1016_v55 }
 0x4e9   :  { %v1166_v56 = vpop.f32.mrf.mxu2 }
 0x4f1   :  { %v1169_v57 = vpop.f32.mrf.mxu2 }
 0x4f9   :  { %v1171_v58 = vpop.f32.mrf.mxu2 }
 0x547   :  { %v1136_v59 = vpop.f32.mrf.mxu3 }
 0x548   :  { %v1137_v9 = vadd.f32 %v13942_v0, %v1136_v59  ;;  %v13017_v59 = vld [vmem:[%s16018_s30 + $0x30] sm:$0xff] }
 0x54a   :  { %v1160_v16 = vadd.f32 %v1159_v50, %v1137_v9 }
 0x54c   :  { %v1173_v19 = vmax.f32 %v1160_v16, 0.0 }
 0x54f   :  { %v1138_v61 = vpop.f32.mrf.mxu3 }
 0x550   :  { %v1139_v6 = vadd.f32 %v13942_v0, %v1138_v61 }
 0x552   :  { %v1162_v13 = vadd.f32 %v1161_v52, %v1139_v6  ;;  %v13015_v6 = vld [vmem:[%s16018_s30 + $0x20] sm:$0xff] }
 0x554   :  { %v1174_v17 = vmax.f32 %v1162_v13, 0.0  ;;  %v13011_v13 = vld [vmem:[%s16018_s30] sm:$0xff] }
 0x557   :  { %v1141_v62 = vpop.f32.mrf.mxu3 }
 0x558   :  { %v1142_v3 = vadd.f32 %v13942_v0, %v1141_v62 }
 0x55a   :  { %v1165_v11 = vadd.f32 %v1164_v54, %v1142_v3 }
 0x55c   :  { %v1175_v15 = vmax.f32 %v1165_v11, 0.0  ;;  %v13013_v11 = vld [vmem:[%s16018_s30 + $0x10] sm:$0xff] }
 0x55f   :  { %v1143_v63 = vpop.f32.mrf.mxu3 }
 0x560   :  { %v1144_v1 = vadd.f32 %v13942_v0, %v1143_v63 }
 0x562   :  { %v1167_v8 = vadd.f32 %v1166_v56, %v1144_v1  ;;  %v13018_v56 = vld [vmem:[%s16018_s30 + $0x38] sm:$0xff] }
 0x563   :  { %1404 = vmatpush.bf16.msrb.mxu3 %v13018_v56 }
 0x564   :  { %v1176_v12 = vmax.f32 %v1167_v8, 0.0 }
 0x567   :  { %v1146_v2 = vpop.f32.mrf.mxu3  ;;  %1405 = vmatpush.bf16.msrb.mxu3 %v13017_v59 }
 0x568   :  { %v1147_v5 = vadd.f32 %v13942_v0, %v1146_v2  ;;  %v13016_v0 = vld [vmem:[%s16018_s30 + $0x28] sm:$0xff] }
 0x56a   :  { %v1170_v7 = vadd.f32 %v1169_v57, %v1147_v5 }
 0x56b   :  { %1406 = vmatpush.bf16.msrb.mxu3 %v13016_v0 }
 0x56c   :  { %v1177_v10 = vmax.f32 %v1170_v7, 0.0 }
 0x56e   :  { %9507 = vmatpush.msk.msrb.mxu0 %vm693_vm0, %v1177_v10  ;;  %v13014_v10 = vld [vmem:[%s16018_s30 + $0x18] sm:$0xff] }
 0x56f   :  { %v1148_v14 = vpop.f32.mrf.mxu3  ;;  %1407 = vmatpush.bf16.msrb.mxu3 %v13015_v6 }
 0x570   :  { %1214 = vmatpush.msrb.mxu0 %v1176_v12  ;;  %v13012_v12 = vld [vmem:[%s16018_s30 + $0x8] sm:$0xff] }
 0x572   :  { %1215 = vmatpush.msrb.mxu0 %v1175_v15 }
 0x573   :  { %1408 = vmatpush.bf16.msrb.mxu3 %v13014_v10 }
 0x574   :  { %1216 = vmatpush.msrb.mxu0 %v1174_v17 }
 0x576   :  { %1217 = vmatpush.msrb.mxu0 %v1173_v19 }
 0x577   :  { %9508 = vmatmul.msk.f32.vlgmr.msrb.gmra.mxu0 %vm1183_vm8, %v15366_v20  ;;  %1409 = vmatpush.bf16.msrb.mxu3 %v13013_v11 }
 0x57b   :  { %1410 = vmatpush.bf16.msrb.mxu3 %v13012_v12 }
 0x57f   :  { %9509 = vmatmul.msk.f32.gmra.mxu0 %vm1183_vm8, %v15370_v21  ;;  %1411 = vmatpush.bf16.msrb.mxu3 %v13011_v13 }
 0x587   :  { %9510 = vmatmul.msk.f32.gmra.mxu0 %vm1183_vm8, %v15374_v22 }
 0x58f   :  { %9511 = vmatmul.msk.f32.gmra.mxu0 %vm1183_vm8, %v15378_v23 }
 0x597   :  { %9512 = vmatmul.msk.f32.gmra.mxu0 %vm1183_vm8, %v15382_v24 }
 0x5f4   :  { %v1219_v29 = vpop.f32.mrf.mxu0 }
 0x5f5   :  { %v1234_v33 = vpack.c.bf16 %v1219_v29, %v1219_v29 }
 0x5f7   :  { %v1244_v37 = vunpack.c.l.b16 %v1234_v33 }
 0x5fc   :  { %v1222_v31 = vpop.f32.mrf.mxu0 }
 0x5fd   :  { %v1235_v32 = vpack.c.bf16 %v1222_v31, %v1222_v31 }
 0x5ff   :  { %v1245_v36 = vunpack.c.l.b16 %v1235_v32 }
 0x601   :  { %v1249_v38 = vpack.c.b16 %v1245_v36, %v1244_v37 }
 0x603   :  { %v1255_v42 = vshll.u32 %v1249_v38, 16  ;;  %v1281_v47 = vrot.slane %v1249_v38, 1  ;;  %v1253_v49 = vshrl.u32 %v1249_v38, 16 }
 0x604   :  { %v1225_v35 = vpop.f32.mrf.mxu0 }
 0x605   :  { %v1236_v39 = vpack.c.bf16 %v1225_v35, %v1225_v35  ;;  %v1257_v46 = vrot.slane %v1255_v42, 1 }
 0x607   :  { %v1246_v43 = vunpack.c.l.b16 %v1236_v39  ;;  %v1258_v54 = vor.u32 %v1257_v46, %v1253_v49 }
 0x60c   :  { %v1228_v40 = vpop.f32.mrf.mxu0 }
 0x60d   :  { %v1237_v41 = vpack.c.bf16 %v1228_v40, %v1228_v40 }
 0x60f   :  { %v1247_v44 = vunpack.c.l.b16 %v1237_v41 }
 0x611   :  { %v1250_v45 = vpack.c.b16 %v1247_v44, %v1246_v43 }
 0x613   :  { %v1282_v48 = vrot.slane %v1250_v45, 1  ;;  %v1260_v50 = vshll.u32 %v1250_v45, 16  ;;  %v1264_v62 = vshrl.u32 %v1250_v45, 16 }
 0x614   :  { %v1231_v51 = vpop.f32.mrf.mxu0 }
 0x615   :  { %v1238_v52 = vpack.c.bf16 %v1231_v51, %v1231_v51  ;;  %v1283_v53 = vsel %vm827_vm4, %v1281_v47, %v1282_v48  ;;  %v1262_v55 = vrot.slane %v1260_v50, 1 }
 0x616   :  { %9561 = vmatmul.msk.bf16.vlgmr.msrb.gmra.mxu1 %vm746_vm3, %v1283_v53 }
 0x617   :  { %v1248_v57 = vunpack.c.l.b16 %v1238_v52  ;;  %v1263_v58 = vsel %vm973_vm7, %v1258_v54, %v1262_v55  ;;  %v1266_v1 = vor.u32 %v1264_v62, %v1262_v55 }
 0x618   :  { %1275 = vrot.lane.b32.xlu1 %v1263_v58, %s14847_s26 }
 0x619   :  { %v1251_v61 = vpack.c.b16 %v1248_v57, %v1248_v57 }
 0x61b   :  { %v1268_v63 = vshll.u32 %v1251_v61, 16  ;;  %v1272_v5 = vshrl.u32 %v1251_v61, 16  ;;  %v1284_v7 = vrot.slane %v1251_v61, 1 }
 0x61d   :  { %v1270_v2 = vrot.slane %v1268_v63, 1  ;;  %v1285_v9 = vsel %vm827_vm4, %v1282_v48, %v1284_v7 }
 0x61f   :  { %v1271_v3 = vsel %vm973_vm7, %v1266_v1, %v1270_v2  ;;  %v1274_v8 = vor.u32 %v1272_v5, %v1270_v2 }
 0x620   :  { %1277 = vrot.lane.b32.xlu2 %v1271_v3, %s14847_s26 }
 0x626   :  { %9562 = vmatmul.msk.bf16.gmra.mxu1 %vm746_vm3, %v1285_v9 }
 0x628   :  { %1279 = vrot.lane.b32.xlu2 %v1274_v8, %s14847_s26 }
 0x636   :  { %9563 = vmatmul.msk.bf16.gmra.mxu1 %vm746_vm3, %v1284_v7 }
 0x67a   :  { %v1278_v17 = vpop.permute.xlu2 %1277 }
 0x67b   :  { %v1290_v25 = vsel %vm746_vm3, %v1250_v45, %v1278_v17 }
 0x682   :  { %v1280_v27 = vpop.permute.xlu2 %1279 }
 0x683   :  { %v1293_v29 = vsel %vm746_vm3, %v1251_v61, %v1280_v27  ;;  %v13061_v27 = vld [vmem:[#allocation20 + $0x10] sm:$0xff] }
 0x68a   :  { %v1276_v14 = vpop.permute.xlu1 %1275 }
 0x68b   :  { %v1287_v15 = vsel %vm746_vm3, %v1249_v38, %v1276_v14  ;;  %v13943_v38 = vld [vmem:[#allocation11] ss:$0 sm:$0xff] }
 0x68c   :  { %1412 = vmatmul.bf16.vlgmr.msrb.gmra.mxu3 %v1287_v15 }
 0x693   :  { %v1436_v16 = vpop.f32.mrf.mxu1 }
 0x69b   :  { %v1438_v19 = vpop.f32.mrf.mxu1 }
 0x69c   :  { %1417 = vmatmul.bf16.gmra.mxu3 %v1290_v25 }
 0x6a3   :  { %v1441_v26 = vpop.f32.mrf.mxu1 }
 0x6ab   :  { %v1443_v28 = vpop.f32.mrf.mxu1 }
 0x6ac   :  { %1422 = vmatmul.bf16.gmra.mxu3 %v1293_v29 }
 0x6b3   :  { %v1446_v31 = vpop.f32.mrf.mxu1 }
 0x6bb   :  { %v1448_v32 = vpop.f32.mrf.mxu1 }
 0x70f   :  { %v1413_v33 = vpop.f32.mrf.mxu3 }
 0x710   :  { %v1414_v45 = vadd.f32 %v13943_v38, %v1413_v33  ;;  %v13060_v33 = vld [vmem:[#allocation20 + $0x8] sm:$0xff] }
 0x712   :  { %v1437_v51 = vadd.f32 %v1436_v16, %v1414_v45  ;;  %v13027_v45 = vld [vmem:[#allocation14 + $0x20] sm:$0xff] }
 0x714   :  { %v1474_v58 = vadd.f32 %v15330_v60, %v1437_v51  ;;  %v13034_v60 = vld [vmem:[#allocation14 + $0x58] sm:$0xff] }
 0x715   :  { %1716 = vmatpush.bf16.msra.mxu3 %v13034_v60  ;;  %v13041_v60 = vld [vmem:[#allocation17 + $0x30] sm:$0xff] }
 0x717   :  { %v1415_v35 = vpop.f32.mrf.mxu3 }
 0x718   :  { %v1416_v42 = vadd.f32 %v13943_v38, %v1415_v35 }
 0x71a   :  { %v1439_v48 = vadd.f32 %v1438_v19, %v1416_v42  ;;  %v13062_v19 = vld [vmem:[#allocation20 + $0x18] sm:$0xff] }
 0x71b   :  { %v13030_v42 = vld [vmem:[#allocation14 + $0x38] sm:$0xff] }
 0x71c   :  { %v1475_v56 = vadd.f32 %v15333_v4, %v1439_v48  ;;  %v13033_v4 = vld [vmem:[#allocation14 + $0x50] sm:$0xff]  ;;  %1689 = vmatpush.bf16.msra.mxu0 %v13030_v42  ;;  %v13024_v48 = vld [vmem:[#allocation14 + $0x8] sm:$0xff]  ;;  %v13058_v42 = vld [vmem:[#allocation17 + $0xb8] sm:$0xff] }
 0x71d   :  { %1717 = vmatpush.bf16.msra.mxu3 %v13033_v4  ;;  %v13040_v4 = vld [vmem:[#allocation17 + $0x28] sm:$0xff] }
 0x71e   :  { %v1480_v59 = vmax.f32 %v1475_v56, 0.0 }
 0x71f   :  { %v1418_v36 = vpop.f32.mrf.mxu3 }
 0x720   :  { %v1419_v40 = vadd.f32 %v13943_v38, %v1418_v36 }
 0x722   :  { %v1442_v46 = vadd.f32 %v1441_v26, %v1419_v40 }
 0x724   :  { %v1476_v53 = vadd.f32 %v15336_v18, %v1442_v46  ;;  %v13032_v18 = vld [vmem:[#allocation14 + $0x48] sm:$0xff]  ;;  %v13026_v46 = vld [vmem:[#allocation14 + $0x18] sm:$0xff] }
 0x725   :  { %1718 = vmatpush.bf16.msra.mxu3 %v13032_v18 }
 0x726   :  { %v1481_v57 = vmax.f32 %v1476_v53, 0.0 }
 0x727   :  { %v1420_v37 = vpop.f32.mrf.mxu3 }
 0x728   :  { %v1421_v39 = vadd.f32 %v13943_v38, %v1420_v37 }
 0x72a   :  { %v1444_v43 = vadd.f32 %v1443_v28, %v1421_v39  ;;  %v13059_v39 = vld [vmem:[#allocation20] sm:$0xff] }
 0x72c   :  { %v1477_v50 = vadd.f32 %v15348_v34, %v1444_v43  ;;  %v13031_v34 = vld [vmem:[#allocation14 + $0x40] sm:$0xff]  ;;  %v13029_v43 = vld [vmem:[#allocation14 + $0x30] sm:$0xff] }
 0x72d   :  { %1719 = vmatpush.bf16.msra.mxu3 %v13031_v34  ;;  %1690 = vmatpush.bf16.msra.mxu0 %v13029_v43  ;;  %v13039_v34 = vld [vmem:[#allocation17 + $0x20] sm:$0xff]  ;;  %v13057_v43 = vld [vmem:[#allocation17 + $0xb0] sm:$0xff] }
 0x72e   :  { %v1482_v55 = vmax.f32 %v1477_v50, 0.0 }
 0x72f   :  { %v1423_v41 = vpop.f32.mrf.mxu3 }
 0x730   :  { %v1424_v44 = vadd.f32 %v13943_v38, %v1423_v41 }
 0x731   :  { %2115 = vmatpush.bf16.msrb.mxu3 %v13062_v19 }
 0x732   :  { %v1447_v47 = vadd.f32 %v1446_v31, %v1424_v44  ;;  %v13028_v44 = vld [vmem:[#allocation14 + $0x28] sm:$0xff] }
 0x733   :  { %1691 = vmatpush.bf16.msra.mxu0 %v13028_v44  ;;  %v1741_v44 = vld [vmem:[#allocation23 + $0x8] sm:$0xff] }
 0x734   :  { %v1478_v49 = vadd.f32 %v15344_v30, %v1447_v47  ;;  %v1479_v30 = vmax.f32 %v1474_v58, 0.0  ;;  %v13025_v47 = vld [vmem:[#allocation14 + $0x10] sm:$0xff]  ;;  %v13042_v58 = vld [vmem:[#allocation17 + $0x38] sm:$0xff] }
 0x735   :  { %2116 = vmatpush.bf16.msrb.mxu3 %v13061_v27 }
 0x736   :  { %v1483_v52 = vmax.f32 %v1478_v49, 0.0  ;;  %v13023_v49 = vld [vmem:[#allocation14] sm:$0xff] }
 0x737   :  { %v1425_v54 = vpop.f32.mrf.mxu3  ;;  %1692 = vmatpush.bf16.msra.mxu0 %v13027_v45  ;;  %v1742_v45 = vld [vmem:[#allocation23 + $0x10] sm:$0xf] }
 0x738   :  { %9564 = vmatpush.msk.msra.mxu2 %vm693_vm0, %v1483_v52 }
 0x739   :  { %2117 = vmatpush.bf16.msrb.mxu3 %v13060_v33 }
 0x73a   :  { %1499 = vmatpush.msra.mxu2 %v1482_v55 }
 0x73b   :  { %1693 = vmatpush.bf16.msra.mxu0 %v13026_v46  ;;  %v13049_v46 = vld [vmem:[#allocation17 + $0x70] sm:$0xff] }
 0x73c   :  { %1500 = vmatpush.msra.mxu2 %v1481_v57 }
 0x73d   :  { %2118 = vmatpush.bf16.msrb.mxu3 %v13059_v39 }
 0x73e   :  { %1501 = vmatpush.msra.mxu2 %v1480_v59 }
 0x73f   :  { %1694 = vmatpush.bf16.msra.mxu0 %v13025_v47  ;;  %v13056_v47 = vld [vmem:[#allocation17 + $0xa8] sm:$0xff] }
 0x740   :  { %1502 = vmatpush.msra.mxu2 %v1479_v30 }
 0x741   :  { %9565 = vmatmul.msk.f32.vlgmr.msra.gmra.mxu2 %vm1183_vm8, %v15366_v20 }
 0x742   :  { %2012 = vmatpush.bf16.msrb.mxu2 %v13042_v58  ;;  %v13043_v58 = vld [vmem:[#allocation17 + $0x40] sm:$0xff] }
 0x743   :  { %1695 = vmatpush.bf16.msra.mxu0 %v13024_v48  ;;  %v13048_v48 = vld [vmem:[#allocation17 + $0x68] sm:$0xff] }
 0x746   :  { %2013 = vmatpush.bf16.msrb.mxu2 %v13041_v60 }
 0x747   :  { %1696 = vmatpush.bf16.msra.mxu0 %v13023_v49  ;;  %v13055_v49 = vld [vmem:[#allocation17 + $0xa0] sm:$0xff] }
 0x749   :  { %9566 = vmatmul.msk.f32.gmra.mxu2 %vm1183_vm8, %v15370_v21 }
 0x74a   :  { %2014 = vmatpush.bf16.msrb.mxu2 %v13040_v4 }
 0x74e   :  { %2015 = vmatpush.bf16.msrb.mxu2 %v13039_v34 }
 0x751   :  { %9567 = vmatmul.msk.f32.gmra.mxu2 %vm1183_vm8, %v15374_v22 }
 0x759   :  { %9568 = vmatmul.msk.f32.gmra.mxu2 %vm1183_vm8, %v15378_v23 }
 0x761   :  { %9569 = vmatmul.msk.f32.gmra.mxu2 %vm1183_vm8, %v15382_v24 }
 0x7c4   :  { %v1504_v20 = vpop.f32.mrf.mxu2 }
 0x7c5   :  { %v1519_v62 = vpack.c.bf16 %v1504_v20, %v1504_v20  ;;  %v13038_v20 = vld [vmem:[#allocation17 + $0x18] sm:$0xff] }
 0x7c6   :  { %2016 = vmatpush.bf16.msrb.mxu2 %v13038_v20 }
 0x7c7   :  { %v1529_v0 = vunpack.c.l.b16 %v1519_v62  ;;  %v13036_v62 = vld [vmem:[#allocation17 + $0x8] sm:$0xff] }
 0x7cc   :  { %v1507_v61 = vpop.f32.mrf.mxu2 }
 0x7cd   :  { %v1520_v21 = vpack.c.bf16 %v1507_v61, %v1507_v61 }
 0x7cf   :  { %v1530_v22 = vunpack.c.l.b16 %v1520_v21  ;;  %v13037_v21 = vld [vmem:[#allocation17 + $0x10] sm:$0xff] }
 0x7d0   :  { %2017 = vmatpush.bf16.msrb.mxu2 %v13037_v21 }
 0x7d1   :  { %v15427_v1 = vpack.c.b16 %v1530_v22, %v1529_v0  ;;  %v13035_v22 = vld [vmem:[#allocation17] sm:$0xff] }
 0x7d3   :  { %v1540_v3 = vshll.u32 %v15427_v1, 16  ;;  %v1566_v9 = vrot.slane %v15427_v1, 1  ;;  %v1538_v11 = vshrl.u32 %v15427_v1, 16 }
 0x7d4   :  { %v1510_v63 = vpop.f32.mrf.mxu2  ;;  %2018 = vmatpush.bf16.msrb.mxu2 %v13036_v62 }
 0x7d5   :  { %v1521_v23 = vpack.c.bf16 %v1510_v63, %v1510_v63  ;;  %v1542_v8 = vrot.slane %v1540_v3, 1 }
 0x7d7   :  { %v1531_v5 = vunpack.c.l.b16 %v1521_v23  ;;  %v1543_v16 = vor.u32 %v1542_v8, %v1538_v11 }
 0x7d8   :  { %2019 = vmatpush.bf16.msrb.mxu2 %v13035_v22 }
 0x7dc   :  { %v1513_v2 = vpop.f32.mrf.mxu2 }
 0x7dd   :  { %v1522_v24 = vpack.c.bf16 %v1513_v2, %v1513_v2  ;;  %v13944_v2 = vld [vmem:[#allocation22] ss:$0 sm:$0xff] }
 0x7df   :  { %v1532_v6 = vunpack.c.l.b16 %v1522_v24 }
 0x7e1   :  { %v1535_v7 = vpack.c.b16 %v1532_v6, %v1531_v5 }
 0x7e3   :  { %v1567_v10 = vrot.slane %v1535_v7, 1  ;;  %v1545_v12 = vshll.u32 %v1535_v7, 16  ;;  %v1549_v29 = vshrl.u32 %v1535_v7, 16 }
 0x7e4   :  { %v1516_v13 = vpop.f32.mrf.mxu2 }
 0x7e5   :  { %v1523_v14 = vpack.c.bf16 %v1516_v13, %v1516_v13  ;;  %v1568_v15 = vsel %vm827_vm4, %v1566_v9, %v1567_v10  ;;  %v1547_v17 = vrot.slane %v1545_v12, 1 }
 0x7e6   :  { %9618 = vmatmul.msk.bf16.vlgmr.msra.gmra.mxu3 %vm746_vm3, %v1568_v15 }
 0x7e7   :  { %v1533_v25 = vunpack.c.l.b16 %v1523_v14  ;;  %v1548_v26 = vsel %vm973_vm7, %v1543_v16, %v1547_v17  ;;  %v1551_v35 = vor.u32 %v1549_v29, %v1547_v17  ;;  %v13945_v14 = vld [vmem:[#allocation16] ss:$0 sm:$0xff] }
 0x7e8   :  { %1560 = vrot.lane.b32.xlu0 %v1548_v26, %s14847_s26  ;;  %v13050_v17 = vld [vmem:[#allocation17 + $0x78] sm:$0xff] }
 0x7e9   :  { %v1536_v28 = vpack.c.b16 %v1533_v25, %v1533_v25  ;;  %2030 = vmatpush.bf16.msrb.mxu0 %v13050_v17 }
 0x7eb   :  { %v1553_v31 = vshll.u32 %v1536_v28, 16  ;;  %v1557_v32 = vshrl.u32 %v1536_v28, 16  ;;  %v1569_v40 = vrot.slane %v1536_v28, 1 }
 0x7ed   :  { %v1555_v36 = vrot.slane %v1553_v31, 1  ;;  %v1570_v41 = vsel %vm827_vm4, %v1567_v10, %v1569_v40  ;;  %2031 = vmatpush.bf16.msrb.mxu0 %v13049_v46 }
 0x7ef   :  { %v1556_v37 = vsel %vm973_vm7, %v1551_v35, %v1555_v36  ;;  %v1559_v38 = vor.u32 %v1557_v32, %v1555_v36 }
 0x7f0   :  { %1562 = vrot.lane.b32.xlu1 %v1556_v37, %s14847_s26 }
 0x7f1   :  { %1564 = vrot.lane.b32.xlu2 %v1559_v38, %s14847_s26  ;;  %2032 = vmatpush.bf16.msrb.mxu0 %v13048_v48  ;;  %v9800_v48 = vld [vmem:[#allocation26 + $0x68] sm:$0xf0]  ;;  %s14881_s26 = smov [#allocation53]  }
 0x7f2   :  { %s9352_s28 = sshll.u32 %s14881_s26, 4  ;;  %s9353_s28 = int_to_ptr.vmem [resolvable:$true] %s9352_s28 }
 0x7f6   :  { %9619 = vmatmul.msk.bf16.gmra.mxu3 %vm746_vm3, %v1570_v41  ;;  %v15454_v41 = vld [vmem:[#allocation23] sm:$0xff] }
 0x806   :  { %9620 = vmatmul.msk.bf16.gmra.mxu3 %vm746_vm3, %v1569_v40 }
 0x816   :  { %9737 = vmatmul.msk.bf16.vlgmr.msrb.gmra.mxu3 %vm746_vm3, %v1548_v26 }
 0x826   :  { %9738 = vmatmul.msk.bf16.gmra.mxu3 %vm746_vm3, %v1556_v37 }
 0x836   :  { %9739 = vmatmul.msk.bf16.gmra.mxu3 %vm746_vm3, %v1559_v38 }
 0x84b   :  { %v1565_v56 = vpop.permute.xlu2 %1564 }
 0x84c   :  { %v1578_v59 = vsel %vm746_vm3, %v1536_v28, %v1565_v56  ;;  %v13044_v56 = vld [vmem:[#allocation17 + $0x48] sm:$0xff] }
 0x85a   :  { %v1561_v50 = vpop.permute.xlu0 %1560 }
 0x85b   :  { %v1572_v51 = vsel %vm746_vm3, %v15427_v1, %v1561_v50  ;;  %v13047_v50 = vld [vmem:[#allocation17 + $0x60] sm:$0xff] }
 0x85c   :  { %1697 = vmatmul.bf16.vlgmr.msra.gmra.mxu0 %v1572_v51  ;;  %v13054_v51 = vld [vmem:[#allocation17 + $0x98] sm:$0xff] }
 0x85d   :  { %2033 = vmatpush.bf16.msrb.mxu0 %v13047_v50 }
 0x862   :  { %v1563_v52 = vpop.permute.xlu1 %1562 }
 0x863   :  { %v1575_v54 = vsel %vm746_vm3, %v1535_v7, %v1563_v52  ;;  %v13046_v52 = vld [vmem:[#allocation17 + $0x58] sm:$0xff] }
 0x864   :  { %2034 = vmatpush.bf16.msrb.mxu0 %v13046_v52 }
 0x869   :  { %v15447_v53 = vpop.f32.mrf.mxu3 }
 0x86c   :  { %1702 = vmatmul.bf16.gmra.mxu0 %v1575_v54  ;;  %v13045_v54 = vld [vmem:[#allocation17 + $0x50] sm:$0xff] }
 0x86d   :  { %2035 = vmatpush.bf16.msrb.mxu0 %v13045_v54  ;;  %v9790_v54 = vld [vmem:[#allocation26 + $0x50] sm:$0xf] }
 0x871   :  { %v1723_v55 = vpop.f32.mrf.mxu3  ;;  %2036 = vmatpush.bf16.msrb.mxu0 %v13044_v56 }
 0x875   :  { %2037 = vmatpush.bf16.msrb.mxu0 %v13043_v58  ;;  %v13073_v58 = vld [vmem:[#allocation26 + $0x54] sm:$0xf] }
 0x879   :  { %v1726_v57 = vpop.f32.mrf.mxu3 }
 0x87c   :  { %1707 = vmatmul.bf16.gmra.mxu0 %v1578_v59 }
 0x881   :  { %v1728_v30 = vpop.f32.mrf.mxu3 }
 0x889   :  { %v1731_v18 = vpop.f32.mrf.mxu3 }
 0x891   :  { %v1733_v61 = vpop.f32.mrf.mxu3 }
 0x899   :  { %v2120_v63 = vpop.f32.mrf.mxu3 }
 0x89a   :  { %v2121_v9 = vadd.f32 %v13944_v2, %v2120_v63 }
 0x8a1   :  { %v2122_v0 = vpop.f32.mrf.mxu3 }
 0x8a2   :  { %v2123_v7 = vadd.f32 %v13944_v2, %v2122_v0 }
 0x8a9   :  { %v2125_v1 = vpop.f32.mrf.mxu3 }
 0x8aa   :  { %v2126_v6 = vadd.f32 %v13944_v2, %v2125_v1 }
 0x8b1   :  { %v2127_v23 = vpop.f32.mrf.mxu3 }
 0x8b2   :  { %v2128_v5 = vadd.f32 %v13944_v2, %v2127_v23 }
 0x8b9   :  { %v2130_v24 = vpop.f32.mrf.mxu3 }
 0x8ba   :  { %v2131_v3 = vadd.f32 %v13944_v2, %v2130_v24 }
 0x8bc   :  { %9740 = vmatpush.msk.msra.mxu2 %vm693_vm0, %v2131_v3 }
 0x8be   :  { %2149 = vmatpush.msra.mxu2 %v2128_v5 }
 0x8c0   :  { %2150 = vmatpush.msra.mxu2 %v2126_v6 }
 0x8c1   :  { %v2132_v8 = vpop.f32.mrf.mxu3 }
 0x8c2   :  { %2151 = vmatpush.msra.mxu2 %v2123_v7 }
 0x8c4   :  { %2152 = vmatpush.msra.mxu2 %v2121_v9 }
 0x8d9   :  { %v1698_v10 = vpop.f32.mrf.mxu0 }
 0x8da   :  { %v1699_v29 = vadd.f32 %v13945_v14, %v1698_v10 }
 0x8dc   :  { %v1722_v37 = vadd.f32 %v15447_v53, %v1699_v29  ;;  %v13053_v53 = vld [vmem:[#allocation17 + $0x90] sm:$0xff] }
 0x8de   :  { %v1735_v40 = vmax.f32 %v1722_v37, 0.0  ;;  %v13077_v37 = vld [vmem:[#allocation26 + $0x74] sm:$0xf] }
 0x8e1   :  { %v1700_v11 = vpop.f32.mrf.mxu0 }
 0x8e2   :  { %v1701_v26 = vadd.f32 %v13945_v14, %v1700_v11 }
 0x8e4   :  { %v1724_v33 = vadd.f32 %v1723_v55, %v1701_v26  ;;  %v13052_v55 = vld [vmem:[#allocation17 + $0x88] sm:$0xff] }
 0x8e6   :  { %v1736_v39 = vmax.f32 %v1724_v33, 0.0 }
 0x8e9   :  { %v1703_v12 = vpop.f32.mrf.mxu0 }
 0x8ea   :  { %v1704_v19 = vadd.f32 %v13945_v14, %v1703_v12 }
 0x8ec   :  { %v1727_v31 = vadd.f32 %v1726_v57, %v1704_v19  ;;  %v13051_v57 = vld [vmem:[#allocation17 + $0x80] sm:$0xff] }
 0x8ee   :  { %v1737_v38 = vmax.f32 %v1727_v31, 0.0  ;;  %v13946_v31 = vld [vmem:[#allocation19] ss:$0 sm:$0xff] }
 0x8f1   :  { %v1705_v13 = vpop.f32.mrf.mxu0 }
 0x8f2   :  { %v1706_v15 = vadd.f32 %v13945_v14, %v1705_v13 }
 0x8f4   :  { %v1729_v27 = vadd.f32 %v1728_v30, %v1706_v15 }
 0x8f6   :  { %v1738_v35 = vmax.f32 %v1729_v27, 0.0 }
 0x8f9   :  { %v1708_v16 = vpop.f32.mrf.mxu0 }
 0x8fa   :  { %v1709_v25 = vadd.f32 %v13945_v14, %v1708_v16 }
 0x8fc   :  { %v1732_v28 = vadd.f32 %v1731_v18, %v1709_v25 }
 0x8fe   :  { %v1739_v32 = vmax.f32 %v1732_v28, 0.0 }
 0x900   :  { %9621 = vmatpush.msk.msra.mxu1 %vm693_vm0, %v1739_v32 }
 0x901   :  { %v1710_v36 = vpop.f32.mrf.mxu0 }
 0x902   :  { %1767 = vmatpush.msra.mxu1 %v1738_v35  ;;  %v9806_v35 = vld [vmem:[#allocation26 + $0x70] sm:$0xf]  ;;  %v13078_v36 = vld [vmem:[#allocation26 + $0x74] sm:$0xf0] }
 0x904   :  { %1768 = vmatpush.msra.mxu1 %v1737_v38 }
 0x906   :  { %1769 = vmatpush.msra.mxu1 %v1736_v39 }
 0x908   :  { %1770 = vmatpush.msra.mxu1 %v1735_v40  ;;  %v9807_v40 = vor.u32 %v13078_v36, %v9806_v35  ;;  %v9918_v35 = vld [vmem:[#allocation26 + $0x150] sm:$0xf]  ;;  %v13106_v36 = vld [vmem:[#allocation26 + $0x154] sm:$0xf0] }
 0x909   :  { %9622 = vmatmul.msk.f32.vlgmr.msra.gmra.mxu1 %vm1183_vm8, %v15454_v41 }
 0x90a   :  { %2048 = vmatpush.bf16.msrb.mxu1 %v13058_v42  ;;  %v9798_v42 = vld [vmem:[#allocation26 + $0x60] sm:$0xf] }
 0x90e   :  { %2049 = vmatpush.bf16.msrb.mxu1 %v13057_v43  ;;  %v13076_v43 = vld [vmem:[#allocation26 + $0x64] sm:$0xf0] }
 0x90f   :  { %v9799_v50 = vor.u32 %v13076_v43, %v9798_v42  ;;  %v9768_v42 = vld [vmem:[#allocation26 + $0x28] sm:$0xf0]  ;;  %v9854_v43 = vld [vmem:[#allocation26 + $0xd0] sm:$0xf] }
 0x911   :  { %9623 = vmatmul.msk.f32.gmra.mxu1 %vm1183_vm8, %v1741_v44 }
 0x912   :  { %2050 = vmatpush.bf16.msrb.mxu1 %v13056_v47  ;;  %v13075_v47 = vld [vmem:[#allocation26 + $0x64] sm:$0xf] }
 0x916   :  { %2051 = vmatpush.bf16.msrb.mxu1 %v13055_v49 }
 0x919   :  { %9624 = vmatmul.msk.f32.gmra.mxu1 %vm1183_vm8, %v1742_v45 }
 0x91a   :  { %2052 = vmatpush.bf16.msrb.mxu1 %v13054_v51 }
 0x91e   :  { %2053 = vmatpush.bf16.msrb.mxu1 %v13053_v53  ;;  %v9803_v53 = vor.u32 %v13075_v47, %v9800_v48  ;;  %v9910_v47 = vld [vmem:[#allocation26 + $0x140] sm:$0xf]  ;;  %v13104_v48 = vld [vmem:[#allocation26 + $0x144] sm:$0xf0] }
 0x922   :  { %2054 = vmatpush.bf16.msrb.mxu1 %v13052_v55  ;;  %v13074_v55 = vld [vmem:[#allocation26 + $0x54] sm:$0xf0] }
 0x926   :  { %2055 = vmatpush.bf16.msrb.mxu1 %v13051_v57 }
 0x92a   :  { %2551 = vmatpush.bf16.msra.mxu1 %v9807_v40  ;;  %v13067_v40 = vld [vmem:[#allocation26 + $0x24] sm:$0xf] }
 0x92e   :  { %2552 = vmatpush.bf16.msra.mxu1 %v9799_v50  ;;  %v9758_v50 = vld [vmem:[#allocation26 + $0x10] sm:$0xf] }
 0x986   :  { %v1772_v59 = vpop.f32.mrf.mxu1 }
 0x987   :  { %v1781_v30 = vpack.c.bf16 %v1772_v59, %v1772_v59  ;;  %v9792_v59 = vld [vmem:[#allocation26 + $0x58] sm:$0xf0] }
 0x989   :  { %v1787_v18 = vunpack.c.l.b16 %v1781_v30 }
 0x98e   :  { %v1775_v60 = vpop.f32.mrf.mxu1 }
 0x98f   :  { %v1782_v4 = vpack.c.bf16 %v1775_v60, %v1775_v60 }
 0x991   :  { %v1788_v34 = vunpack.c.l.b16 %v1782_v4  ;;  %v9870_v4 = vld [vmem:[#allocation26 + $0xf0] sm:$0xf] }
 0x993   :  { %v1790_v20 = vpack.c.b16 %v1788_v34, %v1787_v18 }
 0x995   :  { %2020 = vmatmul.bf16.vlgmr.msrb.gmra.mxu2 %v1790_v20  ;;  %v1797_v62 = vshll.u32 %v1790_v20, 16  ;;  %v1811_v1 = vrot.slane %v1790_v20, 1  ;;  %v1795_v2 = vshrl.u32 %v1790_v20, 16 }
 0x996   :  { %v1778_v61 = vpop.f32.mrf.mxu1 }
 0x997   :  { %v1783_v21 = vpack.c.bf16 %v1778_v61, %v1778_v61  ;;  %v1799_v0 = vrot.slane %v1797_v62, 1  ;;  %v9791_v61 = vor.u32 %v13074_v55, %v9790_v54  ;;  %v9760_v54 = vld [vmem:[#allocation26 + $0x18] sm:$0xf0]  ;;  %v9846_v55 = vld [vmem:[#allocation26 + $0xc0] sm:$0xf] }
 0x999   :  { %v1789_v63 = vunpack.c.l.b16 %v1783_v21  ;;  %v1800_v5 = vor.u32 %v1799_v0, %v1795_v2  ;;  %v13094_v21 = vld [vmem:[#allocation26 + $0xf4] sm:$0xf0]  ;;  %v13072_v0 = vld [vmem:[#allocation26 + $0x44] sm:$0xf0]  ;;  %2553 = vmatpush.bf16.msra.mxu1 %v9791_v61  ;;  %v9752_v61 = vld [vmem:[#allocation26 + $0x8] sm:$0xf0] }
 0x99b   :  { %v1791_v22 = vpack.c.b16 %v1789_v63, %v1789_v63  ;;  %v9795_v63 = vor.u32 %v13073_v58, %v9792_v59  ;;  %v9902_v59 = vld [vmem:[#allocation26 + $0x130] sm:$0xf] }
 0x99d   :  { %v1812_v23 = vrot.slane %v1791_v22, 1  ;;  %v1802_v24 = vshll.u32 %v1791_v22, 16  ;;  %v1806_v8 = vshrl.u32 %v1791_v22, 16 }
 0x99f   :  { %v1813_v3 = vsel %vm827_vm4, %v1811_v1, %v1812_v23  ;;  %v1804_v6 = vrot.slane %v1802_v24, 1  ;;  %v9871_v1 = vor.u32 %v13094_v21, %v9870_v4  ;;  %v13071_v24 = vld [vmem:[#allocation26 + $0x44] sm:$0xf]  ;;  %v9750_v4 = vld [vmem:[#allocation26] sm:$0xf] }
 0x9a0   :  { %2056 = vmatmul.bf16.vlgmr.msrb.gmra.mxu1 %v1813_v3  ;;  %v9784_v3 = vld [vmem:[#allocation26 + $0x48] sm:$0xf0]  ;;  %v9838_v21 = vld [vmem:[#allocation26 + $0xb0] sm:$0xf] }
 0x9a1   :  { %v1805_v7 = vsel %vm973_vm7, %v1800_v5, %v1804_v6  ;;  %v1808_v9 = vor.u32 %v1806_v8, %v1804_v6  ;;  %v9934_v6 = vld [vmem:[#allocation26 + $0x170] sm:$0xf]  ;;  %2569 = vmatpush.bf16.msrb.mxu2 %v9871_v1  ;;  %v13100_v1 = vld [vmem:[#allocation26 + $0x124] sm:$0xf0] }
 0x9a2   :  { %2038 = vmatmul.bf16.vlgmr.msrb.gmra.mxu0 %v1805_v7  ;;  %v13110_v7 = vld [vmem:[#allocation26 + $0x174] sm:$0xf0] }
 0x9a5   :  { %2025 = vmatmul.bf16.gmra.mxu2 %v1791_v22  ;;  %v9782_v22 = vld [vmem:[#allocation26 + $0x40] sm:$0xf] }
 0x9a6   :  { %v9783_v8 = vor.u32 %v13072_v0, %v9782_v22  ;;  %v9894_v0 = vld [vmem:[#allocation26 + $0x120] sm:$0xf] }
 0x9a8   :  { %2554 = vmatpush.bf16.msra.mxu1 %v9783_v8  ;;  %v9886_v8 = vld [vmem:[#allocation26 + $0x110] sm:$0xf] }
 0x9b0   :  { %2061 = vmatmul.bf16.gmra.mxu1 %v1812_v23 }
 0x9b2   :  { %2043 = vmatmul.bf16.gmra.mxu0 %v1808_v9  ;;  %v9787_v9 = vor.u32 %v13071_v24, %v9784_v3  ;;  %v9872_v24 = vld [vmem:[#allocation26 + $0xf8] sm:$0xf0] }
 0x9b5   :  { %9741 = vmatmul.msk.f32.vlgmr.msra.gmra.mxu2 %vm1183_vm8, %v15454_v41  ;;  %v9808_v41 = vld [vmem:[#allocation26 + $0x78] sm:$0xf0] }
 0x9b6   :  { %v9811_v46 = vor.u32 %v13077_v37, %v9808_v41  ;;  %v9919_v37 = vor.u32 %v13106_v36, %v9918_v35  ;;  %v9848_v35 = vld [vmem:[#allocation26 + $0xc8] sm:$0xf0] }
 0x9b8   :  { %2605 = vmatpush.bf16.msra.mxu3 %v9811_v46 }
 0x9bc   :  { %2606 = vmatpush.bf16.msra.mxu3 %v9803_v53 }
 0x9bd   :  { %9742 = vmatmul.msk.f32.gmra.mxu2 %vm1183_vm8, %v1741_v44 }
 0x9c0   :  { %2607 = vmatpush.bf16.msra.mxu3 %v9795_v63 }
 0x9c4   :  { %2608 = vmatpush.bf16.msra.mxu3 %v9787_v9  ;;  %v13098_v9 = vld [vmem:[#allocation26 + $0x114] sm:$0xf0] }
 0x9c5   :  { %9743 = vmatmul.msk.f32.gmra.mxu2 %vm1183_vm8, %v1742_v45 }
 0xa18   :  { %v2021_v10 = vpop.f32.mrf.mxu2 }
 0xa19   :  { %v2022_v38 = vadd.f32 %v13946_v31, %v2021_v10 }
 0xa1d   :  { %v2057_v11 = vpop.f32.mrf.mxu1 }
 0xa1f   :  { %v2039_v12 = vpop.f32.mrf.mxu0 }
 0xa20   :  { %v2023_v13 = vpop.f32.mrf.mxu2  ;;  %v2040_v49 = vadd.f32 %v2039_v12, %v2022_v38  ;;  %v9935_v12 = vor.u32 %v13110_v7, %v9934_v6  ;;  %v9766_v38 = vld [vmem:[#allocation26 + $0x20] sm:$0xf]  ;;  %v13084_v6 = vld [vmem:[#allocation26 + $0xa4] sm:$0xf0] }
 0xa21   :  { %v2024_v33 = vadd.f32 %v13946_v31, %v2023_v13  ;;  %v9926_v13 = vld [vmem:[#allocation26 + $0x160] sm:$0xf] }
 0xa22   :  { %v2058_v18 = vadd.f32 %v2057_v11, %v2040_v49  ;;  %v2180_v11 = vld [vmem:[#allocation25] sm:$0xff]  ;;  %v9911_v49 = vor.u32 %v13104_v48, %v9910_v47  ;;  %v13105_v48 = vld [vmem:[#allocation26 + $0x154] sm:$0xf] }
 0xa23   :  { %v9832_v47 = vld [vmem:[#allocation26 + $0xa8] sm:$0xf0] }
 0xa25   :  { %v2059_v14 = vpop.f32.mrf.mxu1 }
 0xa27   :  { %v2041_v15 = vpop.f32.mrf.mxu0 }
 0xa28   :  { %v2026_v16 = vpop.f32.mrf.mxu2  ;;  %v2042_v44 = vadd.f32 %v2041_v15, %v2024_v33 }
 0xa29   :  { %v2027_v32 = vadd.f32 %v13946_v31, %v2026_v16  ;;  %v2181_v16 = vld [vmem:[#allocation25 + $0x8] sm:$0xff]  ;;  %v13092_v31 = vld [vmem:[#allocation26 + $0xe4] sm:$0xf0] }
 0xa2a   :  { %v2060_v30 = vadd.f32 %v2059_v14, %v2042_v44  ;;  %v13108_v14 = vld [vmem:[#allocation26 + $0x164] sm:$0xf0]  ;;  %v13090_v44 = vld [vmem:[#allocation26 + $0xd4] sm:$0xf0] }
 0xa2b   :  { %v9927_v15 = vor.u32 %v13108_v14, %v9926_v13  ;;  %v9855_v46 = vor.u32 %v13090_v44, %v9854_v43  ;;  %v9822_v14 = vld [vmem:[#allocation26 + $0x90] sm:$0xf]  ;;  %v13107_v43 = vld [vmem:[#allocation26 + $0x164] sm:$0xf]  ;;  %v9928_v44 = vld [vmem:[#allocation26 + $0x168] sm:$0xf0] }
 0xa2d   :  { %v2062_v17 = vpop.f32.mrf.mxu1 }
 0xa2f   :  { %v2044_v19 = vpop.f32.mrf.mxu0 }
 0xa30   :  { %v2028_v25 = vpop.f32.mrf.mxu2  ;;  %v2045_v39 = vadd.f32 %v2044_v19, %v2027_v32  ;;  %v9774_v19 = vld [vmem:[#allocation26 + $0x30] sm:$0xf] }
 0xa31   :  { %v13070_v25 = vld [vmem:[#allocation26 + $0x34] sm:$0xf0] }
 0xa32   :  { %v2063_v56 = vadd.f32 %v2062_v17, %v2045_v39  ;;  %v2182_v17 = vld [vmem:[#allocation25 + $0x10] sm:$0xf]  ;;  %v13068_v39 = vld [vmem:[#allocation26 + $0x24] sm:$0xf0] }
 0xa33   :  { %v9767_v41 = vor.u32 %v13068_v39, %v9766_v38  ;;  %v9936_v38 = vld [vmem:[#allocation26 + $0x178] sm:$0xf0] }
 0xa35   :  { %v2064_v26 = vpop.f32.mrf.mxu1 }
 0xa36   :  { %v13069_v26 = vld [vmem:[#allocation26 + $0x34] sm:$0xf] }
 0xa37   :  { %v2046_v27 = vpop.f32.mrf.mxu0 }
 0xa38   :  { %v2154_v28 = vpop.f32.mrf.mxu2  ;;  %v9775_v27 = vor.u32 %v13070_v25, %v9774_v19  ;;  %v13096_v19 = vld [vmem:[#allocation26 + $0x104] sm:$0xf0] }
 0xa39   :  { %v2166_v51 = vrot.slane %v2154_v28, 1  ;;  %v9776_v28 = vld [vmem:[#allocation26 + $0x38] sm:$0xf0] }
 0xa3a   :  { %v9779_v32 = vor.u32 %v13069_v26, %v9776_v28  ;;  %2555 = vmatpush.bf16.msra.mxu1 %v9775_v27  ;;  %v13089_v26 = vld [vmem:[#allocation26 + $0xd4] sm:$0xf]  ;;  %v9856_v27 = vld [vmem:[#allocation26 + $0xd8] sm:$0xf0]  ;;  %v9814_v28 = vld [vmem:[#allocation26 + $0x80] sm:$0xf] }
 0xa3c   :  { %2609 = vmatpush.bf16.msra.mxu3 %v9779_v32 }
 0xa3e   :  { %2556 = vmatpush.bf16.msra.mxu1 %v9767_v41  ;;  %v9840_v41 = vld [vmem:[#allocation26 + $0xb8] sm:$0xf0] }
 0xa40   :  { %v2157_v29 = vpop.f32.mrf.mxu2 }
 0xa41   :  { %v2167_v45 = vrot.slane %v2157_v29, 1  ;;  %v9862_v29 = vld [vmem:[#allocation26 + $0xe0] sm:$0xf] }
 0xa42   :  { %v9863_v33 = vor.u32 %v13092_v31, %v9862_v29  ;;  %v9859_v29 = vor.u32 %v13089_v26, %v9856_v27  ;;  %v13080_v31 = vld [vmem:[#allocation26 + $0x84] sm:$0xf0] }
 0xa43   :  { %v2168_v60 = vsel %vm827_vm4, %v2166_v51, %v2167_v45  ;;  %v13066_v51 = vld [vmem:[#allocation26 + $0x14] sm:$0xf0]  ;;  %v9815_v32 = vor.u32 %v13080_v31, %v9814_v28 }
 0xa44   :  { %v2174_v2 = vadd.f32 %v2168_v60, %v2058_v18  ;;  %2570 = vmatpush.bf16.msrb.mxu2 %v9863_v33  ;;  %v9759_v53 = vor.u32 %v13066_v51, %v9758_v50  ;;  %v13064_v18 = vld [vmem:[#allocation26 + $0x4] sm:$0xf0]  ;;  %v13087_v33 = vld [vmem:[#allocation26 + $0xc4] sm:$0xf]  ;;  %v9920_v51 = vld [vmem:[#allocation26 + $0x158] sm:$0xf0] }
 0xa45   :  { %v9851_v36 = vor.u32 %v13087_v33, %v9848_v35 }
 0xa46   :  { %v2177_v10 = vmax.f32 %v2174_v2, 0.0  ;;  %2557 = vmatpush.bf16.msra.mxu1 %v9759_v53  ;;  %v13093_v2 = vld [vmem:[#allocation26 + $0xf4] sm:$0xf] }
 0xa47   :  { %v9875_v3 = vor.u32 %v13093_v2, %v9872_v24  ;;  %v13081_v53 = vld [vmem:[#allocation26 + $0x94] sm:$0xf] }
 0xa48   :  { %v2160_v52 = vpop.f32.mrf.mxu2  ;;  %2571 = vmatpush.bf16.msrb.mxu2 %v9855_v46  ;;  %v13083_v46 = vld [vmem:[#allocation26 + $0xa4] sm:$0xf]  ;;  %v13097_v2 = vld [vmem:[#allocation26 + $0x114] sm:$0xf] }
 0xa49   :  { %v2169_v57 = vrot.slane %v2160_v52, 1  ;;  %v13065_v52 = vld [vmem:[#allocation26 + $0x14] sm:$0xf]  ;;  %v9835_v50 = vor.u32 %v13083_v46, %v9832_v47 }
 0xa4b   :  { %v2176_v34 = vadd.f32 %v2169_v57, %v2063_v56  ;;  %v2170_v20 = vsel %vm827_vm4, %v2167_v45, %v2169_v57  ;;  %v9771_v45 = vor.u32 %v13067_v40, %v9768_v42  ;;  %v13088_v56 = vld [vmem:[#allocation26 + $0xc4] sm:$0xf0]  ;;  %v9763_v57 = vor.u32 %v13065_v52, %v9760_v54  ;;  %v13085_v40 = vld [vmem:[#allocation26 + $0xb4] sm:$0xf]  ;;  %v9824_v54 = vld [vmem:[#allocation26 + $0x98] sm:$0xf0] }
 0xa4c   :  { %v2175_v62 = vadd.f32 %v2170_v20, %v2060_v30  ;;  %v9847_v58 = vor.u32 %v13088_v56, %v9846_v55  ;;  %v13102_v30 = vld [vmem:[#allocation26 + $0x134] sm:$0xf0]  ;;  %v9751_v20 = vor.u32 %v13064_v18, %v9750_v4  ;;  %v9843_v42 = vor.u32 %v13085_v40, %v9840_v41  ;;  %v13103_v55 = vld [vmem:[#allocation26 + $0x144] sm:$0xf]  ;;  %v9912_v56 = vld [vmem:[#allocation26 + $0x148] sm:$0xf0] }
 0xa4d   :  { %v2179_v23 = vmax.f32 %v2176_v34, 0.0  ;;  %2610 = vmatpush.bf16.msra.mxu3 %v9771_v45  ;;  %v9903_v60 = vor.u32 %v13102_v30, %v9902_v59  ;;  %v13063_v34 = vld [vmem:[#allocation26 + $0x4] sm:$0xf]  ;;  %v9931_v45 = vor.u32 %v13107_v43, %v9928_v44  ;;  %v9923_v52 = vor.u32 %v13105_v48, %v9920_v51  ;;  %v9816_v18 = vld [vmem:[#allocation26 + $0x88] sm:$0xf0] }
 0xa4e   :  { %v2178_v5 = vmax.f32 %v2175_v62, 0.0  ;;  %2572 = vmatpush.bf16.msrb.mxu2 %v9847_v58  ;;  %v13086_v62 = vld [vmem:[#allocation26 + $0xb4] sm:$0xf0]  ;;  %v9755_v63 = vor.u32 %v13063_v34, %v9752_v61  ;;  %2558 = vmatpush.bf16.msra.mxu1 %v9751_v20  ;;  %v9915_v58 = vor.u32 %v13103_v55, %v9912_v56  ;;  %v13079_v4 = vld [vmem:[#allocation26 + $0x84] sm:$0xf] }
 0xa4f   :  { %9744 = vmatpush.msk.msra.mxu0 %vm693_vm0, %v2179_v23  ;;  %v9839_v22 = vor.u32 %v13086_v62, %v9838_v21  ;;  %v9895_v23 = vor.u32 %v13100_v1, %v9894_v0  ;;  %v9819_v34 = vor.u32 %v13079_v4, %v9816_v18  ;;  %v13101_v20 = vld [vmem:[#allocation26 + $0x134] sm:$0xf]  ;;  %v9904_v61 = vld [vmem:[#allocation26 + $0x138] sm:$0xf0]  ;;  %v13099_v0 = vld [vmem:[#allocation26 + $0x124] sm:$0xf] }
 0xa50   :  { %v9896_v1 = vld [vmem:[#allocation26 + $0x128] sm:$0xf0] }
 0xa51   :  { %2210 = vmatpush.msra.mxu0 %v2178_v5  ;;  %2611 = vmatpush.bf16.msra.mxu3 %v9763_v57  ;;  %v9830_v5 = vld [vmem:[#allocation26 + $0xa0] sm:$0xf]  ;;  %v9827_v57 = vor.u32 %v13081_v53, %v9824_v54 }
 0xa52   :  { %2573 = vmatpush.bf16.msrb.mxu2 %v9839_v22  ;;  %v9831_v7 = vor.u32 %v13084_v6, %v9830_v5  ;;  %2623 = vmatpush.bf16.msrb.mxu1 %v9875_v3  ;;  %v9888_v3 = vld [vmem:[#allocation26 + $0x118] sm:$0xf0] }
 0xa53   :  { %2211 = vmatpush.msra.mxu0 %v2177_v10  ;;  %v9887_v10 = vor.u32 %v13098_v9, %v9886_v8  ;;  %v13095_v8 = vld [vmem:[#allocation26 + $0x104] sm:$0xf]  ;;  %v9880_v9 = vld [vmem:[#allocation26 + $0x108] sm:$0xf0] }
 0xa54   :  { %9745 = vmatmul.msk.f32.vlgmr.msra.gmra.mxu0 %vm2183_vm9, %v2180_v11  ;;  %v13091_v11 = vld [vmem:[#allocation26 + $0xe4] sm:$0xf] }
 0xa55   :  { %2587 = vmatpush.bf16.msrb.mxu0 %v9935_v12  ;;  %2612 = vmatpush.bf16.msra.mxu3 %v9755_v63  ;;  %v9864_v12 = vld [vmem:[#allocation26 + $0xe8] sm:$0xf0]  ;;  %v9907_v63 = vor.u32 %v13101_v20, %v9904_v61 }
 0xa56   :  { %2574 = vmatpush.bf16.msrb.mxu2 %v9831_v7  ;;  %v9867_v13 = vor.u32 %v13091_v11, %v9864_v12  ;;  %v9891_v7 = vor.u32 %v13097_v2, %v9888_v3  ;;  %v10060_v3 = vld [vmem:[#allocation29 + $0xe0] sm:$0xf] }
 0xa58   :  { %2624 = vmatpush.bf16.msrb.mxu1 %v9867_v13  ;;  %v9883_v13 = vor.u32 %v13095_v8, %v9880_v9  ;;  %v10132_v8 = vld [vmem:[#allocation29 + $0x170] sm:$0xf]  ;;  %v13158_v9 = vld [vmem:[#allocation29 + $0x174] sm:$0xf0] }
 0xa59   :  { %2588 = vmatpush.bf16.msrb.mxu0 %v9927_v15  ;;  %v13082_v15 = vld [vmem:[#allocation26 + $0x94] sm:$0xf0] }
 0xa5c   :  { %9746 = vmatmul.msk.f32.gmra.mxu0 %vm2183_vm9, %v2181_v16  ;;  %v9823_v16 = vor.u32 %v13082_v15, %v9822_v14  ;;  %2625 = vmatpush.bf16.msrb.mxu1 %v9859_v29 }
 0xa5d   :  { %2589 = vmatpush.bf16.msrb.mxu0 %v9919_v37  ;;  %v13109_v37 = vld [vmem:[#allocation26 + $0x174] sm:$0xf] }
 0xa5e   :  { %2575 = vmatpush.bf16.msrb.mxu2 %v9823_v16  ;;  %v9939_v39 = vor.u32 %v13109_v37, %v9936_v38 }
 0xa60   :  { %2626 = vmatpush.bf16.msrb.mxu1 %v9851_v36 }
 0xa61   :  { %2590 = vmatpush.bf16.msrb.mxu0 %v9911_v49 }
 0xa62   :  { %2576 = vmatpush.bf16.msrb.mxu2 %v9815_v32 }
 0xa64   :  { %9747 = vmatmul.msk.f32.gmra.mxu0 %vm2183_vm9, %v2182_v17  ;;  %v9878_v17 = vld [vmem:[#allocation26 + $0x100] sm:$0xf]  ;;  %2627 = vmatpush.bf16.msrb.mxu1 %v9843_v42 }
 0xa65   :  { %2591 = vmatpush.bf16.msrb.mxu0 %v9903_v60  ;;  %v9879_v25 = vor.u32 %v13096_v19, %v9878_v17  ;;  %v15488_v42 = vld [vmem:[#allocation28] sm:$0x3] }
 0xa66   :  { %2641 = vmatpush.bf16.msra.mxu2 %v9939_v39 }
 0xa68   :  { %2628 = vmatpush.bf16.msrb.mxu1 %v9835_v50 }
 0xa69   :  { %2592 = vmatpush.bf16.msrb.mxu0 %v9895_v23  ;;  %v9899_v23 = vor.u32 %v13099_v0, %v9896_v1  ;;  %v13142_v1 = vld [vmem:[#allocation29 + $0xf4] sm:$0xf0] }
 0xa6a   :  { %2642 = vmatpush.bf16.msra.mxu2 %v9931_v45  ;;  %v2307_v45 = vperm.slane %v15488_v42, 0 }
 0xa6c   :  { %2629 = vmatpush.bf16.msrb.mxu1 %v9827_v57 }
 0xa6d   :  { %2593 = vmatpush.bf16.msrb.mxu0 %v9887_v10 }
 0xa6e   :  { %2643 = vmatpush.bf16.msra.mxu2 %v9923_v52 }
 0xa70   :  { %2630 = vmatpush.bf16.msrb.mxu1 %v9819_v34  ;;  %v15496_v34 = vld [vmem:[#allocation35] sm:$0xff] }
 0xa71   :  { %2594 = vmatpush.bf16.msrb.mxu0 %v9879_v25 }
 0xa72   :  { %2644 = vmatpush.bf16.msra.mxu2 %v9915_v58 }
 0xa76   :  { %2645 = vmatpush.bf16.msra.mxu2 %v9907_v63  ;;  %v10068_v63 = vld [vmem:[#allocation29 + $0xf0] sm:$0xf] }
 0xa77   :  { %v10069_v2 = vor.u32 %v13142_v1, %v10068_v63  ;;  %v10028_v63 = vld [vmem:[#allocation29 + $0xa0] sm:$0xf]  ;;  %v10196_v1 = vld [vmem:[#allocation29 + $0x1f0] sm:$0xf] }
 0xa7a   :  { %2646 = vmatpush.bf16.msra.mxu2 %v9899_v23  ;;  %v9996_v23 = vld [vmem:[#allocation29 + $0x60] sm:$0xf] }
 0xa7e   :  { %2647 = vmatpush.bf16.msra.mxu2 %v9891_v7 }
 0xa82   :  { %2648 = vmatpush.bf16.msra.mxu2 %v9883_v13  ;;  %v13122_v13 = vld [vmem:[#allocation29 + $0x54] sm:$0xf0] }
 0xad1   :  { %v2213_v49 = vpop.f32.mrf.mxu0 }
 0xad2   :  { %v2222_v59 = vpack.c.bf16 %v2213_v49, %v2213_v49 }
 0xad4   :  { %v2228_v21 = vunpack.c.l.b16 %v2222_v59 }
 0xad9   :  { %v2216_v30 = vpop.f32.mrf.mxu0 }
 0xada   :  { %v2223_v60 = vpack.c.bf16 %v2216_v30, %v2216_v30 }
 0xadc   :  { %v2229_v62 = vunpack.c.l.b16 %v2223_v60 }
 0xade   :  { %v2231_v22 = vpack.c.b16 %v2229_v62, %v2228_v21  ;;  %v10004_v21 = vld [vmem:[#allocation29 + $0x70] sm:$0xf]  ;;  %v13126_v62 = vld [vmem:[#allocation29 + $0x74] sm:$0xf0] }
 0xadf   :  { %v10005_v0 = vor.u32 %v13126_v62, %v10004_v21  ;;  %v9964_v62 = vld [vmem:[#allocation29 + $0x20] sm:$0xf] }
 0xae0   :  { %2559 = vmatmul.bf16.vlgmr.msra.gmra.mxu1 %v2231_v22  ;;  %2613 = vmatmul.bf16.vlgmr.msra.gmra.mxu3 %v2231_v22  ;;  %v2238_v6 = vshll.u32 %v2231_v22, 16  ;;  %v2252_v14 = vrot.slane %v2231_v22, 1  ;;  %v2236_v16 = vshrl.u32 %v2231_v22, 16  ;;  %v15502_v22 = vld [vmem:[#allocation35 + $0x8] sm:$0xf] }
 0xae1   :  { %v2219_v24 = vpop.f32.mrf.mxu0  ;;  %3339 = vmatpush.bf16.msra.mxu1 %v10005_v0  ;;  %v13132_v0 = vld [vmem:[#allocation29 + $0xa4] sm:$0xf0] }
 0xae2   :  { %v2224_v5 = vpack.c.bf16 %v2219_v24, %v2219_v24  ;;  %v2240_v12 = vrot.slane %v2238_v6, 1  ;;  %v13124_v24 = vld [vmem:[#allocation29 + $0x64] sm:$0xf0] }
 0xae3   :  { %v9997_v7 = vor.u32 %v13124_v24, %v9996_v23  ;;  %v13174_v23 = vld [vmem:[#allocation29 + $0x1f4] sm:$0xf0] }
 0xae4   :  { %v2230_v10 = vunpack.c.l.b16 %v2224_v5  ;;  %v2241_v25 = vor.u32 %v2240_v12, %v2236_v16  ;;  %v13140_v5 = vld [vmem:[#allocation29 + $0xe4] sm:$0xf0]  ;;  %v9988_v12 = vld [vmem:[#allocation29 + $0x50] sm:$0xf]  ;;  %v10124_v16 = vld [vmem:[#allocation29 + $0x160] sm:$0xf] }
 0xae5   :  { %3340 = vmatpush.bf16.msra.mxu1 %v9997_v7  ;;  %v9956_v7 = vld [vmem:[#allocation29 + $0x10] sm:$0xf] }
 0xae6   :  { %v2232_v11 = vpack.c.b16 %v2230_v10, %v2230_v10  ;;  %v10061_v10 = vor.u32 %v13140_v5, %v10060_v3  ;;  %v10092_v3 = vld [vmem:[#allocation29 + $0x120] sm:$0xf]  ;;  %v13148_v5 = vld [vmem:[#allocation29 + $0x124] sm:$0xf0] }
 0xae8   :  { %v2253_v15 = vrot.slane %v2232_v11, 1  ;;  %v2243_v17 = vshll.u32 %v2232_v11, 16  ;;  %v2247_v28 = vshrl.u32 %v2232_v11, 16 }
 0xaea   :  { %v2254_v19 = vsel %vm827_vm4, %v2252_v14, %v2253_v15  ;;  %v2245_v26 = vrot.slane %v2243_v17, 1  ;;  %v10052_v14 = vld [vmem:[#allocation29 + $0xd0] sm:$0xf] }
 0xaeb   :  { %2595 = vmatmul.bf16.vlgmr.msrb.gmra.mxu0 %v2254_v19 }
 0xaec   :  { %v15474_v27 = vsel %vm973_vm7, %v2241_v25, %v2245_v26  ;;  %v15477_v29 = vor.u32 %v2247_v28, %v2245_v26  ;;  %v9989_v25 = vor.u32 %v13122_v13, %v9988_v12  ;;  %v9980_v28 = vld [vmem:[#allocation29 + $0x40] sm:$0xf] }
 0xaed   :  { %2577 = vmatmul.bf16.vlgmr.msrb.gmra.mxu2 %v15474_v27  ;;  %v10188_v13 = vld [vmem:[#allocation29 + $0x1e0] sm:$0xf] }
 0xaee   :  { %3353 = vmatpush.bf16.msrb.mxu2 %v10069_v2  ;;  %3341 = vmatpush.bf16.msra.mxu1 %v9989_v25  ;;  %v10180_v25 = vld [vmem:[#allocation29 + $0x1d0] sm:$0xf] }
 0xaf0   :  { %2564 = vmatmul.bf16.gmra.mxu1 %v2232_v11  ;;  %2618 = vmatmul.bf16.gmra.mxu3 %v2232_v11  ;;  %v10133_v11 = vor.u32 %v13158_v9, %v10132_v8  ;;  %v13114_v8 = vld [vmem:[#allocation29 + $0x14] sm:$0xf0] }
 0xaf2   :  { %3354 = vmatpush.bf16.msrb.mxu2 %v10061_v10  ;;  %v10020_v10 = vld [vmem:[#allocation29 + $0x90] sm:$0xf] }
 0xafb   :  { %2600 = vmatmul.bf16.gmra.mxu0 %v2253_v15 }
 0xafd   :  { %2582 = vmatmul.bf16.gmra.mxu2 %v15477_v29 }
 0xb00   :  { %2631 = vmatmul.bf16.vlgmr.msrb.gmra.mxu1 %v15474_v27 }
 0xb0d   :  { %2649 = vmatmul.bf16.vlgmr.msra.gmra.mxu2 %v2254_v19  ;;  %v13156_v19 = vld [vmem:[#allocation29 + $0x164] sm:$0xf0] }
 0xb0e   :  { %v10125_v26 = vor.u32 %v13156_v19, %v10124_v16  ;;  %v9957_v16 = vor.u32 %v13114_v8, %v9956_v7  ;;  %v13146_v19 = vld [vmem:[#allocation29 + $0x114] sm:$0xf0]  ;;  %v10300_v7 = vld [vmem:[#allocation29 + $0x2c0] sm:$0xf]  ;;  %v13200_v8 = vld [vmem:[#allocation29 + $0x2c4] sm:$0xf0] }
 0xb10   :  { %2636 = vmatmul.bf16.gmra.mxu1 %v15477_v29 }
 0xb1d   :  { %2654 = vmatmul.bf16.gmra.mxu2 %v2253_v15  ;;  %v13138_v15 = vld [vmem:[#allocation29 + $0xd4] sm:$0xf0] }
 0xb5d   :  { %v2560_v31 = vpop.f32.mrf.mxu1 }
 0xb5e   :  { %v2561_v49 = vadd.f32 %v2560_v31, %v2307_v45  ;;  %v10053_v31 = vor.u32 %v13138_v15, %v10052_v14  ;;  %v13172_v14 = vld [vmem:[#allocation29 + $0x1e4] sm:$0xf0]  ;;  %v10093_v15 = vor.u32 %v13148_v5, %v10092_v3  ;;  %v10236_v5 = vld [vmem:[#allocation29 + $0x240] sm:$0xf] }
 0xb60   :  { %3355 = vmatpush.bf16.msrb.mxu2 %v10053_v31  ;;  %v13112_v31 = vld [vmem:[#allocation29 + $0x4] sm:$0xf0] }
 0xb63   :  { %v15482_v32 = vpop.f32.mrf.mxu3 }
 0xb65   :  { %v2562_v33 = vpop.f32.mrf.mxu1 }
 0xb66   :  { %v2563_v47 = vadd.f32 %v2562_v33, %v2307_v45  ;;  %v13120_v33 = vld [vmem:[#allocation29 + $0x44] sm:$0xf0] }
 0xb68   :  { %v2596_v35 = vpop.f32.mrf.mxu0 }
 0xb6b   :  { %v15484_v36 = vpop.f32.mrf.mxu3 }
 0xb6d   :  { %v2565_v37 = vpop.f32.mrf.mxu1 }
 0xb6e   :  { %v2566_v50 = vadd.f32 %v2565_v37, %v2307_v45  ;;  %v13154_v37 = vld [vmem:[#allocation29 + $0x154] sm:$0xf0] }
 0xb70   :  { %v2578_v38 = vpop.f32.mrf.mxu2  ;;  %v2598_v39 = vpop.f32.mrf.mxu0 }
 0xb71   :  { %v2579_v54 = vadd.f32 %v2578_v38, %v2561_v49  ;;  %v2308_v38 = vperm.slane %v15488_v42, 1  ;;  %v13152_v49 = vld [vmem:[#allocation29 + $0x144] sm:$0xf0] }
 0xb73   :  { %v15486_v40 = vpop.f32.mrf.mxu3  ;;  %v2597_v58 = vadd.f32 %v2596_v35, %v2579_v54  ;;  %v10116_v35 = vld [vmem:[#allocation29 + $0x150] sm:$0xf] }
 0xb74   :  { %v2620_v45 = vadd.f32 %v15486_v40, %v2308_v38 }
 0xb75   :  { %v2567_v41 = vpop.f32.mrf.mxu1  ;;  %v2659_v18 = vmax.f32 %v2597_v58, 0.0 }
 0xb76   :  { %v13136_v41 = vld [vmem:[#allocation29 + $0xc4] sm:$0xf0] }
 0xb78   :  { %v2580_v43 = vpop.f32.mrf.mxu2  ;;  %v2601_v44 = vpop.f32.mrf.mxu0 }
 0xb79   :  { %v2581_v51 = vadd.f32 %v2580_v43, %v2563_v47  ;;  %v10117_v43 = vor.u32 %v13154_v37, %v10116_v35  ;;  %v10108_v47 = vld [vmem:[#allocation29 + $0x140] sm:$0xf]  ;;  %v13170_v35 = vld [vmem:[#allocation29 + $0x1d4] sm:$0xf0] }
 0xb7a   :  { %v10012_v37 = vld [vmem:[#allocation29 + $0x80] sm:$0xf] }
 0xb7b   :  { %v2621_v46 = vpop.f32.mrf.mxu3  ;;  %v2599_v56 = vadd.f32 %v2598_v39, %v2581_v51  ;;  %v10044_v39 = vld [vmem:[#allocation29 + $0xc0] sm:$0xf]  ;;  %v9972_v51 = vld [vmem:[#allocation29 + $0x30] sm:$0xf] }
 0xb7c   :  { %v9981_v46 = vor.u32 %v13120_v33, %v9980_v28  ;;  %v9948_v28 = vld [vmem:[#allocation29] sm:$0xf]  ;;  %v10189_v33 = vor.u32 %v13172_v14, %v10188_v13 }
 0xb7d   :  { %v15491_v48 = vpop.f32.mrf.mxu1  ;;  %v2661_v60 = vmax.f32 %v2599_v56, 0.0  ;;  %v13134_v56 = vld [vmem:[#allocation29 + $0xb4] sm:$0xf0]  ;;  %v10140_v14 = vld [vmem:[#allocation29 + $0x180] sm:$0xf] }
 0xb7e   :  { %3342 = vmatpush.bf16.msra.mxu1 %v9981_v46  ;;  %v13206_v46 = vld [vmem:[#allocation29 + $0x2f4] sm:$0xf0] }
 0xb80   :  { %v2583_v52 = vpop.f32.mrf.mxu2  ;;  %v2603_v53 = vpop.f32.mrf.mxu0 }
 0xb81   :  { %v2584_v55 = vadd.f32 %v2583_v52, %v2566_v50  ;;  %v10045_v50 = vor.u32 %v13136_v41, %v10044_v39  ;;  %v13118_v52 = vld [vmem:[#allocation29 + $0x34] sm:$0xf0]  ;;  %v2615_v53 = vadd.f32 %v15482_v32, %v2308_v38  ;;  %v13116_v32 = vld [vmem:[#allocation29 + $0x24] sm:$0xf0]  ;;  %v10260_v39 = vld [vmem:[#allocation29 + $0x270] sm:$0xf] }
 0xb82   :  { %v9965_v24 = vor.u32 %v13116_v32, %v9964_v62  ;;  %v13190_v41 = vld [vmem:[#allocation29 + $0x274] sm:$0xf0] }
 0xb83   :  { %v2602_v57 = vadd.f32 %v2601_v44, %v2584_v55  ;;  %v2617_v44 = vadd.f32 %v15484_v36, %v2308_v38  ;;  %v10036_v55 = vld [vmem:[#allocation29 + $0xb0] sm:$0xf]  ;;  %v10109_v36 = vor.u32 %v13152_v49, %v10108_v47  ;;  %v2633_v40 = vadd.f32 %v15491_v48, %v2615_v53  ;;  %3356 = vmatpush.bf16.msrb.mxu2 %v10045_v50  ;;  %v13128_v38 = vld [vmem:[#allocation29 + $0x84] sm:$0xf0]  ;;  %v10076_v47 = vld [vmem:[#allocation29 + $0x100] sm:$0xf] }
 0xb84   :  { %v10037_v21 = vor.u32 %v13134_v56, %v10036_v55  ;;  %v10013_v49 = vor.u32 %v13128_v38, %v10012_v37  ;;  %v13125_v50 = vld [vmem:[#allocation29 + $0x74] sm:$0xf]  ;;  %v10172_v53 = vld [vmem:[#allocation29 + $0x1c0] sm:$0xf]  ;;  %v13166_v32 = vld [vmem:[#allocation29 + $0x1b4] sm:$0xf0] }
 0xb85   :  { %v2663_v59 = vmax.f32 %v2602_v57, 0.0  ;;  %v15493_v30 = vpop.f32.mrf.mxu1  ;;  %v10252_v56 = vld [vmem:[#allocation29 + $0x260] sm:$0xf]  ;;  %v13137_v37 = vld [vmem:[#allocation29 + $0xd4] sm:$0xf] }
 0xb86   :  { %v2635_v42 = vadd.f32 %v15493_v30, %v2617_v44 }
 0xb87   :  { %9940 = vmatpush.msk.msra.mxu0 %vm693_vm0, %v2663_v59  ;;  %3357 = vmatpush.bf16.msrb.mxu2 %v10037_v21  ;;  %v10164_v21 = vld [vmem:[#allocation29 + $0x1b0] sm:$0xf] }
 0xb88   :  { %v2585_v4 = vpop.f32.mrf.mxu2 }
 0xb89   :  { %2693 = vmatpush.msra.mxu0 %v2661_v60  ;;  %v9973_v60 = vor.u32 %v13118_v52, %v9972_v51  ;;  %v10100_v4 = vld [vmem:[#allocation29 + $0x130] sm:$0xf]  ;;  %v10006_v51 = vld [vmem:[#allocation29 + $0x78] sm:$0xf0]  ;;  %v10181_v52 = vor.u32 %v13170_v35, %v10180_v25 }
 0xb8a   :  { %v9990_v35 = vld [vmem:[#allocation29 + $0x58] sm:$0xf0] }
 0xb8b   :  { %2694 = vmatpush.msra.mxu0 %v2659_v18  ;;  %v13150_v18 = vld [vmem:[#allocation29 + $0x134] sm:$0xf0]  ;;  %3343 = vmatpush.bf16.msra.mxu1 %v9973_v60  ;;  %v13123_v60 = vld [vmem:[#allocation29 + $0x64] sm:$0xf] }
 0xb8c   :  { %9941 = vmatmul.msk.f32.vlgmr.msra.gmra.mxu0 %vm2183_vm9, %v15496_v34  ;;  %v10101_v2 = vor.u32 %v13150_v18, %v10100_v4  ;;  %v9998_v4 = vld [vmem:[#allocation29 + $0x68] sm:$0xf0] }
 0xb8d   :  { %v2637_v20 = vpop.f32.mrf.mxu1  ;;  %3367 = vmatpush.bf16.msrb.mxu0 %v10133_v11  ;;  %v13130_v11 = vld [vmem:[#allocation29 + $0x94] sm:$0xf0] }
 0xb8e   :  { %v2638_v54 = vadd.f32 %v2637_v20, %v2620_v45  ;;  %v9949_v45 = vor.u32 %v13112_v31, %v9948_v28  ;;  %v10062_v28 = vld [vmem:[#allocation29 + $0xe8] sm:$0xf0] }
 0xb8f   :  { %3344 = vmatpush.bf16.msra.mxu1 %v9965_v24  ;;  %v13164_v24 = vld [vmem:[#allocation29 + $0x1a4] sm:$0xf0] }
 0xb90   :  { %v15500_v61 = vpop.f32.mrf.mxu2 }
 0xb91   :  { %3368 = vmatpush.bf16.msrb.mxu0 %v10125_v26  ;;  %v2651_v30 = vadd.f32 %v15500_v61, %v2633_v40  ;;  %v10197_v61 = vor.u32 %v13174_v23, %v10196_v1  ;;  %v10021_v26 = vor.u32 %v13130_v11, %v10020_v10  ;;  %v10316_v40 = vld [vmem:[#allocation29 + $0x2e0] sm:$0xf]  ;;  %v13202_v1 = vld [vmem:[#allocation29 + $0x2d4] sm:$0xf0]  ;;  %v10001_v23 = vor.u32 %v13123_v60, %v9998_v4  ;;  %v10148_v10 = vld [vmem:[#allocation29 + $0x190] sm:$0xf] }
 0xb92   :  { %v13162_v11 = vld [vmem:[#allocation29 + $0x194] sm:$0xf0]  ;;  %v13133_v60 = vld [vmem:[#allocation29 + $0xb4] sm:$0xf] }
 0xb93   :  { %v2660_v9 = vmax.f32 %v2651_v30, 0.0  ;;  %3345 = vmatpush.bf16.msra.mxu1 %v9957_v16  ;;  %v10149_v13 = vor.u32 %v13162_v11, %v10148_v10  ;;  %v13141_v16 = vld [vmem:[#allocation29 + $0xf4] sm:$0xf]  ;;  %v9958_v10 = vld [vmem:[#allocation29 + $0x18] sm:$0xf0] }
 0xb94   :  { %9942 = vmatmul.msk.f32.gmra.mxu0 %vm2183_vm9, %v15502_v22  ;;  %v13129_v11 = vld [vmem:[#allocation29 + $0x94] sm:$0xf] }
 0xb95   :  { %v2639_v6 = vpop.f32.mrf.mxu1  ;;  %3369 = vmatpush.bf16.msrb.mxu0 %v10117_v43  ;;  %v10324_v43 = vld [vmem:[#allocation29 + $0x2f0] sm:$0xf] }
 0xb96   :  { %v10029_v6 = vor.u32 %v13132_v0, %v10028_v63  ;;  %v10325_v55 = vor.u32 %v13206_v46, %v10324_v43  ;;  %v13186_v63 = vld [vmem:[#allocation29 + $0x254] sm:$0xf0]  ;;  %v10308_v0 = vld [vmem:[#allocation29 + $0x2d0] sm:$0xf] }
 0xb97   :  { %3346 = vmatpush.bf16.msra.mxu1 %v9949_v45  ;;  %v10309_v3 = vor.u32 %v13202_v1, %v10308_v0  ;;  %v13182_v43 = vld [vmem:[#allocation29 + $0x234] sm:$0xf0]  ;;  %v10292_v46 = vld [vmem:[#allocation29 + $0x2b0] sm:$0xf]  ;;  %v13115_v1 = vld [vmem:[#allocation29 + $0x24] sm:$0xf] }
 0xb98   :  { %v2652_v17 = vpop.f32.mrf.mxu2  ;;  %3358 = vmatpush.bf16.msrb.mxu2 %v10029_v6  ;;  %v13184_v6 = vld [vmem:[#allocation29 + $0x244] sm:$0xf0] }
 0xb99   :  { %v2653_v58 = vadd.f32 %v2652_v17, %v2635_v42  ;;  %3370 = vmatpush.bf16.msrb.mxu0 %v10109_v36  ;;  %v10084_v17 = vld [vmem:[#allocation29 + $0x110] sm:$0xf]  ;;  %v10261_v42 = vor.u32 %v13190_v41, %v10260_v39  ;;  %v10054_v39 = vld [vmem:[#allocation29 + $0xd8] sm:$0xf0] }
 0xb9a   :  { %v10085_v44 = vor.u32 %v13146_v19, %v10084_v17  ;;  %v10070_v17 = vld [vmem:[#allocation29 + $0xf8] sm:$0xf0]  ;;  %v10228_v41 = vld [vmem:[#allocation29 + $0x230] sm:$0xf] }
 0xb9b   :  { %v2662_v48 = vmax.f32 %v2653_v58, 0.0  ;;  %v13204_v58 = vld [vmem:[#allocation29 + $0x2e4] sm:$0xf0]  ;;  %3395 = vmatpush.bf16.msrb.mxu1 %v10261_v42  ;;  %v10073_v25 = vor.u32 %v13141_v16, %v10070_v17  ;;  %v10229_v45 = vor.u32 %v13182_v43, %v10228_v41  ;;  %v10220_v42 = vld [vmem:[#allocation29 + $0x220] sm:$0xf] }
 0xb9c   :  { %3359 = vmatpush.bf16.msrb.mxu2 %v10021_v26  ;;  %v10317_v30 = vor.u32 %v13204_v58, %v10316_v40  ;;  %v13139_v26 = vld [vmem:[#allocation29 + $0xe4] sm:$0xf]  ;;  %v13117_v58 = vld [vmem:[#allocation29 + $0x34] sm:$0xf]  ;;  %v9950_v16 = vld [vmem:[#allocation29 + $0x8] sm:$0xf0] }
 0xb9d   :  { %3371 = vmatpush.bf16.msrb.mxu0 %v10101_v2  ;;  %v10156_v2 = vld [vmem:[#allocation29 + $0x1a0] sm:$0xf]  ;;  %v10065_v31 = vor.u32 %v13139_v26, %v10062_v28  ;;  %v13127_v17 = vld [vmem:[#allocation29 + $0x84] sm:$0xf]  ;;  %v10134_v41 = vld [vmem:[#allocation29 + $0x178] sm:$0xf0] }
 0xb9e   :  { %v13173_v43 = vld [vmem:[#allocation29 + $0x1f4] sm:$0xf] }
 0xba0   :  { %v2655_v57 = vpop.f32.mrf.mxu2  ;;  %3360 = vmatpush.bf16.msrb.mxu2 %v10013_v49  ;;  %v13119_v49 = vld [vmem:[#allocation29 + $0x44] sm:$0xf] }
 0xba1   :  { %v2656_v59 = vadd.f32 %v2655_v57, %v2638_v54  ;;  %3372 = vmatpush.bf16.msrb.mxu0 %v10093_v15  ;;  %v13168_v54 = vld [vmem:[#allocation29 + $0x1c4] sm:$0xf0] }
 0xba2   :  { %v13188_v57 = vld [vmem:[#allocation29 + $0x264] sm:$0xf0]  ;;  %v10173_v18 = vor.u32 %v13168_v54, %v10172_v53  ;;  %v10046_v53 = vld [vmem:[#allocation29 + $0xc8] sm:$0xf0] }
 0xba3   :  { %v2664_v20 = vmax.f32 %v2656_v59, 0.0  ;;  %v10009_v59 = vor.u32 %v13125_v50, %v10006_v51  ;;  %v10253_v62 = vor.u32 %v13188_v57, %v10252_v56  ;;  %v13160_v15 = vld [vmem:[#allocation29 + $0x184] sm:$0xf0]  ;;  %v9982_v50 = vld [vmem:[#allocation29 + $0x48] sm:$0xf0] }
 0xba4   :  { %3409 = vmatpush.bf16.msra.mxu2 %v10325_v55  ;;  %v10141_v19 = vor.u32 %v13160_v15, %v10140_v14  ;;  %v13135_v51 = vld [vmem:[#allocation29 + $0xc4] sm:$0xf]  ;;  %v13180_v54 = vld [vmem:[#allocation29 + $0x224] sm:$0xf0]  ;;  %v10284_v57 = vld [vmem:[#allocation29 + $0x2a0] sm:$0xf] }
 0xba5   :  { %9943 = vmatpush.msk.msrb.mxu3 %vm693_vm0, %v2664_v20  ;;  %3373 = vmatpush.bf16.msrb.mxu0 %v10085_v44  ;;  %v10244_v20 = vld [vmem:[#allocation29 + $0x250] sm:$0xf]  ;;  %v10057_v44 = vor.u32 %v13137_v37, %v10054_v39  ;;  %v10049_v55 = vor.u32 %v13135_v51, %v10046_v53  ;;  %v10221_v56 = vor.u32 %v13180_v54, %v10220_v42  ;;  %v13111_v15 = vld [vmem:[#allocation29 + $0x4] sm:$0xf]  ;;  %v10126_v42 = vld [vmem:[#allocation29 + $0x168] sm:$0xf0] }
 0xba6   :  { %3396 = vmatpush.bf16.msrb.mxu1 %v10253_v62  ;;  %v13178_v62 = vld [vmem:[#allocation29 + $0x214] sm:$0xf0]  ;;  %v13155_v51 = vld [vmem:[#allocation29 + $0x164] sm:$0xf] }
 0xba7   :  { %2716 = vmatpush.msrb.mxu3 %v2662_v48  ;;  %v10245_v48 = vor.u32 %v13186_v63, %v10244_v20  ;;  %v10276_v20 = vld [vmem:[#allocation29 + $0x290] sm:$0xf]  ;;  %v13194_v63 = vld [vmem:[#allocation29 + $0x294] sm:$0xf0]  ;;  %v13171_v54 = vld [vmem:[#allocation29 + $0x1e4] sm:$0xf] }
 0xba8   :  { %v2657_v12 = vpop.f32.mrf.mxu2  ;;  %3410 = vmatpush.bf16.msra.mxu2 %v10317_v30  ;;  %v10277_v0 = vor.u32 %v13194_v63, %v10276_v20 }
 0xba9   :  { %2717 = vmatpush.msrb.mxu3 %v2660_v9  ;;  %v10157_v9 = vor.u32 %v13164_v24, %v10156_v2  ;;  %v10301_v12 = vor.u32 %v13200_v8, %v10300_v7  ;;  %v10204_v24 = vld [vmem:[#allocation29 + $0x200] sm:$0xf]  ;;  %v13192_v8 = vld [vmem:[#allocation29 + $0x284] sm:$0xf0] }
 0xbaa   :  { %9944 = vmatmul.msk.f32.vlgmr.msrb.gmra.mxu3 %vm2183_vm9, %v15496_v34  ;;  %v13144_v34 = vld [vmem:[#allocation29 + $0x104] sm:$0xf0]  ;;  %3397 = vmatpush.bf16.msrb.mxu1 %v10245_v48  ;;  %v10030_v48 = vld [vmem:[#allocation29 + $0xa8] sm:$0xf0]  ;;  %v10268_v7 = vld [vmem:[#allocation29 + $0x280] sm:$0xf] }
 0xbab   :  { %3381 = vmatpush.bf16.msra.mxu3 %v10197_v61  ;;  %v10077_v36 = vor.u32 %v13144_v34, %v10076_v47  ;;  %v10237_v61 = vor.u32 %v13184_v6, %v10236_v5  ;;  %v13198_v47 = vld [vmem:[#allocation29 + $0x2b4] sm:$0xf0] }
 0xbac   :  { %3411 = vmatpush.bf16.msra.mxu2 %v10309_v3  ;;  %v10293_v34 = vor.u32 %v13198_v47, %v10292_v46  ;;  %v13176_v3 = vld [vmem:[#allocation29 + $0x204] sm:$0xf0] }
 0xbad   :  { %3374 = vmatpush.bf16.msrb.mxu0 %v10077_v36  ;;  %v13196_v36 = vld [vmem:[#allocation29 + $0x2a4] sm:$0xf0]  ;;  %v10205_v6 = vor.u32 %v13176_v3, %v10204_v24  ;;  %v10254_v24 = vld [vmem:[#allocation29 + $0x268] sm:$0xf0]  ;;  %v13203_v3 = vld [vmem:[#allocation29 + $0x2e4] sm:$0xf] }
 0xbae   :  { %3398 = vmatpush.bf16.msrb.mxu1 %v10237_v61  ;;  %v10285_v40 = vor.u32 %v13196_v36, %v10284_v57  ;;  %v13113_v61 = vld [vmem:[#allocation29 + $0x14] sm:$0xf]  ;;  %v10262_v57 = vld [vmem:[#allocation29 + $0x278] sm:$0xf0] }
 0xbaf   :  { %3382 = vmatpush.bf16.msra.mxu3 %v10189_v33  ;;  %v13121_v33 = vld [vmem:[#allocation29 + $0x54] sm:$0xf] }
 0xbb0   :  { %3412 = vmatpush.bf16.msra.mxu2 %v10301_v12  ;;  %v9993_v38 = vor.u32 %v13121_v33, %v9990_v35  ;;  %v9961_v12 = vor.u32 %v13113_v61, %v9958_v10  ;;  %v13167_v61 = vld [vmem:[#allocation29 + $0x1c4] sm:$0xf]  ;;  %v10174_v10 = vld [vmem:[#allocation29 + $0x1c8] sm:$0xf0] }
 0xbb1   :  { %3423 = vmatpush.bf16.msra.mxu0 %v10009_v59  ;;  %v9974_v59 = vld [vmem:[#allocation29 + $0x38] sm:$0xf0] }
 0xbb2   :  { %9945 = vmatmul.msk.f32.gmra.mxu3 %vm2183_vm9, %v15502_v22  ;;  %v10165_v22 = vor.u32 %v13166_v32, %v10164_v21  ;;  %3399 = vmatpush.bf16.msrb.mxu1 %v10229_v45  ;;  %v9977_v4 = vor.u32 %v13117_v58, %v9974_v59  ;;  %v10212_v21 = vld [vmem:[#allocation29 + $0x210] sm:$0xf]  ;;  %v13205_v58 = vld [vmem:[#allocation29 + $0x2f4] sm:$0xf]  ;;  %v10326_v59 = vld [vmem:[#allocation29 + $0x2f8] sm:$0xf0] }
 0xbb3   :  { %3383 = vmatpush.bf16.msra.mxu3 %v10181_v52  ;;  %v9985_v52 = vor.u32 %v13119_v49, %v9982_v50  ;;  %v10213_v30 = vor.u32 %v13178_v62, %v10212_v21  ;;  %v10118_v21 = vld [vmem:[#allocation29 + $0x158] sm:$0xf0]  ;;  %v13169_v62 = vld [vmem:[#allocation29 + $0x1d4] sm:$0xf] }
 0xbb4   :  { %3413 = vmatpush.bf16.msra.mxu2 %v10293_v34 }
 0xbb5   :  { %3424 = vmatpush.bf16.msra.mxu0 %v10001_v23  ;;  %v9966_v23 = vld [vmem:[#allocation29 + $0x28] sm:$0xf0] }
 0xbb6   :  { %3400 = vmatpush.bf16.msrb.mxu1 %v10221_v56  ;;  %v9969_v2 = vor.u32 %v13115_v1, %v9966_v23  ;;  %v13189_v56 = vld [vmem:[#allocation29 + $0x274] sm:$0xf]  ;;  %v10329_v23 = vor.u32 %v13205_v58, %v10326_v59  ;;  %v10086_v59 = vld [vmem:[#allocation29 + $0x118] sm:$0xf0] }
 0xbb7   :  { %3384 = vmatpush.bf16.msra.mxu3 %v10173_v18  ;;  %v10038_v18 = vld [vmem:[#allocation29 + $0xb8] sm:$0xf0]  ;;  %v10265_v1 = vor.u32 %v13189_v56, %v10262_v57  ;;  %v13197_v56 = vld [vmem:[#allocation29 + $0x2b4] sm:$0xf] }
 0xbb8   :  { %3414 = vmatpush.bf16.msra.mxu2 %v10285_v40  ;;  %v10041_v32 = vor.u32 %v13133_v60, %v10038_v18  ;;  %v10129_v60 = vor.u32 %v13155_v51, %v10126_v42  ;;  %v13153_v18 = vld [vmem:[#allocation29 + $0x154] sm:$0xf]  ;;  %v10294_v57 = vld [vmem:[#allocation29 + $0x2b8] sm:$0xf0] }
 0xbb9   :  { %3425 = vmatpush.bf16.msra.mxu0 %v9993_v38  ;;  %v13157_v38 = vld [vmem:[#allocation29 + $0x174] sm:$0xf] }
 0xbba   :  { %3401 = vmatpush.bf16.msrb.mxu1 %v10213_v30  ;;  %v10137_v49 = vor.u32 %v13157_v38, %v10134_v41  ;;  %v10238_v38 = vld [vmem:[#allocation29 + $0x248] sm:$0xf0]  ;;  %v13145_v58 = vld [vmem:[#allocation29 + $0x114] sm:$0xf] }
 0xbbb   :  { %3385 = vmatpush.bf16.msra.mxu3 %v10165_v22  ;;  %v13131_v22 = vld [vmem:[#allocation29 + $0xa4] sm:$0xf]  ;;  %v10302_v41 = vld [vmem:[#allocation29 + $0x2c8] sm:$0xf0] }
 0xbbc   :  { %3415 = vmatpush.bf16.msra.mxu2 %v10277_v0  ;;  %v10033_v5 = vor.u32 %v13131_v22, %v10030_v48  ;;  %v10182_v0 = vld [vmem:[#allocation29 + $0x1d8] sm:$0xf0]  ;;  %v13187_v22 = vld [vmem:[#allocation29 + $0x264] sm:$0xf] }
 0xbbd   :  { %3426 = vmatpush.bf16.msra.mxu0 %v9985_v52 }
 0xbbe   :  { %3402 = vmatpush.bf16.msrb.mxu1 %v10205_v6  ;;  %v10121_v6 = vor.u32 %v13153_v18, %v10118_v21  ;;  %v10297_v21 = vor.u32 %v13197_v56, %v10294_v57  ;;  %v13215_v56 = vld [vmem:[#allocation32 + $0x44] sm:$0xf]  ;;  %v10366_v57 = vld [vmem:[#allocation32 + $0x48] sm:$0xf0] }
 0xbbf   :  { %3386 = vmatpush.bf16.msra.mxu3 %v10157_v9  ;;  %v10269_v9 = vor.u32 %v13192_v8, %v10268_v7  ;;  %v10185_v7 = vor.u32 %v13169_v62, %v10182_v0  ;;  %v13151_v8 = vld [vmem:[#allocation29 + $0x144] sm:$0xf] }
 0xbc0   :  { %v13179_v62 = vld [vmem:[#allocation29 + $0x224] sm:$0xf] }
 0xbc1   :  { %3427 = vmatpush.bf16.msra.mxu0 %v9977_v4  ;;  %3416 = vmatpush.bf16.msra.mxu2 %v10269_v9  ;;  %v10110_v9 = vld [vmem:[#allocation29 + $0x148] sm:$0xf0] }
 0xbc3   :  { %3387 = vmatpush.bf16.msra.mxu3 %v10149_v13  ;;  %v10022_v13 = vld [vmem:[#allocation29 + $0x98] sm:$0xf0] }
 0xbc4   :  { %v10025_v14 = vor.u32 %v13129_v11, %v10022_v13  ;;  %v10257_v11 = vor.u32 %v13187_v22, %v10254_v24  ;;  %v13185_v13 = vld [vmem:[#allocation29 + $0x254] sm:$0xf]  ;;  %v13159_v22 = vld [vmem:[#allocation29 + $0x184] sm:$0xf]  ;;  %v10142_v24 = vld [vmem:[#allocation29 + $0x188] sm:$0xf0] }
 0xbc5   :  { %3428 = vmatpush.bf16.msra.mxu0 %v9969_v2 }
 0xbc7   :  { %3388 = vmatpush.bf16.msra.mxu3 %v10141_v19  ;;  %v9953_v19 = vor.u32 %v13111_v15, %v9950_v16  ;;  %v13201_v15 = vld [vmem:[#allocation29 + $0x2d4] sm:$0xf]  ;;  %v10310_v16 = vld [vmem:[#allocation29 + $0x2d8] sm:$0xf0] }
 0xbc9   :  { %3429 = vmatpush.bf16.msra.mxu0 %v9961_v12 }
 0xbcb   :  { %3437 = vmatpush.bf16.msrb.mxu3 %v10073_v25  ;;  %v10014_v25 = vld [vmem:[#allocation29 + $0x88] sm:$0xf0] }
 0xbcc   :  { %v10017_v26 = vor.u32 %v13127_v17, %v10014_v25  ;;  %v10113_v17 = vor.u32 %v13151_v8, %v10110_v9  ;;  %v13149_v25 = vld [vmem:[#allocation29 + $0x134] sm:$0xf]  ;;  %v10390_v9 = vld [vmem:[#allocation32 + $0x78] sm:$0xf0] }
 0xbcd   :  { %3430 = vmatpush.bf16.msra.mxu0 %v9953_v19  ;;  %v10177_v19 = vor.u32 %v13167_v61, %v10174_v10  ;;  %v13221_v8 = vld [vmem:[#allocation32 + $0x74] sm:$0xf]  ;;  %v10214_v10 = vld [vmem:[#allocation29 + $0x218] sm:$0xf0] }
 0xbce   :  { %v13177_v61 = vld [vmem:[#allocation29 + $0x214] sm:$0xf] }
 0xbcf   :  { %3438 = vmatpush.bf16.msrb.mxu3 %v10065_v31 }
 0xbd3   :  { %3439 = vmatpush.bf16.msrb.mxu3 %v10057_v44  ;;  %v10198_v44 = vld [vmem:[#allocation29 + $0x1f8] sm:$0xf0] }
 0xbd4   :  { %v10201_v50 = vor.u32 %v13173_v43, %v10198_v44 }
 0xbd7   :  { %3440 = vmatpush.bf16.msrb.mxu3 %v10049_v55  ;;  %v10190_v55 = vld [vmem:[#allocation29 + $0x1e8] sm:$0xf0] }
 0xbd8   :  { %v10193_v4 = vor.u32 %v13171_v54, %v10190_v55  ;;  %v13181_v54 = vld [vmem:[#allocation29 + $0x234] sm:$0xf]  ;;  %v10230_v55 = vld [vmem:[#allocation29 + $0x238] sm:$0xf0] }
 0xbd9   :  { %v10233_v18 = vor.u32 %v13181_v54, %v10230_v55  ;;  %v10364_v54 = vld [vmem:[#allocation32 + $0x40] sm:$0xf]  ;;  %v13216_v55 = vld [vmem:[#allocation32 + $0x44] sm:$0xf0] }
 0xbdb   :  { %3441 = vmatpush.bf16.msrb.mxu3 %v10041_v32 }
 0xbdf   :  { %3442 = vmatpush.bf16.msrb.mxu3 %v10033_v5  ;;  %v10318_v5 = vld [vmem:[#allocation29 + $0x2e8] sm:$0xf0] }
 0xbe0   :  { %v10321_v12 = vor.u32 %v13203_v3, %v10318_v5  ;;  %v10388_v3 = vld [vmem:[#allocation32 + $0x70] sm:$0xf]  ;;  %v13222_v5 = vld [vmem:[#allocation32 + $0x74] sm:$0xf0] }
 0xbe3   :  { %3443 = vmatpush.bf16.msrb.mxu3 %v10025_v14  ;;  %v10246_v14 = vld [vmem:[#allocation29 + $0x258] sm:$0xf0] }
 0xbe7   :  { %3444 = vmatpush.bf16.msrb.mxu3 %v10017_v26  ;;  %v10102_v26 = vld [vmem:[#allocation29 + $0x138] sm:$0xf0] }
 0xbe8   :  { %v10105_v43 = vor.u32 %v13149_v25, %v10102_v26  ;;  %v10217_v25 = vor.u32 %v13177_v61, %v10214_v10 }
 0xc09   :  { %v2696_v28 = vpop.f32.mrf.mxu0 }
 0xc11   :  { %v2699_v33 = vpop.f32.mrf.mxu0 }
 0xc2d   :  { %v2719_v31 = vpop.f32.mrf.mxu3 }
 0xc2e   :  { %v2725_v35 = vpack.c.bf16 %v2719_v31, %v2696_v28  ;;  %v13165_v28 = vld [vmem:[#allocation29 + $0x1b4] sm:$0xf]  ;;  %v10166_v31 = vld [vmem:[#allocation29 + $0x1b8] sm:$0xf0] }
 0xc2f   :  { %v10169_v44 = vor.u32 %v13165_v28, %v10166_v31  ;;  %v13219_v28 = vld [vmem:[#allocation32 + $0x64] sm:$0xf]  ;;  %v10382_v31 = vld [vmem:[#allocation32 + $0x68] sm:$0xf0] }
 0xc30   :  { %v2729_v45 = vunpack.c.l.b16 %v2725_v35  ;;  %v2730_v46 = vunpack.c.h.b16 %v2725_v35  ;;  %v10313_v35 = vor.u32 %v13201_v15, %v10310_v16  ;;  %v10389_v15 = vor.u32 %v13222_v5, %v10388_v3 }
 0xc31   :  { %v10393_v16 = vor.u32 %v13221_v8, %v10390_v9  ;;  %v15556_v8 = vld [vmem:[#allocation31] sm:$0x3] }
 0xc32   :  { %v2855_v10 = vperm.slane %v15556_v8, 0 }
 0xc35   :  { %v2722_v37 = vpop.f32.mrf.mxu3 }
 0xc36   :  { %v2726_v39 = vpack.c.bf16 %v2722_v37, %v2699_v33  ;;  %v10249_v33 = vor.u32 %v13185_v13, %v10246_v14  ;;  %v13183_v37 = vld [vmem:[#allocation29 + $0x244] sm:$0xf]  ;;  %v10145_v14 = vor.u32 %v13159_v22, %v10142_v24  ;;  %v10334_v24 = vld [vmem:[#allocation32 + $0x8] sm:$0xf0] }
 0xc37   :  { %v10241_v51 = vor.u32 %v13183_v37, %v10238_v38  ;;  %v13191_v37 = vld [vmem:[#allocation29 + $0x284] sm:$0xf]  ;;  %v10270_v38 = vld [vmem:[#allocation29 + $0x288] sm:$0xf0] }
 0xc38   :  { %v2731_v47 = vunpack.c.l.b16 %v2726_v39  ;;  %v2732_v34 = vunpack.c.h.b16 %v2726_v39  ;;  %v13199_v39 = vld [vmem:[#allocation29 + $0x2c4] sm:$0xf] }
 0xc39   :  { %v10305_v42 = vor.u32 %v13199_v39, %v10302_v41  ;;  %v10385_v41 = vor.u32 %v13219_v28, %v10382_v31  ;;  %v13207_v22 = vld [vmem:[#allocation32 + $0x4] sm:$0xf] }
 0xc3a   :  { %v15518_v52 = vpack.c.b16 %v2731_v47, %v2729_v45  ;;  %v15520_v53 = vpack.c.b16 %v2732_v34, %v2730_v46  ;;  %v13147_v45 = vld [vmem:[#allocation29 + $0x124] sm:$0xf]  ;;  %v10094_v46 = vld [vmem:[#allocation29 + $0x128] sm:$0xf0]  ;;  %v10337_v5 = vor.u32 %v13207_v22, %v10334_v24 }
 0xc3c   :  { %3347 = vmatmul.bf16.vlgmr.msra.gmra.mxu1 %v15518_v52  ;;  %3361 = vmatmul.bf16.vlgmr.msrb.gmra.mxu2 %v15520_v53  ;;  %v2740_v36 = vshll.u32 %v15518_v52, 16  ;;  %v2747_v40 = vshll.u32 %v15520_v53, 16  ;;  %v2738_v32 = vshrl.u32 %v15518_v52, 16  ;;  %v2745_v20 = vshrl.u32 %v15520_v53, 16 }
 0xc3d   :  { %3451 = vmatpush.bf16.msra.mxu1 %v10137_v49  ;;  %3465 = vmatpush.bf16.msrb.mxu2 %v10201_v50  ;;  %v2753_v47 = vrot.slane %v15518_v52, 1  ;;  %v2754_v34 = vrot.slane %v15520_v53, 1  ;;  %v13163_v49 = vld [vmem:[#allocation29 + $0x1a4] sm:$0xf]  ;;  %v10158_v50 = vld [vmem:[#allocation29 + $0x1a8] sm:$0xf0] }
 0xc3e   :  { %v2742_v30 = vrot.slane %v2740_v36, 1  ;;  %v2749_v63 = vrot.slane %v2747_v40, 1  ;;  %v10097_v36 = vor.u32 %v13147_v45, %v10094_v46  ;;  %v10161_v40 = vor.u32 %v13163_v49, %v10158_v50  ;;  %v13218_v46 = vld [vmem:[#allocation32 + $0x54] sm:$0xf0]  ;;  %v13217_v49 = vld [vmem:[#allocation32 + $0x54] sm:$0xf] }
 0xc3f   :  { %v10273_v45 = vor.u32 %v13191_v37, %v10270_v38  ;;  %v10374_v50 = vld [vmem:[#allocation32 + $0x58] sm:$0xf0] }
 0xc40   :  { %v15528_v2 = vor.u32 %v2742_v30, %v2738_v32  ;;  %v15530_v48 = vor.u32 %v2749_v63, %v2745_v20  ;;  %v10222_v32 = vld [vmem:[#allocation29 + $0x228] sm:$0xf0]  ;;  %v13195_v30 = vld [vmem:[#allocation29 + $0x2a4] sm:$0xf]  ;;  %v10089_v63 = vor.u32 %v13145_v58, %v10086_v59  ;;  %v10356_v58 = vld [vmem:[#allocation32 + $0x30] sm:$0xf] }
 0xc41   :  { %3452 = vmatpush.bf16.msra.mxu1 %v10129_v60  ;;  %3466 = vmatpush.bf16.msrb.mxu2 %v10193_v4  ;;  %v13161_v60 = vld [vmem:[#allocation29 + $0x194] sm:$0xf]  ;;  %v10150_v4 = vld [vmem:[#allocation29 + $0x198] sm:$0xf0]  ;;  %v10286_v20 = vld [vmem:[#allocation29 + $0x2a8] sm:$0xf0] }
 0xc42   :  { %3375 = vmatmul.bf16.vlgmr.msrb.gmra.mxu0 %v15528_v2  ;;  %3389 = vmatmul.bf16.vlgmr.msra.gmra.mxu3 %v15530_v48  ;;  %v10153_v0 = vor.u32 %v13161_v60, %v10150_v4  ;;  %v10358_v59 = vld [vmem:[#allocation32 + $0x38] sm:$0xf0] }
 0xc43   :  { %3479 = vmatpush.bf16.msrb.mxu0 %v10265_v1  ;;  %3493 = vmatpush.bf16.msra.mxu3 %v10329_v23  ;;  %v13143_v1 = vld [vmem:[#allocation29 + $0x104] sm:$0xf]  ;;  %v10078_v23 = vld [vmem:[#allocation29 + $0x108] sm:$0xf0] }
 0xc44   :  { %v10081_v13 = vor.u32 %v13143_v1, %v10078_v23  ;;  %v10332_v1 = vld [vmem:[#allocation32] sm:$0xf]  ;;  %v13208_v23 = vld [vmem:[#allocation32 + $0x4] sm:$0xf0] }
 0xc45   :  { %3453 = vmatpush.bf16.msra.mxu1 %v10121_v6  ;;  %3467 = vmatpush.bf16.msrb.mxu2 %v10185_v7  ;;  %v10225_v6 = vor.u32 %v13179_v62, %v10222_v32  ;;  %v10289_v7 = vor.u32 %v13195_v30, %v10286_v20  ;;  %v13211_v62 = vld [vmem:[#allocation32 + $0x24] sm:$0xf]  ;;  %v10350_v32 = vld [vmem:[#allocation32 + $0x28] sm:$0xf0]  ;;  %v10333_v3 = vor.u32 %v13208_v23, %v10332_v1 }
 0xc46   :  { %v10353_v20 = vor.u32 %v13211_v62, %v10350_v32 }
 0xc47   :  { %3480 = vmatpush.bf16.msrb.mxu0 %v10257_v11  ;;  %3494 = vmatpush.bf16.msra.mxu3 %v10321_v12  ;;  %v13193_v11 = vld [vmem:[#allocation29 + $0x294] sm:$0xf]  ;;  %v10278_v12 = vld [vmem:[#allocation29 + $0x298] sm:$0xf0] }
 0xc48   :  { %v10281_v26 = vor.u32 %v13193_v11, %v10278_v12 }
 0xc49   :  { %3454 = vmatpush.bf16.msra.mxu1 %v10113_v17  ;;  %3468 = vmatpush.bf16.msrb.mxu2 %v10177_v19  ;;  %v10380_v17 = vld [vmem:[#allocation32 + $0x60] sm:$0xf]  ;;  %v13220_v19 = vld [vmem:[#allocation32 + $0x64] sm:$0xf0] }
 0xc4a   :  { %v10381_v39 = vor.u32 %v13220_v19, %v10380_v17 }
 0xc4b   :  { %3481 = vmatpush.bf16.msrb.mxu0 %v10249_v33  ;;  %3495 = vmatpush.bf16.msra.mxu3 %v10313_v35  ;;  %v13175_v33 = vld [vmem:[#allocation29 + $0x204] sm:$0xf]  ;;  %v10206_v35 = vld [vmem:[#allocation29 + $0x208] sm:$0xf0] }
 0xc4c   :  { %3403 = vmatmul.bf16.vlgmr.msrb.gmra.mxu1 %v2753_v47  ;;  %3417 = vmatmul.bf16.vlgmr.msra.gmra.mxu2 %v2754_v34 }
 0xc4d   :  { %3455 = vmatpush.bf16.msra.mxu1 %v10105_v43  ;;  %3469 = vmatpush.bf16.msrb.mxu2 %v10169_v44  ;;  %v10372_v43 = vld [vmem:[#allocation32 + $0x50] sm:$0xf]  ;;  %v10209_v44 = vor.u32 %v13175_v33, %v10206_v35 }
 0xc4f   :  { %3482 = vmatpush.bf16.msrb.mxu0 %v10241_v51  ;;  %3496 = vmatpush.bf16.msra.mxu3 %v10305_v42  ;;  %v10373_v51 = vor.u32 %v13218_v46, %v10372_v43  ;;  %v10377_v42 = vor.u32 %v13217_v49, %v10374_v50 }
 0xc51   :  { %3456 = vmatpush.bf16.msra.mxu1 %v10097_v36  ;;  %3470 = vmatpush.bf16.msrb.mxu2 %v10161_v40  ;;  %v10365_v36 = vor.u32 %v13216_v55, %v10364_v54  ;;  %v10369_v40 = vor.u32 %v13215_v56, %v10366_v57  ;;  %v3523_v56 = vld [vmem:[#allocation34] sm:$0x3] }
 0xc52   :  { %3431 = vmatmul.bf16.vlgmr.msra.gmra.mxu0 %v15518_v52  ;;  %3445 = vmatmul.bf16.vlgmr.msrb.gmra.mxu3 %v15520_v53  ;;  %v10340_v52 = vld [vmem:[#allocation32 + $0x10] sm:$0xf]  ;;  %v10342_v53 = vld [vmem:[#allocation32 + $0x18] sm:$0xf0] }
 0xc53   :  { %3483 = vmatpush.bf16.msrb.mxu0 %v10233_v18  ;;  %3497 = vmatpush.bf16.msra.mxu3 %v10297_v21  ;;  %v10348_v18 = vld [vmem:[#allocation32 + $0x20] sm:$0xf]  ;;  %v13212_v21 = vld [vmem:[#allocation32 + $0x24] sm:$0xf0] }
 0xc54   :  { %v10349_v30 = vor.u32 %v13212_v21, %v10348_v18  ;;  %v13948_v21 = vld [vmem:[#allocation35] sm:$0xff] }
 0xc55   :  { %3457 = vmatpush.bf16.msra.mxu1 %v10089_v63  ;;  %3471 = vmatpush.bf16.msrb.mxu2 %v10153_v0  ;;  %v13209_v63 = vld [vmem:[#allocation32 + $0x14] sm:$0xf] }
 0xc56   :  { %v10345_v0 = vor.u32 %v13209_v63, %v10342_v53 }
 0xc57   :  { %3484 = vmatpush.bf16.msrb.mxu0 %v10225_v6  ;;  %3498 = vmatpush.bf16.msra.mxu3 %v10289_v7 }
 0xc59   :  { %3458 = vmatpush.bf16.msra.mxu1 %v10081_v13  ;;  %3472 = vmatpush.bf16.msrb.mxu2 %v10145_v14 }
 0xc5b   :  { %3485 = vmatpush.bf16.msrb.mxu0 %v10217_v25  ;;  %3499 = vmatpush.bf16.msra.mxu3 %v10281_v26 }
 0xc5c   :  { %3459 = vmatmul.bf16.vlgmr.msra.gmra.mxu1 %v15528_v2  ;;  %3473 = vmatmul.bf16.vlgmr.msrb.gmra.mxu2 %v15530_v48  ;;  %v13214_v2 = vld [vmem:[#allocation32 + $0x34] sm:$0xf0]  ;;  %v13213_v48 = vld [vmem:[#allocation32 + $0x34] sm:$0xf] }
 0xc5d   :  { %3609 = vmatpush.bf16.msrb.mxu1 %v10389_v15  ;;  %3627 = vmatpush.bf16.msra.mxu2 %v10393_v16  ;;  %v10357_v60 = vor.u32 %v13214_v2, %v10356_v58  ;;  %v10361_v4 = vor.u32 %v13213_v48, %v10358_v59  ;;  %v3526_v59 = vperm.slane %v3523_v56, 1 }
 0xc5f   :  { %3486 = vmatpush.bf16.msrb.mxu0 %v10209_v44  ;;  %3500 = vmatpush.bf16.msra.mxu3 %v10273_v45 }
 0xc61   :  { %3610 = vmatpush.bf16.msrb.mxu1 %v10381_v39  ;;  %3628 = vmatpush.bf16.msra.mxu2 %v10385_v41  ;;  %v2856_v41 = vperm.slane %v15556_v8, 1 }
 0xc62   :  { %3487 = vmatmul.bf16.vlgmr.msrb.gmra.mxu0 %v2753_v47  ;;  %3501 = vmatmul.bf16.vlgmr.msra.gmra.mxu3 %v2754_v34  ;;  %v13210_v47 = vld [vmem:[#allocation32 + $0x14] sm:$0xf0] }
 0xc63   :  { %v10341_v34 = vor.u32 %v13210_v47, %v10340_v52 }
 0xc65   :  { %3611 = vmatpush.bf16.msrb.mxu1 %v10373_v51  ;;  %3629 = vmatpush.bf16.msra.mxu2 %v10377_v42 }
 0xc69   :  { %3612 = vmatpush.bf16.msrb.mxu1 %v10365_v36  ;;  %3630 = vmatpush.bf16.msra.mxu2 %v10369_v40  ;;  %v3525_v36 = vperm.slane %v3523_v56, 0  ;;  %v10472_v56 = vld [vmem:[#allocation38 + $0x80] sm:$0xf] }
 0xc6d   :  { %3613 = vmatpush.bf16.msrb.mxu1 %v10357_v60  ;;  %3631 = vmatpush.bf16.msra.mxu2 %v10361_v4 }
 0xc71   :  { %3614 = vmatpush.bf16.msrb.mxu1 %v10349_v30  ;;  %3632 = vmatpush.bf16.msra.mxu2 %v10353_v20  ;;  %v13949_v20 = vld [vmem:[#allocation35 + $0x8] sm:$0xf] }
 0xc75   :  { %3615 = vmatpush.bf16.msrb.mxu1 %v10341_v34  ;;  %3633 = vmatpush.bf16.msra.mxu2 %v10345_v0 }
 0xc79   :  { %3616 = vmatpush.bf16.msrb.mxu1 %v10333_v3  ;;  %3634 = vmatpush.bf16.msra.mxu2 %v10337_v5  ;;  %v10520_v3 = vld [vmem:[#allocation38 + $0xe0] sm:$0xf]  ;;  %v13253_v5 = vld [vmem:[#allocation38 + $0xec] sm:$0xf0] }
 0xc7c   :  { %3617 = vmatmul.bf16.vlgmr.msrb.gmra.mxu1 %v15474_v27  ;;  %3635 = vmatmul.bf16.vlgmr.msra.gmra.mxu2 %v15474_v27 }
 0xc8c   :  { %3622 = vmatmul.bf16.gmra.mxu1 %v15477_v29  ;;  %3640 = vmatmul.bf16.gmra.mxu2 %v15477_v29 }
 0xcb9   :  { %v15552_v6 = vpop.f32.mrf.mxu1 }
 0xcba   :  { %v3349_v53 = vadd.f32 %v15552_v6, %v2855_v10 }
 0xcbf   :  { %v15554_v7 = vpop.f32.mrf.mxu2  ;;  %v15558_v9 = vpop.f32.mrf.mxu0 }
 0xcc0   :  { %v3363_v34 = vadd.f32 %v15554_v7, %v3349_v53  ;;  %v10632_v7 = vld [vmem:[#allocation38 + $0x1c0] sm:$0xf]  ;;  %v13309_v53 = vld [vmem:[#allocation38 + $0x2ac] sm:$0xf0] }
 0xcc1   :  { %v3350_v61 = vpop.f32.mrf.mxu1 }
 0xcc2   :  { %v3351_v12 = vadd.f32 %v3350_v61, %v2855_v10  ;;  %v3377_v1 = vadd.f32 %v15558_v9, %v3363_v34  ;;  %v10648_v61 = vld [vmem:[#allocation38 + $0x1e0] sm:$0xf] }
 0xcc5   :  { %v15561_v11 = vpop.f32.mrf.mxu3 }
 0xcc6   :  { %v3391_v24 = vadd.f32 %v15561_v11, %v3377_v1 }
 0xcc7   :  { %v3364_v13 = vpop.f32.mrf.mxu2  ;;  %v3378_v15 = vpop.f32.mrf.mxu0 }
 0xcc8   :  { %v3365_v27 = vadd.f32 %v3364_v13, %v3351_v12  ;;  %v10521_v12 = vor.u32 %v13253_v5, %v10520_v3  ;;  %v13285_v13 = vld [vmem:[#allocation38 + $0x1ec] sm:$0xf0] }
 0xcc9   :  { %v15563_v14 = vpop.f32.mrf.mxu1  ;;  %v10649_v10 = vor.u32 %v13285_v13, %v10648_v61  ;;  %v10568_v13 = vld [vmem:[#allocation38 + $0x140] sm:$0xf] }
 0xcca   :  { %v3379_v16 = vadd.f32 %v3378_v15, %v3365_v27  ;;  %v10504_v27 = vld [vmem:[#allocation38 + $0xc0] sm:$0xf]  ;;  %v13249_v15 = vld [vmem:[#allocation38 + $0xcc] sm:$0xf0]  ;;  %4974 = vmatpush.bf16.msra.mxu1 %v10521_v12 }
 0xccb   :  { %v10505_v9 = vor.u32 %v13249_v15, %v10504_v27  ;;  %4988 = vmatpush.bf16.msrb.mxu2 %v10649_v10  ;;  %v10904_v12 = vld [vmem:[#allocation38 + $0x3e0] sm:$0xf]  ;;  %v13265_v27 = vld [vmem:[#allocation38 + $0x14c] sm:$0xf0] }
 0xccd   :  { %v3392_v29 = vpop.f32.mrf.mxu3 }
 0xcce   :  { %v3393_v19 = vadd.f32 %v3392_v29, %v3379_v16  ;;  %v3405_v29 = vadd.f32 %v15563_v14, %v3391_v24  ;;  %v13281_v16 = vld [vmem:[#allocation38 + $0x1cc] sm:$0xf0]  ;;  %4975 = vmatpush.bf16.msra.mxu1 %v10505_v9  ;;  %v10424_v9 = vld [vmem:[#allocation38 + $0x20] sm:$0xf] }
 0xccf   :  { %v15565_v17 = vpop.f32.mrf.mxu2  ;;  %v15567_v28 = vpop.f32.mrf.mxu0 }
 0xcd0   :  { %v3433_v11 = vadd.f32 %v15567_v28, %v2856_v41 }
 0xcd1   :  { %v3406_v25 = vpop.f32.mrf.mxu1 }
 0xcd2   :  { %v3407_v26 = vadd.f32 %v3406_v25, %v3393_v19  ;;  %v3419_v25 = vadd.f32 %v15565_v17, %v3405_v29  ;;  %v13317_v17 = vld [vmem:[#allocation38 + $0x2ec] sm:$0xf0]  ;;  %v10728_v29 = vld [vmem:[#allocation38 + $0x280] sm:$0xf] }
 0xcd5   :  { %v15569_v31 = vpop.f32.mrf.mxu3 }
 0xcd7   :  { %v3420_v33 = vpop.f32.mrf.mxu2  ;;  %v3434_v38 = vpop.f32.mrf.mxu0 }
 0xcd8   :  { %v15571_v35 = vadd.f32 %v3420_v33, %v3407_v26  ;;  %v3435_v44 = vadd.f32 %v3434_v38, %v2856_v41  ;;  %v10633_v26 = vor.u32 %v13281_v16, %v10632_v7  ;;  %v10488_v33 = vld [vmem:[#allocation38 + $0xa0] sm:$0xf]  ;;  %v13245_v38 = vld [vmem:[#allocation38 + $0xac] sm:$0xf0]  ;;  %v3720_v7 = vld [vmem:[#allocation37 + $0x8] sm:$0xf] }
 0xcd9   :  { %v15573_v37 = vpop.f32.mrf.mxu1  ;;  %v10489_v8 = vor.u32 %v13245_v38, %v10488_v33  ;;  %v10552_v38 = vld [vmem:[#allocation38 + $0x120] sm:$0xf] }
 0xcda   :  { %4989 = vmatpush.bf16.msrb.mxu2 %v10633_v26  ;;  %v10888_v26 = vld [vmem:[#allocation38 + $0x3c0] sm:$0xf] }
 0xcdb   :  { %4976 = vmatpush.bf16.msra.mxu1 %v10489_v8  ;;  %v13341_v8 = vld [vmem:[#allocation38 + $0x3ac] sm:$0xf0] }
 0xcdd   :  { %v3448_v43 = vpop.f32.mrf.mxu3 }
 0xcde   :  { %v3449_v46 = vadd.f32 %v3448_v43, %v3435_v44  ;;  %v10616_v44 = vld [vmem:[#allocation38 + $0x1a0] sm:$0xf] }
 0xcdf   :  { %v15575_v39 = vpop.f32.mrf.mxu2  ;;  %v15588_v52 = vpop.f32.mrf.mxu0 }
 0xce1   :  { %v3462_v45 = vpop.f32.mrf.mxu1 }
 0xce2   :  { %v3463_v49 = vadd.f32 %v3462_v45, %v3449_v46  ;;  %v13277_v45 = vld [vmem:[#allocation38 + $0x1ac] sm:$0xf0]  ;;  %v3447_v46 = vadd.f32 %v15569_v31, %v3433_v11 }
 0xce4   :  { %v3461_v28 = vadd.f32 %v15573_v37, %v3447_v46 }
 0xce5   :  { %v15592_v63 = vpop.f32.mrf.mxu3 }
 0xce6   :  { %v3475_v31 = vadd.f32 %v15575_v39, %v3461_v28  ;;  %v13269_v39 = vld [vmem:[#allocation38 + $0x16c] sm:$0xf0] }
 0xce7   :  { %v3476_v50 = vpop.f32.mrf.mxu2  ;;  %v15590_v47 = vpop.f32.mrf.mxu0 }
 0xce8   :  { %v15580_v51 = vadd.f32 %v3476_v50, %v3463_v49 }
 0xced   :  { %v15597_v23 = vpop.f32.mrf.mxu3 }
 0xcf9   :  { %v3618_v42 = vpop.f32.mrf.mxu1 }
 0xcfa   :  { %v3619_v48 = vadd.f32 %v3618_v42, %v3525_v36  ;;  %v10776_v42 = vld [vmem:[#allocation38 + $0x2e0] sm:$0xf] }
 0xcff   :  { %v3636_v54 = vpop.f32.mrf.mxu2 }
 0xd00   :  { %v3637_v32 = vadd.f32 %v3636_v54, %v3526_v59 }
 0xd01   :  { %v3620_v55 = vpop.f32.mrf.mxu1 }
 0xd02   :  { %v3621_v2 = vadd.f32 %v3620_v55, %v3525_v36  ;;  %v10617_v55 = vor.u32 %v13277_v45, %v10616_v44  ;;  %v10712_v44 = vld [vmem:[#allocation38 + $0x260] sm:$0xf]  ;;  %v13301_v45 = vld [vmem:[#allocation38 + $0x26c] sm:$0xf0] }
 0xd03   :  { %v10713_v28 = vor.u32 %v13301_v45, %v10712_v44 }
 0xd04   :  { %4990 = vmatpush.bf16.msrb.mxu2 %v10617_v55  ;;  %v13257_v55 = vld [vmem:[#allocation38 + $0x10c] sm:$0xf0] }
 0xd07   :  { %v3638_v57 = vpop.f32.mrf.mxu2 }
 0xd08   :  { %v3639_v62 = vadd.f32 %v3638_v57, %v3526_v59  ;;  %v10777_v57 = vor.u32 %v13317_v17, %v10776_v42  ;;  %v10408_v42 = vld [vmem:[#allocation38] sm:$0xf]  ;;  %v13225_v17 = vld [vmem:[#allocation38 + $0xc] sm:$0xf0] }
 0xd09   :  { %v3623_v40 = vpop.f32.mrf.mxu1 }
 0xd0a   :  { %v3624_v58 = vadd.f32 %v3623_v40, %v3525_v36  ;;  %v10600_v36 = vld [vmem:[#allocation38 + $0x180] sm:$0xf]  ;;  %v13273_v40 = vld [vmem:[#allocation38 + $0x18c] sm:$0xf0] }
 0xd0b   :  { %v10601_v37 = vor.u32 %v13273_v40, %v10600_v36  ;;  %v10409_v36 = vor.u32 %v13225_v17, %v10408_v42  ;;  %v13381_v40 = vld [vmem:[#allocation38 + $0x4ec] sm:$0xf0]  ;;  %v10650_v42 = vld [vmem:[#allocation38 + $0x1f0] sm:$0xf0] }
 0xd0c   :  { %10394 = vmatpush.msk.msra.mxu0 %vm693_vm0, %v3624_v58  ;;  %v10760_v58 = vld [vmem:[#allocation38 + $0x2c0] sm:$0xf] }
 0xd0d   :  { %4991 = vmatpush.bf16.msrb.mxu2 %v10601_v37  ;;  %v13337_v37 = vld [vmem:[#allocation38 + $0x38c] sm:$0xf0] }
 0xd0e   :  { %3665 = vmatpush.msra.mxu0 %v3621_v2  ;;  %v13313_v2 = vld [vmem:[#allocation38 + $0x2cc] sm:$0xf0] }
 0xd0f   :  { %v3641_v60 = vpop.f32.mrf.mxu2 }
 0xd10   :  { %v3642_v4 = vadd.f32 %v3641_v60, %v3526_v59  ;;  %3666 = vmatpush.msra.mxu0 %v3619_v48  ;;  %v3719_v48 = vld [vmem:[#allocation37] sm:$0xff]  ;;  %v10456_v60 = vld [vmem:[#allocation38 + $0x60] sm:$0xf] }
 0xd11   :  { %v3625_v18 = vpop.f32.mrf.mxu1  ;;  %10395 = vmatmul.msk.f32.vlgmr.msra.gmra.mxu0 %vm2183_vm9, %v13948_v21 }
 0xd12   :  { %10397 = vmatpush.msk.msrb.mxu3 %vm693_vm0, %v3642_v4  ;;  %v13237_v4 = vld [vmem:[#allocation38 + $0x6c] sm:$0xf0]  ;;  %v3491_v18 = vadd.f32 %v15590_v47, %v15580_v51  ;;  %v10440_v51 = vld [vmem:[#allocation38 + $0x40] sm:$0xf] }
 0xd13   :  { %v13233_v47 = vld [vmem:[#allocation38 + $0x4c] sm:$0xf0] }
 0xd14   :  { %3688 = vmatpush.msrb.mxu3 %v3639_v62  ;;  %v10584_v62 = vld [vmem:[#allocation38 + $0x160] sm:$0xf]  ;;  %v3505_v34 = vadd.f32 %v15597_v23, %v3491_v18  ;;  %v13349_v23 = vld [vmem:[#allocation38 + $0x3ec] sm:$0xf0] }
 0xd15   :  { %v10585_v3 = vor.u32 %v13269_v39, %v10584_v62  ;;  %v10905_v11 = vor.u32 %v13349_v23, %v10904_v12  ;;  %v13293_v62 = vld [vmem:[#allocation38 + $0x22c] sm:$0xf0]  ;;  %v11016_v39 = vld [vmem:[#allocation38 + $0x4c0] sm:$0xf] }
 0xd16   :  { %3689 = vmatpush.msrb.mxu3 %v3637_v32  ;;  %v3489_v32 = vadd.f32 %v15588_v52, %v3475_v31  ;;  %v11160_v31 = vld [vmem:[#allocation38 + $0x5e0] sm:$0xf]  ;;  %v13373_v12 = vld [vmem:[#allocation38 + $0x4ac] sm:$0xf0] }
 0xd17   :  { %v3643_v30 = vpop.f32.mrf.mxu2  ;;  %10398 = vmatmul.msk.f32.vlgmr.msrb.gmra.mxu3 %vm2183_vm9, %v13948_v21  ;;  %v10761_v21 = vor.u32 %v13313_v2, %v10760_v58  ;;  %4992 = vmatpush.bf16.msrb.mxu2 %v10585_v3  ;;  %v13413_v58 = vld [vmem:[#allocation38 + $0x5ec] sm:$0xf0]  ;;  %v10664_v3 = vld [vmem:[#allocation38 + $0x200] sm:$0xf] }
 0xd18   :  { %v3503_v24 = vadd.f32 %v15592_v63, %v3489_v32  ;;  %v10441_v63 = vor.u32 %v13233_v47, %v10440_v51  ;;  %v11161_v18 = vor.u32 %v13413_v58, %v11160_v31  ;;  %v13377_v32 = vld [vmem:[#allocation38 + $0x4cc] sm:$0xf0]  ;;  %v13251_v47 = vld [vmem:[#allocation38 + $0xe4] sm:$0xf]  ;;  %v10824_v23 = vld [vmem:[#allocation38 + $0x340] sm:$0xf] }
 0xd19   :  { %10396 = vmatmul.msk.f32.gmra.mxu0 %vm2183_vm9, %v13949_v20  ;;  %v13289_v51 = vld [vmem:[#allocation38 + $0x20c] sm:$0xf0]  ;;  %v10968_v31 = vld [vmem:[#allocation38 + $0x460] sm:$0xf] }
 0xd1a   :  { %v13365_v58 = vld [vmem:[#allocation38 + $0x46c] sm:$0xf0] }
 0xd1f   :  { %10399 = vmatmul.msk.f32.gmra.mxu3 %vm2183_vm9, %v13949_v20  ;;  %v10744_v20 = vld [vmem:[#allocation38 + $0x2a0] sm:$0xf] }
 0xd20   :  { %v10745_v52 = vor.u32 %v13309_v53, %v10744_v20  ;;  %v13409_v20 = vld [vmem:[#allocation38 + $0x5cc] sm:$0xf0] }
 0xd8e   :  { %v3668_v0 = vpop.f32.mrf.mxu0 }
 0xd8f   :  { %v3701_v22 = vrot.slane %v3668_v0, 1 }
 0xd96   :  { %v3671_v6 = vpop.f32.mrf.mxu0 }
 0xd97   :  { %v3702_v19 = vrot.slane %v3671_v6, 1  ;;  %v13305_v6 = vld [vmem:[#allocation38 + $0x28c] sm:$0xf0] }
 0xd98   :  { %v10729_v33 = vor.u32 %v13305_v6, %v10728_v29  ;;  %v13329_v29 = vld [vmem:[#allocation38 + $0x34c] sm:$0xf0] }
 0xd99   :  { %v3713_v43 = vadd.f32 %v3702_v19, %v15571_v35  ;;  %v3703_v14 = vsel %vm827_vm4, %v3701_v22, %v3702_v19  ;;  %v13241_v35 = vld [vmem:[#allocation38 + $0x8c] sm:$0xf0]  ;;  %v10457_v22 = vor.u32 %v13237_v4, %v10456_v60  ;;  %v10569_v19 = vor.u32 %v13265_v27, %v10568_v13 }
 0xd9a   :  { %v3691_v49 = vpop.f32.mrf.mxu3  ;;  %v3711_v50 = vadd.f32 %v3703_v14, %v3419_v25  ;;  %v10473_v59 = vor.u32 %v13241_v35, %v10472_v56  ;;  %v13229_v25 = vld [vmem:[#allocation38 + $0x2c] sm:$0xf0]  ;;  %v10696_v56 = vld [vmem:[#allocation38 + $0x240] sm:$0xf] }
 0xd9b   :  { %v3717_v54 = vmax.f32 %v3713_v43, 0.0  ;;  %v3704_v0 = vrot.slane %v3691_v49, 1  ;;  %v13261_v43 = vld [vmem:[#allocation38 + $0x12c] sm:$0xf0]  ;;  %v10425_v46 = vor.u32 %v13229_v25, %v10424_v9  ;;  %v10872_v49 = vld [vmem:[#allocation38 + $0x3a0] sm:$0xf]  ;;  %4993 = vmatpush.bf16.msrb.mxu2 %v10569_v19 }
 0xd9c   :  { %v3715_v41 = vmax.f32 %v3711_v50, 0.0  ;;  %4977 = vmatpush.bf16.msra.mxu1 %v10473_v59  ;;  %v13345_v14 = vld [vmem:[#allocation38 + $0x3cc] sm:$0xf0]  ;;  %v10553_v50 = vor.u32 %v13261_v43, %v10552_v38  ;;  %v10856_v59 = vld [vmem:[#allocation38 + $0x380] sm:$0xf] }
 0xd9d   :  { %10400 = vmatpush.msk.msrb.mxu0 %vm693_vm0, %v3717_v54  ;;  %v10889_v54 = vor.u32 %v13345_v14, %v10888_v26  ;;  %v13297_v35 = vld [vmem:[#allocation38 + $0x24c] sm:$0xf0]  ;;  %v10857_v53 = vor.u32 %v13337_v37, %v10856_v59  ;;  %v10984_v19 = vld [vmem:[#allocation38 + $0x480] sm:$0xf]  ;;  %v10825_v26 = vor.u32 %v13329_v29, %v10824_v23  ;;  %v10442_v23 = vld [vmem:[#allocation38 + $0x50] sm:$0xf0] }
 0xd9e   :  { %v10697_v60 = vor.u32 %v13297_v35, %v10696_v56  ;;  %v13405_v13 = vld [vmem:[#allocation38 + $0x5ac] sm:$0xf0]  ;;  %v11112_v25 = vld [vmem:[#allocation38 + $0x580] sm:$0xf]  ;;  %v10490_v56 = vld [vmem:[#allocation38 + $0xb0] sm:$0xf0] }
 0xd9f   :  { %3749 = vmatpush.msrb.mxu0 %v3715_v41  ;;  %v10536_v41 = vld [vmem:[#allocation38 + $0x100] sm:$0xf]  ;;  %4994 = vmatpush.bf16.msrb.mxu2 %v10553_v50  ;;  %v13369_v9 = vld [vmem:[#allocation38 + $0x48c] sm:$0xf0]  ;;  %v13283_v50 = vld [vmem:[#allocation38 + $0x1e4] sm:$0xf] }
 0xda0   :  { %10401 = vmatmul.msk.f32.vlgmr.msrb.gmra.mxu0 %vm3721_vm10, %v3719_v48  ;;  %4978 = vmatpush.bf16.msra.mxu1 %v10457_v22  ;;  %v10537_v2 = vor.u32 %v13257_v55, %v10536_v41  ;;  %v11017_v22 = vor.u32 %v13377_v32, %v11016_v39  ;;  %v13325_v38 = vld [vmem:[#allocation38 + $0x32c] sm:$0xf0]  ;;  %v10985_v14 = vor.u32 %v13369_v9, %v10984_v19  ;;  %v13243_v55 = vld [vmem:[#allocation38 + $0xa4] sm:$0xf]  ;;  %v10952_v32 = vld [vmem:[#allocation38 + $0x440] sm:$0xf] }
 0xda1   :  { %5002 = vmatpush.bf16.msra.mxu0 %v10777_v57  ;;  %v11032_v57 = vld [vmem:[#allocation38 + $0x4e0] sm:$0xf]  ;;  %v13275_v35 = vld [vmem:[#allocation38 + $0x1a4] sm:$0xf]  ;;  %v13397_v59 = vld [vmem:[#allocation38 + $0x56c] sm:$0xf0] }
 0xda2   :  { %v3694_v30 = vpop.f32.mrf.mxu3  ;;  %v11033_v4 = vor.u32 %v13381_v40, %v11032_v57  ;;  %v10493_v57 = vor.u32 %v13243_v55, %v10490_v56  ;;  %v13263_v29 = vld [vmem:[#allocation38 + $0x144] sm:$0xf]  ;;  %v11048_v19 = vld [vmem:[#allocation38 + $0x500] sm:$0xf] }
 0xda3   :  { %v3705_v1 = vrot.slane %v3694_v30, 1  ;;  %v11144_v30 = vld [vmem:[#allocation38 + $0x5c0] sm:$0xf]  ;;  %4995 = vmatpush.bf16.msrb.mxu2 %v10537_v2  ;;  %v13315_v56 = vld [vmem:[#allocation38 + $0x2e4] sm:$0xf] }
 0xda4   :  { %4979 = vmatpush.bf16.msra.mxu1 %v10441_v63  ;;  %v11096_v2 = vld [vmem:[#allocation38 + $0x560] sm:$0xf] }
 0xda5   :  { %v3714_v5 = vadd.f32 %v3705_v1, %v3505_v34  ;;  %v3706_v61 = vsel %vm827_vm4, %v3704_v0, %v3705_v1  ;;  %5003 = vmatpush.bf16.msra.mxu0 %v10761_v21  ;;  %v10680_v21 = vld [vmem:[#allocation38 + $0x220] sm:$0xf]  ;;  %v13333_v0 = vld [vmem:[#allocation38 + $0x36c] sm:$0xf0]  ;;  %v11097_v37 = vor.u32 %v13397_v59, %v11096_v2 }
 0xda6   :  { %v3712_v15 = vadd.f32 %v3706_v61, %v3503_v24  ;;  %v10840_v34 = vld [vmem:[#allocation38 + $0x360] sm:$0xf]  ;;  %v10681_v1 = vor.u32 %v13293_v62, %v10680_v21  ;;  %v11145_v24 = vor.u32 %v13409_v20, %v11144_v30  ;;  %v10602_v62 = vld [vmem:[#allocation38 + $0x190] sm:$0xf0]  ;;  %v13361_v30 = vld [vmem:[#allocation38 + $0x44c] sm:$0xf0] }
 0xda7   :  { %v3718_v10 = vmax.f32 %v3714_v5, 0.0  ;;  %5044 = vmatpush.bf16.msra.mxu2 %v11161_v18  ;;  %v10522_v5 = vld [vmem:[#allocation38 + $0xf0] sm:$0xf0]  ;;  %v11000_v61 = vld [vmem:[#allocation38 + $0x4a0] sm:$0xf]  ;;  %v10841_v27 = vor.u32 %v13333_v0, %v10840_v34 }
 0xda8   :  { %v3716_v16 = vmax.f32 %v3712_v15, 0.0  ;;  %10402 = vmatmul.msk.f32.gmra.mxu0 %vm3721_vm10, %v3720_v7  ;;  %4980 = vmatpush.bf16.msra.mxu1 %v10425_v46  ;;  %v10665_v15 = vor.u32 %v13289_v51, %v10664_v3  ;;  %v10525_v6 = vor.u32 %v13251_v47, %v10522_v5  ;;  %v10792_v46 = vld [vmem:[#allocation38 + $0x300] sm:$0xf]  ;;  %v13271_v18 = vld [vmem:[#allocation38 + $0x184] sm:$0xf] }
 0xda9   :  { %10403 = vmatpush.msk.msra.mxu3 %vm693_vm0, %v3718_v10  ;;  %5004 = vmatpush.bf16.msra.mxu0 %v10745_v52  ;;  %v11128_v52 = vld [vmem:[#allocation38 + $0x5a0] sm:$0xf]  ;;  %v11001_v10 = vor.u32 %v13373_v12, %v11000_v61  ;;  %v10605_v39 = vor.u32 %v13271_v18, %v10602_v62  ;;  %v13393_v34 = vld [vmem:[#allocation38 + $0x54c] sm:$0xf0]  ;;  %v10586_v51 = vld [vmem:[#allocation38 + $0x170] sm:$0xf0] }
 0xdaa   :  { %v11129_v63 = vor.u32 %v13405_v13, %v11128_v52  ;;  %v11080_v20 = vld [vmem:[#allocation38 + $0x540] sm:$0xf]  ;;  %v13357_v61 = vld [vmem:[#allocation38 + $0x42c] sm:$0xf0]  ;;  %v13343_v62 = vld [vmem:[#allocation38 + $0x3c4] sm:$0xf] }
 0xdab   :  { %3772 = vmatpush.msra.mxu3 %v3716_v16  ;;  %5045 = vmatpush.bf16.msra.mxu2 %v11145_v24  ;;  %v10506_v16 = vld [vmem:[#allocation38 + $0xd0] sm:$0xf0]  ;;  %v11081_v0 = vor.u32 %v13393_v34, %v11080_v20  ;;  %v13267_v24 = vld [vmem:[#allocation38 + $0x164] sm:$0xf]  ;;  %v10936_v5 = vld [vmem:[#allocation38 + $0x420] sm:$0xf] }
 0xdac   :  { %10404 = vmatmul.msk.f32.vlgmr.msra.gmra.mxu3 %vm3721_vm10, %v3719_v48  ;;  %v10873_v48 = vor.u32 %v13341_v8, %v10872_v49  ;;  %4981 = vmatpush.bf16.msra.mxu1 %v10409_v36  ;;  %v13321_v49 = vld [vmem:[#allocation38 + $0x30c] sm:$0xf0]  ;;  %v13279_v8 = vld [vmem:[#allocation38 + $0x1c4] sm:$0xf]  ;;  %v10618_v36 = vld [vmem:[#allocation38 + $0x1b0] sm:$0xf0]  ;;  %v10589_v47 = vor.u32 %v13267_v24, %v10586_v51  ;;  %v10937_v52 = vor.u32 %v13357_v61, %v10936_v5 }
 0xdad   :  { %5016 = vmatpush.bf16.msrb.mxu3 %v10905_v11  ;;  %5005 = vmatpush.bf16.msra.mxu0 %v10729_v33  ;;  %v13401_v11 = vld [vmem:[#allocation38 + $0x58c] sm:$0xf0]  ;;  %v10808_v33 = vld [vmem:[#allocation38 + $0x320] sm:$0xf]  ;;  %v10793_v17 = vor.u32 %v13321_v49, %v10792_v46  ;;  %v10621_v40 = vor.u32 %v13275_v35, %v10618_v36  ;;  %v10410_v46 = vld [vmem:[#allocation38 + $0x10] sm:$0xf0] }
 0xdae   :  { %v11113_v44 = vor.u32 %v13401_v11, %v11112_v25  ;;  %v10809_v45 = vor.u32 %v13325_v38, %v10808_v33  ;;  %v11064_v12 = vld [vmem:[#allocation38 + $0x520] sm:$0xf]  ;;  %v13389_v13 = vld [vmem:[#allocation38 + $0x52c] sm:$0xf0]  ;;  %v10426_v33 = vld [vmem:[#allocation38 + $0x30] sm:$0xf0] }
 0xdaf   :  { %5046 = vmatpush.bf16.msra.mxu2 %v11129_v63  ;;  %v10920_v63 = vld [vmem:[#allocation38 + $0x400] sm:$0xf]  ;;  %v13385_v25 = vld [vmem:[#allocation38 + $0x50c] sm:$0xf0]  ;;  %v13259_v38 = vld [vmem:[#allocation38 + $0x124] sm:$0xf] }
 0xdb0   :  { %5030 = vmatpush.bf16.msrb.mxu1 %v11033_v4  ;;  %v10474_v4 = vld [vmem:[#allocation38 + $0x90] sm:$0xf0]  ;;  %v11049_v11 = vor.u32 %v13385_v25, %v11048_v19  ;;  %v13347_v36 = vld [vmem:[#allocation38 + $0x3e4] sm:$0xf] }
 0xdb1   :  { %5017 = vmatpush.bf16.msrb.mxu3 %v10889_v54  ;;  %5006 = vmatpush.bf16.msra.mxu0 %v10713_v28  ;;  %v10653_v54 = vor.u32 %v13283_v50, %v10650_v42  ;;  %v10634_v28 = vld [vmem:[#allocation38 + $0x1d0] sm:$0xf0]  ;;  %v13255_v50 = vld [vmem:[#allocation38 + $0x104] sm:$0xf] }
 0xdb2   :  { %v10637_v41 = vor.u32 %v13279_v8, %v10634_v28  ;;  %v10538_v42 = vld [vmem:[#allocation38 + $0x110] sm:$0xf0]  ;;  %v13411_v34 = vld [vmem:[#allocation38 + $0x5e4] sm:$0xf] }
 0xdb3   :  { %5047 = vmatpush.bf16.msra.mxu2 %v11113_v44  ;;  %v13307_v24 = vld [vmem:[#allocation38 + $0x2a4] sm:$0xf] }
 0xdb4   :  { %10405 = vmatmul.msk.f32.gmra.mxu3 %vm3721_vm10, %v3720_v7  ;;  %5031 = vmatpush.bf16.msrb.mxu1 %v11017_v22  ;;  %v13247_v7 = vld [vmem:[#allocation38 + $0xc4] sm:$0xf]  ;;  %v10458_v22 = vld [vmem:[#allocation38 + $0x70] sm:$0xf0] }
 0xdb5   :  { %5018 = vmatpush.bf16.msrb.mxu3 %v10873_v48  ;;  %5007 = vmatpush.bf16.msra.mxu0 %v10697_v60  ;;  %v10509_v43 = vor.u32 %v13247_v7, %v10506_v16  ;;  %v10969_v48 = vor.u32 %v13365_v58, %v10968_v31  ;;  %v13239_v60 = vld [vmem:[#allocation38 + $0x84] sm:$0xf]  ;;  %v13353_v16 = vld [vmem:[#allocation38 + $0x40c] sm:$0xf0] }
 0xdb6   :  { %v10477_v21 = vor.u32 %v13239_v60, %v10474_v4  ;;  %v10921_v9 = vor.u32 %v13353_v16, %v10920_v63  ;;  %v13311_v60 = vld [vmem:[#allocation38 + $0x2c4] sm:$0xf] }
 0xdb7   :  { %5048 = vmatpush.bf16.msra.mxu2 %v11097_v37  ;;  %v13339_v51 = vld [vmem:[#allocation38 + $0x3a4] sm:$0xf] }
 0xdb8   :  { %5032 = vmatpush.bf16.msrb.mxu1 %v11001_v10  ;;  %v10570_v10 = vld [vmem:[#allocation38 + $0x150] sm:$0xf0]  ;;  %v13303_v19 = vld [vmem:[#allocation38 + $0x284] sm:$0xf] }
 0xdb9   :  { %5019 = vmatpush.bf16.msrb.mxu3 %v10857_v53  ;;  %5008 = vmatpush.bf16.msra.mxu0 %v10681_v1  ;;  %v10953_v53 = vor.u32 %v13361_v30, %v10952_v32  ;;  %v13235_v1 = vld [vmem:[#allocation38 + $0x64] sm:$0xf]  ;;  %v10573_v7 = vor.u32 %v13263_v29, %v10570_v10  ;;  %v11034_v30 = vld [vmem:[#allocation38 + $0x4f0] sm:$0xf0] }
 0xdba   :  { %v10461_v3 = vor.u32 %v13235_v1, %v10458_v22  ;;  %v13379_v32 = vld [vmem:[#allocation38 + $0x4e4] sm:$0xf] }
 0xdbb   :  { %5049 = vmatpush.bf16.msra.mxu2 %v11081_v0  ;;  %v11162_v0 = vld [vmem:[#allocation38 + $0x5f0] sm:$0xf0]  ;;  %v13407_v10 = vld [vmem:[#allocation38 + $0x5c4] sm:$0xf] }
 0xdbc   :  { %5033 = vmatpush.bf16.msrb.mxu1 %v10985_v14  ;;  %v10554_v14 = vld [vmem:[#allocation38 + $0x130] sm:$0xf0]  ;;  %v13335_v25 = vld [vmem:[#allocation38 + $0x384] sm:$0xf] }
 0xdbd   :  { %5020 = vmatpush.bf16.msrb.mxu3 %v10841_v27  ;;  %5009 = vmatpush.bf16.msra.mxu0 %v10665_v15  ;;  %v11065_v27 = vor.u32 %v13389_v13, %v11064_v12  ;;  %v13231_v15 = vld [vmem:[#allocation38 + $0x44] sm:$0xf]  ;;  %v10557_v44 = vor.u32 %v13259_v38, %v10554_v14  ;;  %v11037_v13 = vor.u32 %v13379_v32, %v11034_v30 }
 0xdbe   :  { %v13371_v38 = vld [vmem:[#allocation38 + $0x4a4] sm:$0xf] }
 0xdbf   :  { %5050 = vmatpush.bf16.msra.mxu2 %v11065_v27  ;;  %v11165_v27 = vor.u32 %v13411_v34, %v11162_v0  ;;  %v13403_v14 = vld [vmem:[#allocation38 + $0x5a4] sm:$0xf]  ;;  %v10810_v0 = vld [vmem:[#allocation38 + $0x330] sm:$0xf0] }
 0xdc0   :  { %5034 = vmatpush.bf16.msrb.mxu1 %v10969_v48  ;;  %v13323_v34 = vld [vmem:[#allocation38 + $0x324] sm:$0xf] }
 0xdc1   :  { %5058 = vmatpush.bf16.msrb.mxu0 %v10525_v6  ;;  %5021 = vmatpush.bf16.msrb.mxu3 %v10825_v26  ;;  %v10445_v6 = vor.u32 %v13231_v15, %v10442_v23  ;;  %v13227_v26 = vld [vmem:[#allocation38 + $0x24] sm:$0xf] }
 0xdc2   :  { %v13375_v15 = vld [vmem:[#allocation38 + $0x4c4] sm:$0xf] }
 0xdc3   :  { %5051 = vmatpush.bf16.msra.mxu2 %v11049_v11  ;;  %v10858_v11 = vld [vmem:[#allocation38 + $0x390] sm:$0xf0] }
 0xdc4   :  { %5035 = vmatpush.bf16.msrb.mxu1 %v10953_v53 }
 0xdc5   :  { %5059 = vmatpush.bf16.msrb.mxu0 %v10509_v43  ;;  %5022 = vmatpush.bf16.msrb.mxu3 %v10809_v45  ;;  %v10429_v43 = vor.u32 %v13227_v26, %v10426_v33  ;;  %v13223_v45 = vld [vmem:[#allocation38 + $0x4] sm:$0xf] }
 0xdc6   :  { %v10413_v49 = vor.u32 %v13223_v45, %v10410_v46  ;;  %v10861_v46 = vor.u32 %v13335_v25, %v10858_v11  ;;  %v13387_v25 = vld [vmem:[#allocation38 + $0x524] sm:$0xf]  ;;  %v11066_v11 = vld [vmem:[#allocation38 + $0x530] sm:$0xf0] }
 0xdc8   :  { %5036 = vmatpush.bf16.msrb.mxu1 %v10937_v52  ;;  %v10874_v52 = vld [vmem:[#allocation38 + $0x3b0] sm:$0xf0] }
 0xdc9   :  { %5023 = vmatpush.bf16.msrb.mxu3 %v10793_v17  ;;  %5060 = vmatpush.bf16.msrb.mxu0 %v10493_v57  ;;  %v10541_v17 = vor.u32 %v13255_v50, %v10538_v42  ;;  %v10778_v57 = vld [vmem:[#allocation38 + $0x2f0] sm:$0xf0]  ;;  %v10877_v16 = vor.u32 %v13339_v51, %v10874_v52  ;;  %v13331_v42 = vld [vmem:[#allocation38 + $0x364] sm:$0xf] }
 0xdca   :  { %v10781_v59 = vor.u32 %v13315_v56, %v10778_v57  ;;  %v10714_v50 = vld [vmem:[#allocation38 + $0x270] sm:$0xf0]  ;;  %v13391_v51 = vld [vmem:[#allocation38 + $0x544] sm:$0xf] }
 0xdcb   :  { %v11114_v56 = vld [vmem:[#allocation38 + $0x590] sm:$0xf0] }
 0xdcc   :  { %5037 = vmatpush.bf16.msrb.mxu1 %v10921_v9  ;;  %v10730_v9 = vld [vmem:[#allocation38 + $0x290] sm:$0xf0] }
 0xdcd   :  { %5072 = vmatpush.bf16.msra.mxu3 %v10653_v54  ;;  %5061 = vmatpush.bf16.msrb.mxu0 %v10477_v21  ;;  %v10762_v21 = vld [vmem:[#allocation38 + $0x2d0] sm:$0xf0]  ;;  %v10733_v45 = vor.u32 %v13303_v19, %v10730_v9  ;;  %v13355_v19 = vld [vmem:[#allocation38 + $0x424] sm:$0xf] }
 0xdce   :  { %v10765_v1 = vor.u32 %v13311_v60, %v10762_v21  ;;  %v13363_v60 = vld [vmem:[#allocation38 + $0x464] sm:$0xf]  ;;  %v10970_v21 = vld [vmem:[#allocation38 + $0x470] sm:$0xf0] }
 0xdcf   :  { %v10666_v52 = vld [vmem:[#allocation38 + $0x210] sm:$0xf0] }
 0xdd0   :  { %v10938_v9 = vld [vmem:[#allocation38 + $0x430] sm:$0xf0] }
 0xdd1   :  { %5073 = vmatpush.bf16.msra.mxu3 %v10637_v41  ;;  %5062 = vmatpush.bf16.msrb.mxu0 %v10461_v3  ;;  %v10746_v3 = vld [vmem:[#allocation38 + $0x2b0] sm:$0xf0] }
 0xdd2   :  { %v10749_v63 = vor.u32 %v13307_v24, %v10746_v3  ;;  %v13359_v24 = vld [vmem:[#allocation38 + $0x444] sm:$0xf]  ;;  %v10954_v3 = vld [vmem:[#allocation38 + $0x450] sm:$0xf0] }
 0xdd5   :  { %5074 = vmatpush.bf16.msra.mxu3 %v10621_v40  ;;  %5063 = vmatpush.bf16.msrb.mxu0 %v10445_v6  ;;  %v10906_v40 = vld [vmem:[#allocation38 + $0x3f0] sm:$0xf0] }
 0xdd6   :  { %v10909_v37 = vor.u32 %v13347_v36, %v10906_v40  ;;  %v11018_v6 = vld [vmem:[#allocation38 + $0x4d0] sm:$0xf0]  ;;  %v13295_v36 = vld [vmem:[#allocation38 + $0x244] sm:$0xf] }
 0xdd7   :  { %v11021_v26 = vor.u32 %v13375_v15, %v11018_v6  ;;  %v10698_v40 = vld [vmem:[#allocation38 + $0x250] sm:$0xf0]  ;;  %v10528_v15 = vld [vmem:[#allocation38 + $0xe8] sm:$0xf]  ;;  %v13254_v6 = vld [vmem:[#allocation38 + $0xf4] sm:$0xf0] }
 0xdd8   :  { %v10701_v32 = vor.u32 %v13295_v36, %v10698_v40  ;;  %v10496_v36 = vld [vmem:[#allocation38 + $0xa8] sm:$0xf] }
 0xdd9   :  { %5075 = vmatpush.bf16.msra.mxu3 %v10605_v39  ;;  %5064 = vmatpush.bf16.msrb.mxu0 %v10429_v43  ;;  %v10890_v39 = vld [vmem:[#allocation38 + $0x3d0] sm:$0xf0] }
 0xdda   :  { %v10893_v22 = vor.u32 %v13343_v62, %v10890_v39  ;;  %v11002_v43 = vld [vmem:[#allocation38 + $0x4b0] sm:$0xf0]  ;;  %v13395_v62 = vld [vmem:[#allocation38 + $0x564] sm:$0xf] }
 0xddb   :  { %v11098_v39 = vld [vmem:[#allocation38 + $0x570] sm:$0xf0] }
 0xddd   :  { %5076 = vmatpush.bf16.msra.mxu3 %v10589_v47  ;;  %5065 = vmatpush.bf16.msrb.mxu0 %v10413_v49  ;;  %v13299_v49 = vld [vmem:[#allocation38 + $0x264] sm:$0xf] }
 0xde1   :  { %5077 = vmatpush.bf16.msra.mxu3 %v10573_v7  ;;  %v11146_v7 = vld [vmem:[#allocation38 + $0x5d0] sm:$0xf0] }
 0xde2   :  { %v11149_v33 = vor.u32 %v13407_v10, %v11146_v7  ;;  %v10957_v10 = vor.u32 %v13359_v24, %v10954_v3 }
 0xde5   :  { %5078 = vmatpush.bf16.msra.mxu3 %v10557_v44  ;;  %v11130_v44 = vld [vmem:[#allocation38 + $0x5b0] sm:$0xf0] }
 0xde9   :  { %5079 = vmatpush.bf16.msra.mxu3 %v10541_v17  ;;  %v10842_v17 = vld [vmem:[#allocation38 + $0x370] sm:$0xf0] }
 0xdea   :  { %v10845_v57 = vor.u32 %v13331_v42, %v10842_v17  ;;  %v13351_v42 = vld [vmem:[#allocation38 + $0x404] sm:$0xf]  ;;  %v10922_v17 = vld [vmem:[#allocation38 + $0x410] sm:$0xf0] }
 0xdeb   :  { %v10925_v40 = vor.u32 %v13351_v42, %v10922_v17 }
 0xe1d   :  { %v3751_v54 = vpop.f32.mrf.mxu0 }
 0xe25   :  { %v3754_v28 = vpop.f32.mrf.mxu0 }
 0xe2f   :  { %v3774_v8 = vpop.f32.mrf.mxu3 }
 0xe30   :  { %v3780_v41 = vpack.c.bf16 %v3774_v8, %v3751_v54  ;;  %v11005_v54 = vor.u32 %v13371_v38, %v11002_v43  ;;  %v11133_v8 = vor.u32 %v13403_v14, %v11130_v44  ;;  %v10529_v38 = vor.u32 %v13254_v6, %v10528_v15  ;;  %v10512_v14 = vld [vmem:[#allocation38 + $0xc8] sm:$0xf]  ;;  %v13250_v44 = vld [vmem:[#allocation38 + $0xd4] sm:$0xf0] }
 0xe31   :  { %v10592_v15 = vld [vmem:[#allocation38 + $0x168] sm:$0xf]  ;;  %v13270_v6 = vld [vmem:[#allocation38 + $0x174] sm:$0xf0] }
 0xe32   :  { %v3784_v31 = vunpack.c.l.b16 %v3780_v41  ;;  %v3785_v58 = vunpack.c.h.b16 %v3780_v41  ;;  %v10986_v41 = vld [vmem:[#allocation38 + $0x490] sm:$0xf0] }
 0xe37   :  { %v3777_v55 = vpop.f32.mrf.mxu3 }
 0xe38   :  { %v3781_v35 = vpack.c.bf16 %v3777_v55, %v3754_v28  ;;  %v13367_v28 = vld [vmem:[#allocation38 + $0x484] sm:$0xf] }
 0xe39   :  { %v13399_v55 = vld [vmem:[#allocation38 + $0x584] sm:$0xf] }
 0xe3a   :  { %v3786_v2 = vunpack.c.l.b16 %v3781_v35  ;;  %v3787_v48 = vunpack.c.h.b16 %v3781_v35  ;;  %v10717_v35 = vor.u32 %v13299_v49, %v10714_v50  ;;  %v11069_v49 = vor.u32 %v13387_v25, %v11066_v11  ;;  %v13282_v50 = vld [vmem:[#allocation38 + $0x1d4] sm:$0xf0] }
 0xe3b   :  { %v10593_v11 = vor.u32 %v13270_v6, %v10592_v15  ;;  %v10672_v15 = vld [vmem:[#allocation38 + $0x208] sm:$0xf]  ;;  %v13290_v6 = vld [vmem:[#allocation38 + $0x214] sm:$0xf0] }
 0xe3c   :  { %v15622_v4 = vpack.c.b16 %v3786_v2, %v3784_v31  ;;  %v15624_v18 = vpack.c.b16 %v3787_v48, %v3785_v58  ;;  %v13327_v2 = vld [vmem:[#allocation38 + $0x344] sm:$0xf]  ;;  %v10826_v48 = vld [vmem:[#allocation38 + $0x350] sm:$0xf0] }
 0xe3d   :  { %v10829_v30 = vor.u32 %v13327_v2, %v10826_v48  ;;  %v13246_v48 = vld [vmem:[#allocation38 + $0xb4] sm:$0xf0] }
 0xe3e   :  { %v3795_v20 = vshll.u32 %v15622_v4, 16  ;;  %v3802_v53 = vshll.u32 %v15624_v18, 16  ;;  %4982 = vmatmul.bf16.vlgmr.msra.gmra.mxu1 %v15622_v4  ;;  %4996 = vmatmul.bf16.vlgmr.msrb.gmra.mxu2 %v15624_v18  ;;  %v3793_v47 = vshrl.u32 %v15622_v4, 16  ;;  %v3800_v61 = vshrl.u32 %v15624_v18, 16 }
 0xe3f   :  { %5086 = vmatpush.bf16.msra.mxu1 %v10781_v59  ;;  %5100 = vmatpush.bf16.msrb.mxu2 %v10909_v37  ;;  %v15639_v31 = vrot.slane %v15622_v4, 1  ;;  %v15642_v58 = vrot.slane %v15624_v18, 1  ;;  %v10989_v59 = vor.u32 %v13367_v28, %v10986_v41  ;;  %v11117_v37 = vor.u32 %v13399_v55, %v11114_v56  ;;  %v10784_v28 = vld [vmem:[#allocation38 + $0x2e8] sm:$0xf]  ;;  %v13318_v41 = vld [vmem:[#allocation38 + $0x2f4] sm:$0xf0] }
 0xe40   :  { %v3797_v5 = vrot.slane %v3795_v20, 1  ;;  %v3804_v12 = vrot.slane %v3802_v53, 1  ;;  %v13291_v20 = vld [vmem:[#allocation38 + $0x224] sm:$0xf]  ;;  %v10682_v53 = vld [vmem:[#allocation38 + $0x230] sm:$0xf0] }
 0xe41   :  { %v10912_v55 = vld [vmem:[#allocation38 + $0x3e8] sm:$0xf]  ;;  %v13350_v56 = vld [vmem:[#allocation38 + $0x3f4] sm:$0xf0] }
 0xe42   :  { %v15632_v23 = vor.u32 %v3797_v5, %v3793_v47  ;;  %v15634_v29 = vor.u32 %v3804_v12, %v3800_v61  ;;  %v11082_v47 = vld [vmem:[#allocation38 + $0x550] sm:$0xf0]  ;;  %v10685_v5 = vor.u32 %v13291_v20, %v10682_v53  ;;  %v10813_v61 = vor.u32 %v13323_v34, %v10810_v0  ;;  %v13287_v12 = vld [vmem:[#allocation38 + $0x204] sm:$0xf]  ;;  %v10480_v34 = vld [vmem:[#allocation38 + $0x88] sm:$0xf] }
 0xe43   :  { %5087 = vmatpush.bf16.msra.mxu1 %v10765_v1  ;;  %5101 = vmatpush.bf16.msrb.mxu2 %v10893_v22  ;;  %v10973_v1 = vor.u32 %v13363_v60, %v10970_v21  ;;  %v11101_v22 = vor.u32 %v13395_v62, %v11098_v39  ;;  %v11085_v7 = vor.u32 %v13391_v51, %v11082_v47  ;;  %v10768_v62 = vld [vmem:[#allocation38 + $0x2c8] sm:$0xf]  ;;  %v13314_v39 = vld [vmem:[#allocation38 + $0x2d4] sm:$0xf0] }
 0xe44   :  { %5010 = vmatmul.bf16.vlgmr.msra.gmra.mxu0 %v15632_v23  ;;  %5024 = vmatmul.bf16.vlgmr.msrb.gmra.mxu3 %v15634_v29  ;;  %v10785_v60 = vor.u32 %v13318_v41, %v10784_v28  ;;  %v10913_v21 = vor.u32 %v13350_v56, %v10912_v55  ;;  %v10497_v20 = vor.u32 %v13246_v48, %v10496_v36  ;;  %v13242_v0 = vld [vmem:[#allocation38 + $0x94] sm:$0xf0]  ;;  %v10752_v51 = vld [vmem:[#allocation38 + $0x2a8] sm:$0xf] }
 0xe45   :  { %5114 = vmatpush.bf16.msra.mxu0 %v11037_v13  ;;  %5128 = vmatpush.bf16.msrb.mxu3 %v11165_v27  ;;  %v13319_v13 = vld [vmem:[#allocation38 + $0x304] sm:$0xf]  ;;  %v10794_v27 = vld [vmem:[#allocation38 + $0x310] sm:$0xf0]  ;;  %v10769_v24 = vor.u32 %v13314_v39, %v10768_v62  ;;  %v13310_v47 = vld [vmem:[#allocation38 + $0x2b4] sm:$0xf0] }
 0xe46   :  { %v10560_v28 = vld [vmem:[#allocation38 + $0x128] sm:$0xf]  ;;  %v13262_v41 = vld [vmem:[#allocation38 + $0x134] sm:$0xf0] }
 0xe47   :  { %5088 = vmatpush.bf16.msra.mxu1 %v10749_v63  ;;  %5102 = vmatpush.bf16.msrb.mxu2 %v10877_v16  ;;  %v10656_v63 = vld [vmem:[#allocation38 + $0x1e8] sm:$0xf]  ;;  %v13286_v16 = vld [vmem:[#allocation38 + $0x1f4] sm:$0xf0]  ;;  %v10561_v48 = vor.u32 %v13262_v41, %v10560_v28 }
 0xe48   :  { %v10657_v43 = vor.u32 %v13286_v16, %v10656_v63  ;;  %v10736_v63 = vld [vmem:[#allocation38 + $0x288] sm:$0xf]  ;;  %v13306_v16 = vld [vmem:[#allocation38 + $0x294] sm:$0xf0] }
 0xe49   :  { %5115 = vmatpush.bf16.msra.mxu0 %v11021_v26  ;;  %5129 = vmatpush.bf16.msrb.mxu3 %v11149_v33  ;;  %v10669_v26 = vor.u32 %v13287_v12, %v10666_v52  ;;  %v10797_v33 = vor.u32 %v13319_v13, %v10794_v27  ;;  %v10481_v12 = vor.u32 %v13242_v0, %v10480_v34  ;;  %v10464_v13 = vld [vmem:[#allocation38 + $0x68] sm:$0xf]  ;;  %v13238_v27 = vld [vmem:[#allocation38 + $0x74] sm:$0xf0] }
 0xe4a   :  { %v10465_v25 = vor.u32 %v13238_v27, %v10464_v13  ;;  %v10832_v36 = vld [vmem:[#allocation38 + $0x348] sm:$0xf]  ;;  %v13382_v39 = vld [vmem:[#allocation38 + $0x4f4] sm:$0xf0] }
 0xe4b   :  { %5089 = vmatpush.bf16.msra.mxu1 %v10733_v45  ;;  %5103 = vmatpush.bf16.msrb.mxu2 %v10861_v46  ;;  %v10640_v45 = vld [vmem:[#allocation38 + $0x1c8] sm:$0xf]  ;;  %v10941_v46 = vor.u32 %v13355_v19, %v10938_v9  ;;  %v13338_v9 = vld [vmem:[#allocation38 + $0x394] sm:$0xf0] }
 0xe4c   :  { %v10864_v19 = vld [vmem:[#allocation38 + $0x388] sm:$0xf]  ;;  %v13294_v0 = vld [vmem:[#allocation38 + $0x234] sm:$0xf0] }
 0xe4d   :  { %5116 = vmatpush.bf16.msra.mxu0 %v11005_v54  ;;  %5130 = vmatpush.bf16.msrb.mxu3 %v11133_v8  ;;  %v13383_v54 = vld [vmem:[#allocation38 + $0x504] sm:$0xf]  ;;  %v11050_v8 = vld [vmem:[#allocation38 + $0x510] sm:$0xf0]  ;;  %v11040_v62 = vld [vmem:[#allocation38 + $0x4e8] sm:$0xf] }
 0xe4e   :  { %5038 = vmatmul.bf16.vlgmr.msrb.gmra.mxu1 %v15639_v31  ;;  %5052 = vmatmul.bf16.vlgmr.msra.gmra.mxu2 %v15642_v58  ;;  %v11053_v2 = vor.u32 %v13383_v54, %v11050_v8  ;;  %v10432_v54 = vld [vmem:[#allocation38 + $0x28] sm:$0xf]  ;;  %v13230_v8 = vld [vmem:[#allocation38 + $0x34] sm:$0xf0] }
 0xe4f   :  { %5090 = vmatpush.bf16.msra.mxu1 %v10717_v35  ;;  %5104 = vmatpush.bf16.msrb.mxu2 %v10845_v57  ;;  %v10513_v35 = vor.u32 %v13250_v44, %v10512_v14  ;;  %v10641_v57 = vor.u32 %v13282_v50, %v10640_v45  ;;  %v10737_v14 = vor.u32 %v13306_v16, %v10736_v63  ;;  %v10720_v45 = vld [vmem:[#allocation38 + $0x268] sm:$0xf]  ;;  %v13334_v50 = vld [vmem:[#allocation38 + $0x374] sm:$0xf0]  ;;  %v13252_v63 = vld [vmem:[#allocation38 + $0xec] sm:$0xf] }
 0xe50   :  { %v10865_v44 = vor.u32 %v13338_v9, %v10864_v19  ;;  %v10688_v34 = vld [vmem:[#allocation38 + $0x228] sm:$0xf]  ;;  %v13410_v27 = vld [vmem:[#allocation38 + $0x5d4] sm:$0xf0]  ;;  %v10530_v16 = vld [vmem:[#allocation38 + $0xf8] sm:$0xf0] }
 0xe51   :  { %5117 = vmatpush.bf16.msra.mxu0 %v10989_v59  ;;  %5131 = vmatpush.bf16.msrb.mxu3 %v11117_v37  ;;  %v10624_v59 = vld [vmem:[#allocation38 + $0x1a8] sm:$0xf]  ;;  %v13278_v37 = vld [vmem:[#allocation38 + $0x1b4] sm:$0xf0]  ;;  %v13284_v19 = vld [vmem:[#allocation38 + $0x1ec] sm:$0xf] }
 0xe52   :  { %v10625_v53 = vor.u32 %v13278_v37, %v10624_v59  ;;  %v10416_v59 = vld [vmem:[#allocation38 + $0x8] sm:$0xf]  ;;  %v13226_v37 = vld [vmem:[#allocation38 + $0x14] sm:$0xf0]  ;;  %v10658_v9 = vld [vmem:[#allocation38 + $0x1f8] sm:$0xf0] }
 0xe53   :  { %5091 = vmatpush.bf16.msra.mxu1 %v10701_v32  ;;  %5105 = vmatpush.bf16.msrb.mxu2 %v10829_v30  ;;  %v10896_v32 = vld [vmem:[#allocation38 + $0x3c8] sm:$0xf]  ;;  %v13346_v30 = vld [vmem:[#allocation38 + $0x3d4] sm:$0xf0] }
 0xe54   :  { %5066 = vmatmul.bf16.vlgmr.msrb.gmra.mxu0 %v15622_v4  ;;  %5080 = vmatmul.bf16.vlgmr.msra.gmra.mxu3 %v15624_v18  ;;  %v10897_v3 = vor.u32 %v13346_v30, %v10896_v32  ;;  %v10992_v28 = vld [vmem:[#allocation38 + $0x488] sm:$0xf]  ;;  %v13370_v41 = vld [vmem:[#allocation38 + $0x494] sm:$0xf0] }
 0xe55   :  { %5118 = vmatpush.bf16.msra.mxu0 %v10973_v1  ;;  %5132 = vmatpush.bf16.msrb.mxu3 %v11101_v22  ;;  %v10608_v1 = vld [vmem:[#allocation38 + $0x188] sm:$0xf]  ;;  %v13274_v22 = vld [vmem:[#allocation38 + $0x194] sm:$0xf0] }
 0xe56   :  { %v10609_v52 = vor.u32 %v13274_v22, %v10608_v1  ;;  %v10816_v1 = vld [vmem:[#allocation38 + $0x328] sm:$0xf]  ;;  %v13326_v22 = vld [vmem:[#allocation38 + $0x334] sm:$0xf0] }
 0xe57   :  { %5092 = vmatpush.bf16.msra.mxu1 %v10685_v5  ;;  %5106 = vmatpush.bf16.msrb.mxu2 %v10813_v61  ;;  %v10880_v5 = vld [vmem:[#allocation38 + $0x3a8] sm:$0xf]  ;;  %v13342_v61 = vld [vmem:[#allocation38 + $0x3b4] sm:$0xf0]  ;;  %v10817_v13 = vor.u32 %v13326_v22, %v10816_v1 }
 0xe59   :  { %5119 = vmatpush.bf16.msra.mxu0 %v10957_v10  ;;  %5133 = vmatpush.bf16.msrb.mxu3 %v11085_v7  ;;  %v10753_v10 = vor.u32 %v13310_v47, %v10752_v51  ;;  %v10881_v7 = vor.u32 %v13342_v61, %v10880_v5  ;;  %v11041_v51 = vor.u32 %v13382_v39, %v11040_v62  ;;  %v11024_v5 = vld [vmem:[#allocation38 + $0x4c8] sm:$0xf]  ;;  %v13378_v61 = vld [vmem:[#allocation38 + $0x4d4] sm:$0xf0] }
 0xe5b   :  { %5093 = vmatpush.bf16.msra.mxu1 %v10669_v26  ;;  %5107 = vmatpush.bf16.msrb.mxu2 %v10797_v33  ;;  %v10448_v26 = vld [vmem:[#allocation38 + $0x48] sm:$0xf]  ;;  %v13234_v33 = vld [vmem:[#allocation38 + $0x54] sm:$0xf0] }
 0xe5c   :  { %v10449_v42 = vor.u32 %v13234_v33, %v10448_v26  ;;  %v10673_v26 = vor.u32 %v13290_v6, %v10672_v15 }
 0xe5d   :  { %5120 = vmatpush.bf16.msra.mxu0 %v10941_v46  ;;  %5134 = vmatpush.bf16.msrb.mxu3 %v11069_v49  ;;  %v13302_v46 = vld [vmem:[#allocation38 + $0x274] sm:$0xf0]  ;;  %v10848_v49 = vld [vmem:[#allocation38 + $0x368] sm:$0xf] }
 0xe5e   :  { %5094 = vmatmul.bf16.vlgmr.msra.gmra.mxu1 %v15632_v23  ;;  %5108 = vmatmul.bf16.vlgmr.msrb.gmra.mxu2 %v15634_v29  ;;  %v10721_v55 = vor.u32 %v13302_v46, %v10720_v45  ;;  %v10849_v56 = vor.u32 %v13334_v50, %v10848_v49  ;;  %v11136_v45 = vld [vmem:[#allocation38 + $0x5a8] sm:$0xf]  ;;  %v13406_v46 = vld [vmem:[#allocation38 + $0x5b4] sm:$0xf0]  ;;  %v13248_v49 = vld [vmem:[#allocation38 + $0xcc] sm:$0xf] }
 0xe5f   :  { %5142 = vmatpush.bf16.msrb.mxu1 %v10529_v38  ;;  %5156 = vmatpush.bf16.msra.mxu2 %v10657_v43  ;;  %v10576_v38 = vld [vmem:[#allocation38 + $0x148] sm:$0xf]  ;;  %v13266_v43 = vld [vmem:[#allocation38 + $0x154] sm:$0xf0]  ;;  %v10514_v50 = vld [vmem:[#allocation38 + $0xd8] sm:$0xf0] }
 0xe60   :  { %v10577_v17 = vor.u32 %v13266_v43, %v10576_v38  ;;  %v11008_v38 = vld [vmem:[#allocation38 + $0x4a8] sm:$0xf]  ;;  %v13374_v43 = vld [vmem:[#allocation38 + $0x4b4] sm:$0xf0] }
 0xe61   :  { %5121 = vmatpush.bf16.msra.mxu0 %v10925_v40  ;;  %5135 = vmatpush.bf16.msrb.mxu3 %v11053_v2  ;;  %v13330_v40 = vld [vmem:[#allocation38 + $0x354] sm:$0xf0]  ;;  %v10433_v2 = vor.u32 %v13230_v8, %v10432_v54  ;;  %v11009_v54 = vor.u32 %v13374_v43, %v11008_v38  ;;  %v11137_v8 = vor.u32 %v13406_v46, %v11136_v45  ;;  %v11056_v45 = vld [vmem:[#allocation38 + $0x508] sm:$0xf] }
 0xe62   :  { %v10833_v30 = vor.u32 %v13330_v40, %v10832_v36  ;;  %v13244_v36 = vld [vmem:[#allocation38 + $0xac] sm:$0xf]  ;;  %v10498_v40 = vld [vmem:[#allocation38 + $0xb8] sm:$0xf0] }
 0xe63   :  { %5143 = vmatpush.bf16.msrb.mxu1 %v10513_v35  ;;  %5157 = vmatpush.bf16.msra.mxu2 %v10641_v57  ;;  %v10704_v35 = vld [vmem:[#allocation38 + $0x248] sm:$0xf]  ;;  %v13298_v57 = vld [vmem:[#allocation38 + $0x254] sm:$0xf0]  ;;  %v10501_v62 = vor.u32 %v13244_v36, %v10498_v40 }
 0xe64   :  { %5122 = vmatmul.bf16.vlgmr.msra.gmra.mxu0 %v15639_v31  ;;  %5136 = vmatmul.bf16.vlgmr.msrb.gmra.mxu3 %v15642_v58  ;;  %v10705_v32 = vor.u32 %v13298_v57, %v10704_v35  ;;  %v11120_v35 = vld [vmem:[#allocation38 + $0x588] sm:$0xf]  ;;  %v13402_v57 = vld [vmem:[#allocation38 + $0x594] sm:$0xf0] }
 0xe65   :  { %5170 = vmatpush.bf16.msrb.mxu0 %v10785_v60  ;;  %5184 = vmatpush.bf16.msra.mxu3 %v10913_v21  ;;  %v10544_v60 = vld [vmem:[#allocation38 + $0x108] sm:$0xf]  ;;  %v13258_v21 = vld [vmem:[#allocation38 + $0x114] sm:$0xf0] }
 0xe67   :  { %5144 = vmatpush.bf16.msrb.mxu1 %v10497_v20  ;;  %5158 = vmatpush.bf16.msra.mxu2 %v10625_v53  ;;  %v11168_v20 = vld [vmem:[#allocation38 + $0x5e8] sm:$0xf]  ;;  %v13414_v53 = vld [vmem:[#allocation38 + $0x5f4] sm:$0xf0] }
 0xe68   :  { %v11169_v47 = vor.u32 %v13414_v53, %v11168_v20  ;;  %v13240_v20 = vld [vmem:[#allocation38 + $0x8c] sm:$0xf]  ;;  %v10482_v53 = vld [vmem:[#allocation38 + $0x98] sm:$0xf0] }
 0xe69   :  { %5171 = vmatpush.bf16.msrb.mxu0 %v10769_v24  ;;  %5185 = vmatpush.bf16.msra.mxu3 %v10897_v3  ;;  %v10417_v24 = vor.u32 %v13226_v37, %v10416_v59  ;;  %v10545_v3 = vor.u32 %v13258_v21, %v10544_v60  ;;  %v10993_v59 = vor.u32 %v13370_v41, %v10992_v28  ;;  %v10976_v60 = vld [vmem:[#allocation38 + $0x468] sm:$0xf]  ;;  %v13366_v21 = vld [vmem:[#allocation38 + $0x474] sm:$0xf0]  ;;  %v13228_v28 = vld [vmem:[#allocation38 + $0x2c] sm:$0xf] }
 0xe6a   :  { %v11121_v37 = vor.u32 %v13402_v57, %v11120_v35  ;;  %v10977_v1 = vor.u32 %v13366_v21, %v10976_v60  ;;  %v10434_v41 = vld [vmem:[#allocation38 + $0x38] sm:$0xf0] }
 0xe6b   :  { %5145 = vmatpush.bf16.msrb.mxu1 %v10481_v12  ;;  %5159 = vmatpush.bf16.msra.mxu2 %v10609_v52  ;;  %v11152_v12 = vld [vmem:[#allocation38 + $0x5c8] sm:$0xf]  ;;  %v10689_v52 = vor.u32 %v13294_v0, %v10688_v34  ;;  %v13272_v34 = vld [vmem:[#allocation38 + $0x18c] sm:$0xf]  ;;  %v10610_v0 = vld [vmem:[#allocation38 + $0x198] sm:$0xf0] }
 0xe6c   :  { %v10898_v21 = vld [vmem:[#allocation38 + $0x3d8] sm:$0xf0] }
 0xe6d   :  { %5172 = vmatpush.bf16.msrb.mxu0 %v10753_v10  ;;  %5186 = vmatpush.bf16.msra.mxu3 %v10881_v7  ;;  %v10800_v10 = vld [vmem:[#allocation38 + $0x308] sm:$0xf]  ;;  %v13322_v7 = vld [vmem:[#allocation38 + $0x314] sm:$0xf0] }
 0xe6e   :  { %v10801_v33 = vor.u32 %v13322_v7, %v10800_v10  ;;  %v10944_v10 = vld [vmem:[#allocation38 + $0x428] sm:$0xf]  ;;  %v13358_v7 = vld [vmem:[#allocation38 + $0x434] sm:$0xf0] }
 0xe6f   :  { %5146 = vmatpush.bf16.msrb.mxu1 %v10465_v25  ;;  %5160 = vmatpush.bf16.msra.mxu2 %v10593_v11  ;;  %v11025_v25 = vor.u32 %v13378_v61, %v11024_v5  ;;  %v11153_v11 = vor.u32 %v13410_v27, %v11152_v12  ;;  %v11088_v5 = vld [vmem:[#allocation38 + $0x548] sm:$0xf]  ;;  %v13394_v61 = vld [vmem:[#allocation38 + $0x554] sm:$0xf0]  ;;  %v13236_v12 = vld [vmem:[#allocation38 + $0x6c] sm:$0xf]  ;;  %v10945_v38 = vor.u32 %v13358_v7, %v10944_v10 }
 0xe70   :  { %v10594_v27 = vld [vmem:[#allocation38 + $0x178] sm:$0xf0]  ;;  %v11089_v6 = vor.u32 %v13394_v61, %v11088_v5 }
 0xe71   :  { %5173 = vmatpush.bf16.msrb.mxu0 %v10737_v14  ;;  %5187 = vmatpush.bf16.msra.mxu3 %v10865_v44  ;;  %v10533_v14 = vor.u32 %v13252_v63, %v10530_v16  ;;  %v10661_v44 = vor.u32 %v13284_v19, %v10658_v9  ;;  %v11072_v19 = vld [vmem:[#allocation38 + $0x528] sm:$0xf]  ;;  %v13390_v9 = vld [vmem:[#allocation38 + $0x534] sm:$0xf0] }
 0xe72   :  { %v11073_v43 = vor.u32 %v13390_v9, %v11072_v19 }
 0xe73   :  { %5147 = vmatpush.bf16.msrb.mxu1 %v10449_v42  ;;  %5161 = vmatpush.bf16.msra.mxu2 %v10577_v17  ;;  %v13280_v42 = vld [vmem:[#allocation38 + $0x1cc] sm:$0xf]  ;;  %v10642_v17 = vld [vmem:[#allocation38 + $0x1d8] sm:$0xf0] }
 0xe75   :  { %5174 = vmatpush.bf16.msrb.mxu0 %v10721_v55  ;;  %5188 = vmatpush.bf16.msra.mxu3 %v10849_v56  ;;  %v10517_v55 = vor.u32 %v13248_v49, %v10514_v50  ;;  %v10645_v56 = vor.u32 %v13280_v42, %v10642_v17  ;;  %v13386_v50 = vld [vmem:[#allocation38 + $0x514] sm:$0xf0]  ;;  %v13316_v42 = vld [vmem:[#allocation38 + $0x2ec] sm:$0xf]  ;;  %v10786_v17 = vld [vmem:[#allocation38 + $0x2f8] sm:$0xf0] }
 0xe76   :  { %v11057_v57 = vor.u32 %v13386_v50, %v11056_v45  ;;  %v10789_v36 = vor.u32 %v13316_v42, %v10786_v17  ;;  %v13300_v45 = vld [vmem:[#allocation38 + $0x26c] sm:$0xf]  ;;  %v10850_v17 = vld [vmem:[#allocation38 + $0x378] sm:$0xf0] }
 0xe77   :  { %5148 = vmatpush.bf16.msrb.mxu1 %v10433_v2  ;;  %5162 = vmatpush.bf16.msra.mxu2 %v10561_v48  ;;  %v13276_v2 = vld [vmem:[#allocation38 + $0x1ac] sm:$0xf]  ;;  %v10626_v48 = vld [vmem:[#allocation38 + $0x1b8] sm:$0xf0] }
 0xe78   :  { %v10629_v39 = vor.u32 %v13276_v2, %v10626_v48  ;;  %v13312_v2 = vld [vmem:[#allocation38 + $0x2cc] sm:$0xf]  ;;  %v10770_v48 = vld [vmem:[#allocation38 + $0x2d8] sm:$0xf0] }
 0xe79   :  { %5175 = vmatpush.bf16.msrb.mxu0 %v10705_v32  ;;  %5189 = vmatpush.bf16.msra.mxu3 %v10833_v30  ;;  %v11104_v32 = vld [vmem:[#allocation38 + $0x568] sm:$0xf]  ;;  %v13398_v30 = vld [vmem:[#allocation38 + $0x574] sm:$0xf0]  ;;  %v13332_v42 = vld [vmem:[#allocation38 + $0x36c] sm:$0xf] }
 0xe7a   :  { %v11105_v22 = vor.u32 %v13398_v30, %v11104_v32  ;;  %v13256_v32 = vld [vmem:[#allocation38 + $0x10c] sm:$0xf]  ;;  %v10546_v30 = vld [vmem:[#allocation38 + $0x118] sm:$0xf0] }
 0xe7b   :  { %5149 = vmatpush.bf16.msrb.mxu1 %v10417_v24  ;;  %5163 = vmatpush.bf16.msra.mxu2 %v10545_v3  ;;  %v10960_v24 = vld [vmem:[#allocation38 + $0x448] sm:$0xf]  ;;  %v13362_v3 = vld [vmem:[#allocation38 + $0x454] sm:$0xf0] }
 0xe7c   :  { %v10961_v15 = vor.u32 %v13362_v3, %v10960_v24  ;;  %v10549_v3 = vor.u32 %v13256_v32, %v10546_v30 }
 0xe7d   :  { %5176 = vmatpush.bf16.msrb.mxu0 %v10689_v52  ;;  %5190 = vmatpush.bf16.msra.mxu3 %v10817_v13  ;;  %v10466_v52 = vld [vmem:[#allocation38 + $0x78] sm:$0xf0]  ;;  %v13268_v13 = vld [vmem:[#allocation38 + $0x16c] sm:$0xf] }
 0xe7e   :  { %5150 = vmatmul.bf16.vlgmr.msrb.gmra.mxu1 %v15622_v4  ;;  %5164 = vmatmul.bf16.vlgmr.msra.gmra.mxu2 %v15624_v18  ;;  %v10469_v63 = vor.u32 %v13236_v12, %v10466_v52  ;;  %v10597_v16 = vor.u32 %v13268_v13, %v10594_v27  ;;  %v13340_v12 = vld [vmem:[#allocation38 + $0x3ac] sm:$0xf]  ;;  %v10882_v52 = vld [vmem:[#allocation38 + $0x3b8] sm:$0xf0] }
 0xe7f   :  { %5198 = vmatpush.bf16.msra.mxu1 %v11041_v51  ;;  %5212 = vmatpush.bf16.msrb.mxu2 %v11169_v47  ;;  %v10485_v51 = vor.u32 %v13240_v20, %v10482_v53  ;;  %v10613_v47 = vor.u32 %v13272_v34, %v10610_v0  ;;  %v13380_v20 = vld [vmem:[#allocation38 + $0x4ec] sm:$0xf]  ;;  %v11042_v53 = vld [vmem:[#allocation38 + $0x4f8] sm:$0xf0]  ;;  %v10885_v7 = vor.u32 %v13340_v12, %v10882_v52 }
 0xe80   :  { %v13412_v34 = vld [vmem:[#allocation38 + $0x5ec] sm:$0xf]  ;;  %v11170_v0 = vld [vmem:[#allocation38 + $0x5f8] sm:$0xf0]  ;;  %v11045_v5 = vor.u32 %v13380_v20, %v11042_v53 }
 0xe81   :  { %5177 = vmatpush.bf16.msrb.mxu0 %v10673_v26  ;;  %5191 = vmatpush.bf16.msra.mxu3 %v10801_v33  ;;  %v13264_v26 = vld [vmem:[#allocation38 + $0x14c] sm:$0xf]  ;;  %v10578_v33 = vld [vmem:[#allocation38 + $0x158] sm:$0xf0]  ;;  %v11173_v61 = vor.u32 %v13412_v34, %v11170_v0 }
 0xe82   :  { %v10581_v49 = vor.u32 %v13264_v26, %v10578_v33  ;;  %v13376_v13 = vld [vmem:[#allocation38 + $0x4cc] sm:$0xf]  ;;  %v11026_v27 = vld [vmem:[#allocation38 + $0x4d8] sm:$0xf0] }
 0xe83   :  { %5199 = vmatpush.bf16.msra.mxu1 %v11025_v25  ;;  %5213 = vmatpush.bf16.msrb.mxu2 %v11153_v11  ;;  %v13232_v25 = vld [vmem:[#allocation38 + $0x4c] sm:$0xf]  ;;  %v10450_v11 = vld [vmem:[#allocation38 + $0x58] sm:$0xf0]  ;;  %v11029_v19 = vor.u32 %v13376_v13, %v11026_v27 }
 0xe84   :  { %5178 = vmatmul.bf16.vlgmr.msrb.gmra.mxu0 %v15632_v23  ;;  %5192 = vmatmul.bf16.vlgmr.msra.gmra.mxu3 %v15634_v29  ;;  %v10453_v46 = vor.u32 %v13232_v25, %v10450_v11  ;;  %v13336_v25 = vld [vmem:[#allocation38 + $0x38c] sm:$0xf]  ;;  %v10866_v11 = vld [vmem:[#allocation38 + $0x398] sm:$0xf0] }
 0xe85   :  { %5226 = vmatpush.bf16.msra.mxu0 %v10533_v14  ;;  %5240 = vmatpush.bf16.msrb.mxu3 %v10661_v44  ;;  %v10928_v14 = vld [vmem:[#allocation38 + $0x408] sm:$0xf]  ;;  %v13354_v44 = vld [vmem:[#allocation38 + $0x414] sm:$0xf0]  ;;  %v13372_v26 = vld [vmem:[#allocation38 + $0x4ac] sm:$0xf] }
 0xe86   :  { %v10929_v35 = vor.u32 %v13354_v44, %v10928_v14  ;;  %v11010_v33 = vld [vmem:[#allocation38 + $0x4b8] sm:$0xf0]  ;;  %v10869_v44 = vor.u32 %v13336_v25, %v10866_v11  ;;  %v13324_v20 = vld [vmem:[#allocation38 + $0x32c] sm:$0xf] }
 0xe87   :  { %5200 = vmatpush.bf16.msra.mxu1 %v11009_v54  ;;  %5214 = vmatpush.bf16.msrb.mxu2 %v11137_v8  ;;  %v13348_v54 = vld [vmem:[#allocation38 + $0x3ec] sm:$0xf]  ;;  %v10914_v8 = vld [vmem:[#allocation38 + $0x3f8] sm:$0xf0] }
 0xe88   :  { %v10917_v40 = vor.u32 %v13348_v54, %v10914_v8  ;;  %v13368_v54 = vld [vmem:[#allocation38 + $0x48c] sm:$0xf]  ;;  %v10994_v8 = vld [vmem:[#allocation38 + $0x498] sm:$0xf0] }
 0xe89   :  { %5227 = vmatpush.bf16.msra.mxu0 %v10517_v55  ;;  %5241 = vmatpush.bf16.msrb.mxu3 %v10645_v56  ;;  %v13260_v55 = vld [vmem:[#allocation38 + $0x12c] sm:$0xf]  ;;  %v10562_v56 = vld [vmem:[#allocation38 + $0x138] sm:$0xf0] }
 0xe8a   :  { %v10565_v60 = vor.u32 %v13260_v55, %v10562_v56  ;;  %v13296_v55 = vld [vmem:[#allocation38 + $0x24c] sm:$0xf]  ;;  %v10706_v56 = vld [vmem:[#allocation38 + $0x258] sm:$0xf0] }
 0xe8b   :  { %5201 = vmatpush.bf16.msra.mxu1 %v10993_v59  ;;  %5215 = vmatpush.bf16.msrb.mxu2 %v11121_v37  ;;  %v13344_v59 = vld [vmem:[#allocation38 + $0x3cc] sm:$0xf]  ;;  %v10437_v37 = vor.u32 %v13228_v28, %v10434_v41  ;;  %v11122_v41 = vld [vmem:[#allocation38 + $0x598] sm:$0xf0] }
 0xe8c   :  { %v13400_v28 = vld [vmem:[#allocation38 + $0x58c] sm:$0xf]  ;;  %v10818_v53 = vld [vmem:[#allocation38 + $0x338] sm:$0xf0] }
 0xe8d   :  { %5228 = vmatpush.bf16.msra.mxu0 %v10501_v62  ;;  %5242 = vmatpush.bf16.msrb.mxu3 %v10629_v39  ;;  %v13224_v62 = vld [vmem:[#allocation38 + $0xc] sm:$0xf]  ;;  %v10418_v39 = vld [vmem:[#allocation38 + $0x18] sm:$0xf0] }
 0xe8e   :  { %v10421_v24 = vor.u32 %v13224_v62, %v10418_v39  ;;  %v13292_v62 = vld [vmem:[#allocation38 + $0x22c] sm:$0xf]  ;;  %v10690_v39 = vld [vmem:[#allocation38 + $0x238] sm:$0xf0] }
 0xe8f   :  { %5202 = vmatpush.bf16.msra.mxu1 %v10977_v1  ;;  %5216 = vmatpush.bf16.msrb.mxu2 %v11105_v22  ;;  %v10773_v1 = vor.u32 %v13312_v2, %v10770_v48  ;;  %v10901_v22 = vor.u32 %v13344_v59, %v10898_v21  ;;  %v13364_v2 = vld [vmem:[#allocation38 + $0x46c] sm:$0xf]  ;;  %v10978_v48 = vld [vmem:[#allocation38 + $0x478] sm:$0xf0] }
 0xe90   :  { %v13396_v59 = vld [vmem:[#allocation38 + $0x56c] sm:$0xf]  ;;  %v10981_v32 = vor.u32 %v13364_v2, %v10978_v48  ;;  %v10962_v0 = vld [vmem:[#allocation38 + $0x458] sm:$0xf0] }
 0xe91   :  { %5229 = vmatpush.bf16.msra.mxu0 %v10485_v51  ;;  %5243 = vmatpush.bf16.msrb.mxu3 %v10613_v47  ;;  %v13308_v51 = vld [vmem:[#allocation38 + $0x2ac] sm:$0xf]  ;;  %v10754_v47 = vld [vmem:[#allocation38 + $0x2b8] sm:$0xf0] }
 0xe92   :  { %v10757_v10 = vor.u32 %v13308_v51, %v10754_v47  ;;  %v13360_v34 = vld [vmem:[#allocation38 + $0x44c] sm:$0xf]  ;;  %v10674_v47 = vld [vmem:[#allocation38 + $0x218] sm:$0xf0] }
 0xe93   :  { %5203 = vmatpush.bf16.msra.mxu1 %v10961_v15  ;;  %5217 = vmatpush.bf16.msrb.mxu2 %v11089_v6  ;;  %v13408_v15 = vld [vmem:[#allocation38 + $0x5cc] sm:$0xf]  ;;  %v11154_v6 = vld [vmem:[#allocation38 + $0x5d8] sm:$0xf0] }
 0xe94   :  { %v11157_v9 = vor.u32 %v13408_v15, %v11154_v6  ;;  %v13288_v51 = vld [vmem:[#allocation38 + $0x20c] sm:$0xf]  ;;  %v10802_v52 = vld [vmem:[#allocation38 + $0x318] sm:$0xf0] }
 0xe95   :  { %5230 = vmatpush.bf16.msra.mxu0 %v10469_v63  ;;  %5244 = vmatpush.bf16.msrb.mxu3 %v10597_v16  ;;  %v13304_v63 = vld [vmem:[#allocation38 + $0x28c] sm:$0xf]  ;;  %v10738_v16 = vld [vmem:[#allocation38 + $0x298] sm:$0xf0] }
 0xe96   :  { %v10741_v14 = vor.u32 %v13304_v63, %v10738_v16  ;;  %v13320_v12 = vld [vmem:[#allocation38 + $0x30c] sm:$0xf]  ;;  %v10946_v27 = vld [vmem:[#allocation38 + $0x438] sm:$0xf0] }
 0xe97   :  { %5204 = vmatpush.bf16.msra.mxu1 %v10945_v38  ;;  %5218 = vmatpush.bf16.msrb.mxu2 %v11073_v43  ;;  %v13404_v38 = vld [vmem:[#allocation38 + $0x5ac] sm:$0xf]  ;;  %v11138_v43 = vld [vmem:[#allocation38 + $0x5b8] sm:$0xf0] }
 0xe98   :  { %v11141_v50 = vor.u32 %v13404_v38, %v11138_v43  ;;  %v13356_v13 = vld [vmem:[#allocation38 + $0x42c] sm:$0xf]  ;;  %v11074_v6 = vld [vmem:[#allocation38 + $0x538] sm:$0xf0] }
 0xe99   :  { %5231 = vmatpush.bf16.msra.mxu0 %v10453_v46  ;;  %5245 = vmatpush.bf16.msrb.mxu3 %v10581_v49  ;;  %v10722_v46 = vld [vmem:[#allocation38 + $0x278] sm:$0xf0]  ;;  %v11013_v49 = vor.u32 %v13372_v26, %v11010_v33  ;;  %v13388_v15 = vld [vmem:[#allocation38 + $0x52c] sm:$0xf]  ;;  %v10949_v63 = vor.u32 %v13356_v13, %v10946_v27 }
 0xe9a   :  { %v11077_v16 = vor.u32 %v13388_v15, %v11074_v6  ;;  %v13384_v25 = vld [vmem:[#allocation38 + $0x50c] sm:$0xf]  ;;  %v11058_v11 = vld [vmem:[#allocation38 + $0x518] sm:$0xf0] }
 0xe9b   :  { %5205 = vmatpush.bf16.msra.mxu1 %v10929_v35  ;;  %5219 = vmatpush.bf16.msrb.mxu2 %v11057_v57  ;;  %v10997_v35 = vor.u32 %v13368_v54, %v10994_v8  ;;  %v11125_v57 = vor.u32 %v13400_v28, %v11122_v41  ;;  %v11061_v33 = vor.u32 %v13384_v25, %v11058_v11 }
 0xe9d   :  { %5232 = vmatpush.bf16.msra.mxu0 %v10437_v37  ;;  %5246 = vmatpush.bf16.msrb.mxu3 %v10565_v60  ;;  %v11106_v37 = vld [vmem:[#allocation38 + $0x578] sm:$0xf0]  ;;  %v10709_v60 = vor.u32 %v13296_v55, %v10706_v56 }
 0xe9e   :  { %5206 = vmatmul.bf16.vlgmr.msra.gmra.mxu1 %v15639_v31  ;;  %5220 = vmatmul.bf16.vlgmr.msrb.gmra.mxu2 %v15642_v58  ;;  %v11109_v30 = vor.u32 %v13396_v59, %v11106_v37 }
 0xe9f   :  { %5254 = vmatpush.bf16.msrb.mxu1 %v10789_v36  ;;  %5268 = vmatpush.bf16.msra.mxu2 %v10917_v40  ;;  %v13328_v36 = vld [vmem:[#allocation38 + $0x34c] sm:$0xf]  ;;  %v10834_v40 = vld [vmem:[#allocation38 + $0x358] sm:$0xf0] }
 0xea0   :  { %v10837_v21 = vor.u32 %v13328_v36, %v10834_v40 }
 0xea1   :  { %5233 = vmatpush.bf16.msra.mxu0 %v10421_v24  ;;  %5247 = vmatpush.bf16.msrb.mxu3 %v10549_v3  ;;  %v10693_v24 = vor.u32 %v13292_v62, %v10690_v39  ;;  %v10821_v3 = vor.u32 %v13324_v20, %v10818_v53 }
 0xea3   :  { %5255 = vmatpush.bf16.msrb.mxu1 %v10773_v1  ;;  %5269 = vmatpush.bf16.msra.mxu2 %v10901_v22  ;;  %v13392_v1 = vld [vmem:[#allocation38 + $0x54c] sm:$0xf]  ;;  %v11090_v22 = vld [vmem:[#allocation38 + $0x558] sm:$0xf0] }
 0xea4   :  { %5234 = vmatmul.bf16.vlgmr.msra.gmra.mxu0 %v15622_v4  ;;  %5248 = vmatmul.bf16.vlgmr.msrb.gmra.mxu3 %v15624_v18  ;;  %v10725_v4 = vor.u32 %v13300_v45, %v10722_v46  ;;  %v10853_v18 = vor.u32 %v13332_v42, %v10850_v17  ;;  %v15664_v45 = vld [vmem:[#allocation40] sm:$0xf] }
 0xea5   :  { %5282 = vmatpush.bf16.msrb.mxu0 %v11045_v5  ;;  %5296 = vmatpush.bf16.msra.mxu3 %v11173_v61  ;;  %v10965_v5 = vor.u32 %v13360_v34, %v10962_v0  ;;  %v11093_v61 = vor.u32 %v13392_v1, %v11090_v22  ;;  %v4006_v42 = vperm.slane %v15664_v45, 0  ;;  %v4007_v20 = vperm.slane %v15664_v45, 1 }
 0xea7   :  { %5256 = vmatpush.bf16.msrb.mxu1 %v10757_v10  ;;  %5270 = vmatpush.bf16.msra.mxu2 %v10885_v7  ;;  %v10677_v10 = vor.u32 %v13288_v51, %v10674_v47  ;;  %v10805_v7 = vor.u32 %v13320_v12, %v10802_v52 }
 0xea9   :  { %5283 = vmatpush.bf16.msrb.mxu0 %v11029_v19  ;;  %5297 = vmatpush.bf16.msra.mxu3 %v11157_v9  ;;  %v13352_v19 = vld [vmem:[#allocation38 + $0x40c] sm:$0xf]  ;;  %v10930_v9 = vld [vmem:[#allocation38 + $0x418] sm:$0xf0] }
 0xeaa   :  { %v10933_v26 = vor.u32 %v13352_v19, %v10930_v9 }
 0xeab   :  { %5257 = vmatpush.bf16.msrb.mxu1 %v10741_v14  ;;  %5271 = vmatpush.bf16.msra.mxu2 %v10869_v44 }
 0xead   :  { %5284 = vmatpush.bf16.msrb.mxu0 %v11013_v49  ;;  %5298 = vmatpush.bf16.msra.mxu3 %v11141_v50 }
 0xeaf   :  { %5258 = vmatpush.bf16.msrb.mxu1 %v10725_v4  ;;  %5272 = vmatpush.bf16.msra.mxu2 %v10853_v18 }
 0xeb1   :  { %5285 = vmatpush.bf16.msrb.mxu0 %v10997_v35  ;;  %5299 = vmatpush.bf16.msra.mxu3 %v11125_v57 }
 0xeb3   :  { %5259 = vmatpush.bf16.msrb.mxu1 %v10709_v60  ;;  %5273 = vmatpush.bf16.msra.mxu2 %v10837_v21 }
 0xeb5   :  { %5286 = vmatpush.bf16.msrb.mxu0 %v10981_v32  ;;  %5300 = vmatpush.bf16.msra.mxu3 %v11109_v30  ;;  %v15668_v32 = vld [vmem:[#allocation47] sm:$0xff] }
 0xeb7   :  { %5260 = vmatpush.bf16.msrb.mxu1 %v10693_v24  ;;  %5274 = vmatpush.bf16.msra.mxu2 %v10821_v3 }
 0xeb9   :  { %5287 = vmatpush.bf16.msrb.mxu0 %v10965_v5  ;;  %5301 = vmatpush.bf16.msra.mxu3 %v11093_v61 }
 0xebb   :  { %5261 = vmatpush.bf16.msrb.mxu1 %v10677_v10  ;;  %5275 = vmatpush.bf16.msra.mxu2 %v10805_v7  ;;  %v4983_v38 = vpop.f32.mrf.mxu1 }
 0xebc   :  { %v4984_v54 = vadd.f32 %v4983_v38, %v4006_v42 }
 0xebd   :  { %5288 = vmatpush.bf16.msrb.mxu0 %v10949_v63  ;;  %5302 = vmatpush.bf16.msra.mxu3 %v11077_v16 }
 0xebe   :  { %5262 = vmatmul.bf16.vlgmr.msrb.gmra.mxu1 %v15632_v23  ;;  %5276 = vmatmul.bf16.vlgmr.msra.gmra.mxu2 %v15634_v29 }
 0xec1   :  { %5289 = vmatpush.bf16.msrb.mxu0 %v10933_v26  ;;  %5303 = vmatpush.bf16.msra.mxu3 %v11061_v33  ;;  %v4997_v43 = vpop.f32.mrf.mxu2  ;;  %v5011_v14 = vpop.f32.mrf.mxu0  ;;  %v4008_v26 = vperm.slane %v15664_v45, 2 }
 0xec2   :  { %v4998_v41 = vadd.f32 %v4997_v43, %v4984_v54 }
 0xec3   :  { %v4985_v44 = vpop.f32.mrf.mxu1 }
 0xec4   :  { %5290 = vmatmul.bf16.vlgmr.msrb.gmra.mxu0 %v15639_v31  ;;  %5304 = vmatmul.bf16.vlgmr.msra.gmra.mxu3 %v15642_v58  ;;  %v4986_v8 = vadd.f32 %v4985_v44, %v4006_v42  ;;  %v5012_v58 = vadd.f32 %v5011_v14, %v4998_v41 }
 0xec7   :  { %v5025_v46 = vpop.f32.mrf.mxu3 }
 0xec8   :  { %v5026_v35 = vadd.f32 %v5025_v46, %v5012_v58 }
 0xec9   :  { %v4999_v49 = vpop.f32.mrf.mxu2  ;;  %v5013_v50 = vpop.f32.mrf.mxu0 }
 0xeca   :  { %v5000_v4 = vadd.f32 %v4999_v49, %v4986_v8 }
 0xecb   :  { %v5039_v17 = vpop.f32.mrf.mxu1 }
 0xecc   :  { %v5014_v56 = vadd.f32 %v5013_v50, %v5000_v4  ;;  %v5040_v40 = vadd.f32 %v5039_v17, %v5026_v35  ;;  %v13477_v35 = vld [vmem:[#allocation41 + $0x1ec] sm:$0xf0] }
 0xecf   :  { %v5027_v28 = vpop.f32.mrf.mxu3 }
 0xed0   :  { %v5028_v57 = vadd.f32 %v5027_v28, %v5014_v56 }
 0xed1   :  { %v5053_v18 = vpop.f32.mrf.mxu2  ;;  %v5067_v31 = vpop.f32.mrf.mxu0 }
 0xed2   :  { %v5054_v59 = vadd.f32 %v5053_v18, %v5040_v40  ;;  %v5068_v0 = vadd.f32 %v5067_v31, %v4007_v20  ;;  %v11296_v18 = vld [vmem:[#allocation41 + $0xe0] sm:$0xf]  ;;  %v13445_v31 = vld [vmem:[#allocation41 + $0xec] sm:$0xf0] }
 0xed3   :  { %v5041_v55 = vpop.f32.mrf.mxu1  ;;  %v11297_v56 = vor.u32 %v13445_v31, %v11296_v18  ;;  %v11808_v18 = vld [vmem:[#allocation41 + $0x4e0] sm:$0xf]  ;;  %v13573_v31 = vld [vmem:[#allocation41 + $0x4ec] sm:$0xf0] }
 0xed4   :  { %v5042_v2 = vadd.f32 %v5041_v55, %v5028_v57  ;;  %v5310_v39 = vmax.f32 %v5054_v59, 0.0  ;;  %v11424_v55 = vld [vmem:[#allocation41 + $0x1e0] sm:$0xf] }
 0xed5   :  { %7784 = vmatpush.bf16.msra.mxu0 %v11297_v56  ;;  %v11280_v59 = vld [vmem:[#allocation41 + $0xc0] sm:$0xf]  ;;  %v13605_v56 = vld [vmem:[#allocation41 + $0x5ec] sm:$0xf0] }
 0xed7   :  { %v5081_v36 = vpop.f32.mrf.mxu3 }
 0xed8   :  { %v5082_v24 = vadd.f32 %v5081_v36, %v5068_v0  ;;  %v11425_v36 = vor.u32 %v13477_v35, %v11424_v55  ;;  %v13437_v0 = vld [vmem:[#allocation41 + $0xac] sm:$0xf0] }
 0xed9   :  { %v5055_v48 = vpop.f32.mrf.mxu2  ;;  %v5069_v60 = vpop.f32.mrf.mxu0 }
 0xeda   :  { %v5056_v37 = vadd.f32 %v5055_v48, %v5042_v2  ;;  %v5070_v1 = vadd.f32 %v5069_v60, %v4007_v20  ;;  %7797 = vmatpush.bf16.msrb.mxu3 %v11425_v36  ;;  %v11408_v60 = vld [vmem:[#allocation41 + $0x1c0] sm:$0xf] }
 0xedb   :  { %v5095_v62 = vpop.f32.mrf.mxu1 }
 0xedc   :  { %v5314_v21 = vmax.f32 %v5056_v37, 0.0  ;;  %v5096_v47 = vadd.f32 %v5095_v62, %v5082_v24  ;;  %v13441_v37 = vld [vmem:[#allocation41 + $0xcc] sm:$0xf0] }
 0xedd   :  { %v13473_v62 = vld [vmem:[#allocation41 + $0x1cc] sm:$0xf0] }
 0xede   :  { %11174 = vmatpush.msk.msra.mxu1 %vm693_vm0, %v5314_v21  ;;  %v11281_v21 = vor.u32 %v13441_v37, %v11280_v59  ;;  %v13469_v24 = vld [vmem:[#allocation41 + $0x1ac] sm:$0xf0]  ;;  %v11792_v37 = vld [vmem:[#allocation41 + $0x4c0] sm:$0xf] }
 0xedf   :  { %v5083_v30 = vpop.f32.mrf.mxu3 }
 0xee0   :  { %5349 = vmatpush.msra.mxu1 %v5310_v39  ;;  %v5084_v3 = vadd.f32 %v5083_v30, %v5070_v1  ;;  %v11409_v30 = vor.u32 %v13473_v62, %v11408_v60  ;;  %7785 = vmatpush.bf16.msra.mxu0 %v11281_v21  ;;  %v11392_v1 = vld [vmem:[#allocation41 + $0x1a0] sm:$0xf]  ;;  %v13569_v60 = vld [vmem:[#allocation41 + $0x4cc] sm:$0xf0] }
 0xee1   :  { %v5109_v53 = vpop.f32.mrf.mxu2  ;;  %11175 = vmatmul.msk.f32.vlgmr.msra.gmra.mxu1 %vm3721_vm10, %v15668_v32  ;;  %v5123_v34 = vpop.f32.mrf.mxu0 }
 0xee2   :  { %v5110_v12 = vadd.f32 %v5109_v53, %v5096_v47  ;;  %7798 = vmatpush.bf16.msrb.mxu3 %v11409_v30  ;;  %v11248_v47 = vld [vmem:[#allocation41 + $0x80] sm:$0xf]  ;;  %v13601_v30 = vld [vmem:[#allocation41 + $0x5cc] sm:$0xf0] }
 0xee3   :  { %v5097_v22 = vpop.f32.mrf.mxu1 }
 0xee4   :  { %v5098_v5 = vadd.f32 %v5097_v22, %v5084_v3  ;;  %v5124_v27 = vadd.f32 %v5123_v34, %v5110_v12  ;;  %v11264_v34 = vld [vmem:[#allocation41 + $0xa0] sm:$0xf]  ;;  %v11393_v3 = vor.u32 %v13469_v24, %v11392_v1 }
 0xee5   :  { %v11265_v22 = vor.u32 %v13437_v0, %v11264_v34  ;;  %v11776_v24 = vld [vmem:[#allocation41 + $0x4a0] sm:$0xf] }
 0xee6   :  { %7799 = vmatpush.bf16.msrb.mxu3 %v11393_v3  ;;  %v13565_v3 = vld [vmem:[#allocation41 + $0x4ac] sm:$0xf0] }
 0xee7   :  { %v5137_v51 = vpop.f32.mrf.mxu3  ;;  %7786 = vmatpush.bf16.msra.mxu0 %v11265_v22 }
 0xee8   :  { %v5138_v10 = vadd.f32 %v5137_v51, %v5124_v27  ;;  %v11232_v27 = vld [vmem:[#allocation41 + $0x60] sm:$0xf] }
 0xee9   :  { %v5111_v61 = vpop.f32.mrf.mxu2  ;;  %v5125_v13 = vpop.f32.mrf.mxu0 }
 0xeea   :  { %v5112_v52 = vadd.f32 %v5111_v61, %v5098_v5  ;;  %v5311_v16 = vmax.f32 %v5138_v10, 0.0  ;;  %v13433_v5 = vld [vmem:[#allocation41 + $0x8c] sm:$0xf0]  ;;  %v11376_v61 = vld [vmem:[#allocation41 + $0x180] sm:$0xf] }
 0xeeb   :  { %v11249_v12 = vor.u32 %v13433_v5, %v11248_v47  ;;  %v11904_v47 = vld [vmem:[#allocation41 + $0x5a0] sm:$0xf]  ;;  %v13597_v5 = vld [vmem:[#allocation41 + $0x5ac] sm:$0xf0] }
 0xeec   :  { %v5126_v15 = vadd.f32 %v5125_v13, %v5112_v52  ;;  %v13465_v52 = vld [vmem:[#allocation41 + $0x18c] sm:$0xf0] }
 0xeed   :  { %v11377_v13 = vor.u32 %v13465_v52, %v11376_v61  ;;  %7787 = vmatpush.bf16.msra.mxu0 %v11249_v12  ;;  %v11777_v12 = vor.u32 %v13565_v3, %v11776_v24  ;;  %v13697_v3 = vld [vmem:[#allocation41 + $0x8cc] sm:$0xf0] }
 0xeef   :  { %v5139_v6 = vpop.f32.mrf.mxu3  ;;  %7800 = vmatpush.bf16.msrb.mxu3 %v11377_v13 }
 0xef0   :  { %v5140_v7 = vadd.f32 %v5139_v6, %v5126_v15  ;;  %v13429_v15 = vld [vmem:[#allocation41 + $0x6c] sm:$0xf0]  ;;  %v11360_v6 = vld [vmem:[#allocation41 + $0x160] sm:$0xf] }
 0xef1   :  { %v11233_v10 = vor.u32 %v13429_v15, %v11232_v27  ;;  %v11905_v27 = vor.u32 %v13597_v5, %v11904_v47  ;;  %v11760_v15 = vld [vmem:[#allocation41 + $0x480] sm:$0xf]  ;;  %v13729_v47 = vld [vmem:[#allocation41 + $0x9cc] sm:$0xf0] }
 0xef2   :  { %v5315_v63 = vmax.f32 %v5140_v7, 0.0  ;;  %v13461_v7 = vld [vmem:[#allocation41 + $0x16c] sm:$0xf0] }
 0xef3   :  { %7788 = vmatpush.bf16.msra.mxu0 %v11233_v10 }
 0xef4   :  { %11176 = vmatpush.msk.msrb.mxu1 %vm693_vm0, %v5315_v63  ;;  %v11361_v63 = vor.u32 %v13461_v7, %v11360_v6  ;;  %v13561_v6 = vld [vmem:[#allocation41 + $0x48c] sm:$0xf0]  ;;  %v11888_v7 = vld [vmem:[#allocation41 + $0x580] sm:$0xf] }
 0xef6   :  { %5369 = vmatpush.msrb.mxu1 %v5311_v16  ;;  %v11216_v16 = vld [vmem:[#allocation41 + $0x40] sm:$0xf]  ;;  %7801 = vmatpush.bf16.msrb.mxu3 %v11361_v63  ;;  %v13593_v63 = vld [vmem:[#allocation41 + $0x58c] sm:$0xf0] }
 0xef7   :  { %11177 = vmatmul.msk.f32.vlgmr.msrb.gmra.mxu1 %vm3721_vm10, %v15668_v32 }
 0xefb   :  { %v5151_v19 = vpop.f32.mrf.mxu1 }
 0xefc   :  { %v5152_v14 = vadd.f32 %v5151_v19, %v4008_v26  ;;  %v13425_v19 = vld [vmem:[#allocation41 + $0x4c] sm:$0xf0] }
 0xf01   :  { %v5165_v9 = vpop.f32.mrf.mxu2  ;;  %v5179_v11 = vpop.f32.mrf.mxu0 }
 0xf02   :  { %v5166_v46 = vadd.f32 %v5165_v9, %v5152_v14  ;;  %v11344_v9 = vld [vmem:[#allocation41 + $0x140] sm:$0xf]  ;;  %v13421_v14 = vld [vmem:[#allocation41 + $0x2c] sm:$0xf0] }
 0xf03   :  { %v5153_v25 = vpop.f32.mrf.mxu1 }
 0xf04   :  { %v5154_v44 = vadd.f32 %v5153_v25, %v4008_v26  ;;  %v5180_v42 = vadd.f32 %v5179_v11, %v5166_v46  ;;  %v13457_v25 = vld [vmem:[#allocation41 + $0x14c] sm:$0xf0] }
 0xf05   :  { %v13453_v46 = vld [vmem:[#allocation41 + $0x12c] sm:$0xf0] }
 0xf07   :  { %v5193_v33 = vpop.f32.mrf.mxu3 }
 0xf08   :  { %v5194_v28 = vadd.f32 %v5193_v33, %v5180_v42  ;;  %v11217_v33 = vor.u32 %v13425_v19, %v11216_v16 }
 0xf09   :  { %v5167_v38 = vpop.f32.mrf.mxu2  ;;  %v5181_v17 = vpop.f32.mrf.mxu0 }
 0xf0a   :  { %v5168_v49 = vadd.f32 %v5167_v38, %v5154_v44  ;;  %v11345_v38 = vor.u32 %v13457_v25, %v11344_v9  ;;  %v11328_v44 = vld [vmem:[#allocation41 + $0x120] sm:$0xf]  ;;  %7789 = vmatpush.bf16.msra.mxu0 %v11217_v33  ;;  %v11761_v9 = vor.u32 %v13561_v6, %v11760_v15  ;;  %v13557_v33 = vld [vmem:[#allocation41 + $0x46c] sm:$0xf0] }
 0xf0b   :  { %v13537_v15 = vld [vmem:[#allocation41 + $0x3cc] sm:$0xf0] }
 0xf0c   :  { %v5182_v8 = vadd.f32 %v5181_v17, %v5168_v49  ;;  %7802 = vmatpush.bf16.msrb.mxu3 %v11345_v38  ;;  %v11329_v17 = vor.u32 %v13453_v46, %v11328_v44  ;;  %v11872_v38 = vld [vmem:[#allocation41 + $0x560] sm:$0xf] }
 0xf0f   :  { %v5195_v54 = vpop.f32.mrf.mxu3 }
 0xf10   :  { %v5196_v4 = vadd.f32 %v5195_v54, %v5182_v8  ;;  %v11184_v54 = vld [vmem:[#allocation41] sm:$0xf]  ;;  %v13417_v8 = vld [vmem:[#allocation41 + $0xc] sm:$0xf0]  ;;  %7803 = vmatpush.bf16.msrb.mxu3 %v11329_v17 }
 0xf11   :  { %v13585_v17 = vld [vmem:[#allocation41 + $0x54c] sm:$0xf0] }
 0xf1b   :  { %v5207_v43 = vpop.f32.mrf.mxu1 }
 0xf1c   :  { %v5208_v58 = vadd.f32 %v5207_v43, %v5194_v28  ;;  %v11200_v43 = vld [vmem:[#allocation41 + $0x20] sm:$0xf] }
 0xf1d   :  { %v11201_v42 = vor.u32 %v13421_v14, %v11200_v43  ;;  %v11312_v28 = vld [vmem:[#allocation41 + $0x100] sm:$0xf]  ;;  %v13589_v43 = vld [vmem:[#allocation41 + $0x56c] sm:$0xf0] }
 0xf1e   :  { %v11873_v46 = vor.u32 %v13589_v43, %v11872_v38  ;;  %v13533_v38 = vld [vmem:[#allocation41 + $0x3ac] sm:$0xf0]  ;;  %v12272_v43 = vld [vmem:[#allocation41 + $0x880] sm:$0xf] }
 0xf1f   :  { %7790 = vmatpush.bf16.msra.mxu0 %v11201_v42  ;;  %v11856_v42 = vld [vmem:[#allocation41 + $0x540] sm:$0xf] }
 0xf21   :  { %v5221_v50 = vpop.f32.mrf.mxu2  ;;  %v5235_v53 = vpop.f32.mrf.mxu0 }
 0xf22   :  { %v5222_v40 = vadd.f32 %v5221_v50, %v5208_v58  ;;  %v4009_v50 = vperm.slane %v15664_v45, 3  ;;  %v11936_v58 = vld [vmem:[#allocation41 + $0x5e0] sm:$0xf] }
 0xf23   :  { %v5209_v41 = vpop.f32.mrf.mxu1  ;;  %v11937_v59 = vor.u32 %v13605_v56, %v11936_v58  ;;  %v11696_v58 = vld [vmem:[#allocation41 + $0x400] sm:$0xf]  ;;  %v13545_v56 = vld [vmem:[#allocation41 + $0x40c] sm:$0xf0] }
 0xf24   :  { %v5210_v57 = vadd.f32 %v5209_v41, %v5196_v4  ;;  %v5312_v20 = vmax.f32 %v5222_v40, 0.0  ;;  %v13449_v4 = vld [vmem:[#allocation41 + $0x10c] sm:$0xf0]  ;;  %v5236_v35 = vadd.f32 %v5235_v53, %v4009_v50  ;;  %v11809_v40 = vor.u32 %v13573_v31, %v11808_v18 }
 0xf25   :  { %v11313_v45 = vor.u32 %v13449_v4, %v11312_v28  ;;  %v11793_v53 = vor.u32 %v13569_v60, %v11792_v37  ;;  %v11712_v28 = vld [vmem:[#allocation41 + $0x420] sm:$0xf]  ;;  %v13581_v31 = vld [vmem:[#allocation41 + $0x52c] sm:$0xf0] }
 0xf26   :  { %v11840_v4 = vld [vmem:[#allocation41 + $0x520] sm:$0xf]  ;;  %v13509_v37 = vld [vmem:[#allocation41 + $0x2ec] sm:$0xf0] }
 0xf27   :  { %v5249_v51 = vpop.f32.mrf.mxu3  ;;  %7804 = vmatpush.bf16.msrb.mxu3 %v11313_v45  ;;  %v11680_v60 = vld [vmem:[#allocation41 + $0x3e0] sm:$0xf] }
 0xf29   :  { %v5223_v2 = vpop.f32.mrf.mxu2  ;;  %v5237_v11 = vpop.f32.mrf.mxu0 }
 0xf2a   :  { %v5224_v48 = vadd.f32 %v5223_v2, %v5210_v57  ;;  %v11185_v57 = vor.u32 %v13417_v8, %v11184_v54  ;;  %v5238_v36 = vadd.f32 %v5237_v11, %v4009_v50  ;;  %v5250_v2 = vadd.f32 %v5249_v51, %v5236_v35  ;;  %v13553_v50 = vld [vmem:[#allocation41 + $0x44c] sm:$0xf0]  ;;  %v11824_v35 = vld [vmem:[#allocation41 + $0x500] sm:$0xf] }
 0xf2b   :  { %7849 = vmatpush.bf16.msra.mxu3 %v11937_v59  ;;  %v11889_v11 = vor.u32 %v13593_v63, %v11888_v7  ;;  %v11857_v8 = vor.u32 %v13585_v17, %v11856_v42  ;;  %v11552_v59 = vld [vmem:[#allocation41 + $0x2e0] sm:$0xf]  ;;  %v13693_v63 = vld [vmem:[#allocation41 + $0x8ac] sm:$0xf0] }
 0xf2c   :  { %v5316_v39 = vmax.f32 %v5224_v48, 0.0  ;;  %7791 = vmatpush.bf16.msra.mxu0 %v11185_v57  ;;  %v13577_v57 = vld [vmem:[#allocation41 + $0x50c] sm:$0xf0]  ;;  %v12288_v7 = vld [vmem:[#allocation41 + $0x8a0] sm:$0xf] }
 0xf2d   :  { %v13689_v42 = vld [vmem:[#allocation41 + $0x88c] sm:$0xf0]  ;;  %v12400_v17 = vld [vmem:[#allocation41 + $0x980] sm:$0xf] }
 0xf2e   :  { %11178 = vmatpush.msk.msrb.mxu2 %vm693_vm0, %v5316_v39  ;;  %v11920_v39 = vld [vmem:[#allocation41 + $0x5c0] sm:$0xf] }
 0xf2f   :  { %v5251_v49 = vpop.f32.mrf.mxu3  ;;  %v11921_v22 = vor.u32 %v13601_v30, %v11920_v39  ;;  %v13733_v39 = vld [vmem:[#allocation41 + $0x9ec] sm:$0xf0]  ;;  %v11553_v30 = vor.u32 %v13509_v37, %v11552_v59  ;;  %v11616_v37 = vld [vmem:[#allocation41 + $0x360] sm:$0xf] }
 0xf30   :  { %5389 = vmatpush.msrb.mxu2 %v5312_v20  ;;  %v5252_v21 = vadd.f32 %v5251_v49, %v5238_v36  ;;  %7836 = vmatpush.bf16.msrb.mxu0 %v11809_v40  ;;  %v11728_v49 = vld [vmem:[#allocation41 + $0x440] sm:$0xf]  ;;  %v11825_v36 = vor.u32 %v13577_v57, %v11824_v35  ;;  %v12273_v57 = vor.u32 %v13689_v42, %v12272_v43  ;;  %v13493_v59 = vld [vmem:[#allocation41 + $0x26c] sm:$0xf0]  ;;  %v11426_v42 = vld [vmem:[#allocation41 + $0x1f0] sm:$0xf0] }
 0xf31   :  { %11179 = vmatmul.msk.f32.vlgmr.msrb.gmra.mxu2 %vm3721_vm10, %v15668_v32  ;;  %7850 = vmatpush.bf16.msra.mxu3 %v11921_v22  ;;  %v11729_v54 = vor.u32 %v13553_v50, %v11728_v49  ;;  %v12320_v40 = vld [vmem:[#allocation41 + $0x8e0] sm:$0xf]  ;;  %v12289_v49 = vor.u32 %v13693_v63, %v12288_v7  ;;  %v13709_v7 = vld [vmem:[#allocation41 + $0x92c] sm:$0xf0] }
 0xf32   :  { %7810 = vmatpush.bf16.msra.mxu2 %v11553_v30  ;;  %v11456_v63 = vld [vmem:[#allocation41 + $0x220] sm:$0xf] }
 0xf34   :  { %7837 = vmatpush.bf16.msrb.mxu0 %v11793_v53 }
 0xf35   :  { %7851 = vmatpush.bf16.msra.mxu3 %v11905_v27 }
 0xf38   :  { %7838 = vmatpush.bf16.msrb.mxu0 %v11777_v12  ;;  %v11536_v12 = vld [vmem:[#allocation41 + $0x2c0] sm:$0xf] }
 0xf39   :  { %7852 = vmatpush.bf16.msra.mxu3 %v11889_v11  ;;  %v13501_v11 = vld [vmem:[#allocation41 + $0x2ac] sm:$0xf0] }
 0xf3b   :  { %v5263_v26 = vpop.f32.mrf.mxu1 }
 0xf3c   :  { %v5264_v20 = vadd.f32 %v5263_v26, %v5250_v2  ;;  %v11744_v26 = vld [vmem:[#allocation41 + $0x460] sm:$0xf]  ;;  %7839 = vmatpush.bf16.msrb.mxu0 %v11761_v9  ;;  %v13701_v2 = vld [vmem:[#allocation41 + $0x8ec] sm:$0xf0] }
 0xf3d   :  { %v11745_v44 = vor.u32 %v13557_v33, %v11744_v26  ;;  %7853 = vmatpush.bf16.msra.mxu3 %v11873_v46  ;;  %v12321_v22 = vor.u32 %v13701_v2, %v12320_v40  ;;  %v13725_v9 = vld [vmem:[#allocation41 + $0x9ac] sm:$0xf0]  ;;  %v11648_v33 = vld [vmem:[#allocation41 + $0x3a0] sm:$0xf] }
 0xf3e   :  { %v11649_v46 = vor.u32 %v13533_v38, %v11648_v33  ;;  %v12384_v40 = vld [vmem:[#allocation41 + $0x960] sm:$0xf]  ;;  %v13717_v2 = vld [vmem:[#allocation41 + $0x96c] sm:$0xf0] }
 0xf3f   :  { %v12336_v33 = vld [vmem:[#allocation41 + $0x900] sm:$0xf]  ;;  %v13705_v38 = vld [vmem:[#allocation41 + $0x90c] sm:$0xf0] }
 0xf40   :  { %7840 = vmatpush.bf16.msrb.mxu0 %v11745_v44 }
 0xf41   :  { %v5277_v41 = vpop.f32.mrf.mxu2  ;;  %v5291_v55 = vpop.f32.mrf.mxu0  ;;  %7854 = vmatpush.bf16.msra.mxu3 %v11857_v8  ;;  %v11504_v8 = vld [vmem:[#allocation41 + $0x280] sm:$0xf] }
 0xf42   :  { %v5278_v0 = vadd.f32 %v5277_v41, %v5264_v20  ;;  %v13549_v41 = vld [vmem:[#allocation41 + $0x42c] sm:$0xf0] }
 0xf43   :  { %v5265_v48 = vpop.f32.mrf.mxu1  ;;  %v11713_v18 = vor.u32 %v13549_v41, %v11712_v28  ;;  %v13541_v20 = vld [vmem:[#allocation41 + $0x3ec] sm:$0xf0]  ;;  %v11632_v41 = vld [vmem:[#allocation41 + $0x380] sm:$0xf] }
 0xf44   :  { %v5266_v34 = vadd.f32 %v5265_v48, %v5252_v21  ;;  %v5292_v52 = vadd.f32 %v5291_v55, %v5278_v0  ;;  %7841 = vmatpush.bf16.msrb.mxu0 %v11729_v54  ;;  %v11841_v55 = vor.u32 %v13581_v31, %v11840_v4  ;;  %v13721_v54 = vld [vmem:[#allocation41 + $0x98c] sm:$0xf0] }
 0xf45   :  { %v13497_v28 = vld [vmem:[#allocation41 + $0x28c] sm:$0xf0] }
 0xf46   :  { %7855 = vmatpush.bf16.msra.mxu3 %v11841_v55  ;;  %v13529_v31 = vld [vmem:[#allocation41 + $0x38c] sm:$0xf0]  ;;  %v12256_v55 = vld [vmem:[#allocation41 + $0x860] sm:$0xf] }
 0xf47   :  { %v5305_v62 = vpop.f32.mrf.mxu3 }
 0xf48   :  { %v5306_v16 = vadd.f32 %v5305_v62, %v5292_v52  ;;  %7842 = vmatpush.bf16.msrb.mxu0 %v11713_v18  ;;  %v12448_v62 = vld [vmem:[#allocation41 + $0x9e0] sm:$0xf]  ;;  %v13505_v52 = vld [vmem:[#allocation41 + $0x2cc] sm:$0xf0]  ;;  %v11505_v18 = vor.u32 %v13497_v28, %v11504_v8 }
 0xf49   :  { %v5279_v1 = vpop.f32.mrf.mxu2  ;;  %v5293_v61 = vpop.f32.mrf.mxu0  ;;  %v12449_v24 = vor.u32 %v13733_v39, %v12448_v62  ;;  %v11537_v27 = vor.u32 %v13505_v52, %v11536_v12  ;;  %v12240_v62 = vld [vmem:[#allocation41 + $0x840] sm:$0xf]  ;;  %v13521_v12 = vld [vmem:[#allocation41 + $0x34c] sm:$0xf0] }
 0xf4a   :  { %v5280_v51 = vadd.f32 %v5279_v1, %v5266_v34  ;;  %v5313_v14 = vmax.f32 %v5306_v16, 0.0  ;;  %7856 = vmatpush.bf16.msra.mxu3 %v11825_v36  ;;  %v11681_v34 = vor.u32 %v13541_v20, %v11680_v60  ;;  %v12304_v1 = vld [vmem:[#allocation41 + $0x8c0] sm:$0xf]  ;;  %v12401_v36 = vor.u32 %v13721_v54, %v12400_v17  ;;  %v13481_v54 = vld [vmem:[#allocation41 + $0x20c] sm:$0xf0] }
 0xf4b   :  { %v12305_v6 = vor.u32 %v13697_v3, %v12304_v1  ;;  %v12416_v16 = vld [vmem:[#allocation41 + $0x9a0] sm:$0xf]  ;;  %7811 = vmatpush.bf16.msra.mxu2 %v11537_v27  ;;  %v13489_v3 = vld [vmem:[#allocation41 + $0x24c] sm:$0xf0] }
 0xf4c   :  { %v5294_v13 = vadd.f32 %v5293_v61, %v5280_v51  ;;  %v12432_v51 = vld [vmem:[#allocation41 + $0x9c0] sm:$0xf]  ;;  %v12417_v50 = vor.u32 %v13725_v9, %v12416_v16  ;;  %v13485_v16 = vld [vmem:[#allocation41 + $0x22c] sm:$0xf0] }
 0xf4d   :  { %v12368_v1 = vld [vmem:[#allocation41 + $0x940] sm:$0xf]  ;;  %v11457_v9 = vor.u32 %v13485_v16, %v11456_v63  ;;  %v11250_v16 = vld [vmem:[#allocation41 + $0x90] sm:$0xf0] }
 0xf4e   :  { %v12224_v52 = vld [vmem:[#allocation41 + $0x820] sm:$0xf] }
 0xf4f   :  { %v5307_v10 = vpop.f32.mrf.mxu3  ;;  %v11440_v17 = vld [vmem:[#allocation41 + $0x200] sm:$0xf] }
 0xf50   :  { %v5308_v19 = vadd.f32 %v5307_v10, %v5294_v13  ;;  %v11664_v13 = vld [vmem:[#allocation41 + $0x3c0] sm:$0xf]  ;;  %v12433_v10 = vor.u32 %v13729_v47, %v12432_v51  ;;  %v11441_v28 = vor.u32 %v13481_v54, %v11440_v17  ;;  %v13621_v54 = vld [vmem:[#allocation41 + $0x66c] sm:$0xf0] }
 0xf51   :  { %v11600_v51 = vld [vmem:[#allocation41 + $0x340] sm:$0xf] }
 0xf52   :  { %v5317_v25 = vmax.f32 %v5308_v19, 0.0  ;;  %v11665_v19 = vor.u32 %v13537_v15, %v11664_v13  ;;  %v11601_v13 = vor.u32 %v13521_v12, %v11600_v51  ;;  %v11568_v8 = vld [vmem:[#allocation41 + $0x300] sm:$0xf]  ;;  %v11394_v51 = vld [vmem:[#allocation41 + $0x1b0] sm:$0xf0] }
 0xf53   :  { %v12032_v12 = vld [vmem:[#allocation41 + $0x6a0] sm:$0xf] }
 0xf54   :  { %11180 = vmatpush.msk.msra.mxu1 %vm693_vm0, %v5317_v25  ;;  %v11520_v25 = vld [vmem:[#allocation41 + $0x2a0] sm:$0xf] }
 0xf55   :  { %v11521_v26 = vor.u32 %v13501_v11, %v11520_v25  ;;  %v13517_v25 = vld [vmem:[#allocation41 + $0x32c] sm:$0xf0]  ;;  %v12208_v11 = vld [vmem:[#allocation41 + $0x800] sm:$0xf] }
 0xf56   :  { %5409 = vmatpush.msra.mxu1 %v5313_v14  ;;  %v12000_v17 = vld [vmem:[#allocation41 + $0x660] sm:$0xf] }
 0xf57   :  { %11181 = vmatmul.msk.f32.vlgmr.msra.gmra.mxu1 %vm3721_vm10, %v15668_v32  ;;  %v11697_v32 = vor.u32 %v13545_v56, %v11696_v58  ;;  %7812 = vmatpush.bf16.msra.mxu2 %v11521_v26  ;;  %v13673_v26 = vld [vmem:[#allocation41 + $0x80c] sm:$0xf0] }
 0xf58   :  { %7823 = vmatpush.bf16.msrb.mxu1 %v11681_v34 }
 0xf59   :  { %7843 = vmatpush.bf16.msrb.mxu0 %v11697_v32  ;;  %v11633_v32 = vor.u32 %v13529_v31, %v11632_v41  ;;  %v13513_v41 = vld [vmem:[#allocation41 + $0x30c] sm:$0xf0] }
 0xf5a   :  { %v11569_v31 = vor.u32 %v13513_v41, %v11568_v8  ;;  %v12128_v8 = vld [vmem:[#allocation41 + $0x760] sm:$0xf]  ;;  %v13653_v41 = vld [vmem:[#allocation41 + $0x76c] sm:$0xf0] }
 0xf5b   :  { %7813 = vmatpush.bf16.msra.mxu2 %v11505_v18  ;;  %v13637_v18 = vld [vmem:[#allocation41 + $0x6ec] sm:$0xf0] }
 0xf5c   :  { %7824 = vmatpush.bf16.msrb.mxu1 %v11665_v19  ;;  %v11584_v19 = vld [vmem:[#allocation41 + $0x320] sm:$0xf] }
 0xf5d   :  { %v11585_v43 = vor.u32 %v13517_v25, %v11584_v19  ;;  %v13463_v19 = vld [vmem:[#allocation41 + $0x184] sm:$0xf]  ;;  %v12016_v25 = vld [vmem:[#allocation41 + $0x680] sm:$0xf] }
 0xf5e   :  { %v5351_v45 = vpop.f32.mrf.mxu1 }
 0xf60   :  { %7825 = vmatpush.bf16.msrb.mxu1 %v11649_v46  ;;  %v13443_v46 = vld [vmem:[#allocation41 + $0xe4] sm:$0xf] }
 0xf64   :  { %7826 = vmatpush.bf16.msrb.mxu1 %v11633_v32  ;;  %v12337_v32 = vor.u32 %v13705_v38, %v12336_v33  ;;  %v13657_v38 = vld [vmem:[#allocation41 + $0x78c] sm:$0xf0] }
 0xf74   :  { %v5371_v48 = vpop.f32.mrf.mxu1 }
 0xf75   :  { %v5414_v21 = vpack.c.bf16 %v5371_v48, %v5351_v45  ;;  %v13685_v45 = vld [vmem:[#allocation41 + $0x86c] sm:$0xf0]  ;;  %v11488_v48 = vld [vmem:[#allocation41 + $0x260] sm:$0xf] }
 0xf76   :  { %v11489_v60 = vor.u32 %v13493_v59, %v11488_v48  ;;  %v12257_v34 = vor.u32 %v13685_v45, %v12256_v55  ;;  %v13471_v48 = vld [vmem:[#allocation41 + $0x1c4] sm:$0xf]  ;;  %v11410_v59 = vld [vmem:[#allocation41 + $0x1d0] sm:$0xf0] }
 0xf77   :  { %v5418_v53 = vunpack.c.l.b16 %v5414_v21  ;;  %v5419_v0 = vunpack.c.h.b16 %v5414_v21  ;;  %v13525_v21 = vld [vmem:[#allocation41 + $0x36c] sm:$0xf0] }
 0xf78   :  { %v11617_v20 = vor.u32 %v13525_v21, %v11616_v37  ;;  %7814 = vmatpush.bf16.msra.mxu2 %v11489_v60  ;;  %v12048_v21 = vld [vmem:[#allocation41 + $0x6c0] sm:$0xf] }
 0xf79   :  { %v15684_v5 = vpack.c.b16 %v5418_v53, %v5418_v53  ;;  %v15686_v61 = vpack.c.b16 %v5419_v0, %v5419_v0  ;;  %v12385_v53 = vor.u32 %v13717_v2, %v12384_v40  ;;  %v13681_v0 = vld [vmem:[#allocation41 + $0x84c] sm:$0xf0]  ;;  %v13439_v40 = vld [vmem:[#allocation41 + $0xc4] sm:$0xf]  ;;  %v11282_v2 = vld [vmem:[#allocation41 + $0xd0] sm:$0xf0] }
 0xf7a   :  { %7827 = vmatpush.bf16.msrb.mxu1 %v11617_v20  ;;  %v12241_v27 = vor.u32 %v13681_v0, %v12240_v62  ;;  %v13633_v62 = vld [vmem:[#allocation41 + $0x6cc] sm:$0xf0]  ;;  %v12176_v20 = vld [vmem:[#allocation41 + $0x7c0] sm:$0xf] }
 0xf7b   :  { %7792 = vmatmul.bf16.vlgmr.msra.gmra.mxu0 %v15684_v5  ;;  %7805 = vmatmul.bf16.vlgmr.msrb.gmra.mxu3 %v15686_v61  ;;  %v5433_v14 = vshll.u32 %v15684_v5, 16  ;;  %v5440_v44 = vshll.u32 %v15686_v61, 16  ;;  %v5431_v4 = vshrl.u32 %v15684_v5, 16  ;;  %v5438_v56 = vshrl.u32 %v15686_v61, 16  ;;  %v13665_v0 = vld [vmem:[#allocation41 + $0x7cc] sm:$0xf0] }
 0xf7c   :  { %7888 = vmatpush.bf16.msra.mxu0 %v12321_v22  ;;  %7901 = vmatpush.bf16.msrb.mxu3 %v12449_v24  ;;  %v13713_v22 = vld [vmem:[#allocation41 + $0x94c] sm:$0xf0]  ;;  %v11472_v24 = vld [vmem:[#allocation41 + $0x240] sm:$0xf]  ;;  %v15701_v37 = vrot.slane %v15684_v5, 1  ;;  %v15704_v60 = vrot.slane %v15686_v61, 1 }
 0xf7d   :  { %v5435_v58 = vrot.slane %v5433_v14, 1  ;;  %v5442_v35 = vrot.slane %v5440_v44, 1  ;;  %v11473_v47 = vor.u32 %v13489_v3, %v11472_v24  ;;  %v12369_v15 = vor.u32 %v13713_v22, %v12368_v1  ;;  %v11266_v24 = vld [vmem:[#allocation41 + $0xb0] sm:$0xf0]  ;;  %v13467_v3 = vld [vmem:[#allocation41 + $0x1a4] sm:$0xf] }
 0xf7e   :  { %7828 = vmatpush.bf16.msrb.mxu1 %v11601_v13  ;;  %v11285_v1 = vor.u32 %v13439_v40, %v11282_v2  ;;  %v11413_v22 = vor.u32 %v13471_v48, %v11410_v59  ;;  %v12160_v13 = vld [vmem:[#allocation41 + $0x7a0] sm:$0xf]  ;;  %v11397_v63 = vor.u32 %v13467_v3, %v11394_v51  ;;  %v13649_v40 = vld [vmem:[#allocation41 + $0x74c] sm:$0xf0] }
 0xf7f   :  { %v15694_v39 = vor.u32 %v5435_v58, %v5431_v4  ;;  %v15696_v30 = vor.u32 %v5442_v35, %v5438_v56  ;;  %7815 = vmatpush.bf16.msra.mxu2 %v11473_v47  ;;  %v12064_v4 = vld [vmem:[#allocation41 + $0x6e0] sm:$0xf]  ;;  %v13669_v56 = vld [vmem:[#allocation41 + $0x7ec] sm:$0xf0]  ;;  %v12209_v35 = vor.u32 %v13673_v26, %v12208_v11  ;;  %v12177_v47 = vor.u32 %v13665_v0, %v12176_v20  ;;  %v13451_v20 = vld [vmem:[#allocation41 + $0x124] sm:$0xf] }
 0xf80   :  { %7889 = vmatpush.bf16.msra.mxu0 %v12305_v6  ;;  %7902 = vmatpush.bf16.msrb.mxu3 %v12433_v10  ;;  %v13677_v6 = vld [vmem:[#allocation41 + $0x82c] sm:$0xf0]  ;;  %v12352_v10 = vld [vmem:[#allocation41 + $0x920] sm:$0xf]  ;;  %v12065_v55 = vor.u32 %v13637_v18, %v12064_v4  ;;  %v13423_v4 = vld [vmem:[#allocation41 + $0x44] sm:$0xf]  ;;  %v12129_v18 = vor.u32 %v13653_v41, %v12128_v8 }
 0xf81   :  { %v12225_v14 = vor.u32 %v13677_v6, %v12224_v52  ;;  %v12353_v44 = vor.u32 %v13709_v7, %v12352_v10  ;;  %v12192_v58 = vld [vmem:[#allocation41 + $0x7e0] sm:$0xf]  ;;  %v13629_v52 = vld [vmem:[#allocation41 + $0x6ac] sm:$0xf0]  ;;  %v13431_v6 = vld [vmem:[#allocation41 + $0x84] sm:$0xf] }
 0xf82   :  { %7829 = vmatpush.bf16.msrb.mxu1 %v11585_v43  ;;  %v13625_v11 = vld [vmem:[#allocation41 + $0x68c] sm:$0xf0]  ;;  %v12144_v26 = vld [vmem:[#allocation41 + $0x780] sm:$0xf]  ;;  %v13427_v43 = vld [vmem:[#allocation41 + $0x64] sm:$0xf] }
 0xf83   :  { %7816 = vmatpush.bf16.msra.mxu2 %v11457_v9  ;;  %v11378_v9 = vld [vmem:[#allocation41 + $0x190] sm:$0xf0]  ;;  %v12017_v33 = vor.u32 %v13625_v11, %v12016_v25  ;;  %v13613_v0 = vld [vmem:[#allocation41 + $0x62c] sm:$0xf0]  ;;  %v13595_v8 = vld [vmem:[#allocation41 + $0x5a4] sm:$0xf] }
 0xf84   :  { %7890 = vmatpush.bf16.msra.mxu0 %v12289_v49  ;;  %7903 = vmatpush.bf16.msrb.mxu3 %v12417_v50  ;;  %v11298_v49 = vld [vmem:[#allocation41 + $0xf0] sm:$0xf0]  ;;  %v13475_v50 = vld [vmem:[#allocation41 + $0x1e4] sm:$0xf]  ;;  %v13645_v51 = vld [vmem:[#allocation41 + $0x72c] sm:$0xf0] }
 0xf85   :  { %v11429_v45 = vor.u32 %v13475_v50, %v11426_v42  ;;  %v13459_v50 = vld [vmem:[#allocation41 + $0x164] sm:$0xf]  ;;  %v11362_v42 = vld [vmem:[#allocation41 + $0x170] sm:$0xf0]  ;;  %v13641_v25 = vld [vmem:[#allocation41 + $0x70c] sm:$0xf0] }
 0xf86   :  { %7830 = vmatpush.bf16.msrb.mxu1 %v11569_v31 }
 0xf87   :  { %7817 = vmatpush.bf16.msra.mxu2 %v11441_v28  ;;  %v12001_v28 = vor.u32 %v13621_v54, %v12000_v17  ;;  %v13563_v17 = vld [vmem:[#allocation41 + $0x4a4] sm:$0xf]  ;;  %v11778_v54 = vld [vmem:[#allocation41 + $0x4b0] sm:$0xf0] }
 0xf88   :  { %7891 = vmatpush.bf16.msra.mxu0 %v12273_v57  ;;  %7904 = vmatpush.bf16.msrb.mxu3 %v12401_v36  ;;  %v12193_v57 = vor.u32 %v13669_v56, %v12192_v58  ;;  %v11301_v36 = vor.u32 %v13443_v46, %v11298_v49  ;;  %v11381_v46 = vor.u32 %v13463_v19, %v11378_v9  ;;  %v11234_v49 = vld [vmem:[#allocation41 + $0x70] sm:$0xf0]  ;;  %v13455_v56 = vld [vmem:[#allocation41 + $0x144] sm:$0xf]  ;;  %v12080_v19 = vld [vmem:[#allocation41 + $0x700] sm:$0xf] }
 0xf89   :  { %v11237_v31 = vor.u32 %v13427_v43, %v11234_v49  ;;  %v11218_v58 = vld [vmem:[#allocation41 + $0x50] sm:$0xf0]  ;;  %v11781_v41 = vor.u32 %v13563_v17, %v11778_v54  ;;  %v12688_v54 = vld [vmem:[#allocation41 + $0xbc0] sm:$0xf] }
 0xf8a   :  { %7875 = vmatpush.bf16.msra.mxu1 %v12193_v57  ;;  %v13617_v57 = vld [vmem:[#allocation41 + $0x64c] sm:$0xf0]  ;;  %v11221_v48 = vor.u32 %v13423_v4, %v11218_v58  ;;  %v11922_v49 = vld [vmem:[#allocation41 + $0x5d0] sm:$0xf0] }
 0xf8b   :  { %7844 = vmatmul.bf16.vlgmr.msrb.gmra.mxu0 %v15694_v39  ;;  %7857 = vmatmul.bf16.vlgmr.msra.gmra.mxu3 %v15696_v30  ;;  %v11890_v58 = vld [vmem:[#allocation41 + $0x590] sm:$0xf0] }
 0xf8c   :  { %7892 = vmatpush.bf16.msra.mxu0 %v12257_v34  ;;  %7905 = vmatpush.bf16.msrb.mxu3 %v12385_v53  ;;  %v13435_v34 = vld [vmem:[#allocation41 + $0xa4] sm:$0xf]  ;;  %v12049_v53 = vor.u32 %v13633_v62, %v12048_v21  ;;  %v11202_v62 = vld [vmem:[#allocation41 + $0x30] sm:$0xf0] }
 0xf8d   :  { %7862 = vmatpush.bf16.msrb.mxu2 %v12065_v55  ;;  %v11269_v7 = vor.u32 %v13435_v34, %v11266_v24  ;;  %v11365_v55 = vor.u32 %v13459_v50, %v11362_v42  ;;  %v13419_v21 = vld [vmem:[#allocation41 + $0x24] sm:$0xf]  ;;  %v11330_v34 = vld [vmem:[#allocation41 + $0x130] sm:$0xf0] }
 0xf8e   :  { %7876 = vmatpush.bf16.msra.mxu1 %v12177_v47  ;;  %v11186_v24 = vld [vmem:[#allocation41 + $0x10] sm:$0xf0]  ;;  %v11205_v47 = vor.u32 %v13419_v21, %v11202_v62  ;;  %v13583_v21 = vld [vmem:[#allocation41 + $0x544] sm:$0xf] }
 0xf8f   :  { %v11858_v62 = vld [vmem:[#allocation41 + $0x550] sm:$0xf0] }
 0xf90   :  { %7893 = vmatpush.bf16.msra.mxu0 %v12241_v27  ;;  %7906 = vmatpush.bf16.msrb.mxu3 %v12369_v15  ;;  %v12033_v27 = vor.u32 %v13629_v52, %v12032_v12  ;;  %v13661_v15 = vld [vmem:[#allocation41 + $0x7ac] sm:$0xf0]  ;;  %v11333_v12 = vor.u32 %v13451_v20, %v11330_v34  ;;  %v13447_v52 = vld [vmem:[#allocation41 + $0x104] sm:$0xf]  ;;  %v11861_v34 = vor.u32 %v13583_v21, %v11858_v62  ;;  %v12528_v62 = vld [vmem:[#allocation41 + $0xa80] sm:$0xf] }
 0xf91   :  { %7863 = vmatpush.bf16.msrb.mxu2 %v12049_v53  ;;  %v12161_v10 = vor.u32 %v13661_v15, %v12160_v13  ;;  %v11968_v53 = vld [vmem:[#allocation41 + $0x620] sm:$0xf]  ;;  %v11314_v13 = vld [vmem:[#allocation41 + $0x110] sm:$0xf0] }
 0xf92   :  { %v11969_v3 = vor.u32 %v13613_v0, %v11968_v53  ;;  %v13547_v53 = vld [vmem:[#allocation41 + $0x424] sm:$0xf]  ;;  %v11714_v0 = vld [vmem:[#allocation41 + $0x430] sm:$0xf0] }
 0xf93   :  { %7877 = vmatpush.bf16.msra.mxu1 %v12161_v10  ;;  %v13603_v10 = vld [vmem:[#allocation41 + $0x5e4] sm:$0xf] }
 0xf94   :  { %7894 = vmatpush.bf16.msra.mxu0 %v12225_v14  ;;  %7907 = vmatpush.bf16.msrb.mxu3 %v12353_v44  ;;  %v12145_v14 = vor.u32 %v13657_v38, %v12144_v26  ;;  %v11253_v44 = vor.u32 %v13431_v6, %v11250_v16  ;;  %v11810_v6 = vld [vmem:[#allocation41 + $0x4f0] sm:$0xf0]  ;;  %v13609_v16 = vld [vmem:[#allocation41 + $0x60c] sm:$0xf0]  ;;  %v11317_v26 = vor.u32 %v13447_v52, %v11314_v13  ;;  %v12704_v13 = vld [vmem:[#allocation41 + $0xbe0] sm:$0xf] }
 0xf95   :  { %7864 = vmatpush.bf16.msrb.mxu2 %v12033_v27  ;;  %v13571_v27 = vld [vmem:[#allocation41 + $0x4e4] sm:$0xf]  ;;  %v13765_v52 = vld [vmem:[#allocation41 + $0xaec] sm:$0xf0] }
 0xf96   :  { %v11813_v38 = vor.u32 %v13571_v27, %v11810_v6  ;;  %v13543_v6 = vld [vmem:[#allocation41 + $0x404] sm:$0xf] }
 0xf97   :  { %7878 = vmatpush.bf16.msra.mxu1 %v12145_v14  ;;  %v13567_v14 = vld [vmem:[#allocation41 + $0x4c4] sm:$0xf] }
 0xf98   :  { %7895 = vmatpush.bf16.msra.mxu0 %v12209_v35  ;;  %7908 = vmatpush.bf16.msrb.mxu3 %v12337_v32  ;;  %v11346_v35 = vld [vmem:[#allocation41 + $0x150] sm:$0xf0]  ;;  %v11984_v32 = vld [vmem:[#allocation41 + $0x640] sm:$0xf] }
 0xf99   :  { %7865 = vmatpush.bf16.msrb.mxu2 %v12017_v33  ;;  %v11349_v59 = vor.u32 %v13455_v56, %v11346_v35  ;;  %v12081_v33 = vor.u32 %v13641_v25, %v12080_v19  ;;  %v12322_v25 = vld [vmem:[#allocation41 + $0x8f0] sm:$0xf0] }
 0xf9b   :  { %7896 = vmatmul.bf16.vlgmr.msra.gmra.mxu0 %v15701_v37  ;;  %7909 = vmatmul.bf16.vlgmr.msrb.gmra.mxu3 %v15704_v60 }
 0xf9c   :  { %7940 = vmatpush.bf16.msrb.mxu0 %v11301_v36  ;;  %7953 = vmatpush.bf16.msra.mxu3 %v11429_v45  ;;  %v12112_v36 = vld [vmem:[#allocation41 + $0x740] sm:$0xf]  ;;  %v11985_v45 = vor.u32 %v13617_v57, %v11984_v32  ;;  %v13555_v32 = vld [vmem:[#allocation41 + $0x464] sm:$0xf]  ;;  %v11746_v57 = vld [vmem:[#allocation41 + $0x470] sm:$0xf0] }
 0xf9d   :  { %7866 = vmatpush.bf16.msrb.mxu2 %v12001_v28  ;;  %7879 = vmatpush.bf16.msra.mxu1 %v12129_v18  ;;  %v12113_v2 = vor.u32 %v13649_v40, %v12112_v36  ;;  %v11906_v28 = vld [vmem:[#allocation41 + $0x5b0] sm:$0xf0]  ;;  %v13559_v18 = vld [vmem:[#allocation41 + $0x484] sm:$0xf]  ;;  %v11749_v40 = vor.u32 %v13555_v32, %v11746_v57  ;;  %v12672_v57 = vld [vmem:[#allocation41 + $0xba0] sm:$0xf] }
 0xf9e   :  { %v11909_v4 = vor.u32 %v13595_v8, %v11906_v28  ;;  %v13587_v36 = vld [vmem:[#allocation41 + $0x564] sm:$0xf]  ;;  %v13793_v8 = vld [vmem:[#allocation41 + $0xbcc] sm:$0xf0] }
 0xf9f   :  { %v13695_v28 = vld [vmem:[#allocation41 + $0x8c4] sm:$0xf] }
 0xfa0   :  { %7941 = vmatpush.bf16.msrb.mxu0 %v11285_v1  ;;  %7954 = vmatpush.bf16.msra.mxu3 %v11413_v22  ;;  %v12096_v1 = vld [vmem:[#allocation41 + $0x720] sm:$0xf]  ;;  %v13415_v22 = vld [vmem:[#allocation41 + $0x4] sm:$0xf] }
 0xfa1   :  { %7867 = vmatpush.bf16.msrb.mxu2 %v11985_v45  ;;  %7880 = vmatpush.bf16.msra.mxu1 %v12113_v2  ;;  %v12097_v15 = vor.u32 %v13645_v51, %v12096_v1  ;;  %v11189_v11 = vor.u32 %v13415_v22, %v11186_v24  ;;  %v11874_v45 = vld [vmem:[#allocation41 + $0x570] sm:$0xf0]  ;;  %v13579_v1 = vld [vmem:[#allocation41 + $0x524] sm:$0xf] }
 0xfa2   :  { %v11877_v2 = vor.u32 %v13587_v36, %v11874_v45  ;;  %v11842_v22 = vld [vmem:[#allocation41 + $0x530] sm:$0xf0]  ;;  %v13789_v36 = vld [vmem:[#allocation41 + $0xbac] sm:$0xf0]  ;;  %v13691_v45 = vld [vmem:[#allocation41 + $0x8a4] sm:$0xf] }
 0xfa3   :  { %v11845_v51 = vor.u32 %v13579_v1, %v11842_v22  ;;  %v12673_v21 = vor.u32 %v13789_v36, %v12672_v57  ;;  %v12656_v22 = vld [vmem:[#allocation41 + $0xb80] sm:$0xf] }
 0xfa4   :  { %7942 = vmatpush.bf16.msrb.mxu0 %v11269_v7  ;;  %7955 = vmatpush.bf16.msra.mxu3 %v11397_v63  ;;  %v11938_v7 = vld [vmem:[#allocation41 + $0x5f0] sm:$0xf0]  ;;  %v11952_v63 = vld [vmem:[#allocation41 + $0x600] sm:$0xf] }
 0xfa5   :  { %7868 = vmatpush.bf16.msrb.mxu2 %v11969_v3  ;;  %7881 = vmatpush.bf16.msra.mxu1 %v12097_v15  ;;  %v11953_v9 = vor.u32 %v13609_v16, %v11952_v63  ;;  %v11941_v43 = vor.u32 %v13603_v10, %v11938_v7  ;;  %v11717_v3 = vor.u32 %v13547_v53, %v11714_v0  ;;  %v13797_v15 = vld [vmem:[#allocation41 + $0xbec] sm:$0xf0]  ;;  %v11698_v10 = vld [vmem:[#allocation41 + $0x410] sm:$0xf0]  ;;  %v13575_v7 = vld [vmem:[#allocation41 + $0x504] sm:$0xf] }
 0xfa6   :  { %v11826_v63 = vld [vmem:[#allocation41 + $0x510] sm:$0xf0]  ;;  %v13699_v16 = vld [vmem:[#allocation41 + $0x8e4] sm:$0xf] }
 0xfa8   :  { %7943 = vmatpush.bf16.msrb.mxu0 %v11253_v44  ;;  %7956 = vmatpush.bf16.msra.mxu3 %v11381_v46  ;;  %v11794_v44 = vld [vmem:[#allocation41 + $0x4d0] sm:$0xf0]  ;;  %v13599_v46 = vld [vmem:[#allocation41 + $0x5c4] sm:$0xf] }
 0xfa9   :  { %7869 = vmatpush.bf16.msrb.mxu2 %v11953_v9  ;;  %7882 = vmatpush.bf16.msra.mxu1 %v12081_v33  ;;  %v11797_v50 = vor.u32 %v13567_v14, %v11794_v44  ;;  %v11925_v42 = vor.u32 %v13599_v46, %v11922_v49  ;;  %v11701_v44 = vor.u32 %v13543_v6, %v11698_v10  ;;  %v12560_v49 = vld [vmem:[#allocation41 + $0xac0] sm:$0xf]  ;;  %v13749_v10 = vld [vmem:[#allocation41 + $0xa6c] sm:$0xf0] }
 0xfaa   :  { %v11829_v46 = vor.u32 %v13575_v7, %v11826_v63  ;;  %v12640_v7 = vld [vmem:[#allocation41 + $0xb60] sm:$0xf] }
 0xfac   :  { %7944 = vmatpush.bf16.msrb.mxu0 %v11237_v31  ;;  %7957 = vmatpush.bf16.msra.mxu3 %v11365_v55  ;;  %v11762_v31 = vld [vmem:[#allocation41 + $0x490] sm:$0xf0]  ;;  %v13591_v55 = vld [vmem:[#allocation41 + $0x584] sm:$0xf] }
 0xfad   :  { %v11765_v56 = vor.u32 %v13559_v18, %v11762_v31  ;;  %v11893_v35 = vor.u32 %v13591_v55, %v11890_v58  ;;  %v12434_v18 = vld [vmem:[#allocation41 + $0x9d0] sm:$0xf0]  ;;  %v12689_v55 = vor.u32 %v13793_v8, %v12688_v54  ;;  %v12544_v58 = vld [vmem:[#allocation41 + $0xaa0] sm:$0xf] }
 0xfb0   :  { %7945 = vmatpush.bf16.msrb.mxu0 %v11221_v48  ;;  %7958 = vmatpush.bf16.msra.mxu3 %v11349_v59  ;;  %v13551_v48 = vld [vmem:[#allocation41 + $0x444] sm:$0xf]  ;;  %v11730_v59 = vld [vmem:[#allocation41 + $0x450] sm:$0xf0] }
 0xfb1   :  { %v11733_v20 = vor.u32 %v13551_v48, %v11730_v59  ;;  %v12418_v48 = vld [vmem:[#allocation41 + $0x9b0] sm:$0xf0] }
 0xfb4   :  { %7946 = vmatpush.bf16.msrb.mxu0 %v11205_v47  ;;  %7959 = vmatpush.bf16.msra.mxu3 %v11333_v12  ;;  %v5391_v24 = vpop.f32.mrf.mxu2  ;;  %v12576_v12 = vld [vmem:[#allocation41 + $0xae0] sm:$0xf] }
 0xfb5   :  { %v12577_v33 = vor.u32 %v13765_v52, %v12576_v12  ;;  %v12402_v12 = vld [vmem:[#allocation41 + $0x990] sm:$0xf0]  ;;  %v12512_v52 = vld [vmem:[#allocation41 + $0xa60] sm:$0xf] }
 0xfb8   :  { %7947 = vmatpush.bf16.msrb.mxu0 %v11189_v11  ;;  %7960 = vmatpush.bf16.msra.mxu3 %v11317_v26  ;;  %v13731_v11 = vld [vmem:[#allocation41 + $0x9e4] sm:$0xf]  ;;  %v12450_v26 = vld [vmem:[#allocation41 + $0x9f0] sm:$0xf0] }
 0xfb9   :  { %v12453_v17 = vor.u32 %v13731_v11, %v12450_v26 }
 0xfbb   :  { %7948 = vmatmul.bf16.vlgmr.msrb.gmra.mxu0 %v15684_v5  ;;  %7961 = vmatmul.bf16.vlgmr.msra.gmra.mxu3 %v15686_v61 }
 0xfbc   :  { %7992 = vmatpush.bf16.msra.mxu0 %v11813_v38  ;;  %8005 = vmatpush.bf16.msrb.mxu3 %v11941_v43  ;;  %v12705_v38 = vor.u32 %v13797_v15, %v12704_v13 }
 0xfc0   :  { %7993 = vmatpush.bf16.msra.mxu0 %v11797_v50  ;;  %8006 = vmatpush.bf16.msrb.mxu3 %v11925_v42  ;;  %v13761_v50 = vld [vmem:[#allocation41 + $0xacc] sm:$0xf0]  ;;  %v12325_v42 = vor.u32 %v13699_v16, %v12322_v25  ;;  %v12258_v25 = vld [vmem:[#allocation41 + $0x870] sm:$0xf0] }
 0xfc1   :  { %v12561_v31 = vor.u32 %v13761_v50, %v12560_v49 }
 0xfc4   :  { %7994 = vmatpush.bf16.msra.mxu0 %v11781_v41  ;;  %8007 = vmatpush.bf16.msrb.mxu3 %v11909_v4  ;;  %v12306_v41 = vld [vmem:[#allocation41 + $0x8d0] sm:$0xf0]  ;;  %v13727_v4 = vld [vmem:[#allocation41 + $0x9c4] sm:$0xf] }
 0xfc5   :  { %v12437_v32 = vor.u32 %v13727_v4, %v12434_v18  ;;  %v13679_v4 = vld [vmem:[#allocation41 + $0x844] sm:$0xf]  ;;  %v12242_v18 = vld [vmem:[#allocation41 + $0x850] sm:$0xf0] }
 0xfc6   :  { %v12245_v57 = vor.u32 %v13679_v4, %v12242_v18 }
 0xfc8   :  { %7995 = vmatpush.bf16.msra.mxu0 %v11765_v56  ;;  %8008 = vmatpush.bf16.msrb.mxu3 %v11893_v35  ;;  %v13757_v56 = vld [vmem:[#allocation41 + $0xaac] sm:$0xf0]  ;;  %v12309_v35 = vor.u32 %v13695_v28, %v12306_v41  ;;  %v12624_v28 = vld [vmem:[#allocation41 + $0xb40] sm:$0xf] }
 0xfc9   :  { %v12545_v59 = vor.u32 %v13757_v56, %v12544_v58  ;;  %v13777_v41 = vld [vmem:[#allocation41 + $0xb4c] sm:$0xf0] }
 0xfca   :  { %v12625_v56 = vor.u32 %v13777_v41, %v12624_v28  ;;  %v11416_v28 = vld [vmem:[#allocation41 + $0x1c8] sm:$0xf]  ;;  %v13474_v41 = vld [vmem:[#allocation41 + $0x1d4] sm:$0xf0] }
 0xfcc   :  { %7996 = vmatpush.bf16.msra.mxu0 %v11749_v40  ;;  %8009 = vmatpush.bf16.msrb.mxu3 %v11877_v2  ;;  %v12290_v40 = vld [vmem:[#allocation41 + $0x8b0] sm:$0xf0]  ;;  %v13723_v2 = vld [vmem:[#allocation41 + $0x9a4] sm:$0xf] }
 0xfcd   :  { %v12293_v0 = vor.u32 %v13691_v45, %v12290_v40  ;;  %v12421_v1 = vor.u32 %v13723_v2, %v12418_v48  ;;  %v12608_v45 = vld [vmem:[#allocation41 + $0xb20] sm:$0xf]  ;;  %v13773_v40 = vld [vmem:[#allocation41 + $0xb2c] sm:$0xf0]  ;;  %v13675_v2 = vld [vmem:[#allocation41 + $0x824] sm:$0xf] }
 0xfce   :  { %v12226_v48 = vld [vmem:[#allocation41 + $0x830] sm:$0xf0] }
 0xfd0   :  { %7997 = vmatpush.bf16.msra.mxu0 %v11733_v20  ;;  %8010 = vmatpush.bf16.msrb.mxu3 %v11861_v34  ;;  %v13753_v20 = vld [vmem:[#allocation41 + $0xa8c] sm:$0xf0] }
 0xfd1   :  { %v12529_v13 = vor.u32 %v13753_v20, %v12528_v62  ;;  %v12464_v62 = vld [vmem:[#allocation41 + $0xa00] sm:$0xf] }
 0xfd4   :  { %v5411_v47 = vpop.f32.mrf.mxu1  ;;  %7998 = vmatpush.bf16.msra.mxu0 %v11717_v3  ;;  %8011 = vmatpush.bf16.msrb.mxu3 %v11845_v51  ;;  %v13687_v3 = vld [vmem:[#allocation41 + $0x884] sm:$0xf]  ;;  %v12274_v51 = vld [vmem:[#allocation41 + $0x890] sm:$0xf0] }
 0xfd5   :  { %v5415_v27 = vpack.c.bf16 %v5411_v47, %v5391_v24  ;;  %v13785_v24 = vld [vmem:[#allocation41 + $0xb8c] sm:$0xf0]  ;;  %v13719_v47 = vld [vmem:[#allocation41 + $0x984] sm:$0xf]  ;;  %v12277_v63 = vor.u32 %v13687_v3, %v12274_v51  ;;  %v11554_v51 = vld [vmem:[#allocation41 + $0x2f0] sm:$0xf0] }
 0xfd6   :  { %v12405_v16 = vor.u32 %v13719_v47, %v12402_v12  ;;  %v13507_v3 = vld [vmem:[#allocation41 + $0x2e4] sm:$0xf]  ;;  %v11682_v12 = vld [vmem:[#allocation41 + $0x3f0] sm:$0xf0] }
 0xfd7   :  { %v5420_v19 = vunpack.c.l.b16 %v5415_v27  ;;  %v5421_v9 = vunpack.c.h.b16 %v5415_v27  ;;  %v12657_v27 = vor.u32 %v13785_v24, %v12656_v22  ;;  %v12229_v22 = vor.u32 %v13675_v2, %v12226_v48  ;;  %v13539_v47 = vld [vmem:[#allocation41 + $0x3e4] sm:$0xf]  ;;  %v11400_v2 = vld [vmem:[#allocation41 + $0x1a8] sm:$0xf]  ;;  %v13470_v48 = vld [vmem:[#allocation41 + $0x1b4] sm:$0xf0] }
 0xfd8   :  { %7999 = vmatpush.bf16.msra.mxu0 %v11701_v44  ;;  %8012 = vmatpush.bf16.msrb.mxu3 %v11829_v46  ;;  %v12513_v44 = vor.u32 %v13749_v10, %v12512_v52  ;;  %v13671_v52 = vld [vmem:[#allocation41 + $0x804] sm:$0xf] }
 0xfd9   :  { %v15710_v43 = vpack.c.b16 %v5420_v19, %v5420_v19  ;;  %v15712_v14 = vpack.c.b16 %v5421_v9, %v5421_v9  ;;  %v13781_v19 = vld [vmem:[#allocation41 + $0xb6c] sm:$0xf0]  ;;  %v13683_v9 = vld [vmem:[#allocation41 + $0x864] sm:$0xf] }
 0xfda   :  { %v12641_v50 = vor.u32 %v13781_v19, %v12640_v7  ;;  %v12261_v54 = vor.u32 %v13683_v9, %v12258_v25  ;;  %v13478_v19 = vld [vmem:[#allocation41 + $0x1f4] sm:$0xf0]  ;;  %v11557_v9 = vor.u32 %v13507_v3, %v11554_v51  ;;  %v11685_v25 = vor.u32 %v13539_v47, %v11682_v12  ;;  %v11384_v47 = vld [vmem:[#allocation41 + $0x188] sm:$0xf] }
 0xfdb   :  { %7818 = vmatmul.bf16.vlgmr.msra.gmra.mxu2 %v15710_v43  ;;  %7831 = vmatmul.bf16.vlgmr.msrb.gmra.mxu1 %v15712_v14  ;;  %v5447_v34 = vshll.u32 %v15710_v43, 16  ;;  %v5454_v53 = vshll.u32 %v15712_v14, 16  ;;  %v5445_v11 = vshrl.u32 %v15710_v43, 16  ;;  %v5452_v26 = vshrl.u32 %v15712_v14, 16  ;;  %v13434_v51 = vld [vmem:[#allocation41 + $0x94] sm:$0xf0] }
 0xfdc   :  { %7914 = vmatpush.bf16.msra.mxu2 %v12577_v33  ;;  %7927 = vmatpush.bf16.msrb.mxu1 %v12705_v38  ;;  %v13715_v33 = vld [vmem:[#allocation41 + $0x964] sm:$0xf]  ;;  %v12386_v38 = vld [vmem:[#allocation41 + $0x970] sm:$0xf0]  ;;  %v15729_v4 = vrot.slane %v15710_v43, 1  ;;  %v15732_v18 = vrot.slane %v15712_v14, 1 }
 0xfdd   :  { %8044 = vmatpush.bf16.msrb.mxu0 %v12325_v42  ;;  %8057 = vmatpush.bf16.msra.mxu3 %v12453_v17  ;;  %v5449_v15 = vrot.slane %v5447_v34, 1  ;;  %v5456_v6 = vrot.slane %v5454_v53, 1  ;;  %v12496_v42 = vld [vmem:[#allocation41 + $0xa40] sm:$0xf]  ;;  %v13745_v17 = vld [vmem:[#allocation41 + $0xa4c] sm:$0xf0]  ;;  %v12389_v8 = vor.u32 %v13715_v33, %v12386_v38  ;;  %v12609_v34 = vor.u32 %v13773_v40, %v12608_v45 }
 0xfde   :  { %8000 = vmatmul.bf16.vlgmr.msra.gmra.mxu0 %v15694_v39  ;;  %8013 = vmatmul.bf16.vlgmr.msrb.gmra.mxu3 %v15696_v30  ;;  %v12497_v58 = vor.u32 %v13745_v17, %v12496_v42  ;;  %v13737_v53 = vld [vmem:[#allocation41 + $0xa0c] sm:$0xf0]  ;;  %v13503_v33 = vld [vmem:[#allocation41 + $0x2c4] sm:$0xf]  ;;  %v11538_v38 = vld [vmem:[#allocation41 + $0x2d0] sm:$0xf0] }
 0xfdf   :  { %v15722_v46 = vor.u32 %v5449_v15, %v5445_v11  ;;  %v15724_v49 = vor.u32 %v5456_v6, %v5452_v26  ;;  %v12338_v15 = vld [vmem:[#allocation41 + $0x910] sm:$0xf0]  ;;  %v11304_v6 = vld [vmem:[#allocation41 + $0xe8] sm:$0xf]  ;;  %v12465_v10 = vor.u32 %v13737_v53, %v12464_v62  ;;  %v13535_v42 = vld [vmem:[#allocation41 + $0x3c4] sm:$0xf] }
 0xfe0   :  { %7915 = vmatpush.bf16.msra.mxu2 %v12561_v31  ;;  %7928 = vmatpush.bf16.msrb.mxu1 %v12689_v55  ;;  %v13711_v31 = vld [vmem:[#allocation41 + $0x944] sm:$0xf]  ;;  %v12370_v55 = vld [vmem:[#allocation41 + $0x950] sm:$0xf0]  ;;  %v11272_v45 = vld [vmem:[#allocation41 + $0xa8] sm:$0xf] }
 0xfe1   :  { %8045 = vmatpush.bf16.msrb.mxu0 %v12309_v35  ;;  %8058 = vmatpush.bf16.msra.mxu3 %v12437_v32  ;;  %v12480_v35 = vld [vmem:[#allocation41 + $0xa20] sm:$0xf]  ;;  %v13741_v32 = vld [vmem:[#allocation41 + $0xa2c] sm:$0xf0]  ;;  %v12373_v36 = vor.u32 %v13711_v31, %v12370_v55  ;;  %v11666_v17 = vld [vmem:[#allocation41 + $0x3d0] sm:$0xf0]  ;;  %v11541_v31 = vor.u32 %v13503_v33, %v11538_v38 }
 0xfe2   :  { %v12481_v20 = vor.u32 %v13741_v32, %v12480_v35  ;;  %v11669_v55 = vor.u32 %v13535_v42, %v11666_v17  ;;  %v13531_v35 = vld [vmem:[#allocation41 + $0x3a4] sm:$0xf]  ;;  %v13438_v40 = vld [vmem:[#allocation41 + $0xb4] sm:$0xf0] }
 0xfe3   :  { %v13527_v53 = vld [vmem:[#allocation41 + $0x384] sm:$0xf]  ;;  %v13466_v12 = vld [vmem:[#allocation41 + $0x194] sm:$0xf0] }
 0xfe4   :  { %7916 = vmatpush.bf16.msra.mxu2 %v12545_v59  ;;  %7929 = vmatpush.bf16.msrb.mxu1 %v12673_v21  ;;  %v13707_v59 = vld [vmem:[#allocation41 + $0x924] sm:$0xf]  ;;  %v12354_v21 = vld [vmem:[#allocation41 + $0x930] sm:$0xf0] }
 0xfe5   :  { %8046 = vmatpush.bf16.msrb.mxu0 %v12293_v0  ;;  %8059 = vmatpush.bf16.msra.mxu3 %v12421_v1  ;;  %v12592_v0 = vld [vmem:[#allocation41 + $0xb00] sm:$0xf]  ;;  %v13769_v1 = vld [vmem:[#allocation41 + $0xb0c] sm:$0xf0]  ;;  %v12357_v24 = vor.u32 %v13707_v59, %v12354_v21 }
 0xfe6   :  { %v12593_v7 = vor.u32 %v13769_v1, %v12592_v0  ;;  %v5854_v59 = vld [vmem:[#allocation43] sm:$0xf]  ;;  %v11273_v0 = vor.u32 %v13438_v40, %v11272_v45  ;;  %v11401_v1 = vor.u32 %v13470_v48, %v11400_v2  ;;  %v11458_v45 = vld [vmem:[#allocation41 + $0x230] sm:$0xf0]  ;;  %v13515_v48 = vld [vmem:[#allocation41 + $0x324] sm:$0xf] }
 0xfe7   :  { %v5856_v3 = vperm.slane %v5854_v59, 0  ;;  %v11586_v59 = vld [vmem:[#allocation41 + $0x330] sm:$0xf0] }
 0xfe8   :  { %7917 = vmatpush.bf16.msra.mxu2 %v12529_v13  ;;  %7930 = vmatpush.bf16.msrb.mxu1 %v12657_v27  ;;  %v12210_v13 = vld [vmem:[#allocation41 + $0x810] sm:$0xf0]  ;;  %v13703_v27 = vld [vmem:[#allocation41 + $0x904] sm:$0xf] }
 0xfe9   :  { %8047 = vmatpush.bf16.msrb.mxu0 %v12277_v63  ;;  %8060 = vmatpush.bf16.msra.mxu3 %v12405_v16  ;;  %v13446_v63 = vld [vmem:[#allocation41 + $0xf4] sm:$0xf0]  ;;  %v11432_v16 = vld [vmem:[#allocation41 + $0x1e8] sm:$0xf]  ;;  %v12213_v11 = vor.u32 %v13671_v52, %v12210_v13  ;;  %v12341_v26 = vor.u32 %v13703_v27, %v12338_v15  ;;  %v13491_v15 = vld [vmem:[#allocation41 + $0x264] sm:$0xf] }
 0xfeb   :  { %7870 = vmatmul.bf16.vlgmr.msrb.gmra.mxu2 %v15722_v46  ;;  %7883 = vmatmul.bf16.vlgmr.msra.gmra.mxu1 %v15724_v49 }
 0xfec   :  { %7918 = vmatpush.bf16.msra.mxu2 %v12513_v44  ;;  %7931 = vmatpush.bf16.msrb.mxu1 %v12641_v50  ;;  %v11305_v44 = vor.u32 %v13446_v63, %v11304_v6  ;;  %v11433_v50 = vor.u32 %v13478_v19, %v11432_v16  ;;  %v11490_v6 = vld [vmem:[#allocation41 + $0x270] sm:$0xf0]  ;;  %v13523_v63 = vld [vmem:[#allocation41 + $0x364] sm:$0xf]  ;;  %v11240_v19 = vld [vmem:[#allocation41 + $0x68] sm:$0xf] }
 0xfed   :  { %8048 = vmatpush.bf16.msrb.mxu0 %v12261_v54  ;;  %8061 = vmatpush.bf16.msra.mxu3 %v12389_v8  ;;  %v11288_v54 = vld [vmem:[#allocation41 + $0xc8] sm:$0xf]  ;;  %v13442_v8 = vld [vmem:[#allocation41 + $0xd4] sm:$0xf0]  ;;  %v11618_v16 = vld [vmem:[#allocation41 + $0x370] sm:$0xf0]  ;;  %v11493_v33 = vor.u32 %v13491_v15, %v11490_v6 }
 0xfee   :  { %v11289_v32 = vor.u32 %v13442_v8, %v11288_v54  ;;  %v11621_v38 = vor.u32 %v13523_v63, %v11618_v16  ;;  %v13519_v8 = vld [vmem:[#allocation41 + $0x344] sm:$0xf]  ;;  %v12194_v15 = vld [vmem:[#allocation41 + $0x7f0] sm:$0xf0]  ;;  %v11192_v6 = vld [vmem:[#allocation41 + $0x8] sm:$0xf] }
 0xfef   :  { %v11320_v63 = vld [vmem:[#allocation41 + $0x108] sm:$0xf]  ;;  %v13450_v16 = vld [vmem:[#allocation41 + $0x114] sm:$0xf0] }
 0xff0   :  { %7919 = vmatpush.bf16.msra.mxu2 %v12497_v58  ;;  %7932 = vmatpush.bf16.msrb.mxu1 %v12625_v56  ;;  %v13499_v58 = vld [vmem:[#allocation41 + $0x2a4] sm:$0xf]  ;;  %v11522_v56 = vld [vmem:[#allocation41 + $0x2b0] sm:$0xf0] }
 0xff1   :  { %8049 = vmatpush.bf16.msrb.mxu0 %v12245_v57  ;;  %8062 = vmatpush.bf16.msra.mxu3 %v12373_v36  ;;  %v11417_v57 = vor.u32 %v13474_v41, %v11416_v28  ;;  %v11650_v36 = vld [vmem:[#allocation41 + $0x3b0] sm:$0xf0]  ;;  %v11525_v21 = vor.u32 %v13499_v58, %v11522_v56  ;;  %v11224_v41 = vld [vmem:[#allocation41 + $0x48] sm:$0xf]  ;;  %v13458_v56 = vld [vmem:[#allocation41 + $0x154] sm:$0xf0] }
 0xff2   :  { %v11653_v62 = vor.u32 %v13531_v35, %v11650_v36  ;;  %v11602_v28 = vld [vmem:[#allocation41 + $0x350] sm:$0xf0]  ;;  %v11352_v58 = vld [vmem:[#allocation41 + $0x148] sm:$0xf]  ;;  %v13483_v36 = vld [vmem:[#allocation41 + $0x224] sm:$0xf] }
 0xff3   :  { %v11353_v2 = vor.u32 %v13458_v56, %v11352_v58  ;;  %v11800_v58 = vld [vmem:[#allocation41 + $0x4c8] sm:$0xf]  ;;  %v13570_v56 = vld [vmem:[#allocation41 + $0x4d4] sm:$0xf0] }
 0xff4   :  { %7920 = vmatpush.bf16.msra.mxu2 %v12481_v20  ;;  %7933 = vmatpush.bf16.msrb.mxu1 %v12609_v34  ;;  %v13495_v20 = vld [vmem:[#allocation41 + $0x284] sm:$0xf]  ;;  %v11506_v34 = vld [vmem:[#allocation41 + $0x290] sm:$0xf0] }
 0xff5   :  { %8050 = vmatpush.bf16.msrb.mxu0 %v12229_v22  ;;  %8063 = vmatpush.bf16.msra.mxu3 %v12357_v24  ;;  %v11634_v22 = vld [vmem:[#allocation41 + $0x390] sm:$0xf0]  ;;  %v11256_v24 = vld [vmem:[#allocation41 + $0x88] sm:$0xf]  ;;  %v11509_v13 = vor.u32 %v13495_v20, %v11506_v34  ;;  %v13454_v34 = vld [vmem:[#allocation41 + $0x134] sm:$0xf0] }
 0xff6   :  { %v11637_v27 = vor.u32 %v13527_v53, %v11634_v22  ;;  %v11336_v20 = vld [vmem:[#allocation41 + $0x128] sm:$0xf]  ;;  %v13479_v53 = vld [vmem:[#allocation41 + $0x204] sm:$0xf]  ;;  %v11442_v22 = vld [vmem:[#allocation41 + $0x210] sm:$0xf0] }
 0xff8   :  { %7921 = vmatpush.bf16.msra.mxu2 %v12465_v10  ;;  %7934 = vmatpush.bf16.msrb.mxu1 %v12593_v7  ;;  %v7793_v52 = vpop.f32.mrf.mxu0  ;;  %v11257_v10 = vor.u32 %v13434_v51, %v11256_v24  ;;  %v11385_v7 = vor.u32 %v13466_v12, %v11384_v47  ;;  %v13511_v24 = vld [vmem:[#allocation41 + $0x304] sm:$0xf]  ;;  %v11337_v12 = vor.u32 %v13454_v34, %v11336_v20  ;;  %v12162_v20 = vld [vmem:[#allocation41 + $0x7b0] sm:$0xf0]  ;;  %v11784_v34 = vld [vmem:[#allocation41 + $0x4a8] sm:$0xf] }
 0xff9   :  { %8051 = vmatpush.bf16.msrb.mxu0 %v12213_v11  ;;  %8064 = vmatpush.bf16.msra.mxu3 %v12341_v26  ;;  %v11368_v11 = vld [vmem:[#allocation41 + $0x168] sm:$0xf]  ;;  %v13462_v26 = vld [vmem:[#allocation41 + $0x174] sm:$0xf0] }
 0xffa   :  { %v11369_v54 = vor.u32 %v13462_v26, %v11368_v11  ;;  %v13574_v11 = vld [vmem:[#allocation41 + $0x4f4] sm:$0xf0]  ;;  %v11944_v26 = vld [vmem:[#allocation41 + $0x5e8] sm:$0xf] }
 0xffb   :  { %7922 = vmatmul.bf16.vlgmr.msra.gmra.mxu2 %v15729_v4  ;;  %7935 = vmatmul.bf16.vlgmr.msrb.gmra.mxu1 %v15732_v18 }
 0xffc   :  { %7966 = vmatpush.bf16.msrb.mxu2 %v11557_v9  ;;  %7979 = vmatpush.bf16.msra.mxu1 %v11685_v25  ;;  %v7794_v9 = vadd.f32 %v7793_v52, %v5856_v3  ;;  %v13430_v25 = vld [vmem:[#allocation41 + $0x74] sm:$0xf0]  ;;  %v11570_v3 = vld [vmem:[#allocation41 + $0x310] sm:$0xf0]  ;;  %v13635_v52 = vld [vmem:[#allocation41 + $0x6e4] sm:$0xf] }
 0xffd   :  { %8096 = vmatpush.bf16.msra.mxu0 %v11305_v44  ;;  %8109 = vmatpush.bf16.msrb.mxu3 %v11433_v50  ;;  %v13487_v44 = vld [vmem:[#allocation41 + $0x244] sm:$0xf]  ;;  %v11474_v50 = vld [vmem:[#allocation41 + $0x250] sm:$0xf0]  ;;  %v11241_v17 = vor.u32 %v13430_v25, %v11240_v19  ;;  %v11816_v19 = vld [vmem:[#allocation41 + $0x4e8] sm:$0xf]  ;;  %v11573_v25 = vor.u32 %v13511_v24, %v11570_v3 }
 0xffe   :  { %8052 = vmatmul.bf16.vlgmr.msrb.gmra.mxu0 %v15701_v37  ;;  %8065 = vmatmul.bf16.vlgmr.msra.gmra.mxu3 %v15704_v60  ;;  %v7806_v42 = vpop.f32.mrf.mxu3  ;;  %v13623_v3 = vld [vmem:[#allocation41 + $0x684] sm:$0xf] }
0x1000   :  { %7967 = vmatpush.bf16.msrb.mxu2 %v11541_v31  ;;  %7980 = vmatpush.bf16.msra.mxu1 %v11669_v55  ;;  %v15738_v31 = vadd.f32 %v7806_v42, %v7794_v9  ;;  %v13426_v55 = vld [vmem:[#allocation41 + $0x54] sm:$0xf0]  ;;  %v7795_v35 = vpop.f32.mrf.mxu0  ;;  %v11445_v9 = vor.u32 %v13479_v53, %v11442_v22  ;;  %v11321_v42 = vor.u32 %v13450_v16, %v11320_v63 }
0x1001   :  { %8097 = vmatpush.bf16.msra.mxu0 %v11289_v32  ;;  %8110 = vmatpush.bf16.msrb.mxu3 %v11417_v57  ;;  %v11477_v32 = vor.u32 %v13487_v44, %v11474_v50  ;;  %v11605_v57 = vor.u32 %v13519_v8, %v11602_v28  ;;  %v11225_v40 = vor.u32 %v13426_v55, %v11224_v41  ;;  %v13663_v41 = vld [vmem:[#allocation41 + $0x7c4] sm:$0xf]  ;;  %v12178_v55 = vld [vmem:[#allocation41 + $0x7d0] sm:$0xf0]  ;;  %v11928_v35 = vld [vmem:[#allocation41 + $0x5c8] sm:$0xf] }
0x1002   :  { %v11817_v8 = vor.u32 %v13574_v11, %v11816_v19  ;;  %v13566_v53 = vld [vmem:[#allocation41 + $0x4b4] sm:$0xf0] }
0x1004   :  { %7968 = vmatpush.bf16.msrb.mxu2 %v11525_v21  ;;  %7981 = vmatpush.bf16.msra.mxu1 %v11653_v62  ;;  %v11208_v21 = vld [vmem:[#allocation41 + $0x28] sm:$0xf]  ;;  %v13422_v62 = vld [vmem:[#allocation41 + $0x34] sm:$0xf0] }
0x1005   :  { %8098 = vmatpush.bf16.msra.mxu0 %v11273_v0  ;;  %8111 = vmatpush.bf16.msrb.mxu3 %v11401_v1  ;;  %v11461_v0 = vor.u32 %v13483_v36, %v11458_v45  ;;  %v11589_v1 = vor.u32 %v13515_v48, %v11586_v59  ;;  %v11209_v47 = vor.u32 %v13422_v62, %v11208_v21  ;;  %v13659_v62 = vld [vmem:[#allocation41 + $0x7a4] sm:$0xf] }
0x1006   :  { %v7808_v51 = vpop.f32.mrf.mxu3  ;;  %v12181_v45 = vor.u32 %v13663_v41, %v12178_v55  ;;  %v11801_v59 = vor.u32 %v13570_v56, %v11800_v58  ;;  %v12165_v24 = vor.u32 %v13659_v62, %v12162_v20  ;;  %v13615_v41 = vld [vmem:[#allocation41 + $0x644] sm:$0xf]  ;;  %v11986_v55 = vld [vmem:[#allocation41 + $0x650] sm:$0xf0] }
0x1007   :  { %v12018_v51 = vld [vmem:[#allocation41 + $0x690] sm:$0xf0]  ;;  %v13611_v62 = vld [vmem:[#allocation41 + $0x624] sm:$0xf] }
0x1008   :  { %7969 = vmatpush.bf16.msrb.mxu2 %v11509_v13  ;;  %7982 = vmatpush.bf16.msra.mxu1 %v11637_v27  ;;  %v12066_v13 = vld [vmem:[#allocation41 + $0x6f0] sm:$0xf0]  ;;  %v13667_v27 = vld [vmem:[#allocation41 + $0x7e4] sm:$0xf]  ;;  %v12021_v16 = vor.u32 %v13623_v3, %v12018_v51  ;;  %v13550_v3 = vld [vmem:[#allocation41 + $0x434] sm:$0xf0] }
0x1009   :  { %8099 = vmatpush.bf16.msra.mxu0 %v11257_v10  ;;  %8112 = vmatpush.bf16.msrb.mxu3 %v11385_v7  ;;  %v13418_v10 = vld [vmem:[#allocation41 + $0x14] sm:$0xf0]  ;;  %v15740_v7 = vpop.f32.mrf.mxu0  ;;  %v12197_v44 = vor.u32 %v13667_v27, %v12194_v15  ;;  %v11768_v27 = vld [vmem:[#allocation41 + $0x488] sm:$0xf]  ;;  %v11970_v20 = vld [vmem:[#allocation41 + $0x630] sm:$0xf0] }
0x100a   :  { %v11193_v50 = vor.u32 %v13418_v10, %v11192_v6  ;;  %v13562_v15 = vld [vmem:[#allocation41 + $0x494] sm:$0xf0]  ;;  %v11896_v6 = vld [vmem:[#allocation41 + $0x588] sm:$0xf] }
0x100b   :  { %v13594_v10 = vld [vmem:[#allocation41 + $0x594] sm:$0xf0]  ;;  %v11848_v51 = vld [vmem:[#allocation41 + $0x528] sm:$0xf] }
0x100c   :  { %7970 = vmatpush.bf16.msrb.mxu2 %v11493_v33  ;;  %7983 = vmatpush.bf16.msra.mxu1 %v11621_v38  ;;  %v13606_v33 = vld [vmem:[#allocation41 + $0x5f4] sm:$0xf0]  ;;  %v12069_v38 = vor.u32 %v13635_v52, %v12066_v13  ;;  %v13655_v52 = vld [vmem:[#allocation41 + $0x784] sm:$0xf]  ;;  %v12146_v13 = vld [vmem:[#allocation41 + $0x790] sm:$0xf0] }
0x100d   :  { %8100 = vmatpush.bf16.msra.mxu0 %v11241_v17  ;;  %8113 = vmatpush.bf16.msrb.mxu3 %v11369_v54  ;;  %v13631_v17 = vld [vmem:[#allocation41 + $0x6c4] sm:$0xf]  ;;  %v12050_v54 = vld [vmem:[#allocation41 + $0x6d0] sm:$0xf0]  ;;  %v11945_v28 = vor.u32 %v13606_v33, %v11944_v26  ;;  %v12149_v19 = vor.u32 %v13655_v52, %v12146_v13  ;;  %v11769_v26 = vor.u32 %v13562_v15, %v11768_v27 }
0x100e   :  { %v12053_v36 = vor.u32 %v13631_v17, %v12050_v54  ;;  %v11897_v33 = vor.u32 %v13594_v10, %v11896_v6  ;;  %v11880_v17 = vld [vmem:[#allocation41 + $0x568] sm:$0xf]  ;;  %v13590_v54 = vld [vmem:[#allocation41 + $0x574] sm:$0xf0]  ;;  %v11973_v52 = vor.u32 %v13611_v62, %v11970_v20  ;;  %v11954_v27 = vld [vmem:[#allocation41 + $0x610] sm:$0xf0] }
0x100f   :  { %v11881_v56 = vor.u32 %v13590_v54, %v11880_v17  ;;  %v13639_v15 = vld [vmem:[#allocation41 + $0x704] sm:$0xf]  ;;  %v12082_v6 = vld [vmem:[#allocation41 + $0x710] sm:$0xf0]  ;;  %v13698_v62 = vld [vmem:[#allocation41 + $0x8d4] sm:$0xf0] }
0x1010   :  { %7971 = vmatpush.bf16.msrb.mxu2 %v11477_v32  ;;  %7984 = vmatpush.bf16.msra.mxu1 %v11605_v57  ;;  %v13602_v32 = vld [vmem:[#allocation41 + $0x5d4] sm:$0xf0]  ;;  %v15742_v57 = vpop.f32.mrf.mxu3  ;;  %v12085_v54 = vor.u32 %v13639_v15, %v12082_v6  ;;  %v12440_v20 = vld [vmem:[#allocation41 + $0x9c8] sm:$0xf] }
0x1011   :  { %8101 = vmatpush.bf16.msra.mxu0 %v11225_v40  ;;  %8114 = vmatpush.bf16.msrb.mxu3 %v11353_v2  ;;  %v13627_v40 = vld [vmem:[#allocation41 + $0x6a4] sm:$0xf]  ;;  %v12034_v2 = vld [vmem:[#allocation41 + $0x6b0] sm:$0xf0]  ;;  %v7847_v48 = vpop.f32.mrf.mxu0  ;;  %v11929_v21 = vor.u32 %v13602_v32, %v11928_v35 }
0x1012   :  { %v12037_v22 = vor.u32 %v13627_v40, %v12034_v2  ;;  %v13647_v35 = vld [vmem:[#allocation41 + $0x744] sm:$0xf]  ;;  %v12114_v32 = vld [vmem:[#allocation41 + $0x750] sm:$0xf0]  ;;  %v11864_v40 = vld [vmem:[#allocation41 + $0x548] sm:$0xf] }
0x1013   :  { %v13586_v2 = vld [vmem:[#allocation41 + $0x554] sm:$0xf0] }
0x1014   :  { %7972 = vmatpush.bf16.msrb.mxu2 %v11461_v0  ;;  %7985 = vmatpush.bf16.msra.mxu1 %v11589_v1  ;;  %v11912_v0 = vld [vmem:[#allocation41 + $0x5a8] sm:$0xf]  ;;  %v13598_v1 = vld [vmem:[#allocation41 + $0x5b4] sm:$0xf0] }
0x1015   :  { %8102 = vmatpush.bf16.msra.mxu0 %v11209_v47  ;;  %8115 = vmatpush.bf16.msrb.mxu3 %v11337_v12  ;;  %v11785_v47 = vor.u32 %v13566_v53, %v11784_v34  ;;  %v11913_v12 = vor.u32 %v13598_v1, %v11912_v0  ;;  %v11865_v0 = vor.u32 %v13586_v2, %v11864_v40  ;;  %v13643_v1 = vld [vmem:[#allocation41 + $0x724] sm:$0xf] }
0x1016   :  { %v13791_v2 = vld [vmem:[#allocation41 + $0xbc4] sm:$0xf] }
0x1018   :  { %7973 = vmatpush.bf16.msrb.mxu2 %v11445_v9  ;;  %7986 = vmatpush.bf16.msra.mxu1 %v11573_v25  ;;  %v7860_v63 = vpop.f32.mrf.mxu3  ;;  %v13619_v9 = vld [vmem:[#allocation41 + $0x664] sm:$0xf]  ;;  %v12002_v25 = vld [vmem:[#allocation41 + $0x670] sm:$0xf0] }
0x1019   :  { %8103 = vmatpush.bf16.msra.mxu0 %v11193_v50  ;;  %8116 = vmatpush.bf16.msrb.mxu3 %v11321_v42  ;;  %v15748_v11 = vpop.f32.mrf.mxu0  ;;  %v11752_v50 = vld [vmem:[#allocation41 + $0x468] sm:$0xf]  ;;  %v13558_v42 = vld [vmem:[#allocation41 + $0x474] sm:$0xf0] }
0x101a   :  { %v11753_v58 = vor.u32 %v13558_v42, %v11752_v50  ;;  %v13578_v50 = vld [vmem:[#allocation41 + $0x514] sm:$0xf0]  ;;  %v12328_v42 = vld [vmem:[#allocation41 + $0x8e8] sm:$0xf] }
0x101b   :  { %7974 = vmatmul.bf16.vlgmr.msrb.gmra.mxu2 %v15710_v43  ;;  %7987 = vmatmul.bf16.vlgmr.msra.gmra.mxu1 %v15712_v14 }
0x101c   :  { %8018 = vmatpush.bf16.msra.mxu2 %v12069_v38  ;;  %8031 = vmatpush.bf16.msrb.mxu1 %v12197_v44  ;;  %v13651_v38 = vld [vmem:[#allocation41 + $0x764] sm:$0xf]  ;;  %v12130_v44 = vld [vmem:[#allocation41 + $0x770] sm:$0xf0] }
0x101d   :  { %8148 = vmatpush.bf16.msrb.mxu0 %v11817_v8  ;;  %8161 = vmatpush.bf16.msra.mxu3 %v11945_v28  ;;  %v12005_v8 = vor.u32 %v13619_v9, %v12002_v25  ;;  %v12133_v28 = vor.u32 %v13651_v38, %v12130_v44  ;;  %v13795_v9 = vld [vmem:[#allocation41 + $0xbe4] sm:$0xf]  ;;  %v12706_v25 = vld [vmem:[#allocation41 + $0xbf0] sm:$0xf0]  ;;  %v11832_v44 = vld [vmem:[#allocation41 + $0x508] sm:$0xf] }
0x101e   :  { %8104 = vmatmul.bf16.vlgmr.msra.gmra.mxu0 %v15684_v5  ;;  %8117 = vmatmul.bf16.vlgmr.msrb.gmra.mxu3 %v15686_v61 }
0x1020   :  { %8019 = vmatpush.bf16.msra.mxu2 %v12053_v36  ;;  %8032 = vmatpush.bf16.msrb.mxu1 %v12181_v45  ;;  %v11736_v36 = vld [vmem:[#allocation41 + $0x448] sm:$0xf]  ;;  %v13554_v45 = vld [vmem:[#allocation41 + $0x454] sm:$0xf0]  ;;  %v15750_v48 = vpop.f32.mrf.mxu3 }
0x1021   :  { %8149 = vmatpush.bf16.msrb.mxu0 %v11801_v59  ;;  %8162 = vmatpush.bf16.msra.mxu3 %v11929_v21  ;;  %v11989_v59 = vor.u32 %v13615_v41, %v11986_v55  ;;  %v12117_v21 = vor.u32 %v13647_v35, %v12114_v32  ;;  %v7899_v34 = vpop.f32.mrf.mxu0  ;;  %v11737_v53 = vor.u32 %v13554_v45, %v11736_v36  ;;  %v13734_v41 = vld [vmem:[#allocation41 + $0x9f4] sm:$0xf0]  ;;  %v13759_v32 = vld [vmem:[#allocation41 + $0xac4] sm:$0xf]  ;;  %v12562_v36 = vld [vmem:[#allocation41 + $0xad0] sm:$0xf0] }
0x1022   :  { %v11833_v35 = vor.u32 %v13578_v50, %v11832_v44  ;;  %v13730_v34 = vld [vmem:[#allocation41 + $0x9d4] sm:$0xf0] }
0x1023   :  { %v13722_v44 = vld [vmem:[#allocation41 + $0x994] sm:$0xf0] }
0x1024   :  { %8020 = vmatpush.bf16.msra.mxu2 %v12037_v22  ;;  %8033 = vmatpush.bf16.msrb.mxu1 %v12165_v24  ;;  %v12098_v22 = vld [vmem:[#allocation41 + $0x730] sm:$0xf0]  ;;  %v11720_v24 = vld [vmem:[#allocation41 + $0x428] sm:$0xf] }
0x1025   :  { %8150 = vmatpush.bf16.msrb.mxu0 %v11785_v47  ;;  %8163 = vmatpush.bf16.msra.mxu3 %v11913_v12  ;;  %v13582_v47 = vld [vmem:[#allocation41 + $0x534] sm:$0xf0]  ;;  %v13607_v12 = vld [vmem:[#allocation41 + $0x604] sm:$0xf]  ;;  %v12101_v13 = vor.u32 %v13643_v1, %v12098_v22  ;;  %v11721_v10 = vor.u32 %v13550_v3, %v11720_v24  ;;  %v12546_v22 = vld [vmem:[#allocation41 + $0xab0] sm:$0xf0]  ;;  %v12441_v3 = vor.u32 %v13730_v34, %v12440_v20 }
0x1026   :  { %v11849_v63 = vor.u32 %v13582_v47, %v11848_v51  ;;  %v11957_v17 = vor.u32 %v13607_v12, %v11954_v27  ;;  %v13755_v1 = vld [vmem:[#allocation41 + $0xaa4] sm:$0xf]  ;;  %v12674_v47 = vld [vmem:[#allocation41 + $0xbb0] sm:$0xf0]  ;;  %v12296_v12 = vld [vmem:[#allocation41 + $0x8a8] sm:$0xf] }
0x1027   :  { %v13787_v51 = vld [vmem:[#allocation41 + $0xba4] sm:$0xf]  ;;  %v13726_v27 = vld [vmem:[#allocation41 + $0x9b4] sm:$0xf0]  ;;  %v12549_v15 = vor.u32 %v13755_v1, %v12546_v22  ;;  %v12376_v22 = vld [vmem:[#allocation41 + $0x948] sm:$0xf] }
0x1028   :  { %8021 = vmatpush.bf16.msra.mxu2 %v12021_v16  ;;  %8034 = vmatpush.bf16.msrb.mxu1 %v12149_v19  ;;  %v13763_v16 = vld [vmem:[#allocation41 + $0xae4] sm:$0xf]  ;;  %v12578_v19 = vld [vmem:[#allocation41 + $0xaf0] sm:$0xf0]  ;;  %v7912_v38 = vpop.f32.mrf.mxu3  ;;  %v12677_v6 = vor.u32 %v13787_v51, %v12674_v47  ;;  %v13682_v1 = vld [vmem:[#allocation41 + $0x854] sm:$0xf0] }
0x1029   :  { %8151 = vmatpush.bf16.msrb.mxu0 %v11769_v26  ;;  %8164 = vmatpush.bf16.msra.mxu3 %v11897_v33  ;;  %v11704_v26 = vld [vmem:[#allocation41 + $0x408] sm:$0xf]  ;;  %v13546_v33 = vld [vmem:[#allocation41 + $0x414] sm:$0xf0]  ;;  %v12581_v55 = vor.u32 %v13763_v16, %v12578_v19  ;;  %v13775_v34 = vld [vmem:[#allocation41 + $0xb44] sm:$0xf] }
0x102a   :  { %v12408_v38 = vld [vmem:[#allocation41 + $0x988] sm:$0xf] }
0x102c   :  { %8022 = vmatpush.bf16.msra.mxu2 %v12005_v8  ;;  %8035 = vmatpush.bf16.msrb.mxu1 %v12133_v28  ;;  %v13702_v8 = vld [vmem:[#allocation41 + $0x8f4] sm:$0xf0]  ;;  %v12456_v28 = vld [vmem:[#allocation41 + $0x9e8] sm:$0xf] }
0x102d   :  { %8152 = vmatpush.bf16.msrb.mxu0 %v11753_v58  ;;  %8165 = vmatpush.bf16.msra.mxu3 %v11881_v56  ;;  %v12709_v58 = vor.u32 %v13795_v9, %v12706_v25  ;;  %v11705_v56 = vor.u32 %v13546_v33, %v11704_v26  ;;  %v12329_v45 = vor.u32 %v13702_v8, %v12328_v42  ;;  %v13783_v9 = vld [vmem:[#allocation41 + $0xb84] sm:$0xf]  ;;  %v12658_v25 = vld [vmem:[#allocation41 + $0xb90] sm:$0xf0]  ;;  %v12280_v26 = vld [vmem:[#allocation41 + $0x888] sm:$0xf] }
0x102e   :  { %v12457_v40 = vor.u32 %v13734_v41, %v12456_v28  ;;  %v13690_v33 = vld [vmem:[#allocation41 + $0x894] sm:$0xf0]  ;;  %v12514_v8 = vld [vmem:[#allocation41 + $0xa70] sm:$0xf0]  ;;  %v12409_v41 = vor.u32 %v13722_v44, %v12408_v38  ;;  %v13767_v38 = vld [vmem:[#allocation41 + $0xb04] sm:$0xf] }
0x102f   :  { %v12281_v28 = vor.u32 %v13690_v33, %v12280_v26  ;;  %v12466_v33 = vld [vmem:[#allocation41 + $0xa10] sm:$0xf0] }
0x1030   :  { %8023 = vmatpush.bf16.msra.mxu2 %v11989_v59  ;;  %8036 = vmatpush.bf16.msrb.mxu1 %v12117_v21  ;;  %v12690_v59 = vld [vmem:[#allocation41 + $0xbd0] sm:$0xf0]  ;;  %v12312_v21 = vld [vmem:[#allocation41 + $0x8c8] sm:$0xf] }
0x1031   :  { %8153 = vmatpush.bf16.msrb.mxu0 %v11737_v53  ;;  %8166 = vmatpush.bf16.msra.mxu3 %v11865_v0  ;;  %v12565_v53 = vor.u32 %v13759_v32, %v12562_v36  ;;  %v12693_v0 = vor.u32 %v13791_v2, %v12690_v59  ;;  %v12313_v24 = vor.u32 %v13698_v62, %v12312_v21  ;;  %v12392_v32 = vld [vmem:[#allocation41 + $0x968] sm:$0xf]  ;;  %v13718_v36 = vld [vmem:[#allocation41 + $0x974] sm:$0xf0]  ;;  %v13743_v2 = vld [vmem:[#allocation41 + $0xa44] sm:$0xf] }
0x1032   :  { %v12498_v59 = vld [vmem:[#allocation41 + $0xa50] sm:$0xf0]  ;;  %v12393_v62 = vor.u32 %v13718_v36, %v12392_v32  ;;  %v13706_v32 = vld [vmem:[#allocation41 + $0x914] sm:$0xf0]  ;;  %v13444_v36 = vld [vmem:[#allocation41 + $0xec] sm:$0xf] }
0x1033   :  { %v12501_v51 = vor.u32 %v13743_v2, %v12498_v59  ;;  %v12594_v44 = vld [vmem:[#allocation41 + $0xb10] sm:$0xf0]  ;;  %v11306_v2 = vld [vmem:[#allocation41 + $0xf8] sm:$0xf0]  ;;  %v13476_v59 = vld [vmem:[#allocation41 + $0x1ec] sm:$0xf] }
0x1034   :  { %8024 = vmatpush.bf16.msra.mxu2 %v11973_v52  ;;  %8037 = vmatpush.bf16.msrb.mxu1 %v12101_v13  ;;  %v13694_v52 = vld [vmem:[#allocation41 + $0x8b4] sm:$0xf0]  ;;  %v12424_v13 = vld [vmem:[#allocation41 + $0x9a8] sm:$0xf] }
0x1035   :  { %8154 = vmatpush.bf16.msrb.mxu0 %v11721_v10  ;;  %8167 = vmatpush.bf16.msra.mxu3 %v11849_v63  ;;  %v13751_v10 = vld [vmem:[#allocation41 + $0xa84] sm:$0xf]  ;;  %v12530_v63 = vld [vmem:[#allocation41 + $0xa90] sm:$0xf0]  ;;  %v12297_v16 = vor.u32 %v13694_v52, %v12296_v12  ;;  %v12425_v19 = vor.u32 %v13726_v27, %v12424_v13 }
0x1036   :  { %v12533_v42 = vor.u32 %v13751_v10, %v12530_v63  ;;  %v13739_v12 = vld [vmem:[#allocation41 + $0xa24] sm:$0xf]  ;;  %v12482_v52 = vld [vmem:[#allocation41 + $0xa30] sm:$0xf0]  ;;  %v12232_v10 = vld [vmem:[#allocation41 + $0x828] sm:$0xf] }
0x1037   :  { %v13678_v63 = vld [vmem:[#allocation41 + $0x834] sm:$0xf0] }
0x1038   :  { %8025 = vmatpush.bf16.msra.mxu2 %v11957_v17  ;;  %8038 = vmatpush.bf16.msrb.mxu1 %v12085_v54  ;;  %v15756_v50 = vpop.f32.mrf.mxu0  ;;  %v12661_v17 = vor.u32 %v13783_v9, %v12658_v25  ;;  %v13747_v54 = vld [vmem:[#allocation41 + $0xa64] sm:$0xf]  ;;  %v12485_v25 = vor.u32 %v13739_v12, %v12482_v52  ;;  %v13440_v12 = vld [vmem:[#allocation41 + $0xcc] sm:$0xf]  ;;  %v11290_v52 = vld [vmem:[#allocation41 + $0xd8] sm:$0xf0] }
0x1039   :  { %8155 = vmatpush.bf16.msrb.mxu0 %v11705_v56  ;;  %8168 = vmatpush.bf16.msra.mxu3 %v11833_v35  ;;  %v12264_v56 = vld [vmem:[#allocation41 + $0x868] sm:$0xf]  ;;  %v13686_v35 = vld [vmem:[#allocation41 + $0x874] sm:$0xf0]  ;;  %v13735_v9 = vld [vmem:[#allocation41 + $0xa04] sm:$0xf] }
0x103a   :  { %v12265_v21 = vor.u32 %v13686_v35, %v12264_v56  ;;  %v13674_v56 = vld [vmem:[#allocation41 + $0x814] sm:$0xf0]  ;;  %v12344_v35 = vld [vmem:[#allocation41 + $0x908] sm:$0xf] }
0x103b   :  { %8026 = vmatmul.bf16.vlgmr.msra.gmra.mxu2 %v15722_v46  ;;  %8039 = vmatmul.bf16.vlgmr.msrb.gmra.mxu1 %v15724_v49 }
0x103c   :  { %8070 = vmatpush.bf16.msrb.mxu2 %v12581_v55  ;;  %8083 = vmatpush.bf16.msra.mxu1 %v12709_v58  ;;  %v13779_v55 = vld [vmem:[#allocation41 + $0xb64] sm:$0xf]  ;;  %v12642_v58 = vld [vmem:[#allocation41 + $0xb70] sm:$0xf0] }
0x103d   :  { %8200 = vmatpush.bf16.msra.mxu0 %v12329_v45  ;;  %8213 = vmatpush.bf16.msrb.mxu3 %v12457_v40  ;;  %v12517_v45 = vor.u32 %v13747_v54, %v12514_v8  ;;  %v12645_v40 = vor.u32 %v13779_v55, %v12642_v58  ;;  %v11560_v8 = vld [vmem:[#allocation41 + $0x2e8] sm:$0xf]  ;;  %v13542_v55 = vld [vmem:[#allocation41 + $0x3f4] sm:$0xf0] }
0x103e   :  { %8156 = vmatmul.bf16.vlgmr.msrb.gmra.mxu0 %v15694_v39  ;;  %8169 = vmatmul.bf16.vlgmr.msra.gmra.mxu3 %v15696_v30  ;;  %v15758_v20 = vpop.f32.mrf.mxu3  ;;  %v12216_v58 = vld [vmem:[#allocation41 + $0x808] sm:$0xf] }
0x1040   :  { %8071 = vmatpush.bf16.msrb.mxu2 %v12565_v53  ;;  %8084 = vmatpush.bf16.msra.mxu1 %v12693_v0  ;;  %v12626_v53 = vld [vmem:[#allocation41 + $0xb50] sm:$0xf0]  ;;  %v12248_v0 = vld [vmem:[#allocation41 + $0x848] sm:$0xf] }
0x1041   :  { %8201 = vmatpush.bf16.msra.mxu0 %v12313_v24  ;;  %8214 = vmatpush.bf16.msrb.mxu3 %v12441_v3  ;;  %v13714_v24 = vld [vmem:[#allocation41 + $0x954] sm:$0xf0]  ;;  %v7951_v3 = vpop.f32.mrf.mxu0  ;;  %v12629_v47 = vor.u32 %v13775_v34, %v12626_v53  ;;  %v12249_v13 = vor.u32 %v13682_v1, %v12248_v0  ;;  %v12217_v53 = vor.u32 %v13674_v56, %v12216_v58  ;;  %v11544_v1 = vld [vmem:[#allocation41 + $0x2c8] sm:$0xf] }
0x1042   :  { %v12377_v27 = vor.u32 %v13714_v24, %v12376_v22  ;;  %v12345_v0 = vor.u32 %v13706_v32, %v12344_v35  ;;  %v13506_v22 = vld [vmem:[#allocation41 + $0x2d4] sm:$0xf0]  ;;  %v11309_v24 = vor.u32 %v13444_v36, %v11306_v2  ;;  %v11640_v58 = vld [vmem:[#allocation41 + $0x388] sm:$0xf]  ;;  %v13432_v35 = vld [vmem:[#allocation41 + $0x8c] sm:$0xf] }
0x1043   :  { %v13530_v56 = vld [vmem:[#allocation41 + $0x394] sm:$0xf0]  ;;  %v11258_v32 = vld [vmem:[#allocation41 + $0x98] sm:$0xf0]  ;;  %v13464_v36 = vld [vmem:[#allocation41 + $0x18c] sm:$0xf] }
0x1044   :  { %8072 = vmatpush.bf16.msrb.mxu2 %v12549_v15  ;;  %8085 = vmatpush.bf16.msra.mxu1 %v12677_v6  ;;  %v13771_v15 = vld [vmem:[#allocation41 + $0xb24] sm:$0xf]  ;;  %v12610_v6 = vld [vmem:[#allocation41 + $0xb30] sm:$0xf0] }
0x1045   :  { %8202 = vmatpush.bf16.msra.mxu0 %v12297_v16  ;;  %8215 = vmatpush.bf16.msrb.mxu3 %v12425_v19  ;;  %v12360_v16 = vld [vmem:[#allocation41 + $0x928] sm:$0xf]  ;;  %v13710_v19 = vld [vmem:[#allocation41 + $0x934] sm:$0xf0]  ;;  %v12613_v26 = vor.u32 %v13771_v15, %v12610_v6  ;;  %v11545_v15 = vor.u32 %v13506_v22, %v11544_v1 }
0x1046   :  { %v7964_v54 = vpop.f32.mrf.mxu3  ;;  %v11624_v1 = vld [vmem:[#allocation41 + $0x368] sm:$0xf]  ;;  %v13526_v22 = vld [vmem:[#allocation41 + $0x374] sm:$0xf0] }
0x1048   :  { %8073 = vmatpush.bf16.msrb.mxu2 %v12533_v42  ;;  %8086 = vmatpush.bf16.msra.mxu1 %v12661_v17  ;;  %v12233_v42 = vor.u32 %v13678_v63, %v12232_v10  ;;  %v12361_v17 = vor.u32 %v13710_v19, %v12360_v16  ;;  %v11528_v10 = vld [vmem:[#allocation41 + $0x2a8] sm:$0xf]  ;;  %v13502_v63 = vld [vmem:[#allocation41 + $0x2b4] sm:$0xf0]  ;;  %v11293_v16 = vor.u32 %v13440_v12, %v11290_v52  ;;  %v11370_v12 = vld [vmem:[#allocation41 + $0x178] sm:$0xf0] }
0x1049   :  { %8203 = vmatpush.bf16.msra.mxu0 %v12281_v28  ;;  %8216 = vmatpush.bf16.msrb.mxu3 %v12409_v41  ;;  %v13510_v28 = vld [vmem:[#allocation41 + $0x2f4] sm:$0xf0]  ;;  %v11688_v41 = vld [vmem:[#allocation41 + $0x3e8] sm:$0xf] }
0x104a   :  { %v11689_v34 = vor.u32 %v13542_v55, %v11688_v41 }
0x104c   :  { %8074 = vmatpush.bf16.msrb.mxu2 %v12517_v45  ;;  %8087 = vmatpush.bf16.msra.mxu1 %v12645_v40  ;;  %v12469_v45 = vor.u32 %v13735_v9, %v12466_v33  ;;  %v12597_v40 = vor.u32 %v13767_v38, %v12594_v44  ;;  %v11656_v9 = vld [vmem:[#allocation41 + $0x3a8] sm:$0xf]  ;;  %v11274_v33 = vld [vmem:[#allocation41 + $0xb8] sm:$0xf0]  ;;  %v13468_v38 = vld [vmem:[#allocation41 + $0x1ac] sm:$0xf] }
0x104d   :  { %8204 = vmatpush.bf16.msra.mxu0 %v12265_v21  ;;  %8217 = vmatpush.bf16.msrb.mxu3 %v12393_v62  ;;  %v11434_v21 = vld [vmem:[#allocation41 + $0x1f8] sm:$0xf0]  ;;  %v11561_v62 = vor.u32 %v13510_v28, %v11560_v8  ;;  %v11512_v8 = vld [vmem:[#allocation41 + $0x288] sm:$0xf]  ;;  %v13498_v28 = vld [vmem:[#allocation41 + $0x294] sm:$0xf0] }
0x104e   :  { %v11437_v3 = vor.u32 %v13476_v59, %v11434_v21  ;;  %v11402_v44 = vld [vmem:[#allocation41 + $0x1b8] sm:$0xf0]  ;;  %v11513_v2 = vor.u32 %v13498_v28, %v11512_v8  ;;  %v11641_v59 = vor.u32 %v13530_v56, %v11640_v58  ;;  %v11496_v21 = vld [vmem:[#allocation41 + $0x268] sm:$0xf]  ;;  %v13486_v8 = vld [vmem:[#allocation41 + $0x234] sm:$0xf0] }
0x104f   :  { %v11405_v55 = vor.u32 %v13468_v38, %v11402_v44  ;;  %v11354_v38 = vld [vmem:[#allocation41 + $0x158] sm:$0xf0]  ;;  %v11592_v58 = vld [vmem:[#allocation41 + $0x328] sm:$0xf]  ;;  %v13518_v56 = vld [vmem:[#allocation41 + $0x334] sm:$0xf0] }
0x1050   :  { %8075 = vmatpush.bf16.msrb.mxu2 %v12501_v51  ;;  %8088 = vmatpush.bf16.msra.mxu1 %v12629_v47  ;;  %v11672_v51 = vld [vmem:[#allocation41 + $0x3c8] sm:$0xf]  ;;  %v13538_v47 = vld [vmem:[#allocation41 + $0x3d4] sm:$0xf0] }
0x1051   :  { %8205 = vmatpush.bf16.msra.mxu0 %v12249_v13  ;;  %8218 = vmatpush.bf16.msrb.mxu3 %v12377_v27  ;;  %v13472_v13 = vld [vmem:[#allocation41 + $0x1cc] sm:$0xf]  ;;  %v11418_v27 = vld [vmem:[#allocation41 + $0x1d8] sm:$0xf0]  ;;  %v11673_v6 = vor.u32 %v13538_v47, %v11672_v51 }
0x1052   :  { %v11421_v19 = vor.u32 %v13472_v13, %v11418_v27  ;;  %v11242_v51 = vld [vmem:[#allocation41 + $0x78] sm:$0xf0]  ;;  %v13460_v47 = vld [vmem:[#allocation41 + $0x16c] sm:$0xf] }
0x1054   :  { %8076 = vmatpush.bf16.msrb.mxu2 %v12485_v25  ;;  %8089 = vmatpush.bf16.msra.mxu1 %v12613_v26  ;;  %v13534_v25 = vld [vmem:[#allocation41 + $0x3b4] sm:$0xf0]  ;;  %v13436_v26 = vld [vmem:[#allocation41 + $0xac] sm:$0xf] }
0x1055   :  { %8206 = vmatpush.bf16.msra.mxu0 %v12233_v42  ;;  %8219 = vmatpush.bf16.msrb.mxu3 %v12361_v17  ;;  %v11529_v17 = vor.u32 %v13502_v63, %v11528_v10  ;;  %v11657_v54 = vor.u32 %v13534_v25, %v11656_v9  ;;  %v11277_v41 = vor.u32 %v13436_v26, %v11274_v33  ;;  %v13490_v10 = vld [vmem:[#allocation41 + $0x254] sm:$0xf0]  ;;  %v13424_v25 = vld [vmem:[#allocation41 + $0x4c] sm:$0xf] }
0x1056   :  { %v13522_v9 = vld [vmem:[#allocation41 + $0x354] sm:$0xf0]  ;;  %v13456_v33 = vld [vmem:[#allocation41 + $0x14c] sm:$0xf] }
0x1058   :  { %8077 = vmatpush.bf16.msrb.mxu2 %v12469_v45  ;;  %8090 = vmatpush.bf16.msra.mxu1 %v12597_v40  ;;  %v7832_v42 = vpop.f32.mrf.mxu1  ;;  %v11386_v45 = vld [vmem:[#allocation41 + $0x198] sm:$0xf0] }
0x1059   :  { %8207 = vmatpush.bf16.msra.mxu0 %v12217_v53  ;;  %8220 = vmatpush.bf16.msrb.mxu3 %v12345_v0  ;;  %v11389_v53 = vor.u32 %v13464_v36, %v11386_v45  ;;  %v13452_v36 = vld [vmem:[#allocation41 + $0x12c] sm:$0xf]  ;;  %v11338_v45 = vld [vmem:[#allocation41 + $0x138] sm:$0xf0] }
0x105b   :  { %8078 = vmatmul.bf16.vlgmr.msrb.gmra.mxu2 %v15729_v4  ;;  %8091 = vmatmul.bf16.vlgmr.msra.gmra.mxu1 %v15732_v18  ;;  %v15764_v40 = vpop.f32.mrf.mxu0 }
0x105c   :  { %8122 = vmatpush.bf16.msra.mxu2 %v11561_v62  ;;  %8135 = vmatpush.bf16.msrb.mxu1 %v11689_v34  ;;  %v13494_v62 = vld [vmem:[#allocation41 + $0x274] sm:$0xf0]  ;;  %v11261_v34 = vor.u32 %v13432_v35, %v11258_v32  ;;  %v13420_v35 = vld [vmem:[#allocation41 + $0x2c] sm:$0xf]  ;;  %v11210_v32 = vld [vmem:[#allocation41 + $0x38] sm:$0xf0] }
0x105d   :  { %8252 = vmatpush.bf16.msrb.mxu0 %v11309_v24  ;;  %8265 = vmatpush.bf16.msra.mxu3 %v11437_v3  ;;  %v13428_v24 = vld [vmem:[#allocation41 + $0x6c] sm:$0xf]  ;;  %v11497_v27 = vor.u32 %v13494_v62, %v11496_v21  ;;  %v11593_v62 = vor.u32 %v13518_v56, %v11592_v58  ;;  %v12184_v58 = vld [vmem:[#allocation41 + $0x7c8] sm:$0xf]  ;;  %v13666_v56 = vld [vmem:[#allocation41 + $0x7d4] sm:$0xf0] }
0x105e   :  { %8208 = vmatmul.bf16.vlgmr.msra.gmra.mxu0 %v15701_v37  ;;  %8221 = vmatmul.bf16.vlgmr.msrb.gmra.mxu3 %v15704_v60  ;;  %v7819_v0 = vpop.f32.mrf.mxu2  ;;  %v11245_v63 = vor.u32 %v13428_v24, %v11242_v51  ;;  %v11341_v24 = vor.u32 %v13452_v36, %v11338_v45  ;;  %v13638_v51 = vld [vmem:[#allocation41 + $0x6f4] sm:$0xf0]  ;;  %v13600_v36 = vld [vmem:[#allocation41 + $0x5cc] sm:$0xf]  ;;  %v11930_v45 = vld [vmem:[#allocation41 + $0x5d8] sm:$0xf0] }
0x105f   :  { %v7820_v3 = vadd.f32 %v7819_v0, %v15738_v31  ;;  %v11226_v31 = vld [vmem:[#allocation41 + $0x58] sm:$0xf0]  ;;  %v13514_v0 = vld [vmem:[#allocation41 + $0x314] sm:$0xf0] }
0x1060   :  { %8123 = vmatpush.bf16.msra.mxu2 %v11545_v15  ;;  %8136 = vmatpush.bf16.msrb.mxu1 %v11673_v6  ;;  %v7834_v52 = vpop.f32.mrf.mxu1  ;;  %v11625_v15 = vor.u32 %v13526_v22, %v11624_v1  ;;  %v11480_v6 = vld [vmem:[#allocation41 + $0x248] sm:$0xf]  ;;  %v11229_v28 = vor.u32 %v13424_v25, %v11226_v31  ;;  %v11213_v22 = vor.u32 %v13420_v35, %v11210_v32  ;;  %v13568_v35 = vld [vmem:[#allocation41 + $0x4cc] sm:$0xf] }
0x1061   :  { %8253 = vmatpush.bf16.msrb.mxu0 %v11293_v16  ;;  %8266 = vmatpush.bf16.msra.mxu3 %v11421_v19  ;;  %v7833_v13 = vadd.f32 %v7832_v42, %v7820_v3  ;;  %v11373_v16 = vor.u32 %v13460_v47, %v11370_v12  ;;  %v11608_v19 = vld [vmem:[#allocation41 + $0x348] sm:$0xf]  ;;  %v15767_v26 = vpop.f32.mrf.mxu3  ;;  %v11481_v42 = vor.u32 %v13490_v10, %v11480_v6  ;;  %v13670_v52 = vld [vmem:[#allocation41 + $0x7f4] sm:$0xf0]  ;;  %v13448_v6 = vld [vmem:[#allocation41 + $0x10c] sm:$0xf] }
0x1062   :  { %v12072_v3 = vld [vmem:[#allocation41 + $0x6e8] sm:$0xf]  ;;  %v11322_v10 = vld [vmem:[#allocation41 + $0x118] sm:$0xf0] }
0x1063   :  { %v8003_v44 = vpop.f32.mrf.mxu0  ;;  %v7846_v1 = vadd.f32 %v15740_v7, %v7833_v13  ;;  %v12200_v47 = vld [vmem:[#allocation41 + $0x7e8] sm:$0xf]  ;;  %v13604_v7 = vld [vmem:[#allocation41 + $0x5ec] sm:$0xf]  ;;  %v11946_v13 = vld [vmem:[#allocation41 + $0x5f8] sm:$0xf0]  ;;  %v12073_v31 = vor.u32 %v13638_v51, %v12072_v3 }
0x1064   :  { %8124 = vmatpush.bf16.msra.mxu2 %v11529_v17  ;;  %8137 = vmatpush.bf16.msrb.mxu1 %v11657_v54  ;;  %v11609_v17 = vor.u32 %v13522_v9, %v11608_v19  ;;  %v11464_v54 = vld [vmem:[#allocation41 + $0x228] sm:$0xf]  ;;  %v11818_v9 = vld [vmem:[#allocation41 + $0x4f8] sm:$0xf0]  ;;  %v13596_v3 = vld [vmem:[#allocation41 + $0x5ac] sm:$0xf] }
0x1065   :  { %8254 = vmatpush.bf16.msrb.mxu0 %v11277_v41  ;;  %8267 = vmatpush.bf16.msra.mxu3 %v11405_v55  ;;  %v11357_v41 = vor.u32 %v13456_v33, %v11354_v38  ;;  %v11465_v21 = vor.u32 %v13486_v8, %v11464_v54  ;;  %v7859_v25 = vadd.f32 %v15742_v57, %v7846_v1  ;;  %v12056_v54 = vld [vmem:[#allocation41 + $0x6c8] sm:$0xf]  ;;  %v13634_v8 = vld [vmem:[#allocation41 + $0x6d4] sm:$0xf0]  ;;  %v11802_v57 = vld [vmem:[#allocation41 + $0x4d8] sm:$0xf0] }
0x1066   :  { %v7821_v55 = vpop.f32.mrf.mxu2  ;;  %v12201_v33 = vor.u32 %v13670_v52, %v12200_v47  ;;  %v12168_v1 = vld [vmem:[#allocation41 + $0x7a8] sm:$0xf]  ;;  %v11914_v51 = vld [vmem:[#allocation41 + $0x5b8] sm:$0xf0] }
0x1068   :  { %8125 = vmatpush.bf16.msra.mxu2 %v11513_v2  ;;  %8138 = vmatpush.bf16.msrb.mxu1 %v11641_v59  ;;  %v7884_v2 = vpop.f32.mrf.mxu1  ;;  %v11448_v59 = vld [vmem:[#allocation41 + $0x208] sm:$0xf] }
0x1069   :  { %8255 = vmatpush.bf16.msrb.mxu0 %v11261_v34  ;;  %8268 = vmatpush.bf16.msra.mxu3 %v11389_v53  ;;  %v13482_v34 = vld [vmem:[#allocation41 + $0x214] sm:$0xf0]  ;;  %v11576_v53 = vld [vmem:[#allocation41 + $0x308] sm:$0xf]  ;;  %v8016_v12 = vpop.f32.mrf.mxu3 }
0x106a   :  { %v11577_v19 = vor.u32 %v13514_v0, %v11576_v53  ;;  %v11805_v53 = vor.u32 %v13568_v35, %v11802_v57  ;;  %v11933_v0 = vor.u32 %v13600_v36, %v11930_v45  ;;  %v11992_v35 = vld [vmem:[#allocation41 + $0x648] sm:$0xf]  ;;  %v13618_v57 = vld [vmem:[#allocation41 + $0x654] sm:$0xf0] }
0x106c   :  { %8126 = vmatpush.bf16.msra.mxu2 %v11497_v27  ;;  %8139 = vmatpush.bf16.msrb.mxu1 %v11625_v15  ;;  %v13416_v27 = vld [vmem:[#allocation41 + $0xc] sm:$0xf]  ;;  %v11194_v15 = vld [vmem:[#allocation41 + $0x18] sm:$0xf0] }
0x106d   :  { %8256 = vmatpush.bf16.msrb.mxu0 %v11245_v63  ;;  %8269 = vmatpush.bf16.msra.mxu3 %v11373_v16  ;;  %v13572_v63 = vld [vmem:[#allocation41 + $0x4ec] sm:$0xf]  ;;  %v11449_v16 = vor.u32 %v13482_v34, %v11448_v59  ;;  %v11197_v44 = vor.u32 %v13416_v27, %v11194_v15  ;;  %v12057_v59 = vor.u32 %v13634_v8, %v12056_v54  ;;  %v13630_v34 = vld [vmem:[#allocation41 + $0x6b4] sm:$0xf0]  ;;  %v12024_v27 = vld [vmem:[#allocation41 + $0x688] sm:$0xf] }
0x106e   :  { %v7871_v38 = vpop.f32.mrf.mxu2  ;;  %v13626_v15 = vld [vmem:[#allocation41 + $0x694] sm:$0xf0]  ;;  %v13556_v8 = vld [vmem:[#allocation41 + $0x46c] sm:$0xf] }
0x106f   :  { %v13654_v54 = vld [vmem:[#allocation41 + $0x774] sm:$0xf0] }
0x1070   :  { %8127 = vmatpush.bf16.msra.mxu2 %v11481_v42  ;;  %8140 = vmatpush.bf16.msrb.mxu1 %v11609_v17  ;;  %v11325_v42 = vor.u32 %v13448_v6, %v11322_v10  ;;  %v7872_v17 = vadd.f32 %v7871_v38, %v7859_v25  ;;  %v7886_v55 = vpop.f32.mrf.mxu1  ;;  %v11917_v10 = vor.u32 %v13596_v3, %v11914_v51  ;;  %v13622_v38 = vld [vmem:[#allocation41 + $0x674] sm:$0xf0] }
0x1071   :  { %8257 = vmatpush.bf16.msrb.mxu0 %v11229_v28  ;;  %8270 = vmatpush.bf16.msra.mxu3 %v11357_v41  ;;  %v11821_v28 = vor.u32 %v13572_v63, %v11818_v9  ;;  %v11949_v41 = vor.u32 %v13604_v7, %v11946_v13  ;;  %v12152_v63 = vld [vmem:[#allocation41 + $0x788] sm:$0xf]  ;;  %v11770_v9 = vld [vmem:[#allocation41 + $0x498] sm:$0xf0]  ;;  %v13592_v7 = vld [vmem:[#allocation41 + $0x58c] sm:$0xf]  ;;  %v12025_v25 = vor.u32 %v13626_v15, %v12024_v27 }
0x1072   :  { %v15771_v32 = vadd.f32 %v7884_v2, %v7872_v17  ;;  %v11786_v2 = vld [vmem:[#allocation41 + $0x4b8] sm:$0xf0]  ;;  %v12136_v17 = vld [vmem:[#allocation41 + $0x768] sm:$0xf]  ;;  %v11993_v3 = vor.u32 %v13618_v57, %v11992_v35  ;;  %v13700_v57 = vld [vmem:[#allocation41 + $0x8ec] sm:$0xf] }
0x1073   :  { %v11898_v13 = vld [vmem:[#allocation41 + $0x598] sm:$0xf0]  ;;  %v12104_v15 = vld [vmem:[#allocation41 + $0x728] sm:$0xf] }
0x1074   :  { %8128 = vmatpush.bf16.msra.mxu2 %v11465_v21  ;;  %8141 = vmatpush.bf16.msrb.mxu1 %v11593_v62  ;;  %v12185_v21 = vor.u32 %v13666_v56, %v12184_v58  ;;  %v12040_v62 = vld [vmem:[#allocation41 + $0x6a8] sm:$0xf]  ;;  %v11882_v55 = vld [vmem:[#allocation41 + $0x578] sm:$0xf0]  ;;  %v12137_v56 = vor.u32 %v13654_v54, %v12136_v17  ;;  %v13766_v54 = vld [vmem:[#allocation41 + $0xaf4] sm:$0xf0] }
0x1075   :  { %8258 = vmatpush.bf16.msrb.mxu0 %v11213_v22  ;;  %8271 = vmatpush.bf16.msra.mxu3 %v11341_v24  ;;  %v13662_v22 = vld [vmem:[#allocation41 + $0x7b4] sm:$0xf0]  ;;  %v13564_v24 = vld [vmem:[#allocation41 + $0x4ac] sm:$0xf]  ;;  %v12041_v12 = vor.u32 %v13630_v34, %v12040_v62  ;;  %v12584_v17 = vld [vmem:[#allocation41 + $0xae8] sm:$0xf] }
0x1076   :  { %v7873_v47 = vpop.f32.mrf.mxu2  ;;  %v12169_v52 = vor.u32 %v13662_v22, %v12168_v1  ;;  %v11789_v6 = vor.u32 %v13564_v24, %v11786_v2  ;;  %v13650_v62 = vld [vmem:[#allocation41 + $0x754] sm:$0xf0]  ;;  %v13552_v34 = vld [vmem:[#allocation41 + $0x44c] sm:$0xf]  ;;  %v11866_v22 = vld [vmem:[#allocation41 + $0x558] sm:$0xf0] }
0x1077   :  { %v13584_v1 = vld [vmem:[#allocation41 + $0x54c] sm:$0xf]  ;;  %v11976_v47 = vld [vmem:[#allocation41 + $0x628] sm:$0xf]  ;;  %v11834_v35 = vld [vmem:[#allocation41 + $0x518] sm:$0xf0] }
0x1078   :  { %8129 = vmatpush.bf16.msra.mxu2 %v11449_v16  ;;  %8142 = vmatpush.bf16.msrb.mxu1 %v11577_v19  ;;  %v13658_v16 = vld [vmem:[#allocation41 + $0x794] sm:$0xf0]  ;;  %v13560_v19 = vld [vmem:[#allocation41 + $0x48c] sm:$0xf]  ;;  %v11869_v27 = vor.u32 %v13584_v1, %v11866_v22 }
0x1079   :  { %8259 = vmatpush.bf16.msrb.mxu0 %v11197_v44  ;;  %8272 = vmatpush.bf16.msra.mxu3 %v11325_v42  ;;  %v11773_v44 = vor.u32 %v13560_v19, %v11770_v9  ;;  %v11901_v42 = vor.u32 %v13592_v7, %v11898_v13  ;;  %v11850_v19 = vld [vmem:[#allocation41 + $0x538] sm:$0xf0]  ;;  %v11960_v9 = vld [vmem:[#allocation41 + $0x608] sm:$0xf] }
0x107b   :  { %8130 = vmatmul.bf16.vlgmr.msra.gmra.mxu2 %v15710_v43  ;;  %8143 = vmatmul.bf16.vlgmr.msrb.gmra.mxu1 %v15712_v14 }
0x107c   :  { %8174 = vmatpush.bf16.msrb.mxu2 %v12073_v31  ;;  %8187 = vmatpush.bf16.msra.mxu1 %v12201_v33  ;;  %v12153_v31 = vor.u32 %v13658_v16, %v12152_v63  ;;  %v12008_v33 = vld [vmem:[#allocation41 + $0x668] sm:$0xf]  ;;  %v11722_v63 = vld [vmem:[#allocation41 + $0x438] sm:$0xf0]  ;;  %v13580_v16 = vld [vmem:[#allocation41 + $0x52c] sm:$0xf] }
0x107d   :  { %8304 = vmatpush.bf16.msra.mxu0 %v11821_v28  ;;  %8317 = vmatpush.bf16.msrb.mxu3 %v11949_v41  ;;  %v11754_v28 = vld [vmem:[#allocation41 + $0x478] sm:$0xf0]  ;;  %v13588_v41 = vld [vmem:[#allocation41 + $0x56c] sm:$0xf]  ;;  %v12009_v58 = vor.u32 %v13622_v38, %v12008_v33  ;;  %v13642_v33 = vld [vmem:[#allocation41 + $0x714] sm:$0xf0] }
0x107e   :  { %8260 = vmatmul.bf16.vlgmr.msrb.gmra.mxu0 %v15684_v5  ;;  %8273 = vmatmul.bf16.vlgmr.msra.gmra.mxu3 %v15686_v61  ;;  %v15777_v5 = vpop.f32.mrf.mxu1  ;;  %v15779_v61 = vpop.f32.mrf.mxu0  ;;  %v11757_v36 = vor.u32 %v13556_v8, %v11754_v28  ;;  %v11885_v45 = vor.u32 %v13588_v41, %v11882_v55  ;;  %v12712_v8 = vld [vmem:[#allocation41 + $0xbe8] sm:$0xf]  ;;  %v13798_v41 = vld [vmem:[#allocation41 + $0xbf4] sm:$0xf0]  ;;  %v13544_v55 = vld [vmem:[#allocation41 + $0x40c] sm:$0xf] }
0x107f   :  { %v12713_v1 = vor.u32 %v13798_v41, %v12712_v8  ;;  %v12536_v41 = vld [vmem:[#allocation41 + $0xa88] sm:$0xf] }
0x1080   :  { %8175 = vmatpush.bf16.msrb.mxu2 %v12057_v59  ;;  %8188 = vmatpush.bf16.msra.mxu1 %v12185_v21  ;;  %v15781_v59 = vpop.f32.mrf.mxu2  ;;  %v12120_v21 = vld [vmem:[#allocation41 + $0x748] sm:$0xf] }
0x1081   :  { %8305 = vmatpush.bf16.msra.mxu0 %v11805_v53  ;;  %8318 = vmatpush.bf16.msrb.mxu3 %v11933_v0  ;;  %v15783_v53 = vpop.f32.mrf.mxu3  ;;  %v11738_v0 = vld [vmem:[#allocation41 + $0x458] sm:$0xf0]  ;;  %v12121_v51 = vor.u32 %v13650_v62, %v12120_v21  ;;  %v13732_v62 = vld [vmem:[#allocation41 + $0x9ec] sm:$0xf] }
0x1082   :  { %v12330_v21 = vld [vmem:[#allocation41 + $0x8f8] sm:$0xf0] }
0x1084   :  { %8176 = vmatpush.bf16.msrb.mxu2 %v12041_v12  ;;  %8189 = vmatpush.bf16.msra.mxu1 %v12169_v52  ;;  %v13614_v12 = vld [vmem:[#allocation41 + $0x634] sm:$0xf0]  ;;  %v11741_v52 = vor.u32 %v13552_v34, %v11738_v0  ;;  %v12458_v34 = vld [vmem:[#allocation41 + $0x9f8] sm:$0xf0]  ;;  %v12585_v0 = vor.u32 %v13766_v54, %v12584_v17  ;;  %v15789_v17 = vld [vmem:[#allocation43] sm:$0xf] }
0x1085   :  { %8306 = vmatpush.bf16.msra.mxu0 %v11789_v6  ;;  %8319 = vmatpush.bf16.msrb.mxu3 %v11917_v10  ;;  %v13646_v6 = vld [vmem:[#allocation41 + $0x734] sm:$0xf0]  ;;  %v13548_v10 = vld [vmem:[#allocation41 + $0x42c] sm:$0xf]  ;;  %v11977_v7 = vor.u32 %v13614_v12, %v11976_v47  ;;  %v12461_v47 = vor.u32 %v13732_v62, %v12458_v34  ;;  %v12696_v12 = vld [vmem:[#allocation41 + $0xbc8] sm:$0xf] }
0x1086   :  { %v7938_v24 = vpop.f32.mrf.mxu1  ;;  %v8055_v2 = vpop.f32.mrf.mxu0  ;;  %v12105_v13 = vor.u32 %v13646_v6, %v12104_v15  ;;  %v11725_v38 = vor.u32 %v13548_v10, %v11722_v63  ;;  %v12314_v15 = vld [vmem:[#allocation41 + $0x8d8] sm:$0xf0]  ;;  %v13728_v6 = vld [vmem:[#allocation41 + $0x9cc] sm:$0xf]  ;;  %v5857_v54 = vperm.slane %v15789_v17, 1  ;;  %v5858_v62 = vperm.slane %v15789_v17, 2 }
0x1087   :  { %v12568_v2 = vld [vmem:[#allocation41 + $0xac8] sm:$0xf]  ;;  %v12442_v10 = vld [vmem:[#allocation41 + $0x9d8] sm:$0xf0] }
0x1088   :  { %8177 = vmatpush.bf16.msrb.mxu2 %v12025_v25  ;;  %8190 = vmatpush.bf16.msra.mxu1 %v12153_v31  ;;  %v13610_v25 = vld [vmem:[#allocation41 + $0x614] sm:$0xf0]  ;;  %v12088_v31 = vld [vmem:[#allocation41 + $0x708] sm:$0xf] }
0x1089   :  { %8307 = vmatpush.bf16.msra.mxu0 %v11773_v44  ;;  %8320 = vmatpush.bf16.msrb.mxu3 %v11901_v42  ;;  %v11853_v44 = vor.u32 %v13580_v16, %v11850_v19  ;;  %v7925_v42 = vpop.f32.mrf.mxu2  ;;  %v8068_v28 = vpop.f32.mrf.mxu3  ;;  %v12552_v19 = vld [vmem:[#allocation41 + $0xaa8] sm:$0xf] }
0x108a   :  { %v12426_v42 = vld [vmem:[#allocation41 + $0x9b8] sm:$0xf0] }
0x108c   :  { %8178 = vmatpush.bf16.msrb.mxu2 %v12009_v58  ;;  %8191 = vmatpush.bf16.msra.mxu1 %v12137_v56  ;;  %v11706_v58 = vld [vmem:[#allocation41 + $0x418] sm:$0xf0]  ;;  %v13576_v56 = vld [vmem:[#allocation41 + $0x50c] sm:$0xf] }
0x108d   :  { %8308 = vmatpush.bf16.msra.mxu0 %v11757_v36  ;;  %8321 = vmatpush.bf16.msrb.mxu3 %v11885_v45  ;;  %v11961_v36 = vor.u32 %v13610_v25, %v11960_v9  ;;  %v12089_v45 = vor.u32 %v13642_v33, %v12088_v31  ;;  %v11709_v22 = vor.u32 %v13544_v55, %v11706_v58  ;;  %v13758_v9 = vld [vmem:[#allocation41 + $0xab4] sm:$0xf0]  ;;  %v12680_v25 = vld [vmem:[#allocation41 + $0xba8] sm:$0xf]  ;;  %v13692_v33 = vld [vmem:[#allocation41 + $0x8ac] sm:$0xf] }
0x108e   :  { %v11837_v24 = vor.u32 %v13576_v56, %v11834_v35  ;;  %v13790_v31 = vld [vmem:[#allocation41 + $0xbb4] sm:$0xf0]  ;;  %v12553_v8 = vor.u32 %v13758_v9, %v12552_v19  ;;  %v12664_v35 = vld [vmem:[#allocation41 + $0xb88] sm:$0xf] }
0x108f   :  { %v12681_v28 = vor.u32 %v13790_v31, %v12680_v25  ;;  %v13754_v55 = vld [vmem:[#allocation41 + $0xa94] sm:$0xf0]  ;;  %v12504_v19 = vld [vmem:[#allocation41 + $0xa48] sm:$0xf] }
0x1090   :  { %8179 = vmatpush.bf16.msrb.mxu2 %v11993_v3  ;;  %8192 = vmatpush.bf16.msra.mxu1 %v12121_v51  ;;  %v13762_v3 = vld [vmem:[#allocation41 + $0xad4] sm:$0xf0]  ;;  %v12333_v51 = vor.u32 %v13700_v57, %v12330_v21 }
0x1091   :  { %8309 = vmatpush.bf16.msra.mxu0 %v11741_v52  ;;  %8322 = vmatpush.bf16.msrb.mxu3 %v11869_v27  ;;  %v13794_v52 = vld [vmem:[#allocation41 + $0xbd4] sm:$0xf0]  ;;  %v13696_v27 = vld [vmem:[#allocation41 + $0x8cc] sm:$0xf]  ;;  %v12569_v63 = vor.u32 %v13762_v3, %v12568_v2 }
0x1092   :  { %v12697_v16 = vor.u32 %v13794_v52, %v12696_v12  ;;  %v13786_v57 = vld [vmem:[#allocation41 + $0xb94] sm:$0xf0]  ;;  %v13684_v12 = vld [vmem:[#allocation41 + $0x86c] sm:$0xf]  ;;  %v7950_v52 = vadd.f32 %v15756_v50, %v5857_v54  ;;  %v12250_v54 = vld [vmem:[#allocation41 + $0x858] sm:$0xf0] }
0x1093   :  { %v13746_v9 = vld [vmem:[#allocation41 + $0xa54] sm:$0xf0]  ;;  %v13680_v50 = vld [vmem:[#allocation41 + $0x84c] sm:$0xf] }
0x1094   :  { %8180 = vmatpush.bf16.msrb.mxu2 %v11977_v7  ;;  %8193 = vmatpush.bf16.msra.mxu1 %v12105_v13  ;;  %v12317_v7 = vor.u32 %v13696_v27, %v12314_v15  ;;  %v12445_v13 = vor.u32 %v13728_v6, %v12442_v10  ;;  %v12266_v27 = vld [vmem:[#allocation41 + $0x878] sm:$0xf0]  ;;  %v13716_v15 = vld [vmem:[#allocation41 + $0x96c] sm:$0xf]  ;;  %v7963_v10 = vadd.f32 %v15758_v20, %v7950_v52 }
0x1095   :  { %8310 = vmatpush.bf16.msra.mxu0 %v11725_v38  ;;  %8323 = vmatpush.bf16.msrb.mxu3 %v11853_v44  ;;  %v12298_v38 = vld [vmem:[#allocation41 + $0x8b8] sm:$0xf0]  ;;  %v13724_v44 = vld [vmem:[#allocation41 + $0x9ac] sm:$0xf]  ;;  %v12269_v25 = vor.u32 %v13684_v12, %v12266_v27 }
0x1096   :  { %v12301_v58 = vor.u32 %v13692_v33, %v12298_v38  ;;  %v12429_v56 = vor.u32 %v13724_v44, %v12426_v42  ;;  %v12394_v6 = vld [vmem:[#allocation41 + $0x978] sm:$0xf0]  ;;  %v12632_v33 = vld [vmem:[#allocation41 + $0xb48] sm:$0xf]  ;;  %v13778_v38 = vld [vmem:[#allocation41 + $0xb54] sm:$0xf0] }
0x1097   :  { %v12397_v31 = vor.u32 %v13716_v15, %v12394_v6  ;;  %v13712_v20 = vld [vmem:[#allocation41 + $0x94c] sm:$0xf]  ;;  %v11562_v6 = vld [vmem:[#allocation41 + $0x2f8] sm:$0xf0] }
0x1098   :  { %8181 = vmatpush.bf16.msrb.mxu2 %v11961_v36  ;;  %8194 = vmatpush.bf16.msra.mxu1 %v12089_v45  ;;  %v13688_v36 = vld [vmem:[#allocation41 + $0x88c] sm:$0xf]  ;;  %v15792_v21 = vpop.f32.mrf.mxu1 }
0x1099   :  { %8311 = vmatpush.bf16.msra.mxu0 %v11709_v22  ;;  %8324 = vmatpush.bf16.msrb.mxu3 %v11837_v24  ;;  %v13720_v45 = vld [vmem:[#allocation41 + $0x98c] sm:$0xf]  ;;  %v12520_v22 = vld [vmem:[#allocation41 + $0xa68] sm:$0xf]  ;;  %v13750_v24 = vld [vmem:[#allocation41 + $0xa74] sm:$0xf0] }
0x109a   :  { %v13508_v15 = vld [vmem:[#allocation41 + $0x2ec] sm:$0xf] }
0x109b   :  { %8182 = vmatmul.bf16.vlgmr.msrb.gmra.mxu2 %v15722_v46  ;;  %8195 = vmatmul.bf16.vlgmr.msra.gmra.mxu1 %v15724_v49  ;;  %v8105_v34 = vpop.f32.mrf.mxu0 }
0x109c   :  { %8226 = vmatpush.bf16.msra.mxu2 %v12585_v0  ;;  %8239 = vmatpush.bf16.msrb.mxu1 %v12713_v1  ;;  %v12537_v0 = vor.u32 %v13754_v55, %v12536_v41  ;;  %v12665_v1 = vor.u32 %v13786_v57, %v12664_v35  ;;  %v12488_v35 = vld [vmem:[#allocation41 + $0xa28] sm:$0xf]  ;;  %v13742_v57 = vld [vmem:[#allocation41 + $0xa34] sm:$0xf0] }
0x109d   :  { %8356 = vmatpush.bf16.msrb.mxu0 %v12333_v51  ;;  %8369 = vmatpush.bf16.msra.mxu3 %v12461_v47  ;;  %v12648_v51 = vld [vmem:[#allocation41 + $0xb68] sm:$0xf]  ;;  %v13782_v47 = vld [vmem:[#allocation41 + $0xb74] sm:$0xf0] }
0x109e   :  { %8312 = vmatmul.bf16.vlgmr.msra.gmra.mxu0 %v15694_v39  ;;  %8325 = vmatmul.bf16.vlgmr.msrb.gmra.mxu3 %v15696_v30  ;;  %v12282_v39 = vld [vmem:[#allocation41 + $0x898] sm:$0xf0] }
0x109f   :  { %v12410_v30 = vld [vmem:[#allocation41 + $0x998] sm:$0xf0]  ;;  %v12285_v2 = vor.u32 %v13688_v36, %v12282_v39  ;;  %v12253_v36 = vor.u32 %v13680_v50, %v12250_v54  ;;  %v12960_v50 = vld [vmem:[#allocation44 + $0x1e0] sm:$0xf]  ;;  %v11565_v54 = vor.u32 %v13508_v15, %v11562_v6 }
0x10a0   :  { %8227 = vmatpush.bf16.msra.mxu2 %v12569_v63  ;;  %8240 = vmatpush.bf16.msrb.mxu1 %v12697_v16  ;;  %v12413_v3 = vor.u32 %v13720_v45, %v12410_v30  ;;  %v12521_v63 = vor.u32 %v13750_v24, %v12520_v22  ;;  %v12649_v16 = vor.u32 %v13782_v47, %v12648_v51  ;;  %v7990_v41 = vpop.f32.mrf.mxu1  ;;  %v12616_v45 = vld [vmem:[#allocation41 + $0xb28] sm:$0xf]  ;;  %v13774_v30 = vld [vmem:[#allocation41 + $0xb34] sm:$0xf0] }
0x10a1   :  { %8357 = vmatpush.bf16.msrb.mxu0 %v12317_v7  ;;  %8370 = vmatpush.bf16.msra.mxu3 %v12445_v13  ;;  %v8106_v7 = vadd.f32 %v8105_v34, %v5858_v62  ;;  %v7975_v13 = vpop.f32.mrf.mxu2  ;;  %v8118_v42 = vpop.f32.mrf.mxu3  ;;  %v13676_v62 = vld [vmem:[#allocation41 + $0x82c] sm:$0xf]  ;;  %v12234_v34 = vld [vmem:[#allocation41 + $0x838] sm:$0xf0]  ;;  %v12472_v22 = vld [vmem:[#allocation41 + $0xa08] sm:$0xf]  ;;  %v12489_v24 = vor.u32 %v13742_v57, %v12488_v35 }
0x10a2   :  { %v15797_v44 = vadd.f32 %v7975_v13, %v7963_v10  ;;  %v12600_v51 = vld [vmem:[#allocation41 + $0xb08] sm:$0xf]  ;;  %v13770_v47 = vld [vmem:[#allocation41 + $0xb14] sm:$0xf0]  ;;  %v12237_v52 = vor.u32 %v13676_v62, %v12234_v34  ;;  %v13540_v10 = vld [vmem:[#allocation41 + $0x3ec] sm:$0xf] }
0x10a3   :  { %v8107_v55 = vpop.f32.mrf.mxu0  ;;  %v12346_v13 = vld [vmem:[#allocation41 + $0x918] sm:$0xf0]  ;;  %v13536_v57 = vld [vmem:[#allocation41 + $0x3cc] sm:$0xf]  ;;  %v13857_v62 = vld [vmem:[#allocation44 + $0x1cc] sm:$0xf0] }
0x10a4   :  { %8228 = vmatpush.bf16.msra.mxu2 %v12553_v8  ;;  %8241 = vmatpush.bf16.msrb.mxu1 %v12681_v28  ;;  %v12378_v8 = vld [vmem:[#allocation41 + $0x958] sm:$0xf0]  ;;  %v15799_v28 = vadd.f32 %v8118_v42, %v8106_v7  ;;  %v13704_v7 = vld [vmem:[#allocation41 + $0x90c] sm:$0xf]  ;;  %v13861_v42 = vld [vmem:[#allocation44 + $0x1ec] sm:$0xf0]  ;;  %v7989_v15 = vadd.f32 %v15792_v21, %v15797_v44 }
0x10a5   :  { %8358 = vmatpush.bf16.msrb.mxu0 %v12301_v58  ;;  %8371 = vmatpush.bf16.msra.mxu3 %v12429_v56  ;;  %v12505_v58 = vor.u32 %v13746_v9, %v12504_v19  ;;  %v12633_v56 = vor.u32 %v13778_v38, %v12632_v33  ;;  %v12381_v39 = vor.u32 %v13712_v20, %v12378_v8  ;;  %v13672_v19 = vld [vmem:[#allocation41 + $0x80c] sm:$0xf]  ;;  %v12218_v9 = vld [vmem:[#allocation41 + $0x818] sm:$0xf0]  ;;  %v13829_v38 = vld [vmem:[#allocation44 + $0xec] sm:$0xf0] }
0x10a6   :  { %v12601_v33 = vor.u32 %v13770_v47, %v12600_v51  ;;  %v12221_v8 = vor.u32 %v13672_v19, %v12218_v9  ;;  %v12349_v41 = vor.u32 %v13704_v7, %v12346_v13  ;;  %v13504_v55 = vld [vmem:[#allocation41 + $0x2cc] sm:$0xf]  ;;  %v12961_v35 = vor.u32 %v13861_v42, %v12960_v50  ;;  %v11658_v51 = vld [vmem:[#allocation41 + $0x3b8] sm:$0xf0]  ;;  %v12800_v47 = vld [vmem:[#allocation44 + $0xa0] sm:$0xf] }
0x10a7   :  { %v13528_v7 = vld [vmem:[#allocation41 + $0x38c] sm:$0xf]  ;;  %v11642_v13 = vld [vmem:[#allocation41 + $0x398] sm:$0xf0] }
0x10a8   :  { %8229 = vmatpush.bf16.msra.mxu2 %v12537_v0  ;;  %8242 = vmatpush.bf16.msrb.mxu1 %v12665_v1  ;;  %v13708_v0 = vld [vmem:[#allocation41 + $0x92c] sm:$0xf]  ;;  %v12362_v1 = vld [vmem:[#allocation41 + $0x938] sm:$0xf0]  ;;  %v11645_v50 = vor.u32 %v13528_v7, %v11642_v13  ;;  %v12736_v13 = vld [vmem:[#allocation44 + $0x20] sm:$0xf] }
0x10a9   :  { %8359 = vmatpush.bf16.msrb.mxu0 %v12285_v2  ;;  %8372 = vmatpush.bf16.msra.mxu3 %v12413_v3  ;;  %v12617_v2 = vor.u32 %v13774_v30, %v12616_v45  ;;  %v13738_v3 = vld [vmem:[#allocation41 + $0xa14] sm:$0xf0]  ;;  %v7977_v12 = vpop.f32.mrf.mxu2  ;;  %v12365_v27 = vor.u32 %v13708_v0, %v12362_v1  ;;  %v13825_v45 = vld [vmem:[#allocation44 + $0xcc] sm:$0xf0]  ;;  %v12944_v30 = vld [vmem:[#allocation44 + $0x1c0] sm:$0xf] }
0x10aa   :  { %v13500_v1 = vld [vmem:[#allocation41 + $0x2ac] sm:$0xf]  ;;  %v13821_v12 = vld [vmem:[#allocation44 + $0xac] sm:$0xf0]  ;;  %v11594_v7 = vld [vmem:[#allocation41 + $0x338] sm:$0xf0] }
0x10ab   :  { %v12801_v19 = vor.u32 %v13821_v12, %v12800_v47  ;;  %v13492_v42 = vld [vmem:[#allocation41 + $0x26c] sm:$0xf]  ;;  %v12880_v47 = vld [vmem:[#allocation44 + $0x140] sm:$0xf]  ;;  %v13841_v12 = vld [vmem:[#allocation44 + $0x14c] sm:$0xf0] }
0x10ac   :  { %8230 = vmatpush.bf16.msra.mxu2 %v12521_v63  ;;  %8243 = vmatpush.bf16.msrb.mxu1 %v12649_v16  ;;  %v8120_v63 = vpop.f32.mrf.mxu3  ;;  %v11690_v16 = vld [vmem:[#allocation41 + $0x3f8] sm:$0xf0] }
0x10ad   :  { %8360 = vmatpush.bf16.msrb.mxu0 %v12269_v25  ;;  %8373 = vmatpush.bf16.msra.mxu3 %v12397_v31  ;;  %v12832_v25 = vld [vmem:[#allocation44 + $0xe0] sm:$0xf]  ;;  %v12473_v31 = vor.u32 %v13738_v3, %v12472_v22  ;;  %v11693_v20 = vor.u32 %v13540_v10, %v11690_v16  ;;  %v11530_v22 = vld [vmem:[#allocation41 + $0x2b8] sm:$0xf0]  ;;  %v13532_v3 = vld [vmem:[#allocation41 + $0x3ac] sm:$0xf] }
0x10ae   :  { %v11533_v6 = vor.u32 %v13500_v1, %v11530_v22  ;;  %v11661_v10 = vor.u32 %v13532_v3, %v11658_v51  ;;  %v13496_v63 = vld [vmem:[#allocation41 + $0x28c] sm:$0xf]  ;;  %v11514_v16 = vld [vmem:[#allocation41 + $0x298] sm:$0xf0]  ;;  %v13809_v51 = vld [vmem:[#allocation44 + $0x4c] sm:$0xf0] }
0x10af   :  { %v11517_v44 = vor.u32 %v13496_v63, %v11514_v16  ;;  %v13520_v1 = vld [vmem:[#allocation41 + $0x34c] sm:$0xf]  ;;  %v11610_v22 = vld [vmem:[#allocation41 + $0x358] sm:$0xf0] }
0x10b0   :  { %8231 = vmatpush.bf16.msra.mxu2 %v12505_v58  ;;  %8244 = vmatpush.bf16.msrb.mxu1 %v12633_v56  ;;  %v11546_v58 = vld [vmem:[#allocation41 + $0x2d8] sm:$0xf0]  ;;  %v12833_v56 = vor.u32 %v13829_v38, %v12832_v25  ;;  %v12784_v25 = vld [vmem:[#allocation44 + $0x80] sm:$0xf]  ;;  %v8002_v38 = vadd.f32 %v15764_v40, %v7989_v15 }
0x10b1   :  { %8361 = vmatpush.bf16.msrb.mxu0 %v12253_v36  ;;  %8374 = vmatpush.bf16.msra.mxu3 %v12381_v39  ;;  %v11674_v36 = vld [vmem:[#allocation41 + $0x3d8] sm:$0xf0]  ;;  %v12816_v39 = vld [vmem:[#allocation44 + $0xc0] sm:$0xf]  ;;  %v11549_v34 = vor.u32 %v13504_v55, %v11546_v58 }
0x10b2   :  { %v11677_v0 = vor.u32 %v13536_v57, %v11674_v36  ;;  %v11626_v55 = vld [vmem:[#allocation41 + $0x378] sm:$0xf0]  ;;  %v12768_v58 = vld [vmem:[#allocation44 + $0x60] sm:$0xf]  ;;  %v13845_v57 = vld [vmem:[#allocation44 + $0x16c] sm:$0xf0] }
0x10b3   :  { %v11466_v63 = vld [vmem:[#allocation41 + $0x238] sm:$0xf0] }
0x10b4   :  { %8232 = vmatpush.bf16.msra.mxu2 %v12489_v24  ;;  %8245 = vmatpush.bf16.msrb.mxu1 %v12617_v2  ;;  %v12817_v24 = vor.u32 %v13825_v45, %v12816_v39  ;;  %v12945_v2 = vor.u32 %v13857_v62, %v12944_v30  ;;  %v8015_v39 = vadd.f32 %v15767_v26, %v8002_v38  ;;  %v13488_v45 = vld [vmem:[#allocation41 + $0x24c] sm:$0xf]  ;;  %v11482_v30 = vld [vmem:[#allocation41 + $0x258] sm:$0xf0] }
0x10b5   :  { %8362 = vmatpush.bf16.msrb.mxu0 %v12237_v52  ;;  %8375 = vmatpush.bf16.msra.mxu3 %v12365_v27  ;;  %v12928_v52 = vld [vmem:[#allocation44 + $0x1a0] sm:$0xf]  ;;  %v13853_v27 = vld [vmem:[#allocation44 + $0x1ac] sm:$0xf0]  ;;  %v11485_v15 = vor.u32 %v13488_v45, %v11482_v30  ;;  %v13480_v38 = vld [vmem:[#allocation41 + $0x20c] sm:$0xf] }
0x10b6   :  { %v12929_v9 = vor.u32 %v13853_v27, %v12928_v52  ;;  %v13833_v45 = vld [vmem:[#allocation44 + $0x10c] sm:$0xf0]  ;;  %v12840_v30 = vld [vmem:[#allocation44 + $0xe8] sm:$0xf] }
0x10b8   :  { %8233 = vmatpush.bf16.msra.mxu2 %v12473_v31  ;;  %8246 = vmatpush.bf16.msrb.mxu1 %v12601_v33  ;;  %v13817_v31 = vld [vmem:[#allocation44 + $0x8c] sm:$0xf0] }
0x10b9   :  { %8363 = vmatpush.bf16.msrb.mxu0 %v12221_v8  ;;  %8376 = vmatpush.bf16.msra.mxu3 %v12349_v41  ;;  %v13849_v33 = vld [vmem:[#allocation44 + $0x18c] sm:$0xf0]  ;;  %v13524_v41 = vld [vmem:[#allocation41 + $0x36c] sm:$0xf] }
0x10ba   :  { %v11629_v36 = vor.u32 %v13524_v41, %v11626_v55 }
0x10bb   :  { %8234 = vmatmul.bf16.vlgmr.msra.gmra.mxu2 %v15729_v4  ;;  %8247 = vmatmul.bf16.vlgmr.msrb.gmra.mxu1 %v15732_v18  ;;  %v15808_v21 = vpop.f32.mrf.mxu0 }
0x10bc   :  { %8278 = vmatpush.bf16.msrb.mxu2 %v11565_v54  ;;  %8291 = vmatpush.bf16.msra.mxu1 %v11693_v20  ;;  %v11498_v54 = vld [vmem:[#allocation41 + $0x278] sm:$0xf0]  ;;  %v12785_v20 = vor.u32 %v13817_v31, %v12784_v25  ;;  %v13805_v25 = vld [vmem:[#allocation44 + $0x2c] sm:$0xf0]  ;;  %v12864_v31 = vld [vmem:[#allocation44 + $0x120] sm:$0xf] }
0x10bd   :  { %8802 = vmatpush.bf16.msra.mxu0 %v12833_v56  ;;  %8816 = vmatpush.bf16.msrb.mxu3 %v12961_v35  ;;  %v13813_v56 = vld [vmem:[#allocation44 + $0x6c] sm:$0xf0]  ;;  %v12896_v35 = vld [vmem:[#allocation44 + $0x160] sm:$0xf]  ;;  %v11501_v40 = vor.u32 %v13492_v42, %v11498_v54  ;;  %v13512_v42 = vld [vmem:[#allocation41 + $0x30c] sm:$0xf]  ;;  %v12737_v41 = vor.u32 %v13805_v25, %v12736_v13 }
0x10be   :  { %8364 = vmatmul.bf16.vlgmr.msrb.gmra.mxu0 %v15701_v37  ;;  %8377 = vmatmul.bf16.vlgmr.msra.gmra.mxu3 %v15704_v60  ;;  %v12912_v37 = vld [vmem:[#allocation44 + $0x180] sm:$0xf]  ;;  %v8040_v60 = vpop.f32.mrf.mxu1  ;;  %v8027_v62 = vpop.f32.mrf.mxu2  ;;  %v11578_v54 = vld [vmem:[#allocation41 + $0x318] sm:$0xf0] }
0x10bf   :  { %v12913_v8 = vor.u32 %v13849_v33, %v12912_v37  ;;  %v13837_v37 = vld [vmem:[#allocation44 + $0x12c] sm:$0xf0]  ;;  %v12042_v13 = vld [vmem:[#allocation41 + $0x6b8] sm:$0xf0] }
0x10c0   :  { %8279 = vmatpush.bf16.msrb.mxu2 %v11549_v34  ;;  %8292 = vmatpush.bf16.msra.mxu1 %v11677_v0  ;;  %v12769_v34 = vor.u32 %v13813_v56, %v12768_v58  ;;  %v12897_v0 = vor.u32 %v13845_v57, %v12896_v35  ;;  %v12865_v55 = vor.u32 %v13837_v37, %v12864_v31  ;;  %v13636_v58 = vld [vmem:[#allocation41 + $0x6ec] sm:$0xf]  ;;  %v12074_v56 = vld [vmem:[#allocation41 + $0x6f8] sm:$0xf0] }
0x10c1   :  { %8803 = vmatpush.bf16.msra.mxu0 %v12817_v24  ;;  %8817 = vmatpush.bf16.msrb.mxu3 %v12945_v2  ;;  %v12752_v24 = vld [vmem:[#allocation44 + $0x40] sm:$0xf]  ;;  %v8028_v2 = vadd.f32 %v8027_v62, %v8015_v39  ;;  %v15811_v3 = vpop.f32.mrf.mxu3  ;;  %v13668_v35 = vld [vmem:[#allocation41 + $0x7ec] sm:$0xf]  ;;  %v12202_v57 = vld [vmem:[#allocation41 + $0x7f8] sm:$0xf0] }
0x10c2   :  { %v12753_v16 = vor.u32 %v13809_v51, %v12752_v24  ;;  %v12848_v39 = vld [vmem:[#allocation44 + $0x100] sm:$0xf]  ;;  %v12205_v24 = vor.u32 %v13668_v35, %v12202_v57  ;;  %v13660_v37 = vld [vmem:[#allocation41 + $0x7ac] sm:$0xf]  ;;  %v13818_v35 = vld [vmem:[#allocation44 + $0x94] sm:$0xf0] }
0x10c3   :  { %v8041_v26 = vadd.f32 %v8040_v60, %v8028_v2  ;;  %v8159_v27 = vpop.f32.mrf.mxu0  ;;  %v12849_v51 = vor.u32 %v13833_v45, %v12848_v39  ;;  %v13850_v57 = vld [vmem:[#allocation44 + $0x194] sm:$0xf0] }
0x10c4   :  { %8280 = vmatpush.bf16.msrb.mxu2 %v11533_v6  ;;  %8293 = vmatpush.bf16.msra.mxu1 %v11661_v10  ;;  %v11613_v6 = vor.u32 %v13520_v1, %v11610_v22  ;;  %v13484_v10 = vld [vmem:[#allocation41 + $0x22c] sm:$0xf]  ;;  %v13862_v1 = vld [vmem:[#allocation44 + $0x1f4] sm:$0xf0]  ;;  %v12077_v22 = vor.u32 %v13636_v58, %v12074_v56 }
0x10c5   :  { %8804 = vmatpush.bf16.msra.mxu0 %v12801_v19  ;;  %8818 = vmatpush.bf16.msrb.mxu3 %v12929_v9  ;;  %v12881_v19 = vor.u32 %v13841_v12, %v12880_v47  ;;  %v13516_v9 = vld [vmem:[#allocation41 + $0x32c] sm:$0xf]  ;;  %v8054_v33 = vadd.f32 %v15779_v61, %v8041_v26  ;;  %v11469_v60 = vor.u32 %v13484_v10, %v11466_v63  ;;  %v12058_v12 = vld [vmem:[#allocation41 + $0x6d8] sm:$0xf0] }
0x10c6   :  { %v8042_v52 = vpop.f32.mrf.mxu1  ;;  %v13632_v47 = vld [vmem:[#allocation41 + $0x6cc] sm:$0xf]  ;;  %v13826_v10 = vld [vmem:[#allocation44 + $0xd4] sm:$0xf0] }
0x10c7   :  { %v13664_v27 = vld [vmem:[#allocation41 + $0x7cc] sm:$0xf]  ;;  %v12154_v56 = vld [vmem:[#allocation41 + $0x798] sm:$0xf0] }
0x10c8   :  { %8281 = vmatpush.bf16.msrb.mxu2 %v11517_v44  ;;  %8294 = vmatpush.bf16.msra.mxu1 %v11645_v50  ;;  %v11597_v44 = vor.u32 %v13516_v9, %v11594_v7  ;;  %v11450_v50 = vld [vmem:[#allocation41 + $0x218] sm:$0xf0]  ;;  %v12952_v63 = vld [vmem:[#allocation44 + $0x1c8] sm:$0xf] }
0x10c9   :  { %8805 = vmatpush.bf16.msra.mxu0 %v12785_v20  ;;  %8819 = vmatpush.bf16.msrb.mxu3 %v12913_v8  ;;  %v15815_v20 = vadd.f32 %v15783_v53, %v8054_v33  ;;  %v8029_v8 = vpop.f32.mrf.mxu2  ;;  %v8172_v61 = vpop.f32.mrf.mxu3  ;;  %v11453_v62 = vor.u32 %v13480_v38, %v11450_v50  ;;  %v11581_v53 = vor.u32 %v13512_v42, %v11578_v54  ;;  %v13628_v7 = vld [vmem:[#allocation41 + $0x6ac] sm:$0xf]  ;;  %v12170_v33 = vld [vmem:[#allocation41 + $0x7b8] sm:$0xf0] }
0x10ca   :  { %v12808_v38 = vld [vmem:[#allocation44 + $0xa8] sm:$0xf]  ;;  %v13854_v50 = vld [vmem:[#allocation44 + $0x1b4] sm:$0xf0]  ;;  %v12045_v42 = vor.u32 %v13628_v7, %v12042_v13  ;;  %v12173_v54 = vor.u32 %v13660_v37, %v12170_v33 }
0x10cb   :  { %v13624_v8 = vld [vmem:[#allocation41 + $0x68c] sm:$0xf]  ;;  %v13810_v7 = vld [vmem:[#allocation44 + $0x54] sm:$0xf0] }
0x10cc   :  { %8282 = vmatpush.bf16.msrb.mxu2 %v11501_v40  ;;  %8295 = vmatpush.bf16.msra.mxu1 %v11629_v36  ;;  %v12720_v40 = vld [vmem:[#allocation44] sm:$0xf]  ;;  %v13801_v36 = vld [vmem:[#allocation44 + $0xc] sm:$0xf0]  ;;  %v12920_v61 = vld [vmem:[#allocation44 + $0x188] sm:$0xf] }
0x10cd   :  { %8806 = vmatpush.bf16.msra.mxu0 %v12769_v34  ;;  %8820 = vmatpush.bf16.msrb.mxu3 %v12897_v0  ;;  %v13830_v34 = vld [vmem:[#allocation44 + $0xf4] sm:$0xf0]  ;;  %v12968_v0 = vld [vmem:[#allocation44 + $0x1e8] sm:$0xf]  ;;  %v12721_v2 = vor.u32 %v13801_v36, %v12720_v40 }
0x10ce   :  { %v12841_v52 = vor.u32 %v13830_v34, %v12840_v30  ;;  %v12969_v26 = vor.u32 %v13862_v1, %v12968_v0  ;;  %v13620_v30 = vld [vmem:[#allocation41 + $0x66c] sm:$0xf]  ;;  %v12921_v34 = vor.u32 %v13850_v57, %v12920_v61  ;;  %v12138_v1 = vld [vmem:[#allocation41 + $0x778] sm:$0xf0] }
0x10cf   :  { %v13652_v0 = vld [vmem:[#allocation41 + $0x76c] sm:$0xf]  ;;  %v11962_v61 = vld [vmem:[#allocation41 + $0x618] sm:$0xf0] }
0x10d0   :  { %8283 = vmatpush.bf16.msrb.mxu2 %v11485_v15  ;;  %8296 = vmatpush.bf16.msra.mxu1 %v11613_v6  ;;  %v12186_v15 = vld [vmem:[#allocation41 + $0x7d8] sm:$0xf0]  ;;  %v12824_v6 = vld [vmem:[#allocation44 + $0xc8] sm:$0xf] }
0x10d1   :  { %8807 = vmatpush.bf16.msra.mxu0 %v12753_v16  ;;  %8821 = vmatpush.bf16.msrb.mxu3 %v12881_v19  ;;  %v13858_v16 = vld [vmem:[#allocation44 + $0x1d4] sm:$0xf0]  ;;  %v12061_v19 = vor.u32 %v13632_v47, %v12058_v12  ;;  %v12189_v9 = vor.u32 %v13664_v27, %v12186_v15  ;;  %v12825_v25 = vor.u32 %v13826_v10, %v12824_v6  ;;  %v13648_v10 = vld [vmem:[#allocation41 + $0x74c] sm:$0xf] }
0x10d2   :  { %v12953_v31 = vor.u32 %v13858_v16, %v12952_v63  ;;  %v12141_v12 = vor.u32 %v13652_v0, %v12138_v1  ;;  %v12122_v63 = vld [vmem:[#allocation41 + $0x758] sm:$0xf0]  ;;  %v12760_v16 = vld [vmem:[#allocation44 + $0x48] sm:$0xf] }
0x10d3   :  { %v12888_v13 = vld [vmem:[#allocation44 + $0x148] sm:$0xf]  ;;  %v12714_v1 = vld [vmem:[#allocation41 + $0xbf8] sm:$0xf0] }
0x10d4   :  { %8284 = vmatpush.bf16.msrb.mxu2 %v11469_v60  ;;  %8297 = vmatpush.bf16.msra.mxu1 %v11597_v44  ;;  %v13822_v60 = vld [vmem:[#allocation44 + $0xb4] sm:$0xf0]  ;;  %v12936_v44 = vld [vmem:[#allocation44 + $0x1a8] sm:$0xf] }
0x10d5   :  { %8808 = vmatpush.bf16.msra.mxu0 %v12737_v41  ;;  %8822 = vmatpush.bf16.msrb.mxu3 %v12865_v55  ;;  %v12026_v41 = vld [vmem:[#allocation41 + $0x698] sm:$0xf0]  ;;  %v12809_v55 = vor.u32 %v13822_v60, %v12808_v38  ;;  %v12937_v58 = vor.u32 %v13854_v50, %v12936_v44  ;;  %v12125_v60 = vor.u32 %v13648_v10, %v12122_v63  ;;  %v13612_v44 = vld [vmem:[#allocation41 + $0x62c] sm:$0xf] }
0x10d6   :  { %v12029_v39 = vor.u32 %v13624_v8, %v12026_v41  ;;  %v11978_v50 = vld [vmem:[#allocation41 + $0x638] sm:$0xf0]  ;;  %v12744_v41 = vld [vmem:[#allocation44 + $0x28] sm:$0xf] }
0x10d7   :  { %v12106_v8 = vld [vmem:[#allocation41 + $0x738] sm:$0xf0]  ;;  %v13640_v57 = vld [vmem:[#allocation41 + $0x70c] sm:$0xf] }
0x10d8   :  { %8285 = vmatpush.bf16.msrb.mxu2 %v11453_v62  ;;  %8298 = vmatpush.bf16.msra.mxu1 %v11581_v53  ;;  %v8092_v40 = vpop.f32.mrf.mxu1  ;;  %v12010_v62 = vld [vmem:[#allocation41 + $0x678] sm:$0xf0]  ;;  %v13796_v0 = vld [vmem:[#allocation41 + $0xbec] sm:$0xf] }
0x10d9   :  { %8809 = vmatpush.bf16.msra.mxu0 %v12721_v2  ;;  %8823 = vmatpush.bf16.msrb.mxu3 %v12849_v51  ;;  %v12904_v2 = vld [vmem:[#allocation44 + $0x168] sm:$0xf]  ;;  %v13846_v51 = vld [vmem:[#allocation44 + $0x174] sm:$0xf0]  ;;  %v12013_v47 = vor.u32 %v13620_v30, %v12010_v62 }
0x10da   :  { %v12905_v6 = vor.u32 %v13846_v51, %v12904_v2  ;;  %v12090_v30 = vld [vmem:[#allocation41 + $0x718] sm:$0xf0]  ;;  %v13764_v62 = vld [vmem:[#allocation41 + $0xaec] sm:$0xf] }
0x10db   :  { %8286 = vmatmul.bf16.vlgmr.msrb.gmra.mxu2 %v15710_v43  ;;  %8299 = vmatmul.bf16.vlgmr.msra.gmra.mxu1 %v15712_v14  ;;  %v13656_v43 = vld [vmem:[#allocation41 + $0x78c] sm:$0xf]  ;;  %v15821_v36 = vpop.f32.mrf.mxu0  ;;  %v13834_v51 = vld [vmem:[#allocation44 + $0x114] sm:$0xf0] }
0x10dc   :  { %8330 = vmatpush.bf16.msra.mxu2 %v12077_v22  ;;  %8343 = vmatpush.bf16.msrb.mxu1 %v12205_v24  ;;  %v12792_v14 = vld [vmem:[#allocation44 + $0x88] sm:$0xf]  ;;  %v12157_v45 = vor.u32 %v13656_v43, %v12154_v56  ;;  %v13814_v24 = vld [vmem:[#allocation44 + $0x74] sm:$0xf0]  ;;  %v11981_v56 = vor.u32 %v13612_v44, %v11978_v50 }
0x10dd   :  { %8858 = vmatpush.bf16.msrb.mxu0 %v12841_v52  ;;  %8872 = vmatpush.bf16.msra.mxu3 %v12969_v26  ;;  %v12793_v53 = vor.u32 %v13818_v35, %v12792_v14  ;;  %v12776_v22 = vld [vmem:[#allocation44 + $0x68] sm:$0xf]  ;;  %v11994_v26 = vld [vmem:[#allocation41 + $0x658] sm:$0xf0] }
0x10de   :  { %8810 = vmatmul.bf16.vlgmr.msra.gmra.mxu0 %v15632_v23  ;;  %8824 = vmatmul.bf16.vlgmr.msrb.gmra.mxu3 %v15634_v29  ;;  %v13616_v52 = vld [vmem:[#allocation41 + $0x64c] sm:$0xf]  ;;  %v8079_v27 = vpop.f32.mrf.mxu2  ;;  %v12777_v15 = vor.u32 %v13814_v24, %v12776_v22  ;;  %v13838_v43 = vld [vmem:[#allocation44 + $0x134] sm:$0xf0] }
0x10df   :  { %v11997_v38 = vor.u32 %v13616_v52, %v11994_v26  ;;  %v13608_v35 = vld [vmem:[#allocation41 + $0x60c] sm:$0xf]  ;;  %v13802_v24 = vld [vmem:[#allocation44 + $0x14] sm:$0xf0]  ;;  %v12717_v26 = vor.u32 %v13796_v0, %v12714_v1 }
0x10e0   :  { %8331 = vmatpush.bf16.msra.mxu2 %v12061_v19  ;;  %8344 = vmatpush.bf16.msrb.mxu1 %v12189_v9  ;;  %v8080_v19 = vadd.f32 %v8079_v27, %v15815_v20  ;;  %v13644_v20 = vld [vmem:[#allocation41 + $0x72c] sm:$0xf]  ;;  %v12570_v10 = vld [vmem:[#allocation41 + $0xad8] sm:$0xf0] }
0x10e1   :  { %8859 = vmatpush.bf16.msrb.mxu0 %v12825_v25  ;;  %8873 = vmatpush.bf16.msra.mxu3 %v12953_v31  ;;  %v15824_v9 = vpop.f32.mrf.mxu3  ;;  %v13842_v25 = vld [vmem:[#allocation44 + $0x154] sm:$0xf0]  ;;  %v8094_v31 = vpop.f32.mrf.mxu1  ;;  %v12109_v14 = vor.u32 %v13644_v20, %v12106_v8  ;;  %v12728_v22 = vld [vmem:[#allocation44 + $0x8] sm:$0xf] }
0x10e2   :  { %v15826_v37 = vadd.f32 %v8092_v40, %v8080_v19  ;;  %v12856_v2 = vld [vmem:[#allocation44 + $0x108] sm:$0xf]  ;;  %v12729_v27 = vor.u32 %v13802_v24, %v12728_v22  ;;  %v12538_v50 = vld [vmem:[#allocation41 + $0xa98] sm:$0xf0] }
0x10e3   :  { %v8211_v33 = vpop.f32.mrf.mxu0  ;;  %v13792_v63 = vld [vmem:[#allocation41 + $0xbcc] sm:$0xf] }
0x10e4   :  { %8332 = vmatpush.bf16.msra.mxu2 %v12045_v42  ;;  %8345 = vmatpush.bf16.msrb.mxu1 %v12173_v54  ;;  %v12761_v42 = vor.u32 %v13810_v7, %v12760_v16  ;;  %v12889_v54 = vor.u32 %v13842_v25, %v12888_v13  ;;  %v12698_v16 = vld [vmem:[#allocation41 + $0xbd8] sm:$0xf0]  ;;  %v13756_v13 = vld [vmem:[#allocation41 + $0xaac] sm:$0xf] }
0x10e5   :  { %8860 = vmatpush.bf16.msrb.mxu0 %v12809_v55  ;;  %8874 = vmatpush.bf16.msra.mxu3 %v12937_v58  ;;  %v13806_v55 = vld [vmem:[#allocation44 + $0x34] sm:$0xf0]  ;;  %v12872_v58 = vld [vmem:[#allocation44 + $0x128] sm:$0xf]  ;;  %v12701_v7 = vor.u32 %v13792_v63, %v12698_v16 }
0x10e6   :  { %v8081_v40 = vpop.f32.mrf.mxu2  ;;  %v12554_v25 = vld [vmem:[#allocation41 + $0xab8] sm:$0xf0]  ;;  %v13788_v31 = vld [vmem:[#allocation41 + $0xbac] sm:$0xf] }
0x10e7   :  { %v12682_v33 = vld [vmem:[#allocation41 + $0xbb8] sm:$0xf0]  ;;  %v13752_v44 = vld [vmem:[#allocation41 + $0xa8c] sm:$0xf] }
0x10e8   :  { %8333 = vmatpush.bf16.msra.mxu2 %v12029_v39  ;;  %8346 = vmatpush.bf16.msrb.mxu1 %v12157_v45  ;;  %v12745_v39 = vor.u32 %v13806_v55, %v12744_v41  ;;  %v12873_v45 = vor.u32 %v13838_v43, %v12872_v58  ;;  %v12541_v8 = vor.u32 %v13752_v44, %v12538_v50  ;;  %v13748_v55 = vld [vmem:[#allocation41 + $0xa6c] sm:$0xf]  ;;  %v12522_v58 = vld [vmem:[#allocation41 + $0xa78] sm:$0xf0]  ;;  %v13823_v44 = vld [vmem:[#allocation44 + $0xc4] sm:$0xf] }
0x10e9   :  { %8861 = vmatpush.bf16.msrb.mxu0 %v12793_v53  ;;  %8875 = vmatpush.bf16.msra.mxu3 %v12921_v34  ;;  %v12586_v53 = vld [vmem:[#allocation41 + $0xaf8] sm:$0xf0]  ;;  %v8224_v34 = vpop.f32.mrf.mxu3  ;;  %v13780_v43 = vld [vmem:[#allocation41 + $0xb6c] sm:$0xf]  ;;  %v12818_v50 = vld [vmem:[#allocation44 + $0xd0] sm:$0xf0] }
0x10ea   :  { %v12589_v52 = vor.u32 %v13764_v62, %v12586_v53  ;;  %v13768_v63 = vld [vmem:[#allocation41 + $0xb0c] sm:$0xf]  ;;  %v12602_v16 = vld [vmem:[#allocation41 + $0xb18] sm:$0xf0] }
0x10ec   :  { %8334 = vmatpush.bf16.msra.mxu2 %v12013_v47  ;;  %8347 = vmatpush.bf16.msrb.mxu1 %v12141_v12  ;;  %v11965_v47 = vor.u32 %v13608_v35, %v11962_v61  ;;  %v12093_v12 = vor.u32 %v13640_v57, %v12090_v30  ;;  %v13744_v61 = vld [vmem:[#allocation41 + $0xa4c] sm:$0xf]  ;;  %v12634_v30 = vld [vmem:[#allocation41 + $0xb58] sm:$0xf0] }
0x10ed   :  { %8862 = vmatpush.bf16.msrb.mxu0 %v12777_v15  ;;  %8876 = vmatpush.bf16.msra.mxu3 %v12905_v6  ;;  %v12857_v15 = vor.u32 %v13834_v51, %v12856_v2  ;;  %v13760_v6 = vld [vmem:[#allocation41 + $0xacc] sm:$0xf]  ;;  %v12490_v51 = vld [vmem:[#allocation41 + $0xa38] sm:$0xf0] }
0x10ee   :  { %v12573_v19 = vor.u32 %v13760_v6, %v12570_v10  ;;  %v13740_v2 = vld [vmem:[#allocation41 + $0xa2c] sm:$0xf] }
0x10f0   :  { %8335 = vmatpush.bf16.msra.mxu2 %v11997_v38  ;;  %8348 = vmatpush.bf16.msrb.mxu1 %v12125_v60  ;;  %v12557_v38 = vor.u32 %v13756_v13, %v12554_v25  ;;  %v12685_v60 = vor.u32 %v13788_v31, %v12682_v33  ;;  %v12834_v13 = vld [vmem:[#allocation44 + $0xf0] sm:$0xf0]  ;;  %v13859_v25 = vld [vmem:[#allocation44 + $0x1e4] sm:$0xf] }
0x10f1   :  { %8863 = vmatpush.bf16.msrb.mxu0 %v12761_v42  ;;  %8877 = vmatpush.bf16.msra.mxu3 %v12889_v54  ;;  %v13784_v42 = vld [vmem:[#allocation41 + $0xb8c] sm:$0xf]  ;;  %v12666_v54 = vld [vmem:[#allocation41 + $0xb98] sm:$0xf0]  ;;  %v12962_v31 = vld [vmem:[#allocation44 + $0x1f0] sm:$0xf0] }
0x10f2   :  { %v12669_v41 = vor.u32 %v13784_v42, %v12666_v54  ;;  %v13855_v42 = vld [vmem:[#allocation44 + $0x1c4] sm:$0xf]  ;;  %v12946_v54 = vld [vmem:[#allocation44 + $0x1d0] sm:$0xf0] }
0x10f4   :  { %8336 = vmatpush.bf16.msra.mxu2 %v11981_v56  ;;  %8349 = vmatpush.bf16.msrb.mxu1 %v12109_v14  ;;  %v12650_v56 = vld [vmem:[#allocation41 + $0xb78] sm:$0xf0]  ;;  %v12525_v14 = vor.u32 %v13748_v55, %v12522_v58 }
0x10f5   :  { %8864 = vmatpush.bf16.msrb.mxu0 %v12745_v39  ;;  %8878 = vmatpush.bf16.msra.mxu3 %v12873_v45  ;;  %v12653_v35 = vor.u32 %v13780_v43, %v12650_v56  ;;  %v12506_v39 = vld [vmem:[#allocation41 + $0xa58] sm:$0xf0]  ;;  %v13776_v45 = vld [vmem:[#allocation41 + $0xb4c] sm:$0xf]  ;;  %v13815_v43 = vld [vmem:[#allocation44 + $0x84] sm:$0xf] }
0x10f6   :  { %v12509_v22 = vor.u32 %v13744_v61, %v12506_v39  ;;  %v12637_v24 = vor.u32 %v13776_v45, %v12634_v30  ;;  %v12786_v56 = vld [vmem:[#allocation44 + $0x90] sm:$0xf0]  ;;  %v13811_v39 = vld [vmem:[#allocation44 + $0x64] sm:$0xf] }
0x10f7   :  { %v12770_v30 = vld [vmem:[#allocation44 + $0x70] sm:$0xf0] }
0x10f8   :  { %8337 = vmatpush.bf16.msra.mxu2 %v11965_v47  ;;  %8350 = vmatpush.bf16.msrb.mxu1 %v12093_v12  ;;  %v8144_v20 = vpop.f32.mrf.mxu1  ;;  %v13772_v47 = vld [vmem:[#allocation41 + $0xb2c] sm:$0xf]  ;;  %v12618_v12 = vld [vmem:[#allocation41 + $0xb38] sm:$0xf0] }
0x10f9   :  { %8865 = vmatpush.bf16.msrb.mxu0 %v12729_v27  ;;  %8879 = vmatpush.bf16.msra.mxu3 %v12857_v15  ;;  %v13736_v27 = vld [vmem:[#allocation41 + $0xa0c] sm:$0xf]  ;;  %v12474_v15 = vld [vmem:[#allocation41 + $0xa18] sm:$0xf0] }
0x10fa   :  { %v12477_v33 = vor.u32 %v13736_v27, %v12474_v15  ;;  %v12738_v15 = vld [vmem:[#allocation44 + $0x30] sm:$0xf0] }
0x10fb   :  { %8338 = vmatmul.bf16.vlgmr.msra.gmra.mxu2 %v15722_v46  ;;  %8351 = vmatmul.bf16.vlgmr.msrb.gmra.mxu1 %v15724_v49  ;;  %v5859_v46 = vperm.slane %v15789_v17, 3  ;;  %v8261_v49 = vpop.f32.mrf.mxu0 }
0x10fc   :  { %8382 = vmatpush.bf16.msrb.mxu2 %v12589_v52  ;;  %8395 = vmatpush.bf16.msra.mxu1 %v12717_v26  ;;  %v12493_v26 = vor.u32 %v13740_v2, %v12490_v51 }
0x10fd   :  { %8866 = vmatmul.bf16.vlgmr.msrb.gmra.mxu0 %v15632_v23  ;;  %8880 = vmatmul.bf16.vlgmr.msra.gmra.mxu3 %v15634_v29  ;;  %v8262_v57 = vadd.f32 %v8261_v49, %v5859_v46  ;;  %v13819_v46 = vld [vmem:[#allocation44 + $0xa4] sm:$0xf]  ;;  %v12802_v49 = vld [vmem:[#allocation44 + $0xb0] sm:$0xf0] }
0x10fe   :  { %v8131_v40 = vpop.f32.mrf.mxu2  ;;  %v12805_v55 = vor.u32 %v13819_v46, %v12802_v49  ;;  %v13824_v46 = vld [vmem:[#allocation44 + $0xcc] sm:$0xf]  ;;  %v12826_v49 = vld [vmem:[#allocation44 + $0xd8] sm:$0xf0] }
0x10ff   :  { %v8132_v62 = vadd.f32 %v8131_v40, %v15799_v28  ;;  %v12621_v28 = vor.u32 %v13772_v47, %v12618_v12 }
0x1100   :  { %8383 = vmatpush.bf16.msrb.mxu2 %v12573_v19  ;;  %8396 = vmatpush.bf16.msra.mxu1 %v12701_v7  ;;  %v8146_v34 = vpop.f32.mrf.mxu1  ;;  %v13827_v19 = vld [vmem:[#allocation44 + $0xe4] sm:$0xf] }
0x1101   :  { %v8274_v17 = vpop.f32.mrf.mxu3  ;;  %v8145_v0 = vadd.f32 %v8144_v20, %v8132_v62  ;;  %v12949_v20 = vor.u32 %v13855_v42, %v12946_v54  ;;  %v12898_v62 = vld [vmem:[#allocation44 + $0x170] sm:$0xf0]  ;;  %v13807_v34 = vld [vmem:[#allocation44 + $0x44] sm:$0xf] }
0x1102   :  { %v15834_v53 = vadd.f32 %v8274_v17, %v8262_v57  ;;  %v12789_v57 = vor.u32 %v13815_v43, %v12786_v56  ;;  %v12810_v43 = vld [vmem:[#allocation44 + $0xb8] sm:$0xf0]  ;;  %v13852_v56 = vld [vmem:[#allocation44 + $0x1ac] sm:$0xf] }
0x1103   :  { %v8263_v1 = vpop.f32.mrf.mxu0  ;;  %v8158_v52 = vadd.f32 %v15808_v21, %v8145_v0  ;;  %v12605_v21 = vor.u32 %v13768_v63, %v12602_v16  ;;  %v12754_v0 = vld [vmem:[#allocation44 + $0x50] sm:$0xf0] }
0x1104   :  { %8384 = vmatpush.bf16.msrb.mxu2 %v12557_v38  ;;  %8397 = vmatpush.bf16.msra.mxu1 %v12685_v60  ;;  %v12837_v38 = vor.u32 %v13827_v19, %v12834_v13  ;;  %v12965_v60 = vor.u32 %v13859_v25, %v12962_v31  ;;  %v13839_v1 = vld [vmem:[#allocation44 + $0x144] sm:$0xf]  ;;  %v12757_v12 = vor.u32 %v13807_v34, %v12754_v0  ;;  %v12866_v63 = vld [vmem:[#allocation44 + $0x130] sm:$0xf0]  ;;  %v12778_v34 = vld [vmem:[#allocation44 + $0x78] sm:$0xf0] }
0x1105   :  { %v8171_v6 = vadd.f32 %v15811_v3, %v8158_v52  ;;  %v12821_v3 = vor.u32 %v13823_v44, %v12818_v50  ;;  %v12722_v13 = vld [vmem:[#allocation44 + $0x10] sm:$0xf0]  ;;  %v13831_v25 = vld [vmem:[#allocation44 + $0x104] sm:$0xf]  ;;  %v13860_v44 = vld [vmem:[#allocation44 + $0x1ec] sm:$0xf] }
0x1106   :  { %v8133_v10 = vpop.f32.mrf.mxu2  ;;  %v12850_v31 = vld [vmem:[#allocation44 + $0x110] sm:$0xf0]  ;;  %v12970_v50 = vld [vmem:[#allocation44 + $0x1f8] sm:$0xf0]  ;;  %v13844_v0 = vld [vmem:[#allocation44 + $0x16c] sm:$0xf] }
0x1107   :  { %v13835_v10 = vld [vmem:[#allocation44 + $0x124] sm:$0xf] }
0x1108   :  { %8385 = vmatpush.bf16.msrb.mxu2 %v12541_v8  ;;  %8398 = vmatpush.bf16.msra.mxu1 %v12669_v41  ;;  %v13851_v8 = vld [vmem:[#allocation44 + $0x1a4] sm:$0xf]  ;;  %v12930_v41 = vld [vmem:[#allocation44 + $0x1b0] sm:$0xf0] }
0x1109   :  { %v8276_v7 = vpop.f32.mrf.mxu3  ;;  %v12933_v58 = vor.u32 %v13851_v8, %v12930_v41  ;;  %v13856_v8 = vld [vmem:[#allocation44 + $0x1cc] sm:$0xf]  ;;  %v12954_v41 = vld [vmem:[#allocation44 + $0x1d8] sm:$0xf0] }
0x110a   :  { %v12869_v7 = vor.u32 %v13835_v10, %v12866_v63 }
0x110c   :  { %8386 = vmatpush.bf16.msrb.mxu2 %v12525_v14  ;;  %8399 = vmatpush.bf16.msra.mxu1 %v12653_v35  ;;  %v13847_v14 = vld [vmem:[#allocation44 + $0x184] sm:$0xf]  ;;  %v12914_v35 = vld [vmem:[#allocation44 + $0x190] sm:$0xf0] }
0x110d   :  { %v12917_v40 = vor.u32 %v13847_v14, %v12914_v35  ;;  %v12938_v14 = vld [vmem:[#allocation44 + $0x1b8] sm:$0xf0] }
0x1110   :  { %8387 = vmatpush.bf16.msrb.mxu2 %v12509_v22  ;;  %8400 = vmatpush.bf16.msra.mxu1 %v12637_v24  ;;  %v12882_v22 = vld [vmem:[#allocation44 + $0x150] sm:$0xf0] }
0x1111   :  { %v12885_v52 = vor.u32 %v13839_v1, %v12882_v22  ;;  %v12906_v1 = vld [vmem:[#allocation44 + $0x178] sm:$0xf0] }
0x1114   :  { %8388 = vmatpush.bf16.msrb.mxu2 %v12493_v26  ;;  %8401 = vmatpush.bf16.msra.mxu1 %v12621_v28  ;;  %v13803_v26 = vld [vmem:[#allocation44 + $0x24] sm:$0xf] }
0x1115   :  { %v12741_v19 = vor.u32 %v13803_v26, %v12738_v15  ;;  %v12890_v26 = vld [vmem:[#allocation44 + $0x158] sm:$0xf0] }
0x1118   :  { %8389 = vmatpush.bf16.msrb.mxu2 %v12477_v33  ;;  %8402 = vmatpush.bf16.msra.mxu1 %v12605_v21  ;;  %v8196_v61 = vpop.f32.mrf.mxu1  ;;  %v13828_v33 = vld [vmem:[#allocation44 + $0xec] sm:$0xf] }
0x111b   :  { %8390 = vmatmul.bf16.vlgmr.msrb.gmra.mxu2 %v15729_v4  ;;  %8403 = vmatmul.bf16.vlgmr.msra.gmra.mxu1 %v15732_v18  ;;  %v15840_v45 = vpop.f32.mrf.mxu0  ;;  %v13843_v4 = vld [vmem:[#allocation44 + $0x164] sm:$0xf]  ;;  %v12773_v18 = vor.u32 %v13811_v39, %v12770_v30  ;;  %v13848_v39 = vld [vmem:[#allocation44 + $0x18c] sm:$0xf]  ;;  %v12922_v30 = vld [vmem:[#allocation44 + $0x198] sm:$0xf0] }
0x111c   :  { %8830 = vmatpush.bf16.msra.mxu2 %v12837_v38  ;;  %8844 = vmatpush.bf16.msrb.mxu1 %v12965_v60  ;;  %v12901_v17 = vor.u32 %v13843_v4, %v12898_v62  ;;  %v12842_v60 = vld [vmem:[#allocation44 + $0xf8] sm:$0xf0]  ;;  %v12925_v62 = vor.u32 %v13848_v39, %v12922_v30 }
0x111e   :  { %v8183_v24 = vpop.f32.mrf.mxu2 }
0x111f   :  { %v8184_v2 = vadd.f32 %v8183_v24, %v8171_v6  ;;  %v13799_v6 = vld [vmem:[#allocation44 + $0x4] sm:$0xf] }
0x1120   :  { %8831 = vmatpush.bf16.msra.mxu2 %v12821_v3  ;;  %8845 = vmatpush.bf16.msrb.mxu1 %v12949_v20  ;;  %v8198_v47 = vpop.f32.mrf.mxu1  ;;  %v12725_v54 = vor.u32 %v13799_v6, %v12722_v13  ;;  %v12845_v3 = vor.u32 %v13828_v33, %v12842_v60  ;;  %v12973_v20 = vor.u32 %v13860_v44, %v12970_v50  ;;  %v13836_v6 = vld [vmem:[#allocation44 + $0x12c] sm:$0xf]  ;;  %v12874_v13 = vld [vmem:[#allocation44 + $0x138] sm:$0xf0] }
0x1121   :  { %v15842_v51 = vpop.f32.mrf.mxu3  ;;  %v8197_v28 = vadd.f32 %v8196_v61, %v8184_v2  ;;  %v12941_v61 = vor.u32 %v13852_v56, %v12938_v14  ;;  %v12909_v2 = vor.u32 %v13844_v0, %v12906_v1  ;;  %v13808_v47 = vld [vmem:[#allocation44 + $0x4c] sm:$0xf]  ;;  %v12730_v44 = vld [vmem:[#allocation44 + $0x18] sm:$0xf0] }
0x1122   :  { %v13800_v60 = vld [vmem:[#allocation44 + $0xc] sm:$0xf] }
0x1123   :  { %v8315_v27 = vpop.f32.mrf.mxu0  ;;  %v8210_v16 = vadd.f32 %v15821_v36, %v8197_v28  ;;  %v12853_v36 = vor.u32 %v13831_v25, %v12850_v31  ;;  %v13832_v50 = vld [vmem:[#allocation44 + $0x10c] sm:$0xf] }
0x1124   :  { %8832 = vmatpush.bf16.msra.mxu2 %v12805_v55  ;;  %8846 = vmatpush.bf16.msrb.mxu1 %v12933_v58  ;;  %v12957_v55 = vor.u32 %v13856_v8, %v12954_v41  ;;  %v13820_v58 = vld [vmem:[#allocation44 + $0xac] sm:$0xf] }
0x1125   :  { %v8223_v21 = vadd.f32 %v15824_v9, %v8210_v16  ;;  %v12829_v9 = vor.u32 %v13824_v46, %v12826_v49  ;;  %v12813_v35 = vor.u32 %v13820_v58, %v12810_v43  ;;  %v13804_v16 = vld [vmem:[#allocation44 + $0x2c] sm:$0xf] }
0x1126   :  { %v8185_v38 = vpop.f32.mrf.mxu2 }
0x1127   :  { %v12877_v38 = vor.u32 %v13836_v6, %v12874_v13 }
0x1128   :  { %8833 = vmatpush.bf16.msra.mxu2 %v12789_v57  ;;  %8847 = vmatpush.bf16.msrb.mxu1 %v12917_v40  ;;  %v13816_v57 = vld [vmem:[#allocation44 + $0x8c] sm:$0xf]  ;;  %v12794_v40 = vld [vmem:[#allocation44 + $0x98] sm:$0xf0] }
0x1129   :  { %v8328_v42 = vpop.f32.mrf.mxu3  ;;  %v12797_v4 = vor.u32 %v13816_v57, %v12794_v40 }
0x112a   :  { %v12858_v42 = vld [vmem:[#allocation44 + $0x118] sm:$0xf0] }
0x112c   :  { %8834 = vmatpush.bf16.msra.mxu2 %v12773_v18  ;;  %8848 = vmatpush.bf16.msrb.mxu1 %v12901_v17  ;;  %v13812_v18 = vld [vmem:[#allocation44 + $0x6c] sm:$0xf] }
0x112d   :  { %v12781_v24 = vor.u32 %v13812_v18, %v12778_v34 }
0x1130   :  { %8835 = vmatpush.bf16.msra.mxu2 %v12757_v12  ;;  %8849 = vmatpush.bf16.msrb.mxu1 %v12885_v52  ;;  %v12762_v12 = vld [vmem:[#allocation44 + $0x58] sm:$0xf0]  ;;  %v13840_v52 = vld [vmem:[#allocation44 + $0x14c] sm:$0xf] }
0x1131   :  { %v12765_v10 = vor.u32 %v13808_v47, %v12762_v12  ;;  %v12893_v63 = vor.u32 %v13840_v52, %v12890_v26 }
0x1134   :  { %8836 = vmatpush.bf16.msra.mxu2 %v12741_v19  ;;  %8850 = vmatpush.bf16.msrb.mxu1 %v12869_v7  ;;  %v12746_v7 = vld [vmem:[#allocation44 + $0x38] sm:$0xf0] }
0x1135   :  { %v12749_v33 = vor.u32 %v13804_v16, %v12746_v7 }
0x1138   :  { %8837 = vmatpush.bf16.msra.mxu2 %v12725_v54  ;;  %8851 = vmatpush.bf16.msrb.mxu1 %v12853_v36  ;;  %v8248_v17 = vpop.f32.mrf.mxu1  ;;  %v12733_v36 = vor.u32 %v13800_v60, %v12730_v44 }
0x113b   :  { %8838 = vmatmul.bf16.vlgmr.msra.gmra.mxu2 %v15632_v23  ;;  %8852 = vmatmul.bf16.vlgmr.msrb.gmra.mxu1 %v15634_v29  ;;  %v15848_v22 = vpop.f32.mrf.mxu0 }
0x113c   :  { %8886 = vmatpush.bf16.msrb.mxu2 %v12845_v3  ;;  %8900 = vmatpush.bf16.msra.mxu1 %v12973_v20  ;;  %v12861_v3 = vor.u32 %v13832_v50, %v12858_v42 }
0x113e   :  { %v8235_v28 = vpop.f32.mrf.mxu2 }
0x113f   :  { %v8236_v27 = vadd.f32 %v8235_v28, %v8223_v21 }
0x1140   :  { %8887 = vmatpush.bf16.msrb.mxu2 %v12829_v9  ;;  %8901 = vmatpush.bf16.msra.mxu1 %v12957_v55  ;;  %v8250_v19 = vpop.f32.mrf.mxu1  ;;  %v8472_v55 = vld [vmem:[#allocation46] sm:$0xf] }
0x1141   :  { %v8378_v15 = vpop.f32.mrf.mxu3  ;;  %v15850_v25 = vadd.f32 %v8248_v17, %v8236_v27  ;;  %v8474_v14 = vperm.slane %v8472_v55, 0  ;;  %v8476_v1 = vperm.slane %v8472_v55, 2 }
0x1143   :  { %v8367_v31 = vpop.f32.mrf.mxu0 }
0x1144   :  { %8888 = vmatpush.bf16.msrb.mxu2 %v12813_v35  ;;  %8902 = vmatpush.bf16.msra.mxu1 %v12941_v61 }
0x1146   :  { %v8237_v21 = vpop.f32.mrf.mxu2 }
0x1147   :  { %v8477_v21 = vperm.slane %v8472_v55, 3 }
0x1148   :  { %8889 = vmatpush.bf16.msrb.mxu2 %v12797_v4  ;;  %8903 = vmatpush.bf16.msra.mxu1 %v12925_v62 }
0x1149   :  { %v8380_v54 = vpop.f32.mrf.mxu3 }
0x114c   :  { %8890 = vmatpush.bf16.msrb.mxu2 %v12781_v24  ;;  %8904 = vmatpush.bf16.msra.mxu1 %v12909_v2 }
0x1150   :  { %8891 = vmatpush.bf16.msrb.mxu2 %v12765_v10  ;;  %8905 = vmatpush.bf16.msra.mxu1 %v12893_v63 }
0x1154   :  { %8892 = vmatpush.bf16.msrb.mxu2 %v12749_v33  ;;  %8906 = vmatpush.bf16.msra.mxu1 %v12877_v38 }
0x1158   :  { %8893 = vmatpush.bf16.msrb.mxu2 %v12733_v36  ;;  %8907 = vmatpush.bf16.msra.mxu1 %v12861_v3  ;;  %v8300_v20 = vpop.f32.mrf.mxu1 }
0x115b   :  { %8894 = vmatmul.bf16.vlgmr.msrb.gmra.mxu2 %v15632_v23  ;;  %8908 = vmatmul.bf16.vlgmr.msra.gmra.mxu1 %v15634_v29  ;;  %v8811_v46 = vpop.f32.mrf.mxu0 }
0x115c   :  { %v8812_v40 = vadd.f32 %v8811_v46, %v8474_v14 }
0x115e   :  { %v8287_v49 = vpop.f32.mrf.mxu2 }
0x115f   :  { %v8288_v8 = vadd.f32 %v8287_v49, %v15834_v53  ;;  %v13951_v53 = vld [vmem:[#allocation47] sm:$0xff] }
0x1160   :  { %v8302_v9 = vpop.f32.mrf.mxu1 }
0x1161   :  { %v8825_v41 = vpop.f32.mrf.mxu3  ;;  %v8301_v58 = vadd.f32 %v8300_v20, %v8288_v8  ;;  %v7898_v8 = vadd.f32 %v15748_v11, %v15771_v32  ;;  %v9026_v32 = vld [vmem:[#allocation49] sm:$0xff] }
0x1162   :  { %v8826_v39 = vadd.f32 %v8825_v41, %v8812_v40 }
0x1163   :  { %v8813_v43 = vpop.f32.mrf.mxu0  ;;  %v8314_v56 = vadd.f32 %v15840_v45, %v8301_v58  ;;  %v7911_v41 = vadd.f32 %v15750_v48, %v7898_v8  ;;  %v9259_v8 = vld [vmem:[%s15065_s25 + $0x1f0] sm:$0xff] }
0x1164   :  { %v8814_v61 = vadd.f32 %v8813_v43, %v8474_v14 }
0x1165   :  { %v8327_v35 = vadd.f32 %v15842_v51, %v8314_v56  ;;  %v7924_v9 = vadd.f32 %v15781_v59, %v7911_v41  ;;  %v9218_v41 = vld [vmem:[%s15065_s25 + $0xa8] sm:$0xff] }
0x1166   :  { %v8289_v57 = vpop.f32.mrf.mxu2 }
0x1169   :  { %v8827_v23 = vpop.f32.mrf.mxu3 }
0x116a   :  { %v8828_v29 = vadd.f32 %v8827_v23, %v8814_v61 }
0x116c   :  { %12974 = vmatpush.msk.msra.mxu0 %vm693_vm0, %v8828_v29 }
0x116e   :  { %8941 = vmatpush.msra.mxu0 %v8826_v39 }
0x116f   :  { %12975 = vmatmul.msk.f32.vlgmr.msra.gmra.mxu0 %vm3721_vm10, %v13951_v53 }
0x1178   :  { %v8352_v30 = vpop.f32.mrf.mxu1 }
0x117a   :  { %v8867_v4 = vpop.f32.mrf.mxu0 }
0x117b   :  { %v8868_v52 = vadd.f32 %v8867_v4, %v8476_v1  ;;  %v15878_v4 = vld [vmem:[#allocation50] sm:$0x1] }
0x117e   :  { %v8339_v62 = vpop.f32.mrf.mxu2 }
0x117f   :  { %v8340_v18 = vadd.f32 %v8339_v62, %v8327_v35 }
0x1180   :  { %v8881_v45 = vpop.f32.mrf.mxu3  ;;  %v8354_v17 = vpop.f32.mrf.mxu1 }
0x1181   :  { %v8353_v34 = vadd.f32 %v8352_v30, %v8340_v18  ;;  %v8882_v28 = vadd.f32 %v8881_v45, %v8868_v52  ;;  %v9244_v17 = vld [vmem:[%s15065_s25 + $0x178] sm:$0xff] }
0x1182   :  { %v8869_v0 = vpop.f32.mrf.mxu0  ;;  %v9208_v52 = vld [vmem:[%s15065_s25 + $0x58] sm:$0xff] }
0x1183   :  { %v8366_v51 = vadd.f32 %v15848_v22, %v8353_v34  ;;  %v8870_v47 = vadd.f32 %v8869_v0, %v8476_v1  ;;  %v9212_v34 = vld [vmem:[%s15065_s25 + $0x78] sm:$0xff]  ;;  %v9211_v0 = vld [vmem:[%s15065_s25 + $0x70] sm:$0xff]  ;;  %v9242_v1 = vld [vmem:[%s15065_s25 + $0x168] sm:$0xff] }
0x1185   :  { %v8379_v24 = vadd.f32 %v8378_v15, %v8366_v51  ;;  %v8475_v15 = vperm.slane %v8472_v55, 1  ;;  %v7937_v55 = vadd.f32 %v15777_v5, %v7924_v9  ;;  %v9243_v51 = vld [vmem:[%s15065_s25 + $0x170] sm:$0xff]  ;;  %v9258_v9 = vld [vmem:[%s15065_s25 + $0x1e8] sm:$0xff] }
0x1186   :  { %v8341_v2 = vpop.f32.mrf.mxu2 }
0x1187   :  { %v9241_v2 = vld [vmem:[%s15065_s25 + $0x160] sm:$0xff] }
0x1188   :  { %v8883_v12 = vpop.f32.mrf.mxu3 }
0x1189   :  { %v8884_v26 = vadd.f32 %v8883_v12, %v8870_v47  ;;  %v9209_v47 = vld [vmem:[%s15065_s25 + $0x60] sm:$0xff]  ;;  %v9240_v12 = vld [vmem:[%s15065_s25 + $0x158] sm:$0xff] }
0x118b   :  { %12978 = vmatpush.msk.msra.mxu2 %vm693_vm0, %v8884_v26 }
0x118d   :  { %8981 = vmatpush.msra.mxu2 %v8882_v28  ;;  %v9239_v28 = vld [vmem:[%s15065_s25 + $0x150] sm:$0xff] }
0x118e   :  { %12979 = vmatmul.msk.f32.vlgmr.msra.gmra.mxu2 %vm3721_vm10, %v13951_v53 }
0x1198   :  { %v8404_v27 = vpop.f32.mrf.mxu1 }
0x119e   :  { %v8391_v10 = vpop.f32.mrf.mxu2 }
0x119f   :  { %v8392_v63 = vadd.f32 %v8391_v10, %v8379_v24  ;;  %v9210_v24 = vld [vmem:[%s15065_s25 + $0x68] sm:$0xff]  ;;  %v9207_v10 = vld [vmem:[%s15065_s25 + $0x50] sm:$0xff] }
0x11a0   :  { %v8406_v16 = vpop.f32.mrf.mxu1 }
0x11a1   :  { %v8405_v19 = vadd.f32 %v8404_v27, %v8392_v63  ;;  %v9228_v63 = vld [vmem:[%s15065_s25 + $0xf8] sm:$0xff]  ;;  %v9238_v16 = vld [vmem:[%s15065_s25 + $0x148] sm:$0xff] }
0x11a6   :  { %v8393_v22 = vpop.f32.mrf.mxu2 }
0x11a7   :  { %v9206_v22 = vld [vmem:[%s15065_s25 + $0x48] sm:$0xff] }
0x11b8   :  { %v8853_v7 = vpop.f32.mrf.mxu1 }
0x11be   :  { %v8839_v6 = vpop.f32.mrf.mxu2 }
0x11bf   :  { %v8840_v31 = vadd.f32 %v8839_v6, %v8475_v15  ;;  %v9227_v6 = vld [vmem:[%s15065_s25 + $0xf0] sm:$0xff] }
0x11c0   :  { %v8855_v38 = vpop.f32.mrf.mxu1 }
0x11c1   :  { %v8854_v44 = vadd.f32 %v8853_v7, %v8840_v31  ;;  %v9237_v7 = vld [vmem:[%s15065_s25 + $0x140] sm:$0xff]  ;;  %v9226_v31 = vld [vmem:[%s15065_s25 + $0xe8] sm:$0xff] }
0x11c6   :  { %v8841_v13 = vpop.f32.mrf.mxu2 }
0x11c7   :  { %v8842_v33 = vadd.f32 %v8841_v13, %v8475_v15  ;;  %v9205_v15 = vld [vmem:[%s15065_s25 + $0x40] sm:$0xff]  ;;  %v9236_v13 = vld [vmem:[%s15065_s25 + $0x138] sm:$0xff] }
0x11c9   :  { %v8856_v60 = vadd.f32 %v8855_v38, %v8842_v33  ;;  %v9204_v33 = vld [vmem:[%s15065_s25 + $0x38] sm:$0xff]  ;;  %v9235_v38 = vld [vmem:[%s15065_s25 + $0x130] sm:$0xff] }
0x11cb   :  { %12976 = vmatpush.msk.msrb.mxu3 %vm693_vm0, %v8856_v60  ;;  %v9225_v60 = vld [vmem:[%s15065_s25 + $0xe0] sm:$0xff] }
0x11cd   :  { %8961 = vmatpush.msrb.mxu3 %v8854_v44  ;;  %v9224_v44 = vld [vmem:[%s15065_s25 + $0xd8] sm:$0xff] }
0x11ce   :  { %12977 = vmatmul.msk.f32.vlgmr.msrb.gmra.mxu3 %vm3721_vm10, %v13951_v53 }
0x11d8   :  { %v8909_v50 = vpop.f32.mrf.mxu1 }
0x11de   :  { %v8895_v42 = vpop.f32.mrf.mxu2 }
0x11df   :  { %v8896_v36 = vadd.f32 %v8895_v42, %v8477_v21  ;;  %v9222_v42 = vld [vmem:[%s15065_s25 + $0xc8] sm:$0xff] }
0x11e0   :  { %v8911_v20 = vpop.f32.mrf.mxu1 }
0x11e1   :  { %v8910_v49 = vadd.f32 %v8909_v50, %v8896_v36  ;;  %v9223_v50 = vld [vmem:[%s15065_s25 + $0xd0] sm:$0xff] }
0x11e6   :  { %v8897_v54 = vpop.f32.mrf.mxu2 }
0x11e7   :  { %v8898_v3 = vadd.f32 %v8897_v54, %v8477_v21  ;;  %v9221_v54 = vld [vmem:[%s15065_s25 + $0xc0] sm:$0xff] }
0x11e9   :  { %v8912_v46 = vadd.f32 %v8911_v20, %v8898_v3  ;;  %v9260_v3 = vld [vmem:[%s15065_s25 + $0x1f8] sm:$0xff] }
0x11ea   :  { %v9220_v20 = vld [vmem:[%s15065_s25 + $0xb8] sm:$0xff] }
0x11eb   :  { %12980 = vmatpush.msk.msrb.mxu0 %vm693_vm0, %v8912_v46 }
0x11ec   :  { %v8943_v58 = vpop.f32.mrf.mxu0 }
0x11ed   :  { %9001 = vmatpush.msrb.mxu0 %v8910_v49  ;;  %v9010_v43 = vrot.slane %v8943_v58, 1  ;;  %v9219_v49 = vld [vmem:[%s15065_s25 + $0xb0] sm:$0xff]  ;;  %v9257_v58 = vld [vmem:[%s15065_s25 + $0x1e0] sm:$0xff] }
0x11ee   :  { %12981 = vmatmul.msk.f32.vlgmr.msrb.gmra.mxu0 %vm3721_vm10, %v13951_v53 }
0x11ef   :  { %v9018_v56 = vadd.f32 %v9010_v43, %v7937_v55  ;;  %v9256_v55 = vld [vmem:[%s15065_s25 + $0x1d8] sm:$0xff]  ;;  %v9255_v43 = vld [vmem:[%s15065_s25 + $0x1d0] sm:$0xff] }
0x11f1   :  { %v9022_v14 = vmax.f32 %v9018_v56, 0.0  ;;  %v9203_v56 = vld [vmem:[%s15065_s25 + $0x30] sm:$0xff] }
0x11f3   :  { %12982 = vmatpush.msk.msrb.mxu1 %vm863_vm5, %v9022_v14  ;;  %v9217_v14 = vld [vmem:[%s15065_s25 + $0xa0] sm:$0xff] }
0x11f4   :  { %12983 = vmatmul.msk.f32.vlgmr.msrb.gmra.mxu1 %vm9027_vm11, %v9026_v32 }
0x1211   :  { %v8983_v35 = vpop.f32.mrf.mxu2 }
0x1212   :  { %v9012_v61 = vrot.slane %v8983_v35, 1  ;;  %v9234_v35 = vld [vmem:[%s15065_s25 + $0x128] sm:$0xff] }
0x1214   :  { %v9020_v57 = vadd.f32 %v9012_v61, %v15850_v25  ;;  %v9254_v61 = vld [vmem:[%s15065_s25 + $0x1c8] sm:$0xff] }
0x1216   :  { %v9024_v11 = vmax.f32 %v9020_v57, 0.0  ;;  %v9202_v57 = vld [vmem:[%s15065_s25 + $0x28] sm:$0xff] }
0x1218   :  { %12986 = vmatpush.msk.msrb.mxu2 %vm863_vm5, %v9024_v11  ;;  %v9216_v11 = vld [vmem:[%s15065_s25 + $0x98] sm:$0xff] }
0x1219   :  { %12987 = vmatmul.msk.f32.vlgmr.msrb.gmra.mxu2 %vm9027_vm11, %v9026_v32 }
0x1251   :  { %v8963_v48 = vpop.f32.mrf.mxu3 }
0x1252   :  { %v9011_v59 = vrot.slane %v8963_v48, 1 }
0x1254   :  { %v9019_v5 = vadd.f32 %v9011_v59, %v15826_v37  ;;  %v9253_v59 = vld [vmem:[%s15065_s25 + $0x1c0] sm:$0xff] }
0x1256   :  { %v9023_v23 = vmax.f32 %v9019_v5, 0.0  ;;  %v9201_v5 = vld [vmem:[%s15065_s25 + $0x20] sm:$0xff] }
0x1258   :  { %12984 = vmatpush.msk.msra.mxu3 %vm863_vm5, %v9023_v23  ;;  %v9215_v23 = vld [vmem:[%s15065_s25 + $0x90] sm:$0xff] }
0x1259   :  { %12985 = vmatmul.msk.f32.vlgmr.msra.gmra.mxu3 %vm9027_vm11, %v9026_v32 }
0x126b   :  { %v9003_v40 = vpop.f32.mrf.mxu0 }
0x126c   :  { %v9013_v29 = vrot.slane %v9003_v40, 1  ;;  %v9232_v40 = vld [vmem:[%s15065_s25 + $0x118] sm:$0xff] }
0x126e   :  { %v9021_v39 = vadd.f32 %v9013_v29, %v8405_v19 }
0x1270   :  { %v9025_v53 = vmax.f32 %v9021_v39, 0.0  ;;  %v9252_v39 = vld [vmem:[%s15065_s25 + $0x1b8] sm:$0xff] }
0x1271   :  { %v9060_v62 = vpop.f32.mrf.mxu1 }
0x1272   :  { %12988 = vmatpush.msk.msra.mxu0 %vm863_vm5, %v9025_v53  ;;  %v9123_v18 = vpack.c.bf16 %v9060_v62, %v9060_v62  ;;  %v9200_v53 = vld [vmem:[%s15065_s25 + $0x18] sm:$0xff]  ;;  %v9213_v62 = vld [vmem:[%s15065_s25 + $0x80] sm:$0xff] }
0x1273   :  { %12989 = vmatmul.msk.f32.vlgmr.msra.gmra.mxu0 %vm9027_vm11, %v9026_v32  ;;  %v9233_v32 = vld [vmem:[%s15065_s25 + $0x120] sm:$0xff] }
0x1274   :  { %v9134_v45 = vsel %vm9132_vm12, %v9123_v18, 0  ;;  %v9230_v18 = vld [vmem:[%s15065_s25 + $0x108] sm:$0xff] }
0x1275   :  { %9152 = vmatpush.bf16.msra.mxu1 %v9134_v45  ;;  %v9250_v45 = vld [vmem:[%s15065_s25 + $0x1a8] sm:$0xff] }
0x1278   :  { %12990 = vmatmul.msk.bf16.vlgmr.msra.gmra.mxu1 %vm9128_vm13, %v15878_v4 }
0x1279   :  { %9265 = vmatpush.msrb.mxu1 %v9212_v34  ;;  %v9229_v34 = vld [vmem:[%s15065_s25 + $0x100] sm:$0xff] }
0x127b   :  { %9266 = vmatpush.msrb.mxu1 %v9211_v0 }
0x127d   :  { %9267 = vmatpush.msrb.mxu1 %v9210_v24  ;;  %v9248_v24 = vld [vmem:[%s15065_s25 + $0x198] sm:$0xff] }
0x127f   :  { %9268 = vmatpush.msrb.mxu1 %v9209_v47  ;;  %v9247_v47 = vld [vmem:[%s15065_s25 + $0x190] sm:$0xff] }
0x1281   :  { %9269 = vmatpush.msrb.mxu1 %v9208_v52  ;;  %v9245_v52 = vld [vmem:[%s15065_s25 + $0x180] sm:$0xff] }
0x1283   :  { %9270 = vmatpush.msrb.mxu1 %v9207_v10 }
0x1285   :  { %9271 = vmatpush.msrb.mxu1 %v9206_v22 }
0x1287   :  { %9272 = vmatpush.msrb.mxu1 %v9205_v15 }
0x1289   :  { %9273 = vmatpush.msrb.mxu1 %v9204_v33 }
0x128b   :  { %9274 = vmatpush.msrb.mxu1 %v9203_v56 }
0x128d   :  { %9275 = vmatpush.msrb.mxu1 %v9202_v57 }
0x128f   :  { %9276 = vmatpush.msrb.mxu1 %v9201_v5 }
0x1291   :  { %9277 = vmatpush.msrb.mxu1 %v9200_v53 }
0x129c   :  { %v9100_v25 = vpop.f32.mrf.mxu2 }
0x129d   :  { %v9125_v30 = vpack.c.bf16 %v9100_v25, %v9100_v25  ;;  %v9214_v25 = vld [vmem:[%s15065_s25 + $0x88] sm:$0xff] }
0x129f   :  { %v9140_v37 = vsel %vm9132_vm12, %v9125_v30, 0  ;;  %v9231_v30 = vld [vmem:[%s15065_s25 + $0x110] sm:$0xff] }
0x12a0   :  { %9178 = vmatpush.bf16.msra.mxu2 %v9140_v37  ;;  %v9251_v37 = vld [vmem:[%s15065_s25 + $0x1b0] sm:$0xff] }
0x12a3   :  { %12992 = vmatmul.msk.bf16.vlgmr.msra.gmra.mxu2 %vm9128_vm13, %v15878_v4 }
0x12a4   :  { %9305 = vmatpush.msrb.mxu2 %v9244_v17  ;;  %v9198_v17 = vld [vmem:[%s15065_s25 + $0x8] sm:$0xff] }
0x12a6   :  { %9306 = vmatpush.msrb.mxu2 %v9243_v51  ;;  %v9249_v51 = vld [vmem:[%s15065_s25 + $0x1a0] sm:$0xff] }
0x12a8   :  { %9307 = vmatpush.msrb.mxu2 %v9242_v1  ;;  %v9197_v1 = vld [vmem:[%s15065_s25] sm:$0xff] }
0x12aa   :  { %9308 = vmatpush.msrb.mxu2 %v9241_v2 }
0x12ac   :  { %9309 = vmatpush.msrb.mxu2 %v9240_v12  ;;  %v9246_v12 = vld [vmem:[%s15065_s25 + $0x188] sm:$0xff] }
0x12ae   :  { %9310 = vmatpush.msrb.mxu2 %v9239_v28 }
0x12b0   :  { %9311 = vmatpush.msrb.mxu2 %v9238_v16 }
0x12b2   :  { %9312 = vmatpush.msrb.mxu2 %v9237_v7 }
0x12b4   :  { %9313 = vmatpush.msrb.mxu2 %v9236_v13 }
0x12b6   :  { %9314 = vmatpush.msrb.mxu2 %v9235_v38 }
0x12b8   :  { %9315 = vmatpush.msrb.mxu2 %v9234_v35 }
0x12ba   :  { %9316 = vmatpush.msrb.mxu2 %v9233_v32 }
0x12bc   :  { %9317 = vmatpush.msrb.mxu2 %v9232_v40 }
0x12be   :  { %9318 = vmatpush.msrb.mxu2 %v9231_v30 }
0x12c0   :  { %9319 = vmatpush.msrb.mxu2 %v9230_v18 }
0x12c2   :  { %9320 = vmatpush.msrb.mxu2 %v9229_v34 }
0x12dc   :  { %v9080_v26 = vpop.f32.mrf.mxu3 }
0x12dd   :  { %v9124_v27 = vpack.c.bf16 %v9080_v26, %v9080_v26 }
0x12df   :  { %v9137_v19 = vsel %vm9132_vm12, %v9124_v27, 0 }
0x12e0   :  { %9165 = vmatpush.bf16.msrb.mxu3 %v9137_v19 }
0x12e3   :  { %12991 = vmatmul.msk.bf16.vlgmr.msrb.gmra.mxu3 %vm9128_vm13, %v15878_v4 }
0x12e4   :  { %9285 = vmatpush.msra.mxu3 %v9228_v63  ;;  %v13947_v63 = vld [vmem:[#allocation52] ss:$0 sm:$0xff] }
0x12e6   :  { %9286 = vmatpush.msra.mxu3 %v9227_v6 }
0x12e8   :  { %9287 = vmatpush.msra.mxu3 %v9226_v31 }
0x12ea   :  { %9288 = vmatpush.msra.mxu3 %v9225_v60 }
0x12ec   :  { %9289 = vmatpush.msra.mxu3 %v9224_v44 }
0x12ee   :  { %9290 = vmatpush.msra.mxu3 %v9223_v50 }
0x12f0   :  { %v9120_v21 = vpop.f32.mrf.mxu0  ;;  %9291 = vmatpush.msra.mxu3 %v9222_v42 }
0x12f1   :  { %v9126_v36 = vpack.c.bf16 %v9120_v21, %v9120_v21 }
0x12f2   :  { %9292 = vmatpush.msra.mxu3 %v9221_v54 }
0x12f3   :  { %v9143_v46 = vsel %vm9132_vm12, %v9126_v36, 0 }
0x12f4   :  { %9191 = vmatpush.bf16.msrb.mxu0 %v9143_v46  ;;  %9293 = vmatpush.msra.mxu3 %v9220_v20 }
0x12f5   :  { %v9154_v29 = vpop.f32.mrf.mxu1 }
0x12f6   :  { %9294 = vmatpush.msra.mxu3 %v9219_v49 }
0x12f7   :  { %12993 = vmatmul.msk.bf16.vlgmr.msrb.gmra.mxu0 %vm9128_vm13, %v15878_v4  ;;  %v9199_v4 = vld [vmem:[%s15065_s25 + $0x10] sm:$0xff]  ;;  %s9354_s25 = sshll.u32 %s15075_s4, 4  ;;  %s9355_s25 = int_to_ptr.hbm [resolvable:$true] %s9354_s25 }
0x12f8   :  { %9325 = vmatpush.msra.mxu0 %v9260_v3  ;;  %9295 = vmatpush.msra.mxu3 %v9218_v41  ;;  %s14756_s2 = sshra.s32 %s9355_s25, 4  ;;  %s14757_s2 = int_to_ptr.hbm [resolvable:$true] %s14756_s2 }
0x12f9   :  { %9278 = vmatpush.msrb.mxu1 %v9199_v4  ;;  %s14758_s0 = scalar_lea.hbm %s14757_s2, 2  ;;  %p14761_p12 = scmp.lt.s32.totalorder %s14757_s2, %s15075_s4 }
0x12fa   :  { %9326 = vmatpush.msra.mxu0 %v9259_v8  ;;  %9296 = vmatpush.msra.mxu3 %v9217_v14  ;;  %p14759_p11 = scmp.ne.s32.totalorder %s14757_s2, %s14758_s0  ;;  %p14762_p13 = scmp.lt.s32.totalorder %s14760_s29, %s14758_s0 }
0x12fb   :  { %9279 = vmatpush.msrb.mxu1 %v9198_v17 }
0x12fc   :  { %9327 = vmatpush.msra.mxu0 %v9258_v9  ;;  %9297 = vmatpush.msra.mxu3 %v9216_v11  ;;  %p14763_p0 = por %p14762_p13, %p14761_p12 }
0x12fd   :  { %v9156_v2 = vpop.f32.mrf.mxu1  ;;  %9280 = vmatpush.msrb.mxu1 %v9197_v1 }
0x12fe   :  { %9328 = vmatpush.msra.mxu0 %v9257_v58  ;;  %9298 = vmatpush.msra.mxu3 %v9215_v23  ;;  %p14764_p1 = pnand %p14763_p0, %p14759_p11 }
0x12ff   :  { %9281 = vmatmul.f32.vlgmr.msrb.gmra.mxu1 %v9154_v29 }
0x1300   :  { %9329 = vmatpush.msra.mxu0 %v9256_v55  ;;  %9299 = vmatpush.msra.mxu3 %v9214_v25 }
0x1302   :  { %9330 = vmatpush.msra.mxu0 %v9255_v43  ;;  %9300 = vmatpush.msra.mxu3 %v9213_v62 }
0x1304   :  { %9331 = vmatpush.msra.mxu0 %v9254_v61 }
0x1306   :  { %9332 = vmatpush.msra.mxu0 %v9253_v59 }
0x1308   :  { %9333 = vmatpush.msra.mxu0 %v9252_v39 }
0x130a   :  { %9334 = vmatpush.msra.mxu0 %v9251_v37 }
0x130c   :  { %9335 = vmatpush.msra.mxu0 %v9250_v45 }
0x130e   :  { %9336 = vmatpush.msra.mxu0 %v9249_v51 }
0x1310   :  { %9337 = vmatpush.msra.mxu0 %v9248_v24 }
0x1312   :  { %9338 = vmatpush.msra.mxu0 %v9247_v47 }
0x1314   :  { %9339 = vmatpush.msra.mxu0 %v9246_v12 }
0x1316   :  { %9340 = vmatpush.msra.mxu0 %v9245_v52 }
0x1326   :  { %v9180_v48 = vpop.f32.mrf.mxu2 }
0x1327   :  { %9321 = vmatmul.f32.vlgmr.msrb.gmra.mxu2 %v9180_v48 }
0x132e   :  { %v9182_v0 = vpop.f32.mrf.mxu2 }
0x1366   :  { %v9167_v26 = vpop.f32.mrf.mxu3 }
0x1367   :  { %9301 = vmatmul.f32.vlgmr.msra.gmra.mxu3 %v9167_v26 }
0x136e   :  { %v9169_v28 = vpop.f32.mrf.mxu3 }
0x1374   :  { %v9193_v27 = vpop.f32.mrf.mxu0 }
0x1375   :  { %9341 = vmatmul.f32.vlgmr.msra.gmra.mxu0 %v9193_v27 }
0x137c   :  { %v9195_v10 = vpop.f32.mrf.mxu0  ;;  %v9282_v16 = vpop.f32.mrf.mxu1 }
0x137d   :  { %v9283_v19 = vadd.f32 %v13947_v63, %v9282_v16 }
0x13aa   :  { %v9322_v7 = vpop.f32.mrf.mxu2 }
0x13ea   :  { %v9302_v22 = vpop.f32.mrf.mxu3 }
0x13eb   :  { %v9303_v6 = vadd.f32 %v9302_v22, %v9283_v19 }
0x13ed   :  { %v9323_v15 = vadd.f32 %v9322_v7, %v9303_v6 }
0x13f2   :  { %v9342_v13 = vpop.f32.mrf.mxu0 }
0x13f3   :  { %v9343_v31 = vadd.f32 %v9342_v13, %v9323_v15 }
0x13f5   :  { %9346 = vst.msk [vmem:[#allocation53] sm:$0x3] %vm9345_vm14, %v9343_v31 }
0x13f6   :  { %14767 = shalt.err (!%p14764_p1)
}
0x13f7   :  { %9357 = dma.vmem_to_hbm [thread:$0]  %s9353_s28, 32, %s9355_s25, [#allocation4]  }
0x13f8   :  { %14802 = dma.done.wait [#allocation4], 32  }
0x13f9   :  { %14803 = vsyncadd [#allocation4], 4294967264 }
0x13fa   :  { %9362 = vsyncpa [#allocation3], 1 }
0x13fb   :  { %9363 = vsyncpa [#allocation6], 1 }
0x13fc   :  { %9364 = vsyncpa [#allocation9], 1 }
0x13fd   :  { %9365 = vsyncpa [#allocation12], 1 }
0x13fe   :  { %9366 = vsyncpa [#allocation15], 1 }
0x13ff   :  { %9367 = vsyncpa [#allocation18], 1 }
0x1400   :  { %9368 = vsyncpa [#allocation21], 1 }
0x1401   :  { %9369 = vsyncpa [#allocation24], 1 }
0x1402   :  { %9370 = vsyncpa [#allocation27], 1 }
0x1403   :  { %9371 = vsyncpa [#allocation30], 1 }
0x1404   :  { %9372 = vsyncpa [#allocation33], 1 }
0x1405   :  { %9373 = vsyncpa [#allocation36], 1 }
0x1406   :  { %9374 = vsyncpa [#allocation39], 1 }
0x1407   :  { %9375 = vsyncpa [#allocation42], 1 }
0x1408   :  { %9376 = vsyncpa [#allocation45], 1 }
0x1409   :  { %9377 = vsyncpa [#allocation48], 1 }
0x140a   :  { %9378 = vsyncpa [#allocation51], 1 }
0x140b   :  { %9379 = vsyncpa [#allocation4], 1 }

</bundles_post_ra>
